<compile_context>
chip_gen: v7x
topology: tpu7x:2x2x1
jax: 0.10.0
libtpu: 0.0.40
codegen_flags: <defaults>
</compile_context>

<pallas_src>
import functools

import jax
import jax.numpy as jnp
from jax.experimental import pallas as pl
from jax.experimental.pallas import tpu as pltpu


# ----------------------------------------------------------------------------- #
# Helpers
# ----------------------------------------------------------------------------- #
def _round_up(x, m):
    return ((x + m - 1) // m) * m


def _tile(dim, cap):
    """Return (padded_dim, tile). If dim <= cap use one full-dim tile (no padding)."""
    if dim <= cap:
        return dim, dim
    return _round_up(dim, cap), cap


# ----------------------------------------------------------------------------- #
# Pallas kernel 1: fused GEMM  out = act(A @ W + bias)   (used for patch embed)
# ----------------------------------------------------------------------------- #
def _gemm_bias_act_kernel(a_ref, w_ref, bias_ref, o_ref, acc_ref, *, activation):
    k = pl.program_id(2)

    @pl.when(k == 0)
    def _():
        acc_ref[...] = jnp.zeros_like(acc_ref)

    acc_ref[...] += jnp.dot(a_ref[...], w_ref[...], preferred_element_type=jnp.float32)

    @pl.when(k == pl.num_programs(2) - 1)
    def _():
        r = acc_ref[...] + bias_ref[...]
        if activation == "gelu":
            r = jax.nn.gelu(r, approximate=True)
        o_ref[...] = r.astype(o_ref.dtype)


def linear(a, w, bias, activation="none"):
    """act(a @ w + bias).  a: (M, K) f32.  w: (K, N) f32 (pre-transposed at init)."""
    M, K = a.shape
    K2, N = w.shape
    assert K == K2
    Mp, tm = _tile(M, 256)
    Kp, tk = _tile(K, 2048)
    Np, tn = _tile(N, 512)

    a_p = a if (Mp == M and Kp == K) else jnp.pad(a, ((0, Mp - M), (0, Kp - K)))
    w_p = w if (Kp == K and Np == N) else jnp.pad(w, ((0, Kp - K), (0, Np - N)))
    b_p = bias.reshape(1, N)
    if Np != N:
        b_p = jnp.pad(b_p, ((0, 0), (0, Np - N)))

    kernel = functools.partial(_gemm_bias_act_kernel, activation=activation)
    out = pl.pallas_call(
        kernel,
        out_shape=jax.ShapeDtypeStruct((Mp, Np), jnp.float32),
        grid_spec=pltpu.PrefetchScalarGridSpec(
            num_scalar_prefetch=0,
            grid=(Mp // tm, Np // tn, Kp // tk),
            in_specs=[
                pl.BlockSpec((tm, tk), lambda i, j, k: (i, k)),
                pl.BlockSpec((tk, tn), lambda i, j, k: (k, j)),
                pl.BlockSpec((1, tn), lambda i, j, k: (0, j)),
            ],
            out_specs=pl.BlockSpec((tm, tn), lambda i, j, k: (i, j)),
            scratch_shapes=[pltpu.VMEM((tm, tn), jnp.float32)],
        ),
        compiler_params=pltpu.CompilerParams(
            dimension_semantics=("parallel", "parallel", "arbitrary")
        ),
    )(a_p, w_p, b_p)
    if Mp == M and Np == N:
        return out
    return out[:M, :N]


# ----------------------------------------------------------------------------- #
# Pallas kernel 2: the whole transformer stack (depth blocks) in one pallas_call.
# Grid = (depth,).  Activations live in a VMEM scratch across grid iterations;
# per-block weights are streamed (leading depth axis in each stacked weight).
# ----------------------------------------------------------------------------- #
def _vit_blocks_kernel(
    x_in_ref,
    n1_g_ref, n1_b_ref,
    qw_ref, qb_ref, kw_ref, kb_ref, vw_ref, vb_ref,
    pjw_ref, pjb_ref,
    n2_g_ref, n2_b_ref,
    f1w_ref, f1b_ref, f2w_ref, f2b_ref,
    nf_g_ref, nf_b_ref,
    out_ref, key_ref,
    x_scr,
    *, num_heads, scale, eps, hook_layer,
):
    d = pl.program_id(0)
    depth = pl.num_programs(0)

    @pl.when(d == 0)
    def _():
        x_scr[...] = x_in_ref[...]

    B, N, D = x_scr.shape

    def ln(x, g, b):
        mu = jnp.mean(x, axis=-1, keepdims=True)
        var = jnp.mean((x - mu) ** 2, axis=-1, keepdims=True)
        return (x - mu) * jax.lax.rsqrt(var + eps) * g + b

    for bi in range(B):
        x_b = x_scr[bi]                                           # (N, D)

        # ---- MHSA sublayer (pre-LN) ----
        h1 = ln(x_b, n1_g_ref[...], n1_b_ref[...])                # (N, D)
        acc = jnp.zeros((N, D), jnp.float32)
        for hh in range(num_heads):
            q = jnp.dot(h1, qw_ref[hh], preferred_element_type=jnp.float32) + qb_ref[hh]
            k = jnp.dot(h1, kw_ref[hh], preferred_element_type=jnp.float32) + kb_ref[hh]
            v = jnp.dot(h1, vw_ref[hh], preferred_element_type=jnp.float32) + vb_ref[hh]

            # hook on block `hook_layer`: capture the 'key' facet
            @pl.when(d == hook_layer)
            def _(k=k, bi=bi, hh=hh):
                key_ref[bi, hh] = k

            s = jnp.dot(q, k.T, preferred_element_type=jnp.float32) * scale  # (N, N)
            s = s - jnp.max(s, axis=-1, keepdims=True)
            p = jnp.exp(s)
            p = p / jnp.sum(p, axis=-1, keepdims=True)
            o_h = jnp.dot(p, v, preferred_element_type=jnp.float32)          # (N, dh)
            # head-split proj weight -> merging heads is just a sum of matmuls
            acc = acc + jnp.dot(o_h, pjw_ref[hh], preferred_element_type=jnp.float32)
        x_b = x_b + acc + pjb_ref[...]

        # ---- MLP sublayer (pre-LN) ----
        h2 = ln(x_b, n2_g_ref[...], n2_b_ref[...])
        m = jnp.dot(h2, f1w_ref[...], preferred_element_type=jnp.float32) + f1b_ref[...]
        # TODO(synk): torch nn.GELU uses exact erf-GELU; tanh approximation used here.
        m = jax.nn.gelu(m, approximate=True)
        m = jnp.dot(m, f2w_ref[...], preferred_element_type=jnp.float32) + f2b_ref[...]
        x_b = x_b + m

        x_scr[bi] = x_b

        # final LayerNorm fused in on the last block
        @pl.when(d == depth - 1)
        def _(x_b=x_b, bi=bi):
            out_ref[bi] = ln(x_b, nf_g_ref[...], nf_b_ref[...])


def vit_blocks(x_tokens, p, cfg):
    """Run all transformer blocks + final LN.  Returns (out (B,N,D), key (B,H,N,dh))."""
    B, N, D = x_tokens.shape
    H = cfg["num_heads"]
    dh = D // H
    depth = cfg["depth"]
    hidden = D * cfg["mlp_ratio"]

    kernel = functools.partial(
        _vit_blocks_kernel,
        num_heads=H, scale=dh ** -0.5, eps=cfg["eps"], hook_layer=cfg["hook_layer"])

    d_map3 = lambda d: (d, 0, 0)
    d_map4 = lambda d: (d, 0, 0, 0)
    c_map2 = lambda d: (0, 0)
    c_map3 = lambda d: (0, 0, 0)
    c_map4 = lambda d: (0, 0, 0, 0)

    in_specs = [
        pl.BlockSpec((B, N, D), c_map3),                 # tokens (resident)
        pl.BlockSpec((None, 1, D), d_map3),              # n1_g
        pl.BlockSpec((None, 1, D), d_map3),              # n1_b
        pl.BlockSpec((None, H, D, dh), d_map4),          # q_w
        pl.BlockSpec((None, H, 1, dh), d_map4),          # q_b
        pl.BlockSpec((None, H, D, dh), d_map4),          # k_w
        pl.BlockSpec((None, H, 1, dh), d_map4),          # k_b
        pl.BlockSpec((None, H, D, dh), d_map4),          # v_w
        pl.BlockSpec((None, H, 1, dh), d_map4),          # v_b
        pl.BlockSpec((None, H, dh, D), d_map4),          # proj_w (head-split)
        pl.BlockSpec((None, 1, D), d_map3),              # proj_b
        pl.BlockSpec((None, 1, D), d_map3),              # n2_g
        pl.BlockSpec((None, 1, D), d_map3),              # n2_b
        pl.BlockSpec((None, D, hidden), d_map3),         # fc1_w
        pl.BlockSpec((None, 1, hidden), d_map3),         # fc1_b
        pl.BlockSpec((None, hidden, D), d_map3),         # fc2_w
        pl.BlockSpec((None, 1, D), d_map3),              # fc2_b
        pl.BlockSpec((1, D), c_map2),                    # final norm gamma
        pl.BlockSpec((1, D), c_map2),                    # final norm beta
    ]
    out_specs = (
        pl.BlockSpec((B, N, D), c_map3),                 # normalized output tokens
        pl.BlockSpec((B, H, N, dh), c_map4),             # block-`hook_layer` key facet
    )
    out, key = pl.pallas_call(
        kernel,
        out_shape=(jax.ShapeDtypeStruct((B, N, D), jnp.float32),
                   jax.ShapeDtypeStruct((B, H, N, dh), jnp.float32)),
        grid_spec=pltpu.PrefetchScalarGridSpec(
            num_scalar_prefetch=0,
            grid=(depth,),
            in_specs=in_specs,
            out_specs=out_specs,
            scratch_shapes=[pltpu.VMEM((B, N, D), jnp.float32)],
        ),
        compiler_params=pltpu.CompilerParams(dimension_semantics=("arbitrary",)),
    )(x_tokens,
      p["n1_g"], p["n1_b"],
      p["q_w"], p["q_b"], p["k_w"], p["k_b"], p["v_w"], p["v_b"],
      p["proj_w"], p["proj_b"],
      p["n2_g"], p["n2_b"],
      p["fc1_w"], p["fc1_b"], p["fc2_w"], p["fc2_b"],
      p["norm_g"], p["norm_b"])
    return out, key


# ----------------------------------------------------------------------------- #
# ViT config & parameter init (random — pretrained hub weights not loadable here)
# ----------------------------------------------------------------------------- #
CFG = dict(dim=64, depth=12, num_heads=4, mlp_ratio=4, patch_size=8, in_chans=3,
           eps=1e-6, hook_layer=11)


def init_params(key, cfg, num_patches):
    D = cfg["dim"]
    P = cfg["patch_size"]
    Cin = cfg["in_chans"]
    H = cfg["num_heads"]
    dh = D // H
    hidden = D * cfg["mlp_ratio"]
    depth = cfg["depth"]
    ks = jax.random.split(key, 10)

    def w(k, shape):
        return 0.02 * jax.random.normal(k, shape, jnp.float32)

    params = {
        # patch-embed conv weights stored as (K, N) GEMM weight (pre-transposed)
        "patch_w": w(ks[0], (Cin * P * P, D)),
        "patch_b": jnp.zeros((D,), jnp.float32),
        "cls_token": w(ks[1], (1, 1, D)),
        # pos_embed created at this run's token count (stands in for interpolate_pos_encoding)
        "pos_embed": w(ks[2], (1, 1 + num_patches, D)),
        # stacked per-block weights (leading depth axis -> streamed by BlockSpec)
        "n1_g": jnp.ones((depth, 1, D), jnp.float32),
        "n1_b": jnp.zeros((depth, 1, D), jnp.float32),
        "q_w": w(ks[3], (depth, H, D, dh)),
        "q_b": jnp.zeros((depth, H, 1, dh), jnp.float32),
        "k_w": w(ks[4], (depth, H, D, dh)),
        "k_b": jnp.zeros((depth, H, 1, dh), jnp.float32),
        "v_w": w(ks[5], (depth, H, D, dh)),
        "v_b": jnp.zeros((depth, H, 1, dh), jnp.float32),
        "proj_w": w(ks[6], (depth, H, dh, D)),
        "proj_b": jnp.zeros((depth, 1, D), jnp.float32),
        "n2_g": jnp.ones((depth, 1, D), jnp.float32),
        "n2_b": jnp.zeros((depth, 1, D), jnp.float32),
        "fc1_w": w(ks[7], (depth, D, hidden)),
        "fc1_b": jnp.zeros((depth, 1, hidden), jnp.float32),
        "fc2_w": w(ks[8], (depth, hidden, D)),
        "fc2_b": jnp.zeros((depth, 1, D), jnp.float32),
        # final LayerNorm
        "norm_g": jnp.ones((1, D), jnp.float32),
        "norm_b": jnp.zeros((1, D), jnp.float32),
    }
    return params


# ----------------------------------------------------------------------------- #
# ViTEncoder.forward (final_layer_type='none'; dropout / drop_path = identity)
# ----------------------------------------------------------------------------- #
def vit_encoder_forward(params, x, cfg, return_patches=True):
    B, Cin, Him, Wim = x.shape
    P = cfg["patch_size"]
    D = cfg["dim"]
    ph, pw = Him // P, Wim // P

    # --- prepare_tokens: patch embed (stride-P conv == GEMM over flattened patches) ---
    patches = x.astype(jnp.float32).reshape(B, Cin, ph, P, pw, P)
    patches = patches.transpose(0, 2, 4, 1, 3, 5).reshape(B * ph * pw, Cin * P * P)
    tok = linear(patches, params["patch_w"], params["patch_b"]).reshape(B, ph * pw, D)
    cls = jnp.broadcast_to(params["cls_token"], (B, 1, D))
    xseq = jnp.concatenate([cls, tok], axis=1) + params["pos_embed"]

    # --- all transformer blocks + hook-layer 'key' capture + final LN (fused) ---
    out, key_feat = vit_blocks(xseq, params, cfg)       # (B,N,D), (B,H,N,dh)

    # final_layer_type == 'none'
    global_feat_out = out[:, 0].reshape(B, -1)                       # (B, D)
    global_feat_key = key_feat[:, :, 0, :].reshape(B, -1)            # (B, H*dh) = (B, D)

    if return_patches:
        patch_out = out[:, 1:].reshape(B, ph, pw, D).transpose(0, 3, 1, 2)        # (B,D,ph,pw)
        patch_key = key_feat[:, :, 1:, :].transpose(0, 1, 3, 2).reshape(B, D, ph, pw)
    else:
        patch_out = patch_key = None
    # TODO(synk): final_layer_type='conv' (Encoder32 heads) not implemented; the
    # reference default is 'none', which is what is implemented here.
    return global_feat_out, global_feat_key, patch_out, patch_key


# ----------------------------------------------------------------------------- #
# Driver
# ----------------------------------------------------------------------------- #
if __name__ == "__main__":
    key = jax.random.PRNGKey(0)
    k_params, k_x = jax.random.split(key)

    B, Cin, HW = 2, 3, 32                      # small image: 4x4=16 patches + 1 cls token
    P = CFG["patch_size"]
    ph = pw = HW // P
    D = CFG["dim"]

    params = init_params(k_params, CFG, ph * pw)
    x = jax.random.normal(k_x, (B, Cin, HW, HW), jnp.float32)

    @jax.jit
    def run(params, x):
        return vit_encoder_forward(params, x, CFG, return_patches=True)

    gout, gkey, pout, pkey = jax.block_until_ready(run(params, x))

    assert gout.shape == (B, D), gout.shape
    assert gkey.shape == (B, D), gkey.shape
    assert pout.shape == (B, D, ph, pw), pout.shape
    assert pkey.shape == (B, D, ph, pw), pkey.shape
    for t in (gout, gkey, pout, pkey):
        assert t.dtype == jnp.float32
        assert bool(jnp.all(jnp.isfinite(t)))
    print("KERNEL_OK")
</pallas_src>

<mosaic_0001>
module attributes {stable_mosaic.version = 11 : i64} {
  func.func @_gemm_bias_act_kernel(%arg0: i32, %arg1: i32, %arg2: i32, %arg3: memref<32x192xf32, #tpu.memory_space<vmem>>, %arg4: memref<192x64xf32, #tpu.memory_space<vmem>>, %arg5: memref<1x64xf32, #tpu.memory_space<vmem>>, %arg6: memref<32x64xf32, #tpu.memory_space<vmem>>, %arg7: memref<32x64xf32, #tpu.memory_space<vmem>>) attributes {dimension_semantics = [#tpu.dimension_semantics<parallel>, #tpu.dimension_semantics<parallel>, #tpu.dimension_semantics<arbitrary>], iteration_bounds = array<i64: 1, 1, 1>, scalar_prefetch = 0 : i64, scratch_operands = 1 : i64, tpu.core_type = #tpu.core_type<tc>, window_params = [{transform_indices = @transform_0, window_bounds = array<i64: 32, 192>}, {transform_indices = @transform_1, window_bounds = array<i64: 192, 64>}, {transform_indices = @transform_2, window_bounds = array<i64: 1, 64>}, {transform_indices = @transform_3, window_bounds = array<i64: 32, 64>}]} {
    %c0_i32 = arith.constant 0 : i32
    %0 = arith.cmpi eq, %arg2, %c0_i32 : i32
    %1 = arith.extui %0 : i1 to i32
    %c0_i32_0 = arith.constant 0 : i32
    %2 = arith.cmpi ne, %1, %c0_i32_0 : i32
    scf.if %2 {
      %cst_10 = arith.constant 0.000000e+00 : f32
      %12 = vector.broadcast %cst_10 : f32 to vector<32x64xf32>
      %c0_11 = arith.constant 0 : index
      %c0_12 = arith.constant 0 : index
      %13 = vector.load %arg7[%c0_11, %c0_12] : memref<32x64xf32, #tpu.memory_space<vmem>>, vector<32x64xf32>
      tpu.vector_store %arg7[%c0_11, %c0_12], %12 {strides = array<i32>} : memref<32x64xf32, #tpu.memory_space<vmem>>, vector<32x64xf32>,
    } else {
    }
    %c0 = arith.constant 0 : index
    %c0_1 = arith.constant 0 : index
    %3 = vector.load %arg7[%c0, %c0_1] : memref<32x64xf32, #tpu.memory_space<vmem>>, vector<32x64xf32>
    %c0_2 = arith.constant 0 : index
    %c0_3 = arith.constant 0 : index
    %4 = vector.load %arg3[%c0_2, %c0_3] : memref<32x192xf32, #tpu.memory_space<vmem>>, vector<32x192xf32>
    %c0_4 = arith.constant 0 : index
    %c0_5 = arith.constant 0 : index
    %5 = vector.load %arg4[%c0_4, %c0_5] : memref<192x64xf32, #tpu.memory_space<vmem>>, vector<192x64xf32>
    %cst = arith.constant dense<0.000000e+00> : vector<32x64xf32>
    %6 = tpu.matmul %4, %5, %cst {dimension_numbers = #tpu.dot_dimension_numbers<[1], [0], [0], [1], [0, 0, 1, 1], [], []>} : vector<32x192xf32>, vector<192x64xf32>, vector<32x64xf32> -> vector<32x64xf32>
    %7 = arith.addf %3, %6 : vector<32x64xf32>
    %c0_6 = arith.constant 0 : index
    %c0_7 = arith.constant 0 : index
    %8 = vector.load %arg7[%c0_6, %c0_7] : memref<32x64xf32, #tpu.memory_space<vmem>>, vector<32x64xf32>
    tpu.vector_store %arg7[%c0_6, %c0_7], %7 {strides = array<i32>} : memref<32x64xf32, #tpu.memory_space<vmem>>, vector<32x64xf32>,
    %c0_i32_8 = arith.constant 0 : i32
    %9 = arith.cmpi eq, %arg2, %c0_i32_8 : i32
    %10 = arith.extui %9 : i1 to i32
    %c0_i32_9 = arith.constant 0 : i32
    %11 = arith.cmpi ne, %10, %c0_i32_9 : i32
    scf.if %11 {
      %c0_10 = arith.constant 0 : index
      %c0_11 = arith.constant 0 : index
      %12 = vector.load %arg7[%c0_10, %c0_11] : memref<32x64xf32, #tpu.memory_space<vmem>>, vector<32x64xf32>
      %c0_12 = arith.constant 0 : index
      %c0_13 = arith.constant 0 : index
      %13 = vector.load %arg5[%c0_12, %c0_13] : memref<1x64xf32, #tpu.memory_space<vmem>>, vector<1x64xf32>
      %14 = vector.broadcast %13 : vector<1x64xf32> to vector<32x64xf32>
      %15 = arith.addf %12, %14 : vector<32x64xf32>
      %c0_14 = arith.constant 0 : index
      %c0_15 = arith.constant 0 : index
      %16 = vector.load %arg6[%c0_14, %c0_15] : memref<32x64xf32, #tpu.memory_space<vmem>>, vector<32x64xf32>
      tpu.vector_store %arg6[%c0_14, %c0_15], %15 {strides = array<i32>} : memref<32x64xf32, #tpu.memory_space<vmem>>, vector<32x64xf32>,
    } else {
    }
    return
  }
  func.func @transform_0(%arg0: i32, %arg1: i32, %arg2: i32) -> (i32, i32) {
    %c0_i32 = arith.constant 0 : i32
    return %arg0, %arg2 : i32, i32
  }
  func.func @transform_1(%arg0: i32, %arg1: i32, %arg2: i32) -> (i32, i32) {
    %c0_i32 = arith.constant 0 : i32
    return %arg2, %arg1 : i32, i32
  }
  func.func @transform_2(%arg0: i32, %arg1: i32, %arg2: i32) -> (i32, i32) {
    %c0_i32 = arith.constant 0 : i32
    %c0_i32_0 = arith.constant 0 : i32
    return %c0_i32, %arg1 : i32, i32
  }
  func.func @transform_3(%arg0: i32, %arg1: i32, %arg2: i32) -> (i32, i32) {
    %c0_i32 = arith.constant 0 : i32
    return %arg0, %arg1 : i32, i32
  }
}

module attributes {stable_mosaic.version = 11 : i64} {
  func.func @_vit_blocks_kernel(%arg0: i32, %arg1: memref<2x17x64xf32, #tpu.memory_space<vmem>>, %arg2: memref<1x1x64xf32, #tpu.memory_space<vmem>>, %arg3: memref<1x1x64xf32, #tpu.memory_space<vmem>>, %arg4: memref<1x4x64x16xf32, #tpu.memory_space<vmem>>, %arg5: memref<1x4x1x16xf32, #tpu.memory_space<vmem>>, %arg6: memref<1x4x64x16xf32, #tpu.memory_space<vmem>>, %arg7: memref<1x4x1x16xf32, #tpu.memory_space<vmem>>, %arg8: memref<1x4x64x16xf32, #tpu.memory_space<vmem>>, %arg9: memref<1x4x1x16xf32, #tpu.memory_space<vmem>>, %arg10: memref<1x4x16x64xf32, #tpu.memory_space<vmem>>, %arg11: memref<1x1x64xf32, #tpu.memory_space<vmem>>, %arg12: memref<1x1x64xf32, #tpu.memory_space<vmem>>, %arg13: memref<1x1x64xf32, #tpu.memory_space<vmem>>, %arg14: memref<1x64x256xf32, #tpu.memory_space<vmem>>, %arg15: memref<1x1x256xf32, #tpu.memory_space<vmem>>, %arg16: memref<1x256x64xf32, #tpu.memory_space<vmem>>, %arg17: memref<1x1x64xf32, #tpu.memory_space<vmem>>, %arg18: memref<1x64xf32, #tpu.memory_space<vmem>>, %arg19: memref<1x64xf32, #tpu.memory_space<vmem>>, %arg20: memref<2x17x64xf32, #tpu.memory_space<vmem>>, %arg21: memref<2x4x17x16xf32, #tpu.memory_space<vmem>>, %arg22: memref<2x17x64xf32, #tpu.memory_space<vmem>>) attributes {dimension_semantics = [#tpu.dimension_semantics<arbitrary>], iteration_bounds = array<i64: 12>, scalar_prefetch = 0 : i64, scratch_operands = 1 : i64, tpu.core_type = #tpu.core_type<tc>, window_params = [{pipeline_mode = #tpu.pipeline_mode<synchronous>, transform_indices = @transform_0, window_bounds = array<i64: 2, 17, 64>}, {transform_indices = @transform_1, window_bounds = array<i64: 1, 1, 64>}, {transform_indices = @transform_2, window_bounds = array<i64: 1, 1, 64>}, {transform_indices = @transform_3, window_bounds = array<i64: 1, 4, 64, 16>}, {transform_indices = @transform_4, window_bounds = array<i64: 1, 4, 1, 16>}, {transform_indices = @transform_5, window_bounds = array<i64: 1, 4, 64, 16>}, {transform_indices = @transform_6, window_bounds = array<i64: 1, 4, 1, 16>}, {transform_indices = @transform_7, window_bounds = array<i64: 1, 4, 64, 16>}, {transform_indices = @transform_8, window_bounds = array<i64: 1, 4, 1, 16>}, {transform_indices = @transform_9, window_bounds = array<i64: 1, 4, 16, 64>}, {transform_indices = @transform_10, window_bounds = array<i64: 1, 1, 64>}, {transform_indices = @transform_11, window_bounds = array<i64: 1, 1, 64>}, {transform_indices = @transform_12, window_bounds = array<i64: 1, 1, 64>}, {transform_indices = @transform_13, window_bounds = array<i64: 1, 64, 256>}, {transform_indices = @transform_14, window_bounds = array<i64: 1, 1, 256>}, {transform_indices = @transform_15, window_bounds = array<i64: 1, 256, 64>}, {transform_indices = @transform_16, window_bounds = array<i64: 1, 1, 64>}, {pipeline_mode = #tpu.pipeline_mode<synchronous>, transform_indices = @transform_17, window_bounds = array<i64: 1, 64>}, {pipeline_mode = #tpu.pipeline_mode<synchronous>, transform_indices = @transform_18, window_bounds = array<i64: 1, 64>}, {pipeline_mode = #tpu.pipeline_mode<synchronous>, transform_indices = @transform_19, window_bounds = array<i64: 2, 17, 64>}, {pipeline_mode = #tpu.pipeline_mode<synchronous>, transform_indices = @transform_20, window_bounds = array<i64: 2, 4, 17, 16>}]} {
    %c0_i32 = arith.constant 0 : i32
    %0 = arith.cmpi eq, %arg0, %c0_i32 : i32
    %1 = arith.extui %0 : i1 to i32
    %c0_i32_0 = arith.constant 0 : i32
    %2 = arith.cmpi ne, %1, %c0_i32_0 : i32
    scf.if %2 {
      %c0_411 = arith.constant 0 : index
      %c0_412 = arith.constant 0 : index
      %c0_413 = arith.constant 0 : index
      %527 = vector.load %arg1[%c0_411, %c0_412, %c0_413] : memref<2x17x64xf32, #tpu.memory_space<vmem>>, vector<2x17x64xf32>
      %c0_414 = arith.constant 0 : index
      %c0_415 = arith.constant 0 : index
      %c0_416 = arith.constant 0 : index
      %528 = vector.load %arg22[%c0_414, %c0_415, %c0_416] : memref<2x17x64xf32, #tpu.memory_space<vmem>>, vector<2x17x64xf32>
      tpu.vector_store %arg22[%c0_414, %c0_415, %c0_416], %527 {strides = array<i32>} : memref<2x17x64xf32, #tpu.memory_space<vmem>>, vector<2x17x64xf32>,
    } else {
    }
    %c0 = arith.constant 0 : index
    %c0_1 = arith.constant 0 : index
    %c0_2 = arith.constant 0 : index
    %3 = vector.load %arg22[%c0, %c0_1, %c0_2] : memref<2x17x64xf32, #tpu.memory_space<vmem>>, vector<1x17x64xf32>
    %4 = vector.shape_cast %3 : vector<1x17x64xf32> to vector<17x64xf32>
    %c0_3 = arith.constant 0 : index
    %c0_4 = arith.constant 0 : index
    %c0_5 = arith.constant 0 : index
    %5 = vector.load %arg2[%c0_3, %c0_4, %c0_5] : memref<1x1x64xf32, #tpu.memory_space<vmem>>, vector<1x1x64xf32>
    %6 = vector.shape_cast %5 : vector<1x1x64xf32> to vector<1x64xf32>
    %c0_6 = arith.constant 0 : index
    %c0_7 = arith.constant 0 : index
    %c0_8 = arith.constant 0 : index
    %7 = vector.load %arg3[%c0_6, %c0_7, %c0_8] : memref<1x1x64xf32, #tpu.memory_space<vmem>>, vector<1x1x64xf32>
    %8 = vector.shape_cast %7 : vector<1x1x64xf32> to vector<1x64xf32>
    %cst = arith.constant dense<0.000000e+00> : vector<17xf32>
    %9 = vector.multi_reduction <add>, %4, %cst [1] : vector<17x64xf32> to vector<17xf32>
    %10 = vector.shape_cast %9 : vector<17xf32> to vector<17x1xf32>
    %cst_9 = arith.constant 6.400000e+01 : f32
    %11 = vector.broadcast %cst_9 : f32 to vector<17x1xf32>
    %12 = arith.divf %10, %11 : vector<17x1xf32>
    %13 = vector.broadcast %12 : vector<17x1xf32> to vector<17x64xf32>
    %14 = arith.subf %4, %13 : vector<17x64xf32>
    %15 = arith.mulf %14, %14 : vector<17x64xf32>
    %cst_10 = arith.constant dense<0.000000e+00> : vector<17xf32>
    %16 = vector.multi_reduction <add>, %15, %cst_10 [1] : vector<17x64xf32> to vector<17xf32>
    %17 = vector.shape_cast %16 : vector<17xf32> to vector<17x1xf32>
    %cst_11 = arith.constant 6.400000e+01 : f32
    %18 = vector.broadcast %cst_11 : f32 to vector<17x1xf32>
    %19 = arith.divf %17, %18 : vector<17x1xf32>
    %20 = vector.broadcast %12 : vector<17x1xf32> to vector<17x64xf32>
    %21 = arith.subf %4, %20 : vector<17x64xf32>
    %cst_12 = arith.constant 9.99999997E-7 : f32
    %22 = vector.broadcast %cst_12 : f32 to vector<17x1xf32>
    %23 = arith.addf %19, %22 : vector<17x1xf32>
    %24 = math.rsqrt %23 : vector<17x1xf32>
    %25 = vector.broadcast %24 : vector<17x1xf32> to vector<17x64xf32>
    %26 = arith.mulf %21, %25 : vector<17x64xf32>
    %27 = vector.broadcast %6 : vector<1x64xf32> to vector<17x64xf32>
    %28 = arith.mulf %26, %27 : vector<17x64xf32>
    %29 = vector.broadcast %8 : vector<1x64xf32> to vector<17x64xf32>
    %30 = arith.addf %28, %29 : vector<17x64xf32>
    %cst_13 = arith.constant 0.000000e+00 : f32
    %31 = vector.broadcast %cst_13 : f32 to vector<17x64xf32>
    %c0_14 = arith.constant 0 : index
    %c0_15 = arith.constant 0 : index
    %c0_16 = arith.constant 0 : index
    %c0_17 = arith.constant 0 : index
    %32 = vector.load %arg4[%c0_14, %c0_15, %c0_16, %c0_17] : memref<1x4x64x16xf32, #tpu.memory_space<vmem>>, vector<1x1x64x16xf32>
    %33 = vector.shape_cast %32 : vector<1x1x64x16xf32> to vector<64x16xf32>
    %cst_18 = arith.constant dense<0.000000e+00> : vector<17x16xf32>
    %34 = tpu.matmul %30, %33, %cst_18 {dimension_numbers = #tpu.dot_dimension_numbers<[1], [0], [0], [1], [0, 0, 1, 1], [], []>} : vector<17x64xf32>, vector<64x16xf32>, vector<17x16xf32> -> vector<17x16xf32>
    %c0_19 = arith.constant 0 : index
    %c0_20 = arith.constant 0 : index
    %c0_21 = arith.constant 0 : index
    %c0_22 = arith.constant 0 : index
    %35 = vector.load %arg5[%c0_19, %c0_20, %c0_21, %c0_22] : memref<1x4x1x16xf32, #tpu.memory_space<vmem>>, vector<1x1x1x16xf32>
    %36 = vector.shape_cast %35 : vector<1x1x1x16xf32> to vector<1x16xf32>
    %37 = vector.broadcast %36 : vector<1x16xf32> to vector<17x16xf32>
    %38 = arith.addf %34, %37 : vector<17x16xf32>
    %c0_23 = arith.constant 0 : index
    %c0_24 = arith.constant 0 : index
    %c0_25 = arith.constant 0 : index
    %c0_26 = arith.constant 0 : index
    %39 = vector.load %arg6[%c0_23, %c0_24, %c0_25, %c0_26] : memref<1x4x64x16xf32, #tpu.memory_space<vmem>>, vector<1x1x64x16xf32>
    %40 = vector.shape_cast %39 : vector<1x1x64x16xf32> to vector<64x16xf32>
    %cst_27 = arith.constant dense<0.000000e+00> : vector<17x16xf32>
    %41 = tpu.matmul %30, %40, %cst_27 {dimension_numbers = #tpu.dot_dimension_numbers<[1], [0], [0], [1], [0, 0, 1, 1], [], []>} : vector<17x64xf32>, vector<64x16xf32>, vector<17x16xf32> -> vector<17x16xf32>
    %c0_28 = arith.constant 0 : index
    %c0_29 = arith.constant 0 : index
    %c0_30 = arith.constant 0 : index
    %c0_31 = arith.constant 0 : index
    %42 = vector.load %arg7[%c0_28, %c0_29, %c0_30, %c0_31] : memref<1x4x1x16xf32, #tpu.memory_space<vmem>>, vector<1x1x1x16xf32>
    %43 = vector.shape_cast %42 : vector<1x1x1x16xf32> to vector<1x16xf32>
    %44 = vector.broadcast %43 : vector<1x16xf32> to vector<17x16xf32>
    %45 = arith.addf %41, %44 : vector<17x16xf32>
    %c0_32 = arith.constant 0 : index
    %c0_33 = arith.constant 0 : index
    %c0_34 = arith.constant 0 : index
    %c0_35 = arith.constant 0 : index
    %46 = vector.load %arg8[%c0_32, %c0_33, %c0_34, %c0_35] : memref<1x4x64x16xf32, #tpu.memory_space<vmem>>, vector<1x1x64x16xf32>
    %47 = vector.shape_cast %46 : vector<1x1x64x16xf32> to vector<64x16xf32>
    %cst_36 = arith.constant dense<0.000000e+00> : vector<17x16xf32>
    %48 = tpu.matmul %30, %47, %cst_36 {dimension_numbers = #tpu.dot_dimension_numbers<[1], [0], [0], [1], [0, 0, 1, 1], [], []>} : vector<17x64xf32>, vector<64x16xf32>, vector<17x16xf32> -> vector<17x16xf32>
    %c0_37 = arith.constant 0 : index
    %c0_38 = arith.constant 0 : index
    %c0_39 = arith.constant 0 : index
    %c0_40 = arith.constant 0 : index
    %49 = vector.load %arg9[%c0_37, %c0_38, %c0_39, %c0_40] : memref<1x4x1x16xf32, #tpu.memory_space<vmem>>, vector<1x1x1x16xf32>
    %50 = vector.shape_cast %49 : vector<1x1x1x16xf32> to vector<1x16xf32>
    %51 = vector.broadcast %50 : vector<1x16xf32> to vector<17x16xf32>
    %52 = arith.addf %48, %51 : vector<17x16xf32>
    %c11_i32 = arith.constant 11 : i32
    %53 = arith.cmpi eq, %arg0, %c11_i32 : i32
    %54 = arith.extui %53 : i1 to i32
    %c0_i32_41 = arith.constant 0 : i32
    %55 = arith.cmpi ne, %54, %c0_i32_41 : i32
    scf.if %55 {
      %c0_411 = arith.constant 0 : index
      %c0_412 = arith.constant 0 : index
      %c0_413 = arith.constant 0 : index
      %c0_414 = arith.constant 0 : index
      %527 = vector.load %arg21[%c0_411, %c0_412, %c0_413, %c0_414] : memref<2x4x17x16xf32, #tpu.memory_space<vmem>>, vector<1x1x17x16xf32>
      %528 = vector.shape_cast %527 : vector<1x1x17x16xf32> to vector<17x16xf32>
      %529 = vector.shape_cast %45 : vector<17x16xf32> to vector<1x1x17x16xf32>
      tpu.vector_store %arg21[%c0_411, %c0_412, %c0_413, %c0_414], %529 {strides = array<i32>} : memref<2x4x17x16xf32, #tpu.memory_space<vmem>>, vector<1x1x17x16xf32>,
    } else {
    }
    %56 = tpu.transpose %45, [1, 0] : vector<17x16xf32> -> vector<16x17xf32>
    %cst_42 = arith.constant dense<0.000000e+00> : vector<17x17xf32>
    %57 = tpu.matmul %38, %56, %cst_42 {dimension_numbers = #tpu.dot_dimension_numbers<[1], [0], [0], [1], [0, 0, 1, 1], [], []>} : vector<17x16xf32>, vector<16x17xf32>, vector<17x17xf32> -> vector<17x17xf32>
    %cst_43 = arith.constant 2.500000e-01 : f32
    %58 = vector.broadcast %cst_43 : f32 to vector<17x17xf32>
    %59 = arith.mulf %57, %58 : vector<17x17xf32>
    %cst_44 = arith.constant dense<0xFF800000> : vector<17xf32>
    %60 = vector.multi_reduction <maximumf>, %59, %cst_44 [1] : vector<17x17xf32> to vector<17xf32>
    %61 = vector.shape_cast %60 : vector<17xf32> to vector<17x1xf32>
    %62 = vector.broadcast %61 : vector<17x1xf32> to vector<17x17xf32>
    %63 = arith.subf %59, %62 : vector<17x17xf32>
    %64 = math.exp %63 : vector<17x17xf32>
    %cst_45 = arith.constant dense<0.000000e+00> : vector<17xf32>
    %65 = vector.multi_reduction <add>, %64, %cst_45 [1] : vector<17x17xf32> to vector<17xf32>
    %66 = vector.shape_cast %65 : vector<17xf32> to vector<17x1xf32>
    %67 = vector.broadcast %66 : vector<17x1xf32> to vector<17x17xf32>
    %68 = arith.divf %64, %67 : vector<17x17xf32>
    %cst_46 = arith.constant dense<0.000000e+00> : vector<17x16xf32>
    %69 = tpu.matmul %68, %52, %cst_46 {dimension_numbers = #tpu.dot_dimension_numbers<[1], [0], [0], [1], [0, 0, 1, 1], [], []>} : vector<17x17xf32>, vector<17x16xf32>, vector<17x16xf32> -> vector<17x16xf32>
    %c0_47 = arith.constant 0 : index
    %c0_48 = arith.constant 0 : index
    %c0_49 = arith.constant 0 : index
    %c0_50 = arith.constant 0 : index
    %70 = vector.load %arg10[%c0_47, %c0_48, %c0_49, %c0_50] : memref<1x4x16x64xf32, #tpu.memory_space<vmem>>, vector<1x1x16x64xf32>
    %71 = vector.shape_cast %70 : vector<1x1x16x64xf32> to vector<16x64xf32>
    %cst_51 = arith.constant dense<0.000000e+00> : vector<17x64xf32>
    %72 = tpu.matmul %69, %71, %cst_51 {dimension_numbers = #tpu.dot_dimension_numbers<[1], [0], [0], [1], [0, 0, 1, 1], [], []>} : vector<17x16xf32>, vector<16x64xf32>, vector<17x64xf32> -> vector<17x64xf32>
    %73 = arith.addf %31, %72 : vector<17x64xf32>
    %c0_52 = arith.constant 0 : index
    %c1 = arith.constant 1 : index
    %c0_53 = arith.constant 0 : index
    %c0_54 = arith.constant 0 : index
    %74 = vector.load %arg4[%c0_52, %c1, %c0_53, %c0_54] : memref<1x4x64x16xf32, #tpu.memory_space<vmem>>, vector<1x1x64x16xf32>
    %75 = vector.shape_cast %74 : vector<1x1x64x16xf32> to vector<64x16xf32>
    %cst_55 = arith.constant dense<0.000000e+00> : vector<17x16xf32>
    %76 = tpu.matmul %30, %75, %cst_55 {dimension_numbers = #tpu.dot_dimension_numbers<[1], [0], [0], [1], [0, 0, 1, 1], [], []>} : vector<17x64xf32>, vector<64x16xf32>, vector<17x16xf32> -> vector<17x16xf32>
    %c0_56 = arith.constant 0 : index
    %c1_57 = arith.constant 1 : index
    %c0_58 = arith.constant 0 : index
    %c0_59 = arith.constant 0 : index
    %77 = vector.load %arg5[%c0_56, %c1_57, %c0_58, %c0_59] : memref<1x4x1x16xf32, #tpu.memory_space<vmem>>, vector<1x1x1x16xf32>
    %78 = vector.shape_cast %77 : vector<1x1x1x16xf32> to vector<1x16xf32>
    %79 = vector.broadcast %78 : vector<1x16xf32> to vector<17x16xf32>
    %80 = arith.addf %76, %79 : vector<17x16xf32>
    %c0_60 = arith.constant 0 : index
    %c1_61 = arith.constant 1 : index
    %c0_62 = arith.constant 0 : index
    %c0_63 = arith.constant 0 : index
    %81 = vector.load %arg6[%c0_60, %c1_61, %c0_62, %c0_63] : memref<1x4x64x16xf32, #tpu.memory_space<vmem>>, vector<1x1x64x16xf32>
    %82 = vector.shape_cast %81 : vector<1x1x64x16xf32> to vector<64x16xf32>
    %cst_64 = arith.constant dense<0.000000e+00> : vector<17x16xf32>
    %83 = tpu.matmul %30, %82, %cst_64 {dimension_numbers = #tpu.dot_dimension_numbers<[1], [0], [0], [1], [0, 0, 1, 1], [], []>} : vector<17x64xf32>, vector<64x16xf32>, vector<17x16xf32> -> vector<17x16xf32>
    %c0_65 = arith.constant 0 : index
    %c1_66 = arith.constant 1 : index
    %c0_67 = arith.constant 0 : index
    %c0_68 = arith.constant 0 : index
    %84 = vector.load %arg7[%c0_65, %c1_66, %c0_67, %c0_68] : memref<1x4x1x16xf32, #tpu.memory_space<vmem>>, vector<1x1x1x16xf32>
    %85 = vector.shape_cast %84 : vector<1x1x1x16xf32> to vector<1x16xf32>
    %86 = vector.broadcast %85 : vector<1x16xf32> to vector<17x16xf32>
    %87 = arith.addf %83, %86 : vector<17x16xf32>
    %c0_69 = arith.constant 0 : index
    %c1_70 = arith.constant 1 : index
    %c0_71 = arith.constant 0 : index
    %c0_72 = arith.constant 0 : index
    %88 = vector.load %arg8[%c0_69, %c1_70, %c0_71, %c0_72] : memref<1x4x64x16xf32, #tpu.memory_space<vmem>>, vector<1x1x64x16xf32>
    %89 = vector.shape_cast %88 : vector<1x1x64x16xf32> to vector<64x16xf32>
    %cst_73 = arith.constant dense<0.000000e+00> : vector<17x16xf32>
    %90 = tpu.matmul %30, %89, %cst_73 {dimension_numbers = #tpu.dot_dimension_numbers<[1], [0], [0], [1], [0, 0, 1, 1], [], []>} : vector<17x64xf32>, vector<64x16xf32>, vector<17x16xf32> -> vector<17x16xf32>
    %c0_74 = arith.constant 0 : index
    %c1_75 = arith.constant 1 : index
    %c0_76 = arith.constant 0 : index
    %c0_77 = arith.constant 0 : index
    %91 = vector.load %arg9[%c0_74, %c1_75, %c0_76, %c0_77] : memref<1x4x1x16xf32, #tpu.memory_space<vmem>>, vector<1x1x1x16xf32>
    %92 = vector.shape_cast %91 : vector<1x1x1x16xf32> to vector<1x16xf32>
    %93 = vector.broadcast %92 : vector<1x16xf32> to vector<17x16xf32>
    %94 = arith.addf %90, %93 : vector<17x16xf32>
    %c11_i32_78 = arith.constant 11 : i32
    %95 = arith.cmpi eq, %arg0, %c11_i32_78 : i32
    %96 = arith.extui %95 : i1 to i32
    %c0_i32_79 = arith.constant 0 : i32
    %97 = arith.cmpi ne, %96, %c0_i32_79 : i32
    scf.if %97 {
      %c0_411 = arith.constant 0 : index
      %c1_412 = arith.constant 1 : index
      %c0_413 = arith.constant 0 : index
      %c0_414 = arith.constant 0 : index
      %527 = vector.load %arg21[%c0_411, %c1_412, %c0_413, %c0_414] : memref<2x4x17x16xf32, #tpu.memory_space<vmem>>, vector<1x1x17x16xf32>
      %528 = vector.shape_cast %527 : vector<1x1x17x16xf32> to vector<17x16xf32>
      %529 = vector.shape_cast %87 : vector<17x16xf32> to vector<1x1x17x16xf32>
      tpu.vector_store %arg21[%c0_411, %c1_412, %c0_413, %c0_414], %529 {strides = array<i32>} : memref<2x4x17x16xf32, #tpu.memory_space<vmem>>, vector<1x1x17x16xf32>,
    } else {
    }
    %98 = tpu.transpose %87, [1, 0] : vector<17x16xf32> -> vector<16x17xf32>
    %cst_80 = arith.constant dense<0.000000e+00> : vector<17x17xf32>
    %99 = tpu.matmul %80, %98, %cst_80 {dimension_numbers = #tpu.dot_dimension_numbers<[1], [0], [0], [1], [0, 0, 1, 1], [], []>} : vector<17x16xf32>, vector<16x17xf32>, vector<17x17xf32> -> vector<17x17xf32>
    %cst_81 = arith.constant 2.500000e-01 : f32
    %100 = vector.broadcast %cst_81 : f32 to vector<17x17xf32>
    %101 = arith.mulf %99, %100 : vector<17x17xf32>
    %cst_82 = arith.constant dense<0xFF800000> : vector<17xf32>
    %102 = vector.multi_reduction <maximumf>, %101, %cst_82 [1] : vector<17x17xf32> to vector<17xf32>
    %103 = vector.shape_cast %102 : vector<17xf32> to vector<17x1xf32>
    %104 = vector.broadcast %103 : vector<17x1xf32> to vector<17x17xf32>
    %105 = arith.subf %101, %104 : vector<17x17xf32>
    %106 = math.exp %105 : vector<17x17xf32>
    %cst_83 = arith.constant dense<0.000000e+00> : vector<17xf32>
    %107 = vector.multi_reduction <add>, %106, %cst_83 [1] : vector<17x17xf32> to vector<17xf32>
    %108 = vector.shape_cast %107 : vector<17xf32> to vector<17x1xf32>
    %109 = vector.broadcast %108 : vector<17x1xf32> to vector<17x17xf32>
    %110 = arith.divf %106, %109 : vector<17x17xf32>
    %cst_84 = arith.constant dense<0.000000e+00> : vector<17x16xf32>
    %111 = tpu.matmul %110, %94, %cst_84 {dimension_numbers = #tpu.dot_dimension_numbers<[1], [0], [0], [1], [0, 0, 1, 1], [], []>} : vector<17x17xf32>, vector<17x16xf32>, vector<17x16xf32> -> vector<17x16xf32>
    %c0_85 = arith.constant 0 : index
    %c1_86 = arith.constant 1 : index
    %c0_87 = arith.constant 0 : index
    %c0_88 = arith.constant 0 : index
    %112 = vector.load %arg10[%c0_85, %c1_86, %c0_87, %c0_88] : memref<1x4x16x64xf32, #tpu.memory_space<vmem>>, vector<1x1x16x64xf32>
    %113 = vector.shape_cast %112 : vector<1x1x16x64xf32> to vector<16x64xf32>
    %cst_89 = arith.constant dense<0.000000e+00> : vector<17x64xf32>
    %114 = tpu.matmul %111, %113, %cst_89 {dimension_numbers = #tpu.dot_dimension_numbers<[1], [0], [0], [1], [0, 0, 1, 1], [], []>} : vector<17x16xf32>, vector<16x64xf32>, vector<17x64xf32> -> vector<17x64xf32>
    %115 = arith.addf %73, %114 : vector<17x64xf32>
    %c0_90 = arith.constant 0 : index
    %c2 = arith.constant 2 : index
    %c0_91 = arith.constant 0 : index
    %c0_92 = arith.constant 0 : index
    %116 = vector.load %arg4[%c0_90, %c2, %c0_91, %c0_92] : memref<1x4x64x16xf32, #tpu.memory_space<vmem>>, vector<1x1x64x16xf32>
    %117 = vector.shape_cast %116 : vector<1x1x64x16xf32> to vector<64x16xf32>
    %cst_93 = arith.constant dense<0.000000e+00> : vector<17x16xf32>
    %118 = tpu.matmul %30, %117, %cst_93 {dimension_numbers = #tpu.dot_dimension_numbers<[1], [0], [0], [1], [0, 0, 1, 1], [], []>} : vector<17x64xf32>, vector<64x16xf32>, vector<17x16xf32> -> vector<17x16xf32>
    %c0_94 = arith.constant 0 : index
    %c2_95 = arith.constant 2 : index
    %c0_96 = arith.constant 0 : index
    %c0_97 = arith.constant 0 : index
    %119 = vector.load %arg5[%c0_94, %c2_95, %c0_96, %c0_97] : memref<1x4x1x16xf32, #tpu.memory_space<vmem>>, vector<1x1x1x16xf32>
    %120 = vector.shape_cast %119 : vector<1x1x1x16xf32> to vector<1x16xf32>
    %121 = vector.broadcast %120 : vector<1x16xf32> to vector<17x16xf32>
    %122 = arith.addf %118, %121 : vector<17x16xf32>
    %c0_98 = arith.constant 0 : index
    %c2_99 = arith.constant 2 : index
    %c0_100 = arith.constant 0 : index
    %c0_101 = arith.constant 0 : index
    %123 = vector.load %arg6[%c0_98, %c2_99, %c0_100, %c0_101] : memref<1x4x64x16xf32, #tpu.memory_space<vmem>>, vector<1x1x64x16xf32>
    %124 = vector.shape_cast %123 : vector<1x1x64x16xf32> to vector<64x16xf32>
    %cst_102 = arith.constant dense<0.000000e+00> : vector<17x16xf32>
    %125 = tpu.matmul %30, %124, %cst_102 {dimension_numbers = #tpu.dot_dimension_numbers<[1], [0], [0], [1], [0, 0, 1, 1], [], []>} : vector<17x64xf32>, vector<64x16xf32>, vector<17x16xf32> -> vector<17x16xf32>
    %c0_103 = arith.constant 0 : index
    %c2_104 = arith.constant 2 : index
    %c0_105 = arith.constant 0 : index
    %c0_106 = arith.constant 0 : index
    %126 = vector.load %arg7[%c0_103, %c2_104, %c0_105, %c0_106] : memref<1x4x1x16xf32, #tpu.memory_space<vmem>>, vector<1x1x1x16xf32>
    %127 = vector.shape_cast %126 : vector<1x1x1x16xf32> to vector<1x16xf32>
    %128 = vector.broadcast %127 : vector<1x16xf32> to vector<17x16xf32>
    %129 = arith.addf %125, %128 : vector<17x16xf32>
    %c0_107 = arith.constant 0 : index
    %c2_108 = arith.constant 2 : index
    %c0_109 = arith.constant 0 : index
    %c0_110 = arith.constant 0 : index
    %130 = vector.load %arg8[%c0_107, %c2_108, %c0_109, %c0_110] : memref<1x4x64x16xf32, #tpu.memory_space<vmem>>, vector<1x1x64x16xf32>
    %131 = vector.shape_cast %130 : vector<1x1x64x16xf32> to vector<64x16xf32>
    %cst_111 = arith.constant dense<0.000000e+00> : vector<17x16xf32>
    %132 = tpu.matmul %30, %131, %cst_111 {dimension_numbers = #tpu.dot_dimension_numbers<[1], [0], [0], [1], [0, 0, 1, 1], [], []>} : vector<17x64xf32>, vector<64x16xf32>, vector<17x16xf32> -> vector<17x16xf32>
    %c0_112 = arith.constant 0 : index
    %c2_113 = arith.constant 2 : index
    %c0_114 = arith.constant 0 : index
    %c0_115 = arith.constant 0 : index
    %133 = vector.load %arg9[%c0_112, %c2_113, %c0_114, %c0_115] : memref<1x4x1x16xf32, #tpu.memory_space<vmem>>, vector<1x1x1x16xf32>
    %134 = vector.shape_cast %133 : vector<1x1x1x16xf32> to vector<1x16xf32>
    %135 = vector.broadcast %134 : vector<1x16xf32> to vector<17x16xf32>
    %136 = arith.addf %132, %135 : vector<17x16xf32>
    %c11_i32_116 = arith.constant 11 : i32
    %137 = arith.cmpi eq, %arg0, %c11_i32_116 : i32
    %138 = arith.extui %137 : i1 to i32
    %c0_i32_117 = arith.constant 0 : i32
    %139 = arith.cmpi ne, %138, %c0_i32_117 : i32
    scf.if %139 {
      %c0_411 = arith.constant 0 : index
      %c2_412 = arith.constant 2 : index
      %c0_413 = arith.constant 0 : index
      %c0_414 = arith.constant 0 : index
      %527 = vector.load %arg21[%c0_411, %c2_412, %c0_413, %c0_414] : memref<2x4x17x16xf32, #tpu.memory_space<vmem>>, vector<1x1x17x16xf32>
      %528 = vector.shape_cast %527 : vector<1x1x17x16xf32> to vector<17x16xf32>
      %529 = vector.shape_cast %129 : vector<17x16xf32> to vector<1x1x17x16xf32>
      tpu.vector_store %arg21[%c0_411, %c2_412, %c0_413, %c0_414], %529 {strides = array<i32>} : memref<2x4x17x16xf32, #tpu.memory_space<vmem>>, vector<1x1x17x16xf32>,
    } else {
    }
    %140 = tpu.transpose %129, [1, 0] : vector<17x16xf32> -> vector<16x17xf32>
    %cst_118 = arith.constant dense<0.000000e+00> : vector<17x17xf32>
    %141 = tpu.matmul %122, %140, %cst_118 {dimension_numbers = #tpu.dot_dimension_numbers<[1], [0], [0], [1], [0, 0, 1, 1], [], []>} : vector<17x16xf32>, vector<16x17xf32>, vector<17x17xf32> -> vector<17x17xf32>
    %cst_119 = arith.constant 2.500000e-01 : f32
    %142 = vector.broadcast %cst_119 : f32 to vector<17x17xf32>
    %143 = arith.mulf %141, %142 : vector<17x17xf32>
    %cst_120 = arith.constant dense<0xFF800000> : vector<17xf32>
    %144 = vector.multi_reduction <maximumf>, %143, %cst_120 [1] : vector<17x17xf32> to vector<17xf32>
    %145 = vector.shape_cast %144 : vector<17xf32> to vector<17x1xf32>
    %146 = vector.broadcast %145 : vector<17x1xf32> to vector<17x17xf32>
    %147 = arith.subf %143, %146 : vector<17x17xf32>
    %148 = math.exp %147 : vector<17x17xf32>
    %cst_121 = arith.constant dense<0.000000e+00> : vector<17xf32>
    %149 = vector.multi_reduction <add>, %148, %cst_121 [1] : vector<17x17xf32> to vector<17xf32>
    %150 = vector.shape_cast %149 : vector<17xf32> to vector<17x1xf32>
    %151 = vector.broadcast %150 : vector<17x1xf32> to vector<17x17xf32>
    %152 = arith.divf %148, %151 : vector<17x17xf32>
    %cst_122 = arith.constant dense<0.000000e+00> : vector<17x16xf32>
    %153 = tpu.matmul %152, %136, %cst_122 {dimension_numbers = #tpu.dot_dimension_numbers<[1], [0], [0], [1], [0, 0, 1, 1], [], []>} : vector<17x17xf32>, vector<17x16xf32>, vector<17x16xf32> -> vector<17x16xf32>
    %c0_123 = arith.constant 0 : index
    %c2_124 = arith.constant 2 : index
    %c0_125 = arith.constant 0 : index
    %c0_126 = arith.constant 0 : index
    %154 = vector.load %arg10[%c0_123, %c2_124, %c0_125, %c0_126] : memref<1x4x16x64xf32, #tpu.memory_space<vmem>>, vector<1x1x16x64xf32>
    %155 = vector.shape_cast %154 : vector<1x1x16x64xf32> to vector<16x64xf32>
    %cst_127 = arith.constant dense<0.000000e+00> : vector<17x64xf32>
    %156 = tpu.matmul %153, %155, %cst_127 {dimension_numbers = #tpu.dot_dimension_numbers<[1], [0], [0], [1], [0, 0, 1, 1], [], []>} : vector<17x16xf32>, vector<16x64xf32>, vector<17x64xf32> -> vector<17x64xf32>
    %157 = arith.addf %115, %156 : vector<17x64xf32>
    %c0_128 = arith.constant 0 : index
    %c3 = arith.constant 3 : index
    %c0_129 = arith.constant 0 : index
    %c0_130 = arith.constant 0 : index
    %158 = vector.load %arg4[%c0_128, %c3, %c0_129, %c0_130] : memref<1x4x64x16xf32, #tpu.memory_space<vmem>>, vector<1x1x64x16xf32>
    %159 = vector.shape_cast %158 : vector<1x1x64x16xf32> to vector<64x16xf32>
    %cst_131 = arith.constant dense<0.000000e+00> : vector<17x16xf32>
    %160 = tpu.matmul %30, %159, %cst_131 {dimension_numbers = #tpu.dot_dimension_numbers<[1], [0], [0], [1], [0, 0, 1, 1], [], []>} : vector<17x64xf32>, vector<64x16xf32>, vector<17x16xf32> -> vector<17x16xf32>
    %c0_132 = arith.constant 0 : index
    %c3_133 = arith.constant 3 : index
    %c0_134 = arith.constant 0 : index
    %c0_135 = arith.constant 0 : index
    %161 = vector.load %arg5[%c0_132, %c3_133, %c0_134, %c0_135] : memref<1x4x1x16xf32, #tpu.memory_space<vmem>>, vector<1x1x1x16xf32>
    %162 = vector.shape_cast %161 : vector<1x1x1x16xf32> to vector<1x16xf32>
    %163 = vector.broadcast %162 : vector<1x16xf32> to vector<17x16xf32>
    %164 = arith.addf %160, %163 : vector<17x16xf32>
    %c0_136 = arith.constant 0 : index
    %c3_137 = arith.constant 3 : index
    %c0_138 = arith.constant 0 : index
    %c0_139 = arith.constant 0 : index
    %165 = vector.load %arg6[%c0_136, %c3_137, %c0_138, %c0_139] : memref<1x4x64x16xf32, #tpu.memory_space<vmem>>, vector<1x1x64x16xf32>
    %166 = vector.shape_cast %165 : vector<1x1x64x16xf32> to vector<64x16xf32>
    %cst_140 = arith.constant dense<0.000000e+00> : vector<17x16xf32>
    %167 = tpu.matmul %30, %166, %cst_140 {dimension_numbers = #tpu.dot_dimension_numbers<[1], [0], [0], [1], [0, 0, 1, 1], [], []>} : vector<17x64xf32>, vector<64x16xf32>, vector<17x16xf32> -> vector<17x16xf32>
    %c0_141 = arith.constant 0 : index
    %c3_142 = arith.constant 3 : index
    %c0_143 = arith.constant 0 : index
    %c0_144 = arith.constant 0 : index
    %168 = vector.load %arg7[%c0_141, %c3_142, %c0_143, %c0_144] : memref<1x4x1x16xf32, #tpu.memory_space<vmem>>, vector<1x1x1x16xf32>
    %169 = vector.shape_cast %168 : vector<1x1x1x16xf32> to vector<1x16xf32>
    %170 = vector.broadcast %169 : vector<1x16xf32> to vector<17x16xf32>
    %171 = arith.addf %167, %170 : vector<17x16xf32>
    %c0_145 = arith.constant 0 : index
    %c3_146 = arith.constant 3 : index
    %c0_147 = arith.constant 0 : index
    %c0_148 = arith.constant 0 : index
    %172 = vector.load %arg8[%c0_145, %c3_146, %c0_147, %c0_148] : memref<1x4x64x16xf32, #tpu.memory_space<vmem>>, vector<1x1x64x16xf32>
    %173 = vector.shape_cast %172 : vector<1x1x64x16xf32> to vector<64x16xf32>
    %cst_149 = arith.constant dense<0.000000e+00> : vector<17x16xf32>
    %174 = tpu.matmul %30, %173, %cst_149 {dimension_numbers = #tpu.dot_dimension_numbers<[1], [0], [0], [1], [0, 0, 1, 1], [], []>} : vector<17x64xf32>, vector<64x16xf32>, vector<17x16xf32> -> vector<17x16xf32>
    %c0_150 = arith.constant 0 : index
    %c3_151 = arith.constant 3 : index
    %c0_152 = arith.constant 0 : index
    %c0_153 = arith.constant 0 : index
    %175 = vector.load %arg9[%c0_150, %c3_151, %c0_152, %c0_153] : memref<1x4x1x16xf32, #tpu.memory_space<vmem>>, vector<1x1x1x16xf32>
    %176 = vector.shape_cast %175 : vector<1x1x1x16xf32> to vector<1x16xf32>
    %177 = vector.broadcast %176 : vector<1x16xf32> to vector<17x16xf32>
    %178 = arith.addf %174, %177 : vector<17x16xf32>
    %c11_i32_154 = arith.constant 11 : i32
    %179 = arith.cmpi eq, %arg0, %c11_i32_154 : i32
    %180 = arith.extui %179 : i1 to i32
    %c0_i32_155 = arith.constant 0 : i32
    %181 = arith.cmpi ne, %180, %c0_i32_155 : i32
    scf.if %181 {
      %c0_411 = arith.constant 0 : index
      %c3_412 = arith.constant 3 : index
      %c0_413 = arith.constant 0 : index
      %c0_414 = arith.constant 0 : index
      %527 = vector.load %arg21[%c0_411, %c3_412, %c0_413, %c0_414] : memref<2x4x17x16xf32, #tpu.memory_space<vmem>>, vector<1x1x17x16xf32>
      %528 = vector.shape_cast %527 : vector<1x1x17x16xf32> to vector<17x16xf32>
      %529 = vector.shape_cast %171 : vector<17x16xf32> to vector<1x1x17x16xf32>
      tpu.vector_store %arg21[%c0_411, %c3_412, %c0_413, %c0_414], %529 {strides = array<i32>} : memref<2x4x17x16xf32, #tpu.memory_space<vmem>>, vector<1x1x17x16xf32>,
    } else {
    }
    %182 = tpu.transpose %171, [1, 0] : vector<17x16xf32> -> vector<16x17xf32>
    %cst_156 = arith.constant dense<0.000000e+00> : vector<17x17xf32>
    %183 = tpu.matmul %164, %182, %cst_156 {dimension_numbers = #tpu.dot_dimension_numbers<[1], [0], [0], [1], [0, 0, 1, 1], [], []>} : vector<17x16xf32>, vector<16x17xf32>, vector<17x17xf32> -> vector<17x17xf32>
    %cst_157 = arith.constant 2.500000e-01 : f32
    %184 = vector.broadcast %cst_157 : f32 to vector<17x17xf32>
    %185 = arith.mulf %183, %184 : vector<17x17xf32>
    %cst_158 = arith.constant dense<0xFF800000> : vector<17xf32>
    %186 = vector.multi_reduction <maximumf>, %185, %cst_158 [1] : vector<17x17xf32> to vector<17xf32>
    %187 = vector.shape_cast %186 : vector<17xf32> to vector<17x1xf32>
    %188 = vector.broadcast %187 : vector<17x1xf32> to vector<17x17xf32>
    %189 = arith.subf %185, %188 : vector<17x17xf32>
    %190 = math.exp %189 : vector<17x17xf32>
    %cst_159 = arith.constant dense<0.000000e+00> : vector<17xf32>
    %191 = vector.multi_reduction <add>, %190, %cst_159 [1] : vector<17x17xf32> to vector<17xf32>
    %192 = vector.shape_cast %191 : vector<17xf32> to vector<17x1xf32>
    %193 = vector.broadcast %192 : vector<17x1xf32> to vector<17x17xf32>
    %194 = arith.divf %190, %193 : vector<17x17xf32>
    %cst_160 = arith.constant dense<0.000000e+00> : vector<17x16xf32>
    %195 = tpu.matmul %194, %178, %cst_160 {dimension_numbers = #tpu.dot_dimension_numbers<[1], [0], [0], [1], [0, 0, 1, 1], [], []>} : vector<17x17xf32>, vector<17x16xf32>, vector<17x16xf32> -> vector<17x16xf32>
    %c0_161 = arith.constant 0 : index
    %c3_162 = arith.constant 3 : index
    %c0_163 = arith.constant 0 : index
    %c0_164 = arith.constant 0 : index
    %196 = vector.load %arg10[%c0_161, %c3_162, %c0_163, %c0_164] : memref<1x4x16x64xf32, #tpu.memory_space<vmem>>, vector<1x1x16x64xf32>
    %197 = vector.shape_cast %196 : vector<1x1x16x64xf32> to vector<16x64xf32>
    %cst_165 = arith.constant dense<0.000000e+00> : vector<17x64xf32>
    %198 = tpu.matmul %195, %197, %cst_165 {dimension_numbers = #tpu.dot_dimension_numbers<[1], [0], [0], [1], [0, 0, 1, 1], [], []>} : vector<17x16xf32>, vector<16x64xf32>, vector<17x64xf32> -> vector<17x64xf32>
    %199 = arith.addf %157, %198 : vector<17x64xf32>
    %200 = arith.addf %4, %199 : vector<17x64xf32>
    %c0_166 = arith.constant 0 : index
    %c0_167 = arith.constant 0 : index
    %c0_168 = arith.constant 0 : index
    %201 = vector.load %arg11[%c0_166, %c0_167, %c0_168] : memref<1x1x64xf32, #tpu.memory_space<vmem>>, vector<1x1x64xf32>
    %202 = vector.shape_cast %201 : vector<1x1x64xf32> to vector<1x64xf32>
    %203 = vector.broadcast %202 : vector<1x64xf32> to vector<17x64xf32>
    %204 = arith.addf %200, %203 : vector<17x64xf32>
    %c0_169 = arith.constant 0 : index
    %c0_170 = arith.constant 0 : index
    %c0_171 = arith.constant 0 : index
    %205 = vector.load %arg12[%c0_169, %c0_170, %c0_171] : memref<1x1x64xf32, #tpu.memory_space<vmem>>, vector<1x1x64xf32>
    %206 = vector.shape_cast %205 : vector<1x1x64xf32> to vector<1x64xf32>
    %c0_172 = arith.constant 0 : index
    %c0_173 = arith.constant 0 : index
    %c0_174 = arith.constant 0 : index
    %207 = vector.load %arg13[%c0_172, %c0_173, %c0_174] : memref<1x1x64xf32, #tpu.memory_space<vmem>>, vector<1x1x64xf32>
    %208 = vector.shape_cast %207 : vector<1x1x64xf32> to vector<1x64xf32>
    %cst_175 = arith.constant dense<0.000000e+00> : vector<17xf32>
    %209 = vector.multi_reduction <add>, %204, %cst_175 [1] : vector<17x64xf32> to vector<17xf32>
    %210 = vector.shape_cast %209 : vector<17xf32> to vector<17x1xf32>
    %cst_176 = arith.constant 6.400000e+01 : f32
    %211 = vector.broadcast %cst_176 : f32 to vector<17x1xf32>
    %212 = arith.divf %210, %211 : vector<17x1xf32>
    %213 = vector.broadcast %212 : vector<17x1xf32> to vector<17x64xf32>
    %214 = arith.subf %204, %213 : vector<17x64xf32>
    %215 = arith.mulf %214, %214 : vector<17x64xf32>
    %cst_177 = arith.constant dense<0.000000e+00> : vector<17xf32>
    %216 = vector.multi_reduction <add>, %215, %cst_177 [1] : vector<17x64xf32> to vector<17xf32>
    %217 = vector.shape_cast %216 : vector<17xf32> to vector<17x1xf32>
    %cst_178 = arith.constant 6.400000e+01 : f32
    %218 = vector.broadcast %cst_178 : f32 to vector<17x1xf32>
    %219 = arith.divf %217, %218 : vector<17x1xf32>
    %220 = vector.broadcast %212 : vector<17x1xf32> to vector<17x64xf32>
    %221 = arith.subf %204, %220 : vector<17x64xf32>
    %cst_179 = arith.constant 9.99999997E-7 : f32
    %222 = vector.broadcast %cst_179 : f32 to vector<17x1xf32>
    %223 = arith.addf %219, %222 : vector<17x1xf32>
    %224 = math.rsqrt %223 : vector<17x1xf32>
    %225 = vector.broadcast %224 : vector<17x1xf32> to vector<17x64xf32>
    %226 = arith.mulf %221, %225 : vector<17x64xf32>
    %227 = vector.broadcast %206 : vector<1x64xf32> to vector<17x64xf32>
    %228 = arith.mulf %226, %227 : vector<17x64xf32>
    %229 = vector.broadcast %208 : vector<1x64xf32> to vector<17x64xf32>
    %230 = arith.addf %228, %229 : vector<17x64xf32>
    %c0_180 = arith.constant 0 : index
    %c0_181 = arith.constant 0 : index
    %c0_182 = arith.constant 0 : index
    %231 = vector.load %arg14[%c0_180, %c0_181, %c0_182] : memref<1x64x256xf32, #tpu.memory_space<vmem>>, vector<1x64x256xf32>
    %232 = vector.shape_cast %231 : vector<1x64x256xf32> to vector<64x256xf32>
    %cst_183 = arith.constant dense<0.000000e+00> : vector<17x256xf32>
    %233 = tpu.matmul %230, %232, %cst_183 {dimension_numbers = #tpu.dot_dimension_numbers<[1], [0], [0], [1], [0, 0, 1, 1], [], []>} : vector<17x64xf32>, vector<64x256xf32>, vector<17x256xf32> -> vector<17x256xf32>
    %c0_184 = arith.constant 0 : index
    %c0_185 = arith.constant 0 : index
    %c0_186 = arith.constant 0 : index
    %234 = vector.load %arg15[%c0_184, %c0_185, %c0_186] : memref<1x1x256xf32, #tpu.memory_space<vmem>>, vector<1x1x256xf32>
    %235 = vector.shape_cast %234 : vector<1x1x256xf32> to vector<1x256xf32>
    %236 = vector.broadcast %235 : vector<1x256xf32> to vector<17x256xf32>
    %237 = arith.addf %233, %236 : vector<17x256xf32>
    %238 = arith.mulf %237, %237 : vector<17x256xf32>
    %239 = arith.mulf %237, %238 : vector<17x256xf32>
    %cst_187 = arith.constant 4.471500e-02 : f32
    %240 = vector.broadcast %cst_187 : f32 to vector<17x256xf32>
    %241 = arith.mulf %240, %239 : vector<17x256xf32>
    %242 = arith.addf %237, %241 : vector<17x256xf32>
    %cst_188 = arith.constant 0.797884583 : f32
    %243 = vector.broadcast %cst_188 : f32 to vector<17x256xf32>
    %244 = arith.mulf %243, %242 : vector<17x256xf32>
    %245 = math.tanh %244 : vector<17x256xf32>
    %cst_189 = arith.constant 1.000000e+00 : f32
    %246 = vector.broadcast %cst_189 : f32 to vector<17x256xf32>
    %247 = arith.addf %246, %245 : vector<17x256xf32>
    %cst_190 = arith.constant 5.000000e-01 : f32
    %248 = vector.broadcast %cst_190 : f32 to vector<17x256xf32>
    %249 = arith.mulf %248, %247 : vector<17x256xf32>
    %250 = arith.mulf %237, %249 : vector<17x256xf32>
    %c0_191 = arith.constant 0 : index
    %c0_192 = arith.constant 0 : index
    %c0_193 = arith.constant 0 : index
    %251 = vector.load %arg16[%c0_191, %c0_192, %c0_193] : memref<1x256x64xf32, #tpu.memory_space<vmem>>, vector<1x256x64xf32>
    %252 = vector.shape_cast %251 : vector<1x256x64xf32> to vector<256x64xf32>
    %cst_194 = arith.constant dense<0.000000e+00> : vector<17x64xf32>
    %253 = tpu.matmul %250, %252, %cst_194 {dimension_numbers = #tpu.dot_dimension_numbers<[1], [0], [0], [1], [0, 0, 1, 1], [], []>} : vector<17x256xf32>, vector<256x64xf32>, vector<17x64xf32> -> vector<17x64xf32>
    %c0_195 = arith.constant 0 : index
    %c0_196 = arith.constant 0 : index
    %c0_197 = arith.constant 0 : index
    %254 = vector.load %arg17[%c0_195, %c0_196, %c0_197] : memref<1x1x64xf32, #tpu.memory_space<vmem>>, vector<1x1x64xf32>
    %255 = vector.shape_cast %254 : vector<1x1x64xf32> to vector<1x64xf32>
    %256 = vector.broadcast %255 : vector<1x64xf32> to vector<17x64xf32>
    %257 = arith.addf %253, %256 : vector<17x64xf32>
    %258 = arith.addf %204, %257 : vector<17x64xf32>
    %c0_198 = arith.constant 0 : index
    %c0_199 = arith.constant 0 : index
    %c0_200 = arith.constant 0 : index
    %259 = vector.load %arg22[%c0_198, %c0_199, %c0_200] : memref<2x17x64xf32, #tpu.memory_space<vmem>>, vector<1x17x64xf32>
    %260 = vector.shape_cast %259 : vector<1x17x64xf32> to vector<17x64xf32>
    %261 = vector.shape_cast %258 : vector<17x64xf32> to vector<1x17x64xf32>
    tpu.vector_store %arg22[%c0_198, %c0_199, %c0_200], %261 {strides = array<i32>} : memref<2x17x64xf32, #tpu.memory_space<vmem>>, vector<1x17x64xf32>,
    %c11_i32_201 = arith.constant 11 : i32
    %262 = arith.cmpi eq, %arg0, %c11_i32_201 : i32
    %263 = arith.extui %262 : i1 to i32
    %c0_i32_202 = arith.constant 0 : i32
    %264 = arith.cmpi ne, %263, %c0_i32_202 : i32
    scf.if %264 {
      %c0_411 = arith.constant 0 : index
      %c0_412 = arith.constant 0 : index
      %527 = vector.load %arg18[%c0_411, %c0_412] : memref<1x64xf32, #tpu.memory_space<vmem>>, vector<1x64xf32>
      %c0_413 = arith.constant 0 : index
      %c0_414 = arith.constant 0 : index
      %528 = vector.load %arg19[%c0_413, %c0_414] : memref<1x64xf32, #tpu.memory_space<vmem>>, vector<1x64xf32>
      %cst_415 = arith.constant dense<0.000000e+00> : vector<17xf32>
      %529 = vector.multi_reduction <add>, %258, %cst_415 [1] : vector<17x64xf32> to vector<17xf32>
      %530 = vector.shape_cast %529 : vector<17xf32> to vector<17x1xf32>
      %cst_416 = arith.constant 6.400000e+01 : f32
      %531 = vector.broadcast %cst_416 : f32 to vector<17x1xf32>
      %532 = arith.divf %530, %531 : vector<17x1xf32>
      %533 = vector.broadcast %532 : vector<17x1xf32> to vector<17x64xf32>
      %534 = arith.subf %258, %533 : vector<17x64xf32>
      %535 = arith.mulf %534, %534 : vector<17x64xf32>
      %cst_417 = arith.constant dense<0.000000e+00> : vector<17xf32>
      %536 = vector.multi_reduction <add>, %535, %cst_417 [1] : vector<17x64xf32> to vector<17xf32>
      %537 = vector.shape_cast %536 : vector<17xf32> to vector<17x1xf32>
      %cst_418 = arith.constant 6.400000e+01 : f32
      %538 = vector.broadcast %cst_418 : f32 to vector<17x1xf32>
      %539 = arith.divf %537, %538 : vector<17x1xf32>
      %540 = vector.broadcast %532 : vector<17x1xf32> to vector<17x64xf32>
      %541 = arith.subf %258, %540 : vector<17x64xf32>
      %cst_419 = arith.constant 9.99999997E-7 : f32
      %542 = vector.broadcast %cst_419 : f32 to vector<17x1xf32>
      %543 = arith.addf %539, %542 : vector<17x1xf32>
      %544 = math.rsqrt %543 : vector<17x1xf32>
      %545 = vector.broadcast %544 : vector<17x1xf32> to vector<17x64xf32>
      %546 = arith.mulf %541, %545 : vector<17x64xf32>
      %547 = vector.broadcast %527 : vector<1x64xf32> to vector<17x64xf32>
      %548 = arith.mulf %546, %547 : vector<17x64xf32>
      %549 = vector.broadcast %528 : vector<1x64xf32> to vector<17x64xf32>
      %550 = arith.addf %548, %549 : vector<17x64xf32>
      %c0_420 = arith.constant 0 : index
      %c0_421 = arith.constant 0 : index
      %c0_422 = arith.constant 0 : index
      %551 = vector.load %arg20[%c0_420, %c0_421, %c0_422] : memref<2x17x64xf32, #tpu.memory_space<vmem>>, vector<1x17x64xf32>
      %552 = vector.shape_cast %551 : vector<1x17x64xf32> to vector<17x64xf32>
      %553 = vector.shape_cast %550 : vector<17x64xf32> to vector<1x17x64xf32>
      tpu.vector_store %arg20[%c0_420, %c0_421, %c0_422], %553 {strides = array<i32>} : memref<2x17x64xf32, #tpu.memory_space<vmem>>, vector<1x17x64xf32>,
    } else {
    }
    %c1_203 = arith.constant 1 : index
    %c0_204 = arith.constant 0 : index
    %c0_205 = arith.constant 0 : index
    %265 = vector.load %arg22[%c1_203, %c0_204, %c0_205] : memref<2x17x64xf32, #tpu.memory_space<vmem>>, vector<1x17x64xf32>
    %266 = vector.shape_cast %265 : vector<1x17x64xf32> to vector<17x64xf32>
    %c0_206 = arith.constant 0 : index
    %c0_207 = arith.constant 0 : index
    %c0_208 = arith.constant 0 : index
    %267 = vector.load %arg2[%c0_206, %c0_207, %c0_208] : memref<1x1x64xf32, #tpu.memory_space<vmem>>, vector<1x1x64xf32>
    %268 = vector.shape_cast %267 : vector<1x1x64xf32> to vector<1x64xf32>
    %c0_209 = arith.constant 0 : index
    %c0_210 = arith.constant 0 : index
    %c0_211 = arith.constant 0 : index
    %269 = vector.load %arg3[%c0_209, %c0_210, %c0_211] : memref<1x1x64xf32, #tpu.memory_space<vmem>>, vector<1x1x64xf32>
    %270 = vector.shape_cast %269 : vector<1x1x64xf32> to vector<1x64xf32>
    %cst_212 = arith.constant dense<0.000000e+00> : vector<17xf32>
    %271 = vector.multi_reduction <add>, %266, %cst_212 [1] : vector<17x64xf32> to vector<17xf32>
    %272 = vector.shape_cast %271 : vector<17xf32> to vector<17x1xf32>
    %cst_213 = arith.constant 6.400000e+01 : f32
    %273 = vector.broadcast %cst_213 : f32 to vector<17x1xf32>
    %274 = arith.divf %272, %273 : vector<17x1xf32>
    %275 = vector.broadcast %274 : vector<17x1xf32> to vector<17x64xf32>
    %276 = arith.subf %266, %275 : vector<17x64xf32>
    %277 = arith.mulf %276, %276 : vector<17x64xf32>
    %cst_214 = arith.constant dense<0.000000e+00> : vector<17xf32>
    %278 = vector.multi_reduction <add>, %277, %cst_214 [1] : vector<17x64xf32> to vector<17xf32>
    %279 = vector.shape_cast %278 : vector<17xf32> to vector<17x1xf32>
    %cst_215 = arith.constant 6.400000e+01 : f32
    %280 = vector.broadcast %cst_215 : f32 to vector<17x1xf32>
    %281 = arith.divf %279, %280 : vector<17x1xf32>
    %282 = vector.broadcast %274 : vector<17x1xf32> to vector<17x64xf32>
    %283 = arith.subf %266, %282 : vector<17x64xf32>
    %cst_216 = arith.constant 9.99999997E-7 : f32
    %284 = vector.broadcast %cst_216 : f32 to vector<17x1xf32>
    %285 = arith.addf %281, %284 : vector<17x1xf32>
    %286 = math.rsqrt %285 : vector<17x1xf32>
    %287 = vector.broadcast %286 : vector<17x1xf32> to vector<17x64xf32>
    %288 = arith.mulf %283, %287 : vector<17x64xf32>
    %289 = vector.broadcast %268 : vector<1x64xf32> to vector<17x64xf32>
    %290 = arith.mulf %288, %289 : vector<17x64xf32>
    %291 = vector.broadcast %270 : vector<1x64xf32> to vector<17x64xf32>
    %292 = arith.addf %290, %291 : vector<17x64xf32>
    %cst_217 = arith.constant 0.000000e+00 : f32
    %293 = vector.broadcast %cst_217 : f32 to vector<17x64xf32>
    %c0_218 = arith.constant 0 : index
    %c0_219 = arith.constant 0 : index
    %c0_220 = arith.constant 0 : index
    %c0_221 = arith.constant 0 : index
    %294 = vector.load %arg4[%c0_218, %c0_219, %c0_220, %c0_221] : memref<1x4x64x16xf32, #tpu.memory_space<vmem>>, vector<1x1x64x16xf32>
    %295 = vector.shape_cast %294 : vector<1x1x64x16xf32> to vector<64x16xf32>
    %cst_222 = arith.constant dense<0.000000e+00> : vector<17x16xf32>
    %296 = tpu.matmul %292, %295, %cst_222 {dimension_numbers = #tpu.dot_dimension_numbers<[1], [0], [0], [1], [0, 0, 1, 1], [], []>} : vector<17x64xf32>, vector<64x16xf32>, vector<17x16xf32> -> vector<17x16xf32>
    %c0_223 = arith.constant 0 : index
    %c0_224 = arith.constant 0 : index
    %c0_225 = arith.constant 0 : index
    %c0_226 = arith.constant 0 : index
    %297 = vector.load %arg5[%c0_223, %c0_224, %c0_225, %c0_226] : memref<1x4x1x16xf32, #tpu.memory_space<vmem>>, vector<1x1x1x16xf32>
    %298 = vector.shape_cast %297 : vector<1x1x1x16xf32> to vector<1x16xf32>
    %299 = vector.broadcast %298 : vector<1x16xf32> to vector<17x16xf32>
    %300 = arith.addf %296, %299 : vector<17x16xf32>
    %c0_227 = arith.constant 0 : index
    %c0_228 = arith.constant 0 : index
    %c0_229 = arith.constant 0 : index
    %c0_230 = arith.constant 0 : index
    %301 = vector.load %arg6[%c0_227, %c0_228, %c0_229, %c0_230] : memref<1x4x64x16xf32, #tpu.memory_space<vmem>>, vector<1x1x64x16xf32>
    %302 = vector.shape_cast %301 : vector<1x1x64x16xf32> to vector<64x16xf32>
    %cst_231 = arith.constant dense<0.000000e+00> : vector<17x16xf32>
    %303 = tpu.matmul %292, %302, %cst_231 {dimension_numbers = #tpu.dot_dimension_numbers<[1], [0], [0], [1], [0, 0, 1, 1], [], []>} : vector<17x64xf32>, vector<64x16xf32>, vector<17x16xf32> -> vector<17x16xf32>
    %c0_232 = arith.constant 0 : index
    %c0_233 = arith.constant 0 : index
    %c0_234 = arith.constant 0 : index
    %c0_235 = arith.constant 0 : index
    %304 = vector.load %arg7[%c0_232, %c0_233, %c0_234, %c0_235] : memref<1x4x1x16xf32, #tpu.memory_space<vmem>>, vector<1x1x1x16xf32>
    %305 = vector.shape_cast %304 : vector<1x1x1x16xf32> to vector<1x16xf32>
    %306 = vector.broadcast %305 : vector<1x16xf32> to vector<17x16xf32>
    %307 = arith.addf %303, %306 : vector<17x16xf32>
    %c0_236 = arith.constant 0 : index
    %c0_237 = arith.constant 0 : index
    %c0_238 = arith.constant 0 : index
    %c0_239 = arith.constant 0 : index
    %308 = vector.load %arg8[%c0_236, %c0_237, %c0_238, %c0_239] : memref<1x4x64x16xf32, #tpu.memory_space<vmem>>, vector<1x1x64x16xf32>
    %309 = vector.shape_cast %308 : vector<1x1x64x16xf32> to vector<64x16xf32>
    %cst_240 = arith.constant dense<0.000000e+00> : vector<17x16xf32>
    %310 = tpu.matmul %292, %309, %cst_240 {dimension_numbers = #tpu.dot_dimension_numbers<[1], [0], [0], [1], [0, 0, 1, 1], [], []>} : vector<17x64xf32>, vector<64x16xf32>, vector<17x16xf32> -> vector<17x16xf32>
    %c0_241 = arith.constant 0 : index
    %c0_242 = arith.constant 0 : index
    %c0_243 = arith.constant 0 : index
    %c0_244 = arith.constant 0 : index
    %311 = vector.load %arg9[%c0_241, %c0_242, %c0_243, %c0_244] : memref<1x4x1x16xf32, #tpu.memory_space<vmem>>, vector<1x1x1x16xf32>
    %312 = vector.shape_cast %311 : vector<1x1x1x16xf32> to vector<1x16xf32>
    %313 = vector.broadcast %312 : vector<1x16xf32> to vector<17x16xf32>
    %314 = arith.addf %310, %313 : vector<17x16xf32>
    %c11_i32_245 = arith.constant 11 : i32
    %315 = arith.cmpi eq, %arg0, %c11_i32_245 : i32
    %316 = arith.extui %315 : i1 to i32
    %c0_i32_246 = arith.constant 0 : i32
    %317 = arith.cmpi ne, %316, %c0_i32_246 : i32
    scf.if %317 {
      %c1_411 = arith.constant 1 : index
      %c0_412 = arith.constant 0 : index
      %c0_413 = arith.constant 0 : index
      %c0_414 = arith.constant 0 : index
      %527 = vector.load %arg21[%c1_411, %c0_412, %c0_413, %c0_414] : memref<2x4x17x16xf32, #tpu.memory_space<vmem>>, vector<1x1x17x16xf32>
      %528 = vector.shape_cast %527 : vector<1x1x17x16xf32> to vector<17x16xf32>
      %529 = vector.shape_cast %307 : vector<17x16xf32> to vector<1x1x17x16xf32>
      tpu.vector_store %arg21[%c1_411, %c0_412, %c0_413, %c0_414], %529 {strides = array<i32>} : memref<2x4x17x16xf32, #tpu.memory_space<vmem>>, vector<1x1x17x16xf32>,
    } else {
    }
    %318 = tpu.transpose %307, [1, 0] : vector<17x16xf32> -> vector<16x17xf32>
    %cst_247 = arith.constant dense<0.000000e+00> : vector<17x17xf32>
    %319 = tpu.matmul %300, %318, %cst_247 {dimension_numbers = #tpu.dot_dimension_numbers<[1], [0], [0], [1], [0, 0, 1, 1], [], []>} : vector<17x16xf32>, vector<16x17xf32>, vector<17x17xf32> -> vector<17x17xf32>
    %cst_248 = arith.constant 2.500000e-01 : f32
    %320 = vector.broadcast %cst_248 : f32 to vector<17x17xf32>
    %321 = arith.mulf %319, %320 : vector<17x17xf32>
    %cst_249 = arith.constant dense<0xFF800000> : vector<17xf32>
    %322 = vector.multi_reduction <maximumf>, %321, %cst_249 [1] : vector<17x17xf32> to vector<17xf32>
    %323 = vector.shape_cast %322 : vector<17xf32> to vector<17x1xf32>
    %324 = vector.broadcast %323 : vector<17x1xf32> to vector<17x17xf32>
    %325 = arith.subf %321, %324 : vector<17x17xf32>
    %326 = math.exp %325 : vector<17x17xf32>
    %cst_250 = arith.constant dense<0.000000e+00> : vector<17xf32>
    %327 = vector.multi_reduction <add>, %326, %cst_250 [1] : vector<17x17xf32> to vector<17xf32>
    %328 = vector.shape_cast %327 : vector<17xf32> to vector<17x1xf32>
    %329 = vector.broadcast %328 : vector<17x1xf32> to vector<17x17xf32>
    %330 = arith.divf %326, %329 : vector<17x17xf32>
    %cst_251 = arith.constant dense<0.000000e+00> : vector<17x16xf32>
    %331 = tpu.matmul %330, %314, %cst_251 {dimension_numbers = #tpu.dot_dimension_numbers<[1], [0], [0], [1], [0, 0, 1, 1], [], []>} : vector<17x17xf32>, vector<17x16xf32>, vector<17x16xf32> -> vector<17x16xf32>
    %c0_252 = arith.constant 0 : index
    %c0_253 = arith.constant 0 : index
    %c0_254 = arith.constant 0 : index
    %c0_255 = arith.constant 0 : index
    %332 = vector.load %arg10[%c0_252, %c0_253, %c0_254, %c0_255] : memref<1x4x16x64xf32, #tpu.memory_space<vmem>>, vector<1x1x16x64xf32>
    %333 = vector.shape_cast %332 : vector<1x1x16x64xf32> to vector<16x64xf32>
    %cst_256 = arith.constant dense<0.000000e+00> : vector<17x64xf32>
    %334 = tpu.matmul %331, %333, %cst_256 {dimension_numbers = #tpu.dot_dimension_numbers<[1], [0], [0], [1], [0, 0, 1, 1], [], []>} : vector<17x16xf32>, vector<16x64xf32>, vector<17x64xf32> -> vector<17x64xf32>
    %335 = arith.addf %293, %334 : vector<17x64xf32>
    %c0_257 = arith.constant 0 : index
    %c1_258 = arith.constant 1 : index
    %c0_259 = arith.constant 0 : index
    %c0_260 = arith.constant 0 : index
    %336 = vector.load %arg4[%c0_257, %c1_258, %c0_259, %c0_260] : memref<1x4x64x16xf32, #tpu.memory_space<vmem>>, vector<1x1x64x16xf32>
    %337 = vector.shape_cast %336 : vector<1x1x64x16xf32> to vector<64x16xf32>
    %cst_261 = arith.constant dense<0.000000e+00> : vector<17x16xf32>
    %338 = tpu.matmul %292, %337, %cst_261 {dimension_numbers = #tpu.dot_dimension_numbers<[1], [0], [0], [1], [0, 0, 1, 1], [], []>} : vector<17x64xf32>, vector<64x16xf32>, vector<17x16xf32> -> vector<17x16xf32>
    %c0_262 = arith.constant 0 : index
    %c1_263 = arith.constant 1 : index
    %c0_264 = arith.constant 0 : index
    %c0_265 = arith.constant 0 : index
    %339 = vector.load %arg5[%c0_262, %c1_263, %c0_264, %c0_265] : memref<1x4x1x16xf32, #tpu.memory_space<vmem>>, vector<1x1x1x16xf32>
    %340 = vector.shape_cast %339 : vector<1x1x1x16xf32> to vector<1x16xf32>
    %341 = vector.broadcast %340 : vector<1x16xf32> to vector<17x16xf32>
    %342 = arith.addf %338, %341 : vector<17x16xf32>
    %c0_266 = arith.constant 0 : index
    %c1_267 = arith.constant 1 : index
    %c0_268 = arith.constant 0 : index
    %c0_269 = arith.constant 0 : index
    %343 = vector.load %arg6[%c0_266, %c1_267, %c0_268, %c0_269] : memref<1x4x64x16xf32, #tpu.memory_space<vmem>>, vector<1x1x64x16xf32>
    %344 = vector.shape_cast %343 : vector<1x1x64x16xf32> to vector<64x16xf32>
    %cst_270 = arith.constant dense<0.000000e+00> : vector<17x16xf32>
    %345 = tpu.matmul %292, %344, %cst_270 {dimension_numbers = #tpu.dot_dimension_numbers<[1], [0], [0], [1], [0, 0, 1, 1], [], []>} : vector<17x64xf32>, vector<64x16xf32>, vector<17x16xf32> -> vector<17x16xf32>
    %c0_271 = arith.constant 0 : index
    %c1_272 = arith.constant 1 : index
    %c0_273 = arith.constant 0 : index
    %c0_274 = arith.constant 0 : index
    %346 = vector.load %arg7[%c0_271, %c1_272, %c0_273, %c0_274] : memref<1x4x1x16xf32, #tpu.memory_space<vmem>>, vector<1x1x1x16xf32>
    %347 = vector.shape_cast %346 : vector<1x1x1x16xf32> to vector<1x16xf32>
    %348 = vector.broadcast %347 : vector<1x16xf32> to vector<17x16xf32>
    %349 = arith.addf %345, %348 : vector<17x16xf32>
    %c0_275 = arith.constant 0 : index
    %c1_276 = arith.constant 1 : index
    %c0_277 = arith.constant 0 : index
    %c0_278 = arith.constant 0 : index
    %350 = vector.load %arg8[%c0_275, %c1_276, %c0_277, %c0_278] : memref<1x4x64x16xf32, #tpu.memory_space<vmem>>, vector<1x1x64x16xf32>
    %351 = vector.shape_cast %350 : vector<1x1x64x16xf32> to vector<64x16xf32>
    %cst_279 = arith.constant dense<0.000000e+00> : vector<17x16xf32>
    %352 = tpu.matmul %292, %351, %cst_279 {dimension_numbers = #tpu.dot_dimension_numbers<[1], [0], [0], [1], [0, 0, 1, 1], [], []>} : vector<17x64xf32>, vector<64x16xf32>, vector<17x16xf32> -> vector<17x16xf32>
    %c0_280 = arith.constant 0 : index
    %c1_281 = arith.constant 1 : index
    %c0_282 = arith.constant 0 : index
    %c0_283 = arith.constant 0 : index
    %353 = vector.load %arg9[%c0_280, %c1_281, %c0_282, %c0_283] : memref<1x4x1x16xf32, #tpu.memory_space<vmem>>, vector<1x1x1x16xf32>
    %354 = vector.shape_cast %353 : vector<1x1x1x16xf32> to vector<1x16xf32>
    %355 = vector.broadcast %354 : vector<1x16xf32> to vector<17x16xf32>
    %356 = arith.addf %352, %355 : vector<17x16xf32>
    %c11_i32_284 = arith.constant 11 : i32
    %357 = arith.cmpi eq, %arg0, %c11_i32_284 : i32
    %358 = arith.extui %357 : i1 to i32
    %c0_i32_285 = arith.constant 0 : i32
    %359 = arith.cmpi ne, %358, %c0_i32_285 : i32
    scf.if %359 {
      %c1_411 = arith.constant 1 : index
      %c1_412 = arith.constant 1 : index
      %c0_413 = arith.constant 0 : index
      %c0_414 = arith.constant 0 : index
      %527 = vector.load %arg21[%c1_411, %c1_412, %c0_413, %c0_414] : memref<2x4x17x16xf32, #tpu.memory_space<vmem>>, vector<1x1x17x16xf32>
      %528 = vector.shape_cast %527 : vector<1x1x17x16xf32> to vector<17x16xf32>
      %529 = vector.shape_cast %349 : vector<17x16xf32> to vector<1x1x17x16xf32>
      tpu.vector_store %arg21[%c1_411, %c1_412, %c0_413, %c0_414], %529 {strides = array<i32>} : memref<2x4x17x16xf32, #tpu.memory_space<vmem>>, vector<1x1x17x16xf32>,
    } else {
    }
    %360 = tpu.transpose %349, [1, 0] : vector<17x16xf32> -> vector<16x17xf32>
    %cst_286 = arith.constant dense<0.000000e+00> : vector<17x17xf32>
    %361 = tpu.matmul %342, %360, %cst_286 {dimension_numbers = #tpu.dot_dimension_numbers<[1], [0], [0], [1], [0, 0, 1, 1], [], []>} : vector<17x16xf32>, vector<16x17xf32>, vector<17x17xf32> -> vector<17x17xf32>
    %cst_287 = arith.constant 2.500000e-01 : f32
    %362 = vector.broadcast %cst_287 : f32 to vector<17x17xf32>
    %363 = arith.mulf %361, %362 : vector<17x17xf32>
    %cst_288 = arith.constant dense<0xFF800000> : vector<17xf32>
    %364 = vector.multi_reduction <maximumf>, %363, %cst_288 [1] : vector<17x17xf32> to vector<17xf32>
    %365 = vector.shape_cast %364 : vector<17xf32> to vector<17x1xf32>
    %366 = vector.broadcast %365 : vector<17x1xf32> to vector<17x17xf32>
    %367 = arith.subf %363, %366 : vector<17x17xf32>
    %368 = math.exp %367 : vector<17x17xf32>
    %cst_289 = arith.constant dense<0.000000e+00> : vector<17xf32>
    %369 = vector.multi_reduction <add>, %368, %cst_289 [1] : vector<17x17xf32> to vector<17xf32>
    %370 = vector.shape_cast %369 : vector<17xf32> to vector<17x1xf32>
    %371 = vector.broadcast %370 : vector<17x1xf32> to vector<17x17xf32>
    %372 = arith.divf %368, %371 : vector<17x17xf32>
    %cst_290 = arith.constant dense<0.000000e+00> : vector<17x16xf32>
    %373 = tpu.matmul %372, %356, %cst_290 {dimension_numbers = #tpu.dot_dimension_numbers<[1], [0], [0], [1], [0, 0, 1, 1], [], []>} : vector<17x17xf32>, vector<17x16xf32>, vector<17x16xf32> -> vector<17x16xf32>
    %c0_291 = arith.constant 0 : index
    %c1_292 = arith.constant 1 : index
    %c0_293 = arith.constant 0 : index
    %c0_294 = arith.constant 0 : index
    %374 = vector.load %arg10[%c0_291, %c1_292, %c0_293, %c0_294] : memref<1x4x16x64xf32, #tpu.memory_space<vmem>>, vector<1x1x16x64xf32>
    %375 = vector.shape_cast %374 : vector<1x1x16x64xf32> to vector<16x64xf32>
    %cst_295 = arith.constant dense<0.000000e+00> : vector<17x64xf32>
    %376 = tpu.matmul %373, %375, %cst_295 {dimension_numbers = #tpu.dot_dimension_numbers<[1], [0], [0], [1], [0, 0, 1, 1], [], []>} : vector<17x16xf32>, vector<16x64xf32>, vector<17x64xf32> -> vector<17x64xf32>
    %377 = arith.addf %335, %376 : vector<17x64xf32>
    %c0_296 = arith.constant 0 : index
    %c2_297 = arith.constant 2 : index
    %c0_298 = arith.constant 0 : index
    %c0_299 = arith.constant 0 : index
    %378 = vector.load %arg4[%c0_296, %c2_297, %c0_298, %c0_299] : memref<1x4x64x16xf32, #tpu.memory_space<vmem>>, vector<1x1x64x16xf32>
    %379 = vector.shape_cast %378 : vector<1x1x64x16xf32> to vector<64x16xf32>
    %cst_300 = arith.constant dense<0.000000e+00> : vector<17x16xf32>
    %380 = tpu.matmul %292, %379, %cst_300 {dimension_numbers = #tpu.dot_dimension_numbers<[1], [0], [0], [1], [0, 0, 1, 1], [], []>} : vector<17x64xf32>, vector<64x16xf32>, vector<17x16xf32> -> vector<17x16xf32>
    %c0_301 = arith.constant 0 : index
    %c2_302 = arith.constant 2 : index
    %c0_303 = arith.constant 0 : index
    %c0_304 = arith.constant 0 : index
    %381 = vector.load %arg5[%c0_301, %c2_302, %c0_303, %c0_304] : memref<1x4x1x16xf32, #tpu.memory_space<vmem>>, vector<1x1x1x16xf32>
    %382 = vector.shape_cast %381 : vector<1x1x1x16xf32> to vector<1x16xf32>
    %383 = vector.broadcast %382 : vector<1x16xf32> to vector<17x16xf32>
    %384 = arith.addf %380, %383 : vector<17x16xf32>
    %c0_305 = arith.constant 0 : index
    %c2_306 = arith.constant 2 : index
    %c0_307 = arith.constant 0 : index
    %c0_308 = arith.constant 0 : index
    %385 = vector.load %arg6[%c0_305, %c2_306, %c0_307, %c0_308] : memref<1x4x64x16xf32, #tpu.memory_space<vmem>>, vector<1x1x64x16xf32>
    %386 = vector.shape_cast %385 : vector<1x1x64x16xf32> to vector<64x16xf32>
    %cst_309 = arith.constant dense<0.000000e+00> : vector<17x16xf32>
    %387 = tpu.matmul %292, %386, %cst_309 {dimension_numbers = #tpu.dot_dimension_numbers<[1], [0], [0], [1], [0, 0, 1, 1], [], []>} : vector<17x64xf32>, vector<64x16xf32>, vector<17x16xf32> -> vector<17x16xf32>
    %c0_310 = arith.constant 0 : index
    %c2_311 = arith.constant 2 : index
    %c0_312 = arith.constant 0 : index
    %c0_313 = arith.constant 0 : index
    %388 = vector.load %arg7[%c0_310, %c2_311, %c0_312, %c0_313] : memref<1x4x1x16xf32, #tpu.memory_space<vmem>>, vector<1x1x1x16xf32>
    %389 = vector.shape_cast %388 : vector<1x1x1x16xf32> to vector<1x16xf32>
    %390 = vector.broadcast %389 : vector<1x16xf32> to vector<17x16xf32>
    %391 = arith.addf %387, %390 : vector<17x16xf32>
    %c0_314 = arith.constant 0 : index
    %c2_315 = arith.constant 2 : index
    %c0_316 = arith.constant 0 : index
    %c0_317 = arith.constant 0 : index
    %392 = vector.load %arg8[%c0_314, %c2_315, %c0_316, %c0_317] : memref<1x4x64x16xf32, #tpu.memory_space<vmem>>, vector<1x1x64x16xf32>
    %393 = vector.shape_cast %392 : vector<1x1x64x16xf32> to vector<64x16xf32>
    %cst_318 = arith.constant dense<0.000000e+00> : vector<17x16xf32>
    %394 = tpu.matmul %292, %393, %cst_318 {dimension_numbers = #tpu.dot_dimension_numbers<[1], [0], [0], [1], [0, 0, 1, 1], [], []>} : vector<17x64xf32>, vector<64x16xf32>, vector<17x16xf32> -> vector<17x16xf32>
    %c0_319 = arith.constant 0 : index
    %c2_320 = arith.constant 2 : index
    %c0_321 = arith.constant 0 : index
    %c0_322 = arith.constant 0 : index
    %395 = vector.load %arg9[%c0_319, %c2_320, %c0_321, %c0_322] : memref<1x4x1x16xf32, #tpu.memory_space<vmem>>, vector<1x1x1x16xf32>
    %396 = vector.shape_cast %395 : vector<1x1x1x16xf32> to vector<1x16xf32>
    %397 = vector.broadcast %396 : vector<1x16xf32> to vector<17x16xf32>
    %398 = arith.addf %394, %397 : vector<17x16xf32>
    %c11_i32_323 = arith.constant 11 : i32
    %399 = arith.cmpi eq, %arg0, %c11_i32_323 : i32
    %400 = arith.extui %399 : i1 to i32
    %c0_i32_324 = arith.constant 0 : i32
    %401 = arith.cmpi ne, %400, %c0_i32_324 : i32
    scf.if %401 {
      %c1_411 = arith.constant 1 : index
      %c2_412 = arith.constant 2 : index
      %c0_413 = arith.constant 0 : index
      %c0_414 = arith.constant 0 : index
      %527 = vector.load %arg21[%c1_411, %c2_412, %c0_413, %c0_414] : memref<2x4x17x16xf32, #tpu.memory_space<vmem>>, vector<1x1x17x16xf32>
      %528 = vector.shape_cast %527 : vector<1x1x17x16xf32> to vector<17x16xf32>
      %529 = vector.shape_cast %391 : vector<17x16xf32> to vector<1x1x17x16xf32>
      tpu.vector_store %arg21[%c1_411, %c2_412, %c0_413, %c0_414], %529 {strides = array<i32>} : memref<2x4x17x16xf32, #tpu.memory_space<vmem>>, vector<1x1x17x16xf32>,
    } else {
    }
    %402 = tpu.transpose %391, [1, 0] : vector<17x16xf32> -> vector<16x17xf32>
    %cst_325 = arith.constant dense<0.000000e+00> : vector<17x17xf32>
    %403 = tpu.matmul %384, %402, %cst_325 {dimension_numbers = #tpu.dot_dimension_numbers<[1], [0], [0], [1], [0, 0, 1, 1], [], []>} : vector<17x16xf32>, vector<16x17xf32>, vector<17x17xf32> -> vector<17x17xf32>
    %cst_326 = arith.constant 2.500000e-01 : f32
    %404 = vector.broadcast %cst_326 : f32 to vector<17x17xf32>
    %405 = arith.mulf %403, %404 : vector<17x17xf32>
    %cst_327 = arith.constant dense<0xFF800000> : vector<17xf32>
    %406 = vector.multi_reduction <maximumf>, %405, %cst_327 [1] : vector<17x17xf32> to vector<17xf32>
    %407 = vector.shape_cast %406 : vector<17xf32> to vector<17x1xf32>
    %408 = vector.broadcast %407 : vector<17x1xf32> to vector<17x17xf32>
    %409 = arith.subf %405, %408 : vector<17x17xf32>
    %410 = math.exp %409 : vector<17x17xf32>
    %cst_328 = arith.constant dense<0.000000e+00> : vector<17xf32>
    %411 = vector.multi_reduction <add>, %410, %cst_328 [1] : vector<17x17xf32> to vector<17xf32>
    %412 = vector.shape_cast %411 : vector<17xf32> to vector<17x1xf32>
    %413 = vector.broadcast %412 : vector<17x1xf32> to vector<17x17xf32>
    %414 = arith.divf %410, %413 : vector<17x17xf32>
    %cst_329 = arith.constant dense<0.000000e+00> : vector<17x16xf32>
    %415 = tpu.matmul %414, %398, %cst_329 {dimension_numbers = #tpu.dot_dimension_numbers<[1], [0], [0], [1], [0, 0, 1, 1], [], []>} : vector<17x17xf32>, vector<17x16xf32>, vector<17x16xf32> -> vector<17x16xf32>
    %c0_330 = arith.constant 0 : index
    %c2_331 = arith.constant 2 : index
    %c0_332 = arith.constant 0 : index
    %c0_333 = arith.constant 0 : index
    %416 = vector.load %arg10[%c0_330, %c2_331, %c0_332, %c0_333] : memref<1x4x16x64xf32, #tpu.memory_space<vmem>>, vector<1x1x16x64xf32>
    %417 = vector.shape_cast %416 : vector<1x1x16x64xf32> to vector<16x64xf32>
    %cst_334 = arith.constant dense<0.000000e+00> : vector<17x64xf32>
    %418 = tpu.matmul %415, %417, %cst_334 {dimension_numbers = #tpu.dot_dimension_numbers<[1], [0], [0], [1], [0, 0, 1, 1], [], []>} : vector<17x16xf32>, vector<16x64xf32>, vector<17x64xf32> -> vector<17x64xf32>
    %419 = arith.addf %377, %418 : vector<17x64xf32>
    %c0_335 = arith.constant 0 : index
    %c3_336 = arith.constant 3 : index
    %c0_337 = arith.constant 0 : index
    %c0_338 = arith.constant 0 : index
    %420 = vector.load %arg4[%c0_335, %c3_336, %c0_337, %c0_338] : memref<1x4x64x16xf32, #tpu.memory_space<vmem>>, vector<1x1x64x16xf32>
    %421 = vector.shape_cast %420 : vector<1x1x64x16xf32> to vector<64x16xf32>
    %cst_339 = arith.constant dense<0.000000e+00> : vector<17x16xf32>
    %422 = tpu.matmul %292, %421, %cst_339 {dimension_numbers = #tpu.dot_dimension_numbers<[1], [0], [0], [1], [0, 0, 1, 1], [], []>} : vector<17x64xf32>, vector<64x16xf32>, vector<17x16xf32> -> vector<17x16xf32>
    %c0_340 = arith.constant 0 : index
    %c3_341 = arith.constant 3 : index
    %c0_342 = arith.constant 0 : index
    %c0_343 = arith.constant 0 : index
    %423 = vector.load %arg5[%c0_340, %c3_341, %c0_342, %c0_343] : memref<1x4x1x16xf32, #tpu.memory_space<vmem>>, vector<1x1x1x16xf32>
    %424 = vector.shape_cast %423 : vector<1x1x1x16xf32> to vector<1x16xf32>
    %425 = vector.broadcast %424 : vector<1x16xf32> to vector<17x16xf32>
    %426 = arith.addf %422, %425 : vector<17x16xf32>
    %c0_344 = arith.constant 0 : index
    %c3_345 = arith.constant 3 : index
    %c0_346 = arith.constant 0 : index
    %c0_347 = arith.constant 0 : index
    %427 = vector.load %arg6[%c0_344, %c3_345, %c0_346, %c0_347] : memref<1x4x64x16xf32, #tpu.memory_space<vmem>>, vector<1x1x64x16xf32>
    %428 = vector.shape_cast %427 : vector<1x1x64x16xf32> to vector<64x16xf32>
    %cst_348 = arith.constant dense<0.000000e+00> : vector<17x16xf32>
    %429 = tpu.matmul %292, %428, %cst_348 {dimension_numbers = #tpu.dot_dimension_numbers<[1], [0], [0], [1], [0, 0, 1, 1], [], []>} : vector<17x64xf32>, vector<64x16xf32>, vector<17x16xf32> -> vector<17x16xf32>
    %c0_349 = arith.constant 0 : index
    %c3_350 = arith.constant 3 : index
    %c0_351 = arith.constant 0 : index
    %c0_352 = arith.constant 0 : index
    %430 = vector.load %arg7[%c0_349, %c3_350, %c0_351, %c0_352] : memref<1x4x1x16xf32, #tpu.memory_space<vmem>>, vector<1x1x1x16xf32>
    %431 = vector.shape_cast %430 : vector<1x1x1x16xf32> to vector<1x16xf32>
    %432 = vector.broadcast %431 : vector<1x16xf32> to vector<17x16xf32>
    %433 = arith.addf %429, %432 : vector<17x16xf32>
    %c0_353 = arith.constant 0 : index
    %c3_354 = arith.constant 3 : index
    %c0_355 = arith.constant 0 : index
    %c0_356 = arith.constant 0 : index
    %434 = vector.load %arg8[%c0_353, %c3_354, %c0_355, %c0_356] : memref<1x4x64x16xf32, #tpu.memory_space<vmem>>, vector<1x1x64x16xf32>
    %435 = vector.shape_cast %434 : vector<1x1x64x16xf32> to vector<64x16xf32>
    %cst_357 = arith.constant dense<0.000000e+00> : vector<17x16xf32>
    %436 = tpu.matmul %292, %435, %cst_357 {dimension_numbers = #tpu.dot_dimension_numbers<[1], [0], [0], [1], [0, 0, 1, 1], [], []>} : vector<17x64xf32>, vector<64x16xf32>, vector<17x16xf32> -> vector<17x16xf32>
    %c0_358 = arith.constant 0 : index
    %c3_359 = arith.constant 3 : index
    %c0_360 = arith.constant 0 : index
    %c0_361 = arith.constant 0 : index
    %437 = vector.load %arg9[%c0_358, %c3_359, %c0_360, %c0_361] : memref<1x4x1x16xf32, #tpu.memory_space<vmem>>, vector<1x1x1x16xf32>
    %438 = vector.shape_cast %437 : vector<1x1x1x16xf32> to vector<1x16xf32>
    %439 = vector.broadcast %438 : vector<1x16xf32> to vector<17x16xf32>
    %440 = arith.addf %436, %439 : vector<17x16xf32>
    %c11_i32_362 = arith.constant 11 : i32
    %441 = arith.cmpi eq, %arg0, %c11_i32_362 : i32
    %442 = arith.extui %441 : i1 to i32
    %c0_i32_363 = arith.constant 0 : i32
    %443 = arith.cmpi ne, %442, %c0_i32_363 : i32
    scf.if %443 {
      %c1_411 = arith.constant 1 : index
      %c3_412 = arith.constant 3 : index
      %c0_413 = arith.constant 0 : index
      %c0_414 = arith.constant 0 : index
      %527 = vector.load %arg21[%c1_411, %c3_412, %c0_413, %c0_414] : memref<2x4x17x16xf32, #tpu.memory_space<vmem>>, vector<1x1x17x16xf32>
      %528 = vector.shape_cast %527 : vector<1x1x17x16xf32> to vector<17x16xf32>
      %529 = vector.shape_cast %433 : vector<17x16xf32> to vector<1x1x17x16xf32>
      tpu.vector_store %arg21[%c1_411, %c3_412, %c0_413, %c0_414], %529 {strides = array<i32>} : memref<2x4x17x16xf32, #tpu.memory_space<vmem>>, vector<1x1x17x16xf32>,
    } else {
    }
    %444 = tpu.transpose %433, [1, 0] : vector<17x16xf32> -> vector<16x17xf32>
    %cst_364 = arith.constant dense<0.000000e+00> : vector<17x17xf32>
    %445 = tpu.matmul %426, %444, %cst_364 {dimension_numbers = #tpu.dot_dimension_numbers<[1], [0], [0], [1], [0, 0, 1, 1], [], []>} : vector<17x16xf32>, vector<16x17xf32>, vector<17x17xf32> -> vector<17x17xf32>
    %cst_365 = arith.constant 2.500000e-01 : f32
    %446 = vector.broadcast %cst_365 : f32 to vector<17x17xf32>
    %447 = arith.mulf %445, %446 : vector<17x17xf32>
    %cst_366 = arith.constant dense<0xFF800000> : vector<17xf32>
    %448 = vector.multi_reduction <maximumf>, %447, %cst_366 [1] : vector<17x17xf32> to vector<17xf32>
    %449 = vector.shape_cast %448 : vector<17xf32> to vector<17x1xf32>
    %450 = vector.broadcast %449 : vector<17x1xf32> to vector<17x17xf32>
    %451 = arith.subf %447, %450 : vector<17x17xf32>
    %452 = math.exp %451 : vector<17x17xf32>
    %cst_367 = arith.constant dense<0.000000e+00> : vector<17xf32>
    %453 = vector.multi_reduction <add>, %452, %cst_367 [1] : vector<17x17xf32> to vector<17xf32>
    %454 = vector.shape_cast %453 : vector<17xf32> to vector<17x1xf32>
    %455 = vector.broadcast %454 : vector<17x1xf32> to vector<17x17xf32>
    %456 = arith.divf %452, %455 : vector<17x17xf32>
    %cst_368 = arith.constant dense<0.000000e+00> : vector<17x16xf32>
    %457 = tpu.matmul %456, %440, %cst_368 {dimension_numbers = #tpu.dot_dimension_numbers<[1], [0], [0], [1], [0, 0, 1, 1], [], []>} : vector<17x17xf32>, vector<17x16xf32>, vector<17x16xf32> -> vector<17x16xf32>
    %c0_369 = arith.constant 0 : index
    %c3_370 = arith.constant 3 : index
    %c0_371 = arith.constant 0 : index
    %c0_372 = arith.constant 0 : index
    %458 = vector.load %arg10[%c0_369, %c3_370, %c0_371, %c0_372] : memref<1x4x16x64xf32, #tpu.memory_space<vmem>>, vector<1x1x16x64xf32>
    %459 = vector.shape_cast %458 : vector<1x1x16x64xf32> to vector<16x64xf32>
    %cst_373 = arith.constant dense<0.000000e+00> : vector<17x64xf32>
    %460 = tpu.matmul %457, %459, %cst_373 {dimension_numbers = #tpu.dot_dimension_numbers<[1], [0], [0], [1], [0, 0, 1, 1], [], []>} : vector<17x16xf32>, vector<16x64xf32>, vector<17x64xf32> -> vector<17x64xf32>
    %461 = arith.addf %419, %460 : vector<17x64xf32>
    %462 = arith.addf %266, %461 : vector<17x64xf32>
    %c0_374 = arith.constant 0 : index
    %c0_375 = arith.constant 0 : index
    %c0_376 = arith.constant 0 : index
    %463 = vector.load %arg11[%c0_374, %c0_375, %c0_376] : memref<1x1x64xf32, #tpu.memory_space<vmem>>, vector<1x1x64xf32>
    %464 = vector.shape_cast %463 : vector<1x1x64xf32> to vector<1x64xf32>
    %465 = vector.broadcast %464 : vector<1x64xf32> to vector<17x64xf32>
    %466 = arith.addf %462, %465 : vector<17x64xf32>
    %c0_377 = arith.constant 0 : index
    %c0_378 = arith.constant 0 : index
    %c0_379 = arith.constant 0 : index
    %467 = vector.load %arg12[%c0_377, %c0_378, %c0_379] : memref<1x1x64xf32, #tpu.memory_space<vmem>>, vector<1x1x64xf32>
    %468 = vector.shape_cast %467 : vector<1x1x64xf32> to vector<1x64xf32>
    %c0_380 = arith.constant 0 : index
    %c0_381 = arith.constant 0 : index
    %c0_382 = arith.constant 0 : index
    %469 = vector.load %arg13[%c0_380, %c0_381, %c0_382] : memref<1x1x64xf32, #tpu.memory_space<vmem>>, vector<1x1x64xf32>
    %470 = vector.shape_cast %469 : vector<1x1x64xf32> to vector<1x64xf32>
    %cst_383 = arith.constant dense<0.000000e+00> : vector<17xf32>
    %471 = vector.multi_reduction <add>, %466, %cst_383 [1] : vector<17x64xf32> to vector<17xf32>
    %472 = vector.shape_cast %471 : vector<17xf32> to vector<17x1xf32>
    %cst_384 = arith.constant 6.400000e+01 : f32
    %473 = vector.broadcast %cst_384 : f32 to vector<17x1xf32>
    %474 = arith.divf %472, %473 : vector<17x1xf32>
    %475 = vector.broadcast %474 : vector<17x1xf32> to vector<17x64xf32>
    %476 = arith.subf %466, %475 : vector<17x64xf32>
    %477 = arith.mulf %476, %476 : vector<17x64xf32>
    %cst_385 = arith.constant dense<0.000000e+00> : vector<17xf32>
    %478 = vector.multi_reduction <add>, %477, %cst_385 [1] : vector<17x64xf32> to vector<17xf32>
    %479 = vector.shape_cast %478 : vector<17xf32> to vector<17x1xf32>
    %cst_386 = arith.constant 6.400000e+01 : f32
    %480 = vector.broadcast %cst_386 : f32 to vector<17x1xf32>
    %481 = arith.divf %479, %480 : vector<17x1xf32>
    %482 = vector.broadcast %474 : vector<17x1xf32> to vector<17x64xf32>
    %483 = arith.subf %466, %482 : vector<17x64xf32>
    %cst_387 = arith.constant 9.99999997E-7 : f32
    %484 = vector.broadcast %cst_387 : f32 to vector<17x1xf32>
    %485 = arith.addf %481, %484 : vector<17x1xf32>
    %486 = math.rsqrt %485 : vector<17x1xf32>
    %487 = vector.broadcast %486 : vector<17x1xf32> to vector<17x64xf32>
    %488 = arith.mulf %483, %487 : vector<17x64xf32>
    %489 = vector.broadcast %468 : vector<1x64xf32> to vector<17x64xf32>
    %490 = arith.mulf %488, %489 : vector<17x64xf32>
    %491 = vector.broadcast %470 : vector<1x64xf32> to vector<17x64xf32>
    %492 = arith.addf %490, %491 : vector<17x64xf32>
    %c0_388 = arith.constant 0 : index
    %c0_389 = arith.constant 0 : index
    %c0_390 = arith.constant 0 : index
    %493 = vector.load %arg14[%c0_388, %c0_389, %c0_390] : memref<1x64x256xf32, #tpu.memory_space<vmem>>, vector<1x64x256xf32>
    %494 = vector.shape_cast %493 : vector<1x64x256xf32> to vector<64x256xf32>
    %cst_391 = arith.constant dense<0.000000e+00> : vector<17x256xf32>
    %495 = tpu.matmul %492, %494, %cst_391 {dimension_numbers = #tpu.dot_dimension_numbers<[1], [0], [0], [1], [0, 0, 1, 1], [], []>} : vector<17x64xf32>, vector<64x256xf32>, vector<17x256xf32> -> vector<17x256xf32>
    %c0_392 = arith.constant 0 : index
    %c0_393 = arith.constant 0 : index
    %c0_394 = arith.constant 0 : index
    %496 = vector.load %arg15[%c0_392, %c0_393, %c0_394] : memref<1x1x256xf32, #tpu.memory_space<vmem>>, vector<1x1x256xf32>
    %497 = vector.shape_cast %496 : vector<1x1x256xf32> to vector<1x256xf32>
    %498 = vector.broadcast %497 : vector<1x256xf32> to vector<17x256xf32>
    %499 = arith.addf %495, %498 : vector<17x256xf32>
    %500 = arith.mulf %499, %499 : vector<17x256xf32>
    %501 = arith.mulf %499, %500 : vector<17x256xf32>
    %cst_395 = arith.constant 4.471500e-02 : f32
    %502 = vector.broadcast %cst_395 : f32 to vector<17x256xf32>
    %503 = arith.mulf %502, %501 : vector<17x256xf32>
    %504 = arith.addf %499, %503 : vector<17x256xf32>
    %cst_396 = arith.constant 0.797884583 : f32
    %505 = vector.broadcast %cst_396 : f32 to vector<17x256xf32>
    %506 = arith.mulf %505, %504 : vector<17x256xf32>
    %507 = math.tanh %506 : vector<17x256xf32>
    %cst_397 = arith.constant 1.000000e+00 : f32
    %508 = vector.broadcast %cst_397 : f32 to vector<17x256xf32>
    %509 = arith.addf %508, %507 : vector<17x256xf32>
    %cst_398 = arith.constant 5.000000e-01 : f32
    %510 = vector.broadcast %cst_398 : f32 to vector<17x256xf32>
    %511 = arith.mulf %510, %509 : vector<17x256xf32>
    %512 = arith.mulf %499, %511 : vector<17x256xf32>
    %c0_399 = arith.constant 0 : index
    %c0_400 = arith.constant 0 : index
    %c0_401 = arith.constant 0 : index
    %513 = vector.load %arg16[%c0_399, %c0_400, %c0_401] : memref<1x256x64xf32, #tpu.memory_space<vmem>>, vector<1x256x64xf32>
    %514 = vector.shape_cast %513 : vector<1x256x64xf32> to vector<256x64xf32>
    %cst_402 = arith.constant dense<0.000000e+00> : vector<17x64xf32>
    %515 = tpu.matmul %512, %514, %cst_402 {dimension_numbers = #tpu.dot_dimension_numbers<[1], [0], [0], [1], [0, 0, 1, 1], [], []>} : vector<17x256xf32>, vector<256x64xf32>, vector<17x64xf32> -> vector<17x64xf32>
    %c0_403 = arith.constant 0 : index
    %c0_404 = arith.constant 0 : index
    %c0_405 = arith.constant 0 : index
    %516 = vector.load %arg17[%c0_403, %c0_404, %c0_405] : memref<1x1x64xf32, #tpu.memory_space<vmem>>, vector<1x1x64xf32>
    %517 = vector.shape_cast %516 : vector<1x1x64xf32> to vector<1x64xf32>
    %518 = vector.broadcast %517 : vector<1x64xf32> to vector<17x64xf32>
    %519 = arith.addf %515, %518 : vector<17x64xf32>
    %520 = arith.addf %466, %519 : vector<17x64xf32>
    %c1_406 = arith.constant 1 : index
    %c0_407 = arith.constant 0 : index
    %c0_408 = arith.constant 0 : index
    %521 = vector.load %arg22[%c1_406, %c0_407, %c0_408] : memref<2x17x64xf32, #tpu.memory_space<vmem>>, vector<1x17x64xf32>
    %522 = vector.shape_cast %521 : vector<1x17x64xf32> to vector<17x64xf32>
    %523 = vector.shape_cast %520 : vector<17x64xf32> to vector<1x17x64xf32>
    tpu.vector_store %arg22[%c1_406, %c0_407, %c0_408], %523 {strides = array<i32>} : memref<2x17x64xf32, #tpu.memory_space<vmem>>, vector<1x17x64xf32>,
    %c11_i32_409 = arith.constant 11 : i32
    %524 = arith.cmpi eq, %arg0, %c11_i32_409 : i32
    %525 = arith.extui %524 : i1 to i32
    %c0_i32_410 = arith.constant 0 : i32
    %526 = arith.cmpi ne, %525, %c0_i32_410 : i32
    scf.if %526 {
      %c0_411 = arith.constant 0 : index
      %c0_412 = arith.constant 0 : index
      %527 = vector.load %arg18[%c0_411, %c0_412] : memref<1x64xf32, #tpu.memory_space<vmem>>, vector<1x64xf32>
      %c0_413 = arith.constant 0 : index
      %c0_414 = arith.constant 0 : index
      %528 = vector.load %arg19[%c0_413, %c0_414] : memref<1x64xf32, #tpu.memory_space<vmem>>, vector<1x64xf32>
      %cst_415 = arith.constant dense<0.000000e+00> : vector<17xf32>
      %529 = vector.multi_reduction <add>, %520, %cst_415 [1] : vector<17x64xf32> to vector<17xf32>
      %530 = vector.shape_cast %529 : vector<17xf32> to vector<17x1xf32>
      %cst_416 = arith.constant 6.400000e+01 : f32
      %531 = vector.broadcast %cst_416 : f32 to vector<17x1xf32>
      %532 = arith.divf %530, %531 : vector<17x1xf32>
      %533 = vector.broadcast %532 : vector<17x1xf32> to vector<17x64xf32>
      %534 = arith.subf %520, %533 : vector<17x64xf32>
      %535 = arith.mulf %534, %534 : vector<17x64xf32>
      %cst_417 = arith.constant dense<0.000000e+00> : vector<17xf32>
      %536 = vector.multi_reduction <add>, %535, %cst_417 [1] : vector<17x64xf32> to vector<17xf32>
      %537 = vector.shape_cast %536 : vector<17xf32> to vector<17x1xf32>
      %cst_418 = arith.constant 6.400000e+01 : f32
      %538 = vector.broadcast %cst_418 : f32 to vector<17x1xf32>
      %539 = arith.divf %537, %538 : vector<17x1xf32>
      %540 = vector.broadcast %532 : vector<17x1xf32> to vector<17x64xf32>
      %541 = arith.subf %520, %540 : vector<17x64xf32>
      %cst_419 = arith.constant 9.99999997E-7 : f32
      %542 = vector.broadcast %cst_419 : f32 to vector<17x1xf32>
      %543 = arith.addf %539, %542 : vector<17x1xf32>
      %544 = math.rsqrt %543 : vector<17x1xf32>
      %545 = vector.broadcast %544 : vector<17x1xf32> to vector<17x64xf32>
      %546 = arith.mulf %541, %545 : vector<17x64xf32>
      %547 = vector.broadcast %527 : vector<1x64xf32> to vector<17x64xf32>
      %548 = arith.mulf %546, %547 : vector<17x64xf32>
      %549 = vector.broadcast %528 : vector<1x64xf32> to vector<17x64xf32>
      %550 = arith.addf %548, %549 : vector<17x64xf32>
      %c1_420 = arith.constant 1 : index
      %c0_421 = arith.constant 0 : index
      %c0_422 = arith.constant 0 : index
      %551 = vector.load %arg20[%c1_420, %c0_421, %c0_422] : memref<2x17x64xf32, #tpu.memory_space<vmem>>, vector<1x17x64xf32>
      %552 = vector.shape_cast %551 : vector<1x17x64xf32> to vector<17x64xf32>
      %553 = vector.shape_cast %550 : vector<17x64xf32> to vector<1x17x64xf32>
      tpu.vector_store %arg20[%c1_420, %c0_421, %c0_422], %553 {strides = array<i32>} : memref<2x17x64xf32, #tpu.memory_space<vmem>>, vector<1x17x64xf32>,
    } else {
    }
    return
  }
  func.func @transform_0(%arg0: i32) -> (i32, i32, i32) {
    %c0_i32 = arith.constant 0 : i32
    %c0_i32_0 = arith.constant 0 : i32
    %c0_i32_1 = arith.constant 0 : i32
    %c0_i32_2 = arith.constant 0 : i32
    return %c0_i32, %c0_i32_0, %c0_i32_1 : i32, i32, i32
  }
  func.func @transform_1(%arg0: i32) -> (i32, i32, i32) {
    %c0_i32 = arith.constant 0 : i32
    %c0_i32_0 = arith.constant 0 : i32
    %c0_i32_1 = arith.constant 0 : i32
    return %arg0, %c0_i32, %c0_i32_0 : i32, i32, i32
  }
  func.func @transform_2(%arg0: i32) -> (i32, i32, i32) {
    %c0_i32 = arith.constant 0 : i32
    %c0_i32_0 = arith.constant 0 : i32
    %c0_i32_1 = arith.constant 0 : i32
    return %arg0, %c0_i32, %c0_i32_0 : i32, i32, i32
  }
  func.func @transform_3(%arg0: i32) -> (i32, i32, i32, i32) {
    %c0_i32 = arith.constant 0 : i32
    %c0_i32_0 = arith.constant 0 : i32
    %c0_i32_1 = arith.constant 0 : i32
    %c0_i32_2 = arith.constant 0 : i32
    return %arg0, %c0_i32, %c0_i32_0, %c0_i32_1 : i32, i32, i32, i32
  }
  func.func @transform_4(%arg0: i32) -> (i32, i32, i32, i32) {
    %c0_i32 = arith.constant 0 : i32
    %c0_i32_0 = arith.constant 0 : i32
    %c0_i32_1 = arith.constant 0 : i32
    %c0_i32_2 = arith.constant 0 : i32
    return %arg0, %c0_i32, %c0_i32_0, %c0_i32_1 : i32, i32, i32, i32
  }
  func.func @transform_5(%arg0: i32) -> (i32, i32, i32, i32) {
    %c0_i32 = arith.constant 0 : i32
    %c0_i32_0 = arith.constant 0 : i32
    %c0_i32_1 = arith.constant 0 : i32
    %c0_i32_2 = arith.constant 0 : i32
    return %arg0, %c0_i32, %c0_i32_0, %c0_i32_1 : i32, i32, i32, i32
  }
  func.func @transform_6(%arg0: i32) -> (i32, i32, i32, i32) {
    %c0_i32 = arith.constant 0 : i32
    %c0_i32_0 = arith.constant 0 : i32
    %c0_i32_1 = arith.constant 0 : i32
    %c0_i32_2 = arith.constant 0 : i32
    return %arg0, %c0_i32, %c0_i32_0, %c0_i32_1 : i32, i32, i32, i32
  }
  func.func @transform_7(%arg0: i32) -> (i32, i32, i32, i32) {
    %c0_i32 = arith.constant 0 : i32
    %c0_i32_0 = arith.constant 0 : i32
    %c0_i32_1 = arith.constant 0 : i32
    %c0_i32_2 = arith.constant 0 : i32
    return %arg0, %c0_i32, %c0_i32_0, %c0_i32_1 : i32, i32, i32, i32
  }
  func.func @transform_8(%arg0: i32) -> (i32, i32, i32, i32) {
    %c0_i32 = arith.constant 0 : i32
    %c0_i32_0 = arith.constant 0 : i32
    %c0_i32_1 = arith.constant 0 : i32
    %c0_i32_2 = arith.constant 0 : i32
    return %arg0, %c0_i32, %c0_i32_0, %c0_i32_1 : i32, i32, i32, i32
  }
  func.func @transform_9(%arg0: i32) -> (i32, i32, i32, i32) {
    %c0_i32 = arith.constant 0 : i32
    %c0_i32_0 = arith.constant 0 : i32
    %c0_i32_1 = arith.constant 0 : i32
    %c0_i32_2 = arith.constant 0 : i32
    return %arg0, %c0_i32, %c0_i32_0, %c0_i32_1 : i32, i32, i32, i32
  }
  func.func @transform_10(%arg0: i32) -> (i32, i32, i32) {
    %c0_i32 = arith.constant 0 : i32
    %c0_i32_0 = arith.constant 0 : i32
    %c0_i32_1 = arith.constant 0 : i32
    return %arg0, %c0_i32, %c0_i32_0 : i32, i32, i32
  }
  func.func @transform_11(%arg0: i32) -> (i32, i32, i32) {
    %c0_i32 = arith.constant 0 : i32
    %c0_i32_0 = arith.constant 0 : i32
    %c0_i32_1 = arith.constant 0 : i32
    return %arg0, %c0_i32, %c0_i32_0 : i32, i32, i32
  }
  func.func @transform_12(%arg0: i32) -> (i32, i32, i32) {
    %c0_i32 = arith.constant 0 : i32
    %c0_i32_0 = arith.constant 0 : i32
    %c0_i32_1 = arith.constant 0 : i32
    return %arg0, %c0_i32, %c0_i32_0 : i32, i32, i32
  }
  func.func @transform_13(%arg0: i32) -> (i32, i32, i32) {
    %c0_i32 = arith.constant 0 : i32
    %c0_i32_0 = arith.constant 0 : i32
    %c0_i32_1 = arith.constant 0 : i32
    return %arg0, %c0_i32, %c0_i32_0 : i32, i32, i32
  }
  func.func @transform_14(%arg0: i32) -> (i32, i32, i32) {
    %c0_i32 = arith.constant 0 : i32
    %c0_i32_0 = arith.constant 0 : i32
    %c0_i32_1 = arith.constant 0 : i32
    return %arg0, %c0_i32, %c0_i32_0 : i32, i32, i32
  }
  func.func @transform_15(%arg0: i32) -> (i32, i32, i32) {
    %c0_i32 = arith.constant 0 : i32
    %c0_i32_0 = arith.constant 0 : i32
    %c0_i32_1 = arith.constant 0 : i32
    return %arg0, %c0_i32, %c0_i32_0 : i32, i32, i32
  }
  func.func @transform_16(%arg0: i32) -> (i32, i32, i32) {
    %c0_i32 = arith.constant 0 : i32
    %c0_i32_0 = arith.constant 0 : i32
    %c0_i32_1 = arith.constant 0 : i32
    return %arg0, %c0_i32, %c0_i32_0 : i32, i32, i32
  }
  func.func @transform_17(%arg0: i32) -> (i32, i32) {
    %c0_i32 = arith.constant 0 : i32
    %c0_i32_0 = arith.constant 0 : i32
    %c0_i32_1 = arith.constant 0 : i32
    return %c0_i32, %c0_i32_0 : i32, i32
  }
  func.func @transform_18(%arg0: i32) -> (i32, i32) {
    %c0_i32 = arith.constant 0 : i32
    %c0_i32_0 = arith.constant 0 : i32
    %c0_i32_1 = arith.constant 0 : i32
    return %c0_i32, %c0_i32_0 : i32, i32
  }
  func.func @transform_19(%arg0: i32) -> (i32, i32, i32) {
    %c0_i32 = arith.constant 0 : i32
    %c0_i32_0 = arith.constant 0 : i32
    %c0_i32_1 = arith.constant 0 : i32
    %c0_i32_2 = arith.constant 0 : i32
    return %c0_i32, %c0_i32_0, %c0_i32_1 : i32, i32, i32
  }
  func.func @transform_20(%arg0: i32) -> (i32, i32, i32, i32) {
    %c0_i32 = arith.constant 0 : i32
    %c0_i32_0 = arith.constant 0 : i32
    %c0_i32_1 = arith.constant 0 : i32
    %c0_i32_2 = arith.constant 0 : i32
    %c0_i32_3 = arith.constant 0 : i32
    return %c0_i32, %c0_i32_0, %c0_i32_1, %c0_i32_2 : i32, i32, i32, i32
  }
}

</mosaic_0001>

<bundles_post_ra>
// kernel: run.2
= control target key start
LH: loop header
LB: loop body
LE: loop exit
PB: predicated region body
PF: predicated region fallthrough
CT: control target
= control target key end

     0   :  { %vm18_vm0 = vcmask 523264   ;;  %v258_v0 = vmov 0.0|0.0   ;;  %v259_v4 = vmov 0.0   ;;  %s431_s1 = inlined_call_operand.vmem [shape: f32[192,64], index: 1, kind: input, shape index: {}]   ;;  %s432_s0 = inlined_call_operand.vmem [shape: f32[32,192], index: 0, kind: input, shape index: {}]   ;;  %s433_s2 = inlined_call_operand.vmem [shape: f32[1,64], index: 2, kind: input, shape index: {}]   ;;  %s434_s3 = inlined_call_operand.vmem [shape: f32[32,64], index: 3, kind: output, shape index: {}]  }
   0x1   :  { %196 = vmatprep.subr.bf16.mxu0 %v258_v0  ;;  %232 = vmatprep.subr.bf16.mxu1 %v258_v0  ;;  %v35_v1 = vld [vmem:[%s431_s1] sm:$0xff]  ;;  %v36_v2 = vld [vmem:[%s431_s1 + $0x8] sm:$0xff]  ;;  %v37_v3 = vld [vmem:[%s431_s1 + $0x10] sm:$0xff]  ;;  %19 = vst.msk [vmem:[#allocation2] sm:$0xff] %vm18_vm0, %v259_v4 }
   0x2   :  { %20 = vst.msk [vmem:[#allocation2 + $0x8] sm:$0xff] %vm18_vm0, %v259_v4  ;;  %21 = vst.msk [vmem:[#allocation2 + $0x10] sm:$0xff] %vm18_vm0, %v259_v4  ;;  %v197_v5 = vpack.c.bf16 %v36_v2, %v35_v1  ;;  %v38_v6 = vld [vmem:[%s431_s1 + $0x18] sm:$0xff]  ;;  %v39_v8 = vld [vmem:[%s431_s1 + $0x20] sm:$0xff] }
   0x3   :  { %22 = vst.msk [vmem:[#allocation2 + $0x18] sm:$0xff] %vm18_vm0, %v259_v4  ;;  %v200_v7 = vpack.c.bf16 %v38_v6, %v37_v3  ;;  %v40_v9 = vld [vmem:[%s431_s1 + $0x28] sm:$0xff]  ;;  %v41_v11 = vld [vmem:[%s431_s1 + $0x30] sm:$0xff]  ;;  %v42_v12 = vld [vmem:[%s431_s1 + $0x38] sm:$0xff] }
   0x4   :  { %198 = vmatpush1.bf16.msra.mxu0 %v197_v5  ;;  %244 = vmatpush1.bf16.msra.mxu1 %v197_v5  ;;  %v203_v10 = vpack.c.bf16 %v40_v9, %v39_v8  ;;  %v28_v13 = vld [vmem:[%s432_s0 + $0x8] sm:$0xff]  ;;  %v206_v15 = vpack.c.bf16 %v42_v12, %v41_v11  ;;  %v43_v16 = vld [vmem:[%s431_s1 + $0x40] sm:$0xff]  ;;  %v45_v19 = vld [vmem:[%s431_s1 + $0x50] sm:$0xff] }
   0x5   :  { %199 = vmatprep.subr.bf16.mxu0 %v258_v0  ;;  %233 = vmatprep.subr.bf16.mxu1 %v258_v0  ;;  %v32_v14 = vld [vmem:[%s432_s0 + $0x28] sm:$0xff]  ;;  %v46_v20 = vld [vmem:[%s431_s1 + $0x58] sm:$0xff]  ;;  %v47_v22 = vld [vmem:[%s431_s1 + $0x60] sm:$0xff] }
   0x6   :  { %191 = vmatprep.mubr.msk.f32.mxu0 %vm18_vm0, %v28_v13  ;;  %193 = vmatprep.mubr.msk.f32.mxu1 %vm18_vm0, %v32_v14  ;;  %v44_v17 = vld [vmem:[%s431_s1 + $0x48] sm:$0xff]  ;;  %v212_v21 = vpack.c.bf16 %v46_v20, %v45_v19  ;;  %v49_v25 = vld [vmem:[%s431_s1 + $0x70] sm:$0xff]  ;;  %v50_v26 = vld [vmem:[%s431_s1 + $0x78] sm:$0xff] }
   0x7   :  { %v209_v18 = vpack.c.bf16 %v44_v17, %v43_v16  ;;  %v48_v23 = vld [vmem:[%s431_s1 + $0x68] sm:$0xff]  ;;  %v218_v27 = vpack.c.bf16 %v50_v26, %v49_v25  ;;  %v51_v28 = vld [vmem:[%s431_s1 + $0x80] sm:$0xff]  ;;  %v53_v31 = vld [vmem:[%s431_s1 + $0x90] sm:$0xff] }
   0x8   :  { %201 = vmatpush1.bf16.msra.mxu0 %v200_v7  ;;  %245 = vmatpush1.bf16.msra.mxu1 %v200_v7  ;;  %v215_v24 = vpack.c.bf16 %v48_v23, %v47_v22  ;;  %v52_v29 = vld [vmem:[%s431_s1 + $0x88] sm:$0xff]  ;;  %v54_v32 = vld [vmem:[%s431_s1 + $0x98] sm:$0xff]  ;;  %v55_v34 = vld [vmem:[%s431_s1 + $0xa0] sm:$0xff] }
   0x9   :  { %202 = vmatprep.subr.bf16.mxu0 %v258_v0  ;;  %234 = vmatprep.subr.bf16.mxu1 %v258_v0  ;;  %v221_v30 = vpack.c.bf16 %v52_v29, %v51_v28  ;;  %v224_v33 = vpack.c.bf16 %v54_v32, %v53_v31  ;;  %v56_v35 = vld [vmem:[%s431_s1 + $0xa8] sm:$0xff]  ;;  %v57_v37 = vld [vmem:[%s431_s1 + $0xb0] sm:$0xff]  ;;  %v58_v38 = vld [vmem:[%s431_s1 + $0xb8] sm:$0xff] }
   0xa   :  { %v227_v36 = vpack.c.bf16 %v56_v35, %v55_v34  ;;  %v230_v39 = vpack.c.bf16 %v58_v38, %v57_v37  ;;  %v27_v40 = vld [vmem:[%s432_s0] sm:$0xff]  ;;  %v30_v42 = vld [vmem:[%s432_s0 + $0x18] sm:$0xff]  ;;  %v29_v44 = vld [vmem:[%s432_s0 + $0x10] sm:$0xff] }
   0xb   :  { %v31_v41 = vld [vmem:[%s432_s0 + $0x20] sm:$0xff]  ;;  %v34_v43 = vld [vmem:[%s432_s0 + $0x38] sm:$0xff]  ;;  %v33_v45 = vld [vmem:[%s432_s0 + $0x30] sm:$0xff] }
   0xc   :  { %204 = vmatpush1.bf16.msra.mxu0 %v203_v10  ;;  %246 = vmatpush1.bf16.msra.mxu1 %v203_v10  ;;  %v23_v46 = vld [vmem:[#allocation2] sm:$0xff]  ;;  %v25_v47 = vld [vmem:[#allocation2 + $0x10] sm:$0xff]  ;;  %v24_v54 = vld [vmem:[#allocation2 + $0x8] sm:$0xff] }
   0xd   :  { %205 = vmatprep.subr.bf16.mxu0 %v258_v0  ;;  %235 = vmatprep.subr.bf16.mxu1 %v258_v0  ;;  %v26_v55 = vld [vmem:[#allocation2 + $0x18] sm:$0xff]  ;;  %v195_v62 = vld [vmem:[%s433_s2] ss:$0 sm:$0xff] }
  0x10   :  { %207 = vmatpush1.bf16.msra.mxu0 %v206_v15  ;;  %247 = vmatpush1.bf16.msra.mxu1 %v206_v15 }
  0x11   :  { %208 = vmatprep.subr.bf16.mxu0 %v258_v0  ;;  %236 = vmatprep.subr.bf16.mxu1 %v258_v0 }
  0x14   :  { %210 = vmatpush1.bf16.msra.mxu0 %v209_v18  ;;  %248 = vmatpush1.bf16.msra.mxu1 %v209_v18 }
  0x15   :  { %211 = vmatprep.subr.bf16.mxu0 %v258_v0  ;;  %237 = vmatprep.subr.bf16.mxu1 %v258_v0 }
  0x18   :  { %213 = vmatpush1.bf16.msra.mxu0 %v212_v21  ;;  %249 = vmatpush1.bf16.msra.mxu1 %v212_v21 }
  0x19   :  { %214 = vmatprep.subr.bf16.mxu0 %v258_v0  ;;  %238 = vmatprep.subr.bf16.mxu1 %v258_v0 }
  0x1c   :  { %216 = vmatpush1.bf16.msra.mxu0 %v215_v24  ;;  %250 = vmatpush1.bf16.msra.mxu1 %v215_v24 }
  0x1d   :  { %217 = vmatprep.subr.bf16.mxu0 %v258_v0  ;;  %239 = vmatprep.subr.bf16.mxu1 %v258_v0 }
  0x20   :  { %219 = vmatpush1.bf16.msra.mxu0 %v218_v27  ;;  %251 = vmatpush1.bf16.msra.mxu1 %v218_v27 }
  0x21   :  { %220 = vmatprep.subr.bf16.mxu0 %v258_v0  ;;  %240 = vmatprep.subr.bf16.mxu1 %v258_v0 }
  0x24   :  { %222 = vmatpush1.bf16.msra.mxu0 %v221_v30  ;;  %252 = vmatpush1.bf16.msra.mxu1 %v221_v30 }
  0x25   :  { %223 = vmatprep.subr.bf16.mxu0 %v258_v0  ;;  %241 = vmatprep.subr.bf16.mxu1 %v258_v0 }
  0x28   :  { %225 = vmatpush1.bf16.msra.mxu0 %v224_v33  ;;  %253 = vmatpush1.bf16.msra.mxu1 %v224_v33 }
  0x29   :  { %226 = vmatprep.subr.bf16.mxu0 %v258_v0  ;;  %242 = vmatprep.subr.bf16.mxu1 %v258_v0 }
  0x2c   :  { %228 = vmatpush1.bf16.msra.mxu0 %v227_v36  ;;  %254 = vmatpush1.bf16.msra.mxu1 %v227_v36 }
  0x2d   :  { %229 = vmatprep.subr.bf16.mxu0 %v258_v0  ;;  %243 = vmatprep.subr.bf16.mxu1 %v258_v0 }
  0x30   :  { %231 = vmatpush1.bf16.msra.mxu0 %v230_v39  ;;  %255 = vmatpush1.bf16.msra.mxu1 %v230_v39 }
  0x33   :  { %137 = vmatmul.mubr.f32.vlgmr.msra.gmra.mrb[0].mxu0 %v27_v40  ;;  %147 = vmatmul.mubr.f32.vlgmr.msra.gmra.mrb[0].mxu1 %v31_v41 }
  0x34   :  { %192 = vmatprep.mubr.msk.f32.mxu0 %vm18_vm0, %v30_v42  ;;  %194 = vmatprep.mubr.msk.f32.mxu1 %vm18_vm0, %v34_v43 }
  0x37   :  { %142 = vmatmul.mubr.f32.gmra.mrb[2].mxu0 %v29_v44  ;;  %152 = vmatmul.mubr.f32.gmra.mrb[2].mxu1 %v33_v45 }
 0x106   :  { %v138_v48 = vpop.f32.mrb[0].mxu0  ;;  %v148_v49 = vpop.f32.mrb[0].mxu1 }
 0x107   :  { %v157_v50 = vadd.f32 %v138_v48, %v23_v46  ;;  %v159_v51 = vadd.f32 %v148_v49, %v25_v47  ;;  %v140_v52 = vpop.f32.mrb[1].mxu0  ;;  %v150_v53 = vpop.f32.mrb[1].mxu1 }
 0x109   :  { %161 = vst.msk [vmem:[#allocation2] sm:$0xff] %vm18_vm0, %v157_v50  ;;  %163 = vst.msk [vmem:[#allocation2 + $0x10] sm:$0xff] %vm18_vm0, %v159_v51 }
 0x10a   :  { %v143_v56 = vpop.f32.mrb[2].mxu0  ;;  %v153_v57 = vpop.f32.mrb[2].mxu1 }
 0x10b   :  { %v158_v58 = vadd.f32 %v143_v56, %v24_v54  ;;  %v160_v59 = vadd.f32 %v153_v57, %v26_v55  ;;  %v145_v60 = vpop.f32.mrb[3].mxu0  ;;  %v155_v61 = vpop.f32.mrb[3].mxu1 }
 0x10d   :  { %162 = vst.msk [vmem:[#allocation2 + $0x8] sm:$0xff] %vm18_vm0, %v158_v58  ;;  %164 = vst.msk [vmem:[#allocation2 + $0x18] sm:$0xff] %vm18_vm0, %v160_v59 }
 0x110   :  { %v168_v63 = vld [vmem:[#allocation2] sm:$0xff]  ;;  %v170_v0 = vld [vmem:[#allocation2 + $0x10] sm:$0xff] }
 0x111   :  { %v179_v1 = vadd.f32 %v195_v62, %v168_v63  ;;  %v181_v2 = vadd.f32 %v195_v62, %v170_v0 }
 0x113   :  { %183 = vst.msk [vmem:[%s434_s3] sm:$0xff] %vm18_vm0, %v179_v1  ;;  %185 = vst.msk [vmem:[%s434_s3 + $0x10] sm:$0xff] %vm18_vm0, %v181_v2 }
 0x114   :  { %v169_v3 = vld [vmem:[#allocation2 + $0x8] sm:$0xff]  ;;  %v171_v4 = vld [vmem:[#allocation2 + $0x18] sm:$0xff] }
 0x115   :  { %v180_v5 = vadd.f32 %v195_v62, %v169_v3  ;;  %v182_v6 = vadd.f32 %v195_v62, %v171_v4 }
 0x117   :  { %184 = vst.msk [vmem:[%s434_s3 + $0x8] sm:$0xff] %vm18_vm0, %v180_v5  ;;  %186 = vst.msk [vmem:[%s434_s3 + $0x18] sm:$0xff] %vm18_vm0, %v182_v6 }

// kernel: squeeze.3
= control target key start
LH: loop header
LB: loop body
LE: loop exit
PB: predicated region body
PF: predicated region fallthrough
CT: control target
= control target key end

     0   :  { %s113_s0 = inlined_call_operand.vmem [shape: f32[2,4,16], index: 0, kind: input, shape index: {}]   ;;  %s114_s1 = inlined_call_operand.hbm [shape: f32[2,64], index: 1, kind: output, shape index: {}]  }
   0x1   :  { %v52_v0 = vld [vmem:[%s113_s0 + $0x4] sm:$0xf]  ;;  %v9_v1 = vld [vmem:[%s113_s0] sm:$0xf] }
   0x2   :  { %8 = vst [vmem:[#allocation3 + $0x8] sm:$0xf] %v52_v0  ;;  %10 = vst [vmem:[#allocation3] sm:$0xf] %v9_v1 }
   0x3   :  { %2 = vsyncpa [#allocation1], 0  ;;  %s16_s0 = smov 3  ;;  %s30_s10 = smov 3  ;;  %vm13_vm0 = vcmask 130048   ;;  %vm20_vm1 = vcmask 523648  }
   0x4   :  { %s11_s11 = smov 3  ;;  %s23_s12 = smov 3  ;;  %vm27_vm2 = vcmask 392448   ;;  %vm34_vm3 = vcmask 261248  }
   0x5   :  { %s81_s13 = smov 48   ;;  %s82_s14 = smov 16  }
   0x6   :  { %s83_s15 = smov 32   ;;  %s84_s16 = smov [#allocation0]  }
   0x7   :  { %s46_s17 = sshll.u32 %s84_s16, 4  ;;  %s47_s17 = int_to_ptr.vmem [resolvable:$true] %s46_s17 }
   0x8   :  { %s57_s18 = scalar_lea.vmem %s47_s17, 32  ;;  %p62_p1 = scmp.lt.s32.totalorder %s47_s17, %s47_s17 }
   0x9   :  { %v17_v2 = vld [vmem:[#allocation3 + $0x3] ss:$8 sm:%s16_s0]   ;;  %v31_v3 = vld [vmem:[#allocation3 + $0x1] ss:$8 sm:%s30_s10]   ;;  %v12_v4 = vld [vmem:[#allocation3] ss:$8 sm:%s11_s11]   ;;  %p58_p0 = scmp.ne.s32.totalorder %s47_s17, %s57_s18  ;;  %p63_p2 = scmp.lt.s32.totalorder %s57_s18, %s57_s18 }
   0xa   :  { %18 = vrot.lane.b32.xlu0 %v17_v2, %s81_s13  ;;  %32 = vrot.lane.b32.xlu1 %v31_v3, %s82_s14  ;;  %v24_v5 = vld [vmem:[#allocation3 + $0x2] ss:$8 sm:%s23_s12]   ;;  %14 = vst.msk [vmem:[#allocation2] sm:$0x3] %vm13_vm0, %v12_v4  }
   0xb   :  { %p64_p3 = por %p63_p2, %p62_p1 }
   0xd   :  { %p65_p4 = pnand %p64_p3, %p58_p0 }
   0xe   :  { %25 = vrot.lane.b32.xlu0 %v24_v5, %s83_s15 }
  0x7c   :  { %v19_v6 = vpop.permute.xlu0 %18   ;;  %v33_v7 = vpop.permute.xlu1 %32  }
  0x7d   :  { %21 = vst.msk [vmem:[#allocation2] sm:$0x3] %vm20_vm1, %v19_v6  }
  0x80   :  { %v26_v8 = vpop.permute.xlu0 %25  }
  0x81   :  { %28 = vst.msk [vmem:[#allocation2] sm:$0x3] %vm27_vm2, %v26_v8  }
  0x82   :  { %35 = vst.msk [vmem:[#allocation2] sm:$0x3] %vm34_vm3, %v33_v7  }
  0x89   :  { %v39_v9 = vld [vmem:[#allocation2] sm:$0x3] }
  0x8a   :  { %41 = vst [vmem:[#allocation0] sm:$0x3] %v39_v9 }
  0x8b   :  { %68 = shalt.err (!%p65_p4)
}
  0x8c   :  { %s69_s21 = scalar_lea.hbm %s114_s1, 32 }
  0x8d   :  { %p70_p5 = scmp.ne.s32.totalorder %s114_s1, %s69_s21  ;;  %p73_p6 = scmp.lt.u32.totalorder %s69_s21, %s114_s1 }
  0x8f   :  { %p75_p7 = pnand %p73_p6, %p70_p5 }
  0x91   :  { %78 = shalt.err (!%p75_p7)
}
  0x92   :  { %49 = dma.vmem_to_hbm [thread:$0]  %s47_s17, 32, %s114_s1, [#allocation1]  }
  0x93   :  { %79 = dma.done.wait [#allocation1], 32  }
  0x94   :  { %80 = vsyncadd [#allocation1], 4294967264 }
  0x95   :  { %51 = vsyncpa [#allocation1], 1 }

// kernel: run.3
= control target key start
LH: loop header
LB: loop body
LE: loop exit
PB: predicated region body
PF: predicated region fallthrough
CT: control target
= control target key end

     0   :  { %s11326_s0 = inlined_call_operand.vmem [shape: f32[2,17,64], index: 0, kind: input, shape index: {}]   ;;  %s11327_s1 = inlined_call_operand.vmem [shape: f32[12,1,64], index: 1, kind: input, shape index: {}]   ;;  %s11328_s2 = inlined_call_operand.vmem [shape: f32[12,1,64], index: 2, kind: input, shape index: {}]   ;;  %s11329_s3 = inlined_call_operand.vmem [shape: f32[12,4,64,16], index: 3, kind: input, shape index: {}]   ;;  %s11330_s4 = inlined_call_operand.vmem [shape: f32[12,4,1,16], index: 4, kind: input, shape index: {}]   ;;  %s11331_s5 = inlined_call_operand.vmem [shape: f32[12,4,64,16], index: 5, kind: input, shape index: {}]   ;;  %s11332_s6 = inlined_call_operand.vmem [shape: f32[12,4,1,16], index: 6, kind: input, shape index: {}]   ;;  %s11333_s7 = inlined_call_operand.vmem [shape: f32[12,4,64,16], index: 7, kind: input, shape index: {}]   ;;  %s11334_s8 = inlined_call_operand.vmem [shape: f32[12,4,1,16], index: 8, kind: input, shape index: {}]   ;;  %s11335_s9 = inlined_call_operand.vmem [shape: f32[12,4,16,64], index: 9, kind: input, shape index: {}]   ;;  %s11336_s10 = inlined_call_operand.vmem [shape: f32[12,1,64], index: 10, kind: input, shape index: {}]   ;;  %s11337_s11 = inlined_call_operand.vmem [shape: f32[12,1,64], index: 11, kind: input, shape index: {}]   ;;  %s11338_s12 = inlined_call_operand.vmem [shape: f32[12,1,64], index: 12, kind: input, shape index: {}]   ;;  %s11339_s13 = inlined_call_operand.vmem [shape: f32[12,64,256], index: 13, kind: input, shape index: {}]   ;;  %s11340_s14 = inlined_call_operand.vmem [shape: f32[12,1,256], index: 14, kind: input, shape index: {}]   ;;  %s11341_s15 = inlined_call_operand.vmem [shape: f32[12,256,64], index: 15, kind: input, shape index: {}]   ;;  %s11342_s16 = inlined_call_operand.vmem [shape: f32[12,1,64], index: 16, kind: input, shape index: {}]   ;;  %s11343_s17 = inlined_call_operand.vmem [shape: f32[1,64], index: 17, kind: input, shape index: {}]   ;;  %s11344_s18 = inlined_call_operand.vmem [shape: f32[1,64], index: 18, kind: input, shape index: {}]   ;;  %s11345_s19 = inlined_call_operand.vmem [shape: f32[2,17,64], index: 19, kind: output, shape index: {0}]   ;;  %s11346_s20 = inlined_call_operand.vmem [shape: f32[2,4,17,16], index: 20, kind: output, shape index: {1}]  }
   0x1   :  { %11361 = sst [smem:[#allocation7_spill]] %s11326_s0 }
   0x2   :  { %11362 = sst [smem:[#allocation8_spill]] %s11327_s1  ;;  %s9652_s1 = smov 0  }
   0x3   :  { %11363 = sst [smem:[#allocation9_spill]] %s11328_s2 }
   0x4   :  { %11364 = sst [smem:[#allocation10_spill]] %s11329_s3 }
   0x5   :  { %11365 = sst [smem:[#allocation11_spill]] %s11330_s4 }
   0x6   :  { %11366 = sst [smem:[#allocation12_spill]] %s11331_s5 }
   0x7   :  { %11367 = sst [smem:[#allocation13_spill]] %s11332_s6 }
   0x8   :  { %11368 = sst [smem:[#allocation14_spill]] %s11333_s7 }
   0x9   :  { %11369 = sst [smem:[#allocation15_spill]] %s11334_s8 }
   0xa   :  { %11370 = sst [smem:[#allocation16_spill]] %s11335_s9 }
   0xb   :  { %11371 = sst [smem:[#allocation17_spill]] %s11336_s10 }
   0xc   :  { %11372 = sst [smem:[#allocation18_spill]] %s11337_s11 }
   0xd   :  { %11373 = sst [smem:[#allocation19_spill]] %s11338_s12 }
   0xe   :  { %11374 = sst [smem:[#allocation20_spill]] %s11343_s17 }
   0xf   :  { %11375 = sst [smem:[#allocation21_spill]] %s11344_s18 }
  0x10   :  { %11376 = sst [smem:[#allocation22_spill]] %s11345_s19 }
  0x11   :  { %11377 = sst [smem:[#allocation23_spill]] %s11346_s20 }
  0x12 LB: > { %11378 = sst [smem:[#allocation3_spill]] %s9542_s1  ;;  %s9658_s22 = sadd.s32 4294967295, %s9542_s1   ;;  %s9542_s1 = sphi %s9652_s1, %s31_s1  }
  0x13   : > { %11379 = sst [smem:[#allocation4_spill]] %s9658_s22  ;;  %p7019_p0 = scmp.ge.s32.totalorder %s9542_s1, 1 }
  0x14   : > { %p689_p1 = scmp.lt.s32.totalorder %s9542_s1, 13 }
  0x16   : > { %p690_p2 = pnand %p7019_p0, %p689_p1 }
  0x18   : > { %693 = sbr.rel (%p690_p2) target bundleno = 10875 (0x2a7b), region = 96 }
  0x1f   : > { %p801_p3 = scmp.lt.s32.totalorder %s9658_s22, 11  ;;  %s11380_s25 = sld [smem:[#allocation8_spill]] }
  0x20   : > { %s11382_s28 = sld [smem:[#allocation9_spill]]  ;;  %s11384_s1 = sld [smem:[#allocation10_spill]] }
  0x21   : > { %s802_s23 = scalar_select %p801_p3, %s9658_s22, 11 }
  0x22   : > { %s11385_s20 = sld [smem:[#allocation11_spill]]  ;;  %s11386_s5 = sld [smem:[#allocation12_spill]] }
  0x23   : > { %s7469_s29 = sshll.u32 %s802_s23, 8  ;;  %s7022_s30 = sshll.u32 %s802_s23, 2 }
  0x24   : > { %s11387_s6 = sld [smem:[#allocation13_spill]]  ;;  %s11388_s7 = sld [smem:[#allocation14_spill]] }
  0x25   : > { %s9667_s3 = scalar_lea.vmem %s11380_s25, %s802_s23  ;;  %s11389_s8 = sld [smem:[#allocation15_spill]] }
  0x26   : > { %11381 = sst [smem:[#allocation5_spill]] %s9667_s3  ;;  %s9672_s4 = scalar_lea.vmem %s11382_s28, %s802_s23 }
  0x27   : > { %11383 = sst [smem:[#allocation6_spill]] %s9672_s4  ;;  %s9677_s19 = scalar_lea.vmem %s11384_s1, %s7469_s29 }
  0x28   : > { %s9682_s22 = scalar_lea.vmem %s11385_s20, %s7022_s30  ;;  %s9687_s25 = scalar_lea.vmem %s11386_s5, %s7469_s29 }
  0x29   : > { %s7472_s18 = sshll.u32 %s802_s23, 6  ;;  %s11390_s10 = sld [smem:[#allocation17_spill]] }
  0x2a   : > { %s9692_s28 = scalar_lea.vmem %s11387_s6, %s7022_s30  ;;  %s9697_s1 = scalar_lea.vmem %s11388_s7, %s7469_s29 }
  0x2b   : > { %s9702_s17 = scalar_lea.vmem %s11389_s8, %s7022_s30  ;;  %s11391_s9 = sld [smem:[#allocation16_spill]] }
  0x2c   : > { %s11392_s11 = sld [smem:[#allocation18_spill]]  ;;  %s11393_s12 = sld [smem:[#allocation19_spill]] }
  0x2d   : > { %s7473_s21 = sshll.u32 %s802_s23, 7 }
  0x2e   : > { %s9727_s24 = scalar_lea.vmem %s11339_s13, %s7473_s21 }
  0x2f   : > { %s9707_s2 = scalar_lea.vmem %s11390_s10, %s802_s23  ;;  %s7033_s10 = sshll.u32 %s802_s23, 1 }
  0x30   : > { %s9732_s26 = scalar_lea.vmem %s11340_s14, %s7033_s10 }
  0x31   : > { %s9712_s27 = scalar_lea.vmem %s11391_s9, %s7472_s18  ;;  %s9737_s9 = scalar_lea.vmem %s11341_s15, %s7469_s29 }
  0x32   : > { %s9717_s4 = scalar_lea.vmem %s11392_s11, %s802_s23  ;;  %s9722_s30 = scalar_lea.vmem %s11393_s12, %s802_s23 }
  0x33   : > { %s9742_s11 = scalar_lea.vmem %s11342_s16, %s802_s23  ;;  %s11394_s12 = sld [smem:[#allocation4_spill]] }
  0x39   : > { %p7036_p4 = scmp.ne.s32.totalorder %s11394_s12, 0 }
  0x3a   : > { %s11395_s20 = sld [smem:[#allocation7_spill]] (!%p7036_p4)  ;;  %vm875_vm0 = vcmask (!%p7036_p4), 523264   ;;  %vm878_vm1 = vcmask (!%p7036_p4), 516096  }
  0x3b   : > { %868 = sbr.rel (%p7036_p4) target bundleno = 69 (0x45), region = 100 }
  0x40   : > { %v869_v0 = vld [vmem:[%s11395_s20] sm:$0xff] (!%p7036_p4)  ;;  %v870_v1 = vld [vmem:[%s11395_s20 + $0x8] sm:$0xff] (!%p7036_p4)  ;;  %v871_v2 = vld [vmem:[%s11395_s20 + $0x10] sm:$0x1] (!%p7036_p4) }
  0x41   : > { %876 = vst.msk [vmem:[#allocation2] sm:$0xff] (!%p7036_p4), %vm875_vm0, %v869_v0  ;;  %877 = vst.msk [vmem:[#allocation2 + $0x8] sm:$0xff] (!%p7036_p4), %vm875_vm0, %v870_v1  ;;  %v872_v3 = vld [vmem:[%s11395_s20 + $0x18] sm:$0xff] (!%p7036_p4)  ;;  %v873_v4 = vld [vmem:[%s11395_s20 + $0x20] sm:$0xff] (!%p7036_p4) }
  0x42   : > { %879 = vst.msk [vmem:[#allocation2 + $0x10] sm:$0x1] %vm878_vm1, %v871_v2  ;;  %v874_v5 = vld [vmem:[%s11395_s20 + $0x28] sm:$0x1] }
  0x43   : > { %880 = vst.msk [vmem:[#allocation2 + $0x18] sm:$0xff] %vm875_vm0, %v872_v3  ;;  %881 = vst.msk [vmem:[#allocation2 + $0x20] sm:$0xff] %vm875_vm0, %v873_v4 }
  0x44   : > { %882 = vst.msk [vmem:[#allocation2 + $0x28] sm:$0x1] %vm878_vm1, %v874_v5 }
  0x45 PF: > { %vm888_vm2 = vcmask 523264   ;;  %vm895_vm3 = vcmask 516096   ;;  %v948_v27 = vld [vmem:[%s9677_s19] sm:$0xff]  ;;  %v949_v28 = vld [vmem:[%s9677_s19 + $0x8] sm:$0xff]  ;;  %v9544_v32 = vmov 0.0|0.0   ;;  %v950_v34 = vld [vmem:[%s9677_s19 + $0x10] sm:$0xff] }
  0x46   : > { %v8902_v29 = vpack.c.bf16 %v949_v28, %v948_v27  ;;  %v1052_v30 = vld [vmem:[%s9687_s25] sm:$0xff]  ;;  %v1053_v31 = vld [vmem:[%s9687_s25 + $0x8] sm:$0xff]  ;;  %8901 = vmatprep.subr.bf16.mxu0 %v9544_v32  ;;  %8913 = vmatprep.subr.bf16.mxu1 %v9544_v32  ;;  %v951_v35 = vld [vmem:[%s9677_s19 + $0x18] sm:$0xff]  ;;  %vm9545_vm4 = vmmov 0   ;;  %v9546_v45 = vmov 0.0   ;;  %s11396_s8 = sld [smem:[#allocation5_spill]] }
  0x47   : > { %v8914_v33 = vpack.c.bf16 %v1053_v31, %v1052_v30  ;;  %v8905_v36 = vpack.c.bf16 %v951_v35, %v950_v34  ;;  %v1054_v37 = vld [vmem:[%s9687_s25 + $0x10] sm:$0xff]  ;;  %v1055_v38 = vld [vmem:[%s9687_s25 + $0x18] sm:$0xff]  ;;  %v952_v40 = vld [vmem:[%s9677_s19 + $0x20] sm:$0xff]  ;;  %7973 = vmatprep.mubr.msk.f32.mxu0 %vm9545_vm4, %v9546_v45  ;;  %7998 = vmatprep.mubr.msk.f32.mxu1 %vm9545_vm4, %v9546_v45  ;;  %s11397_s21 = sld [smem:[#allocation6_spill]]  ;;  %s11398_s10 = sld [smem:[#allocation4_spill]] }
  0x48   : > { %8903 = vmatpush3.bf16.msra.mxu0 %v8902_v29  ;;  %v8917_v39 = vpack.c.bf16 %v1055_v38, %v1054_v37  ;;  %v953_v41 = vld [vmem:[%s9677_s19 + $0x28] sm:$0xff]  ;;  %v1056_v42 = vld [vmem:[%s9687_s25 + $0x20] sm:$0xff]  ;;  %v954_v47 = vld [vmem:[%s9677_s19 + $0x30] sm:$0xff] }
  0x49   : > { %8915 = vmatpush3.bf16.msra.mxu1 %v8914_v33  ;;  %8904 = vmatprep.subr.bf16.mxu0 %v9544_v32  ;;  %v8908_v43 = vpack.c.bf16 %v953_v41, %v952_v40  ;;  %v1057_v44 = vld [vmem:[%s9687_s25 + $0x28] sm:$0xff]  ;;  %v955_v48 = vld [vmem:[%s9677_s19 + $0x38] sm:$0xff]  ;;  %v1058_v49 = vld [vmem:[%s9687_s25 + $0x30] sm:$0xff] }
  0x4a   : > { %8916 = vmatprep.subr.bf16.mxu1 %v9544_v32  ;;  %v8920_v46 = vpack.c.bf16 %v1057_v44, %v1056_v42  ;;  %v1059_v50 = vld [vmem:[%s9687_s25 + $0x38] sm:$0xff]  ;;  %v8911_v51 = vpack.c.bf16 %v955_v48, %v954_v47  ;;  %v1147_v1 = vld [vmem:[%s9697_s1] sm:$0xff]  ;;  %v1148_v2 = vld [vmem:[%s9697_s1 + $0x8] sm:$0xff] }
  0x4b   : > { %v9763_v6 = vld [vmem:[#allocation2] sm:$0xff]  ;;  %v9767_v8 = vld [vmem:[#allocation2 + $0x8] sm:$0xff]  ;;  %v8923_v52 = vpack.c.bf16 %v1059_v50, %v1058_v49 }
  0x4c   : > { %v9765_v7 = vld [vmem:[#allocation2 + $0x10] sm:$0x1]  ;;  %v889_v9 = vsel %vm888_vm2, %v9763_v6, 0.0  ;;  %v892_v11 = vsel %vm888_vm2, %v9767_v8, 0.0  ;;  %8906 = vmatpush3.bf16.msra.mxu0 %v8905_v36  ;;  %v7037_v63 = vld [vmem:[%s11396_s8] ss:$0 sm:$0xff] }
  0x4d   : > { %v896_v10 = vsel %vm895_vm3, %v9765_v7, 0.0  ;;  %890 = vadd.xlane.f32.xlu0 %v889_v9  ;;  %8918 = vmatpush3.bf16.msra.mxu1 %v8917_v39  ;;  %v7038_v3 = vld [vmem:[%s11397_s21] ss:$0 sm:$0xff]  ;;  %v8926_v9 = vpack.c.bf16 %v1148_v2, %v1147_v1  ;;  %p7051_p5 = scmp.ne.s32.totalorder %s11398_s10, 11 }
  0x4e   : > { %897 = vadd.xlane.f32.xlu1 %v896_v10  ;;  %8907 = vmatprep.subr.bf16.mxu0 %v9544_v32  ;;  %v7039_v27 = vld [vmem:[%s9682_s22] ss:$0 sm:$0xff]  ;;  %vm1246_vm5 = vcmask (!%p7051_p5), 130048   ;;  %vm1249_vm6 = vcmask (!%p7051_p5), 122880   ;;  %s11399_s29 = sld [smem:[#allocation23_spill]] (!%p7051_p5) }
  0x4f   : > { %8919 = vmatprep.subr.bf16.mxu1 %v9544_v32  ;;  %v7043_v28 = vld [vmem:[%s9692_s28] ss:$0 sm:$0xff] }
  0x50   : > { %8909 = vmatpush3.bf16.msra.mxu0 %v8908_v43  ;;  %v7047_v49 = vld [vmem:[%s9702_s17] ss:$0 sm:$0xff] }
  0x51   : > { %893 = vadd.xlane.f32.xlu0 %v892_v11  ;;  %8921 = vmatpush3.bf16.msra.mxu1 %v8920_v46 }
  0x52   : > { %8910 = vmatprep.subr.bf16.mxu0 %v9544_v32  ;;  %8922 = vmatprep.subr.bf16.mxu1 %v9544_v32 }
  0x54   : > { %8912 = vmatpush3.bf16.msra.mxu0 %v8911_v51 }
  0x55   : > { %8924 = vmatpush3.bf16.msra.mxu1 %v8923_v52  ;;  %8925 = vmatprep.subr.bf16.mxu0 %v9544_v32 }
  0xda   : > { %v891_v12 = vpop.xlane.xlu0 %890 }
  0xdb   : > { %v898_v13 = vpop.xlane.xlu1 %897  ;;  %v900_v14 = vmul.f32 0.015625, %v891_v12 }
  0xdc   : > { %v902_v15 = vmul.f32 0.015625, %v898_v13  ;;  %v1149_v13 = vld [vmem:[%s9697_s1 + $0x10] sm:$0xff] }
  0xdd   : > { %v9776_v16 = vsub.f32 %v9763_v6, %v900_v14  ;;  %v1150_v14 = vld [vmem:[%s9697_s1 + $0x18] sm:$0xff] }
  0xde   : > { %v9779_v17 = vsub.f32 %v9765_v7, %v902_v15  ;;  %v894_v18 = vpop.xlane.xlu0 %893 }
  0xdf   : > { %v901_v19 = vmul.f32 0.015625, %v894_v18  ;;  %v906_v20 = vmul.f32 %v9776_v16, %v9776_v16  ;;  %v8929_v18 = vpack.c.bf16 %v1150_v14, %v1149_v13 }
  0xe0   : > { %v908_v21 = vmul.f32 %v9779_v17, %v9779_v17 }
  0xe1   : > { %v9786_v22 = vsub.f32 %v9767_v8, %v901_v19  ;;  %v909_v23 = vsel %vm888_vm2, %v906_v20, 0.0  ;;  %v1151_v20 = vld [vmem:[%s9697_s1 + $0x20] sm:$0xff] }
  0xe2   : > { %910 = vadd.xlane.f32.xlu1 %v909_v23  ;;  %v915_v24 = vsel %vm895_vm3, %v908_v21, 0.0  ;;  %v1152_v21 = vld [vmem:[%s9697_s1 + $0x28] sm:$0xff] }
  0xe3   : > { %v907_v25 = vmul.f32 %v9786_v22, %v9786_v22 }
  0xe5   : > { %v912_v26 = vsel %vm888_vm2, %v907_v25, 0.0  ;;  %v1154_v25 = vld [vmem:[%s9697_s1 + $0x38] sm:$0xff] }
  0xe6   : > { %916 = vadd.xlane.f32.xlu1 %v915_v24  ;;  %913 = vadd.xlane.f32.xlu0 %v912_v26  ;;  %v1153_v24 = vld [vmem:[%s9697_s1 + $0x30] sm:$0xff] }
  0xe7   : > { %v8935_v26 = vpack.c.bf16 %v1154_v25, %v1153_v24 }
 0x16f   : > { %v911_v53 = vpop.xlane.xlu1 %910 }
 0x170   : > { %v918_v54 = vmul.f32 0.015625, %v911_v53 }
 0x172   : > { %v921_v55 = vadd.f32 1e-06, %v918_v54 }
 0x173   : > { %v917_v56 = vpop.xlane.xlu1 %916  ;;  %v914_v57 = vpop.xlane.xlu0 %913 }
 0x174   : > { %9380 = vrsqrt.f32 %v921_v55  ;;  %v920_v58 = vmul.f32 0.015625, %v917_v56  ;;  %v919_v59 = vmul.f32 0.015625, %v914_v57 }
 0x176   : > { %v923_v60 = vadd.f32 1e-06, %v920_v58  ;;  %v922_v61 = vadd.f32 1e-06, %v919_v59 }
 0x178   : > { %9382 = vrsqrt.f32 %v923_v60 }
 0x179   : > { %9384 = vrsqrt.f32 %v922_v61 }
 0x17e   : > { %v9381_v62 = vpop.eup %9380 }
 0x17f   : > { %v927_v0 = vmul.f32 %v9381_v62, %v9776_v16 }
 0x181   : > { %v936_v4 = vmul.f32 %v7037_v63, %v927_v0 }
 0x182   : > { %v9383_v5 = vpop.eup %9382 }
 0x183   : > { %v9385_v10 = vpop.eup %9384  ;;  %v9827_v11 = vadd.f32 %v7038_v3, %v936_v4  ;;  %v929_v15 = vmul.f32 %v9383_v5, %v9779_v17 }
 0x184   : > { %v928_v12 = vmul.f32 %v9385_v10, %v9786_v22  ;;  %v8932_v22 = vpack.c.bf16 %v1152_v21, %v1151_v20 }
 0x185   : > { %7974 = vmatmul.mubr.msk.f32.vlgmr.msra.gmra.mrb[0].mxu0 %vm888_vm2, %v9827_v11  ;;  %7999 = vmatmul.mubr.msk.f32.vlgmr.msra.gmra.mrb[0].mxu1 %vm888_vm2, %v9827_v11  ;;  %v938_v19 = vmul.f32 %v7037_v63, %v929_v15 }
 0x186   : > { %8927 = vmatpush3.bf16.msra.mxu0 %v8926_v9  ;;  %7976 = vmatprep.mubr.msk.f32.mxu0 %vm9545_vm4, %v9546_v45  ;;  %v937_v16 = vmul.f32 %v7037_v63, %v928_v12 }
 0x187   : > { %8001 = vmatprep.mubr.msk.f32.mxu1 %vm9545_vm4, %v9546_v45  ;;  %8928 = vmatprep.subr.bf16.mxu0 %v9544_v32  ;;  %v9855_v23 = vadd.f32 %v7038_v3, %v938_v19 }
 0x188   : > { %v9842_v17 = vadd.f32 %v7038_v3, %v937_v16 }
 0x18a   : > { %7977 = vmatmul.mubr.msk.f32.gmra.mrb[2].mxu0 %vm888_vm2, %v9842_v17  ;;  %8002 = vmatmul.mubr.msk.f32.gmra.mrb[2].mxu1 %vm888_vm2, %v9842_v17 }
 0x18b   : > { %8930 = vmatpush3.bf16.msra.mxu0 %v8929_v18  ;;  %7979 = vmatprep.mubr.msk.f32.mxu0 %vm9545_vm4, %v9546_v45 }
 0x18c   : > { %8004 = vmatprep.mubr.msk.f32.mxu1 %vm9545_vm4, %v9546_v45  ;;  %8931 = vmatprep.subr.bf16.mxu0 %v9544_v32 }
 0x18e   : > { %7980 = vmatmul.mubr.msk.f32.gmra.mrb[4].mxu0 %vm888_vm2, %v9855_v23  ;;  %8005 = vmatmul.mubr.msk.f32.gmra.mrb[4].mxu1 %vm888_vm2, %v9855_v23 }
 0x18f   : > { %8933 = vmatpush3.bf16.msra.mxu0 %v8932_v22  ;;  %8023 = vmatprep.mubr.msk.f32.mxu0 %vm9545_vm4, %v9546_v45 }
 0x190   : > { %8934 = vmatprep.subr.bf16.mxu0 %v9544_v32 }
 0x193   : > { %8936 = vmatpush3.bf16.msra.mxu0 %v8935_v26 }
 0x196   : > { %8024 = vmatmul.mubr.msk.f32.vlgmr.msra.gmra.mrb[6].mxu0 %vm888_vm2, %v9827_v11 }
 0x197   : > { %8026 = vmatprep.mubr.msk.f32.mxu0 %vm9545_vm4, %v9546_v45 }
 0x19a   : > { %8027 = vmatmul.mubr.msk.f32.gmra.mrb[8].mxu0 %vm888_vm2, %v9842_v17 }
 0x19b   : > { %8029 = vmatprep.mubr.msk.f32.mxu0 %vm9545_vm4, %v9546_v45 }
 0x19e   : > { %8030 = vmatmul.mubr.msk.f32.gmra.mrb[10].mxu0 %vm888_vm2, %v9855_v23 }
 0x258   : > { %v1038_v29 = vpop.f32.mrb[0].mxu0  ;;  %v1133_v30 = vpop.f32.mrb[0].mxu1 }
 0x259   : > { %v1039_v31 = vadd.f32 %v7039_v27, %v1038_v29  ;;  %v1134_v33 = vadd.f32 %v7043_v28, %v1133_v30  ;;  %v7975_v34 = vpop.f32.mrb[1].mxu0  ;;  %v8000_v35 = vpop.f32.mrb[1].mxu1 }
 0x25b   : > { %1247 = vst.msk [vmem:[%s11399_s29] sm:$0xff] (!%p7051_p5), %vm1246_vm5, %v1134_v33 }
 0x25d   : > { %v1043_v36 = vpop.f32.mrb[2].mxu0  ;;  %v1138_v37 = vpop.f32.mrb[2].mxu1 }
 0x25e   : > { %v1044_v38 = vadd.f32 %v7039_v27, %v1043_v36  ;;  %v1139_v39 = vadd.f32 %v7043_v28, %v1138_v37  ;;  %v7978_v40 = vpop.f32.mrb[3].mxu0  ;;  %v8003_v41 = vpop.f32.mrb[3].mxu1 }
 0x260   : > { %1248 = vst.msk [vmem:[%s11399_s29 + $0x8] sm:$0xff] (!%p7051_p5), %vm1246_vm5, %v1139_v39 }
 0x261   : > { %v1048_v42 = vpop.f32.mrb[4].mxu0  ;;  %v1143_v43 = vpop.f32.mrb[4].mxu1 }
 0x262   : > { %v1049_v44 = vadd.f32 %v7039_v27, %v1048_v42  ;;  %v1144_v46 = vadd.f32 %v7043_v28, %v1143_v43  ;;  %v7981_v47 = vpop.f32.mrb[5].mxu0  ;;  %v8006_v48 = vpop.f32.mrb[5].mxu1 }
 0x264   : > { %1250 = vst.msk [vmem:[%s11399_s29 + $0x10] sm:$0x1] (!%p7051_p5), %vm1249_vm6, %v1144_v46 }
 0x269   : > { %v1228_v50 = vpop.f32.mrb[6].mxu0 }
 0x26a   : > { %v9879_v51 = vadd.f32 %v7047_v49, %v1228_v50  ;;  %v8025_v52 = vpop.f32.mrb[7].mxu0 }
 0x26c   : > { %1245 = sbr.rel (%p7051_p5) target bundleno = 627 (0x273), region = 104 }
 0x26d   : > { %v1233_v53 = vpop.f32.mrb[8].mxu0 }
 0x26e   : > { %v9881_v54 = vadd.f32 %v7047_v49, %v1233_v53  ;;  %v8028_v55 = vpop.f32.mrb[9].mxu0 }
 0x271   : > { %v1238_v56 = vpop.f32.mrb[10].mxu0 }
 0x272   : > { %v9883_v57 = vadd.f32 %v7047_v49, %v1238_v56  ;;  %v8031_v58 = vpop.f32.mrb[11].mxu0 }
 0x273 PF: > { %8937 = vmatprep.subr.bf16.mxu1 %v9544_v32  ;;  %vm1251_vm7 = vcmask 130048   ;;  %v8938_v59 = vpack.c.bf16 %v1139_v39, %v1134_v33  ;;  %8038 = vmatprep.mubr.msk.f32.mxu1 %vm9545_vm4, %v9546_v45  ;;  %vm1353_vm9 = vcmask 138240   ;;  %vm1360_vm10 = vcmask 131072   ;;  %v9927_v13 = vld [vmem:[%s9712_s27] sm:$0xff]  ;;  %v9930_v14 = vld [vmem:[%s9712_s27 + $0x8] sm:$0xff]  ;;  %v7064_v36 = vld [vmem:[%s9677_s19 + $0x50] sm:$0xff] }
 0x274   : > { %vm9902_vm8 = vmpackc.low %vm1251_vm7, %vm1251_vm7  ;;  %8944 = vmatprep.subr.bf16.mxu0 %v9544_v32  ;;  %8078 = vmatprep.mubr.msk.f32.mxu0 %vm9545_vm4, %v9546_v45  ;;  %v7062_v15 = vld [vmem:[%s9677_s19 + $0x40] sm:$0xff]  ;;  %v7063_v16 = vld [vmem:[%s9677_s19 + $0x48] sm:$0xff]  ;;  %v8942_v42 = vpack.c.bf16 %v9881_v54, %v9879_v51  ;;  %vm1397_vm11 = vcmask 1040384   ;;  %s11403_s21 = sld [smem:[#allocation23_spill]] (!%p7051_p5)  ;;  %vm1780_vm12 = vcmask (!%p7051_p5), 122880  }
 0x275   : > { %8940 = vmatpush3.bf16.xpose.msk.msra.mxu1 %vm9902_vm8, %v8938_v59  ;;  %v8945_v18 = vpack.c.bf16 %v7063_v16, %v7062_v15  ;;  %v7065_v37 = vld [vmem:[%s9677_s19 + $0x58] sm:$0xff]  ;;  %v7066_v39 = vld [vmem:[%s9677_s19 + $0x60] sm:$0xff]  ;;  %v7067_v40 = vld [vmem:[%s9677_s19 + $0x68] sm:$0xff] }
 0x276   : > { %8036 = vmatprep.subr.mxu1 %v9546_v45  ;;  %v8951_v41 = vpack.c.bf16 %v7067_v40, %v7066_v39  ;;  %v7068_v43 = vld [vmem:[%s9677_s19 + $0x70] sm:$0xff]  ;;  %v7088_v47 = vld [vmem:[%s9697_s1 + $0x40] sm:$0xff]  ;;  %v7089_v48 = vld [vmem:[%s9697_s1 + $0x48] sm:$0xff] }
 0x277   : > { %8946 = vmatpush3.bf16.msra.mxu0 %v8945_v18  ;;  %v8969_v49 = vpack.c.bf16 %v7089_v48, %v7088_v47  ;;  %v7090_v50 = vld [vmem:[%s9697_s1 + $0x50] sm:$0xff]  ;;  %v7091_v51 = vld [vmem:[%s9697_s1 + $0x58] sm:$0xff]  ;;  %v7092_v53 = vld [vmem:[%s9697_s1 + $0x60] sm:$0xff] }
 0x278   : > { %8947 = vmatprep.subr.bf16.mxu0 %v9544_v32  ;;  %v8972_v52 = vpack.c.bf16 %v7091_v51, %v7090_v50  ;;  %v7093_v54 = vld [vmem:[%s9697_s1 + $0x68] sm:$0xff]  ;;  %v7094_v56 = vld [vmem:[%s9697_s1 + $0x70] sm:$0xff]  ;;  %v7079_v15 = vld [vmem:[%s9687_s25 + $0x60] sm:$0xff] }
 0x279   : > { %v8975_v55 = vpack.c.bf16 %v7093_v54, %v7092_v53  ;;  %v7080_v16 = vld [vmem:[%s9687_s25 + $0x68] sm:$0xff]  ;;  %v7084_v53 = vld [vmem:[%s9692_s28 + $0x1] ss:$0 sm:$0xff] }
 0x27d   : > { %8037 = vmatpush3.xpose.msk.msra.mxu1 %vm1251_vm7, %v1144_v46 }
 0x27e   : > { %8941 = vmatprep.subr.bf16.mxu1 %v9544_v32 }
 0x280   : > { %8039 = vmatmul.mubr.msk.f32.vlgmr.msra.gmra.mrb[6].mxu1 %vm1251_vm7, %v1039_v31 }
 0x281   : > { %8041 = vmatprep.mubr.msk.f32.mxu1 %vm9545_vm4, %v9546_v45  ;;  %8943 = vmatpush3.bf16.msra.mxu1 %v8942_v42 }
 0x282   : > { %8051 = vmatprep.subr.mxu1 %v9546_v45 }
 0x284   : > { %8042 = vmatmul.mubr.msk.f32.gmra.mrb[8].mxu1 %vm1251_vm7, %v1044_v38  ;;  %v8948_v38 = vpack.c.bf16 %v7065_v37, %v7064_v36  ;;  %v7097_v36 = vld [vmem:[%s9702_s17 + $0x1] ss:$0 sm:$0xff] }
 0x285   : > { %8044 = vmatprep.mubr.msk.f32.mxu1 %vm9545_vm4, %v9546_v45  ;;  %8052 = vmatpush3.msk.msra.mxu1 %vm1397_vm11, %v9883_v57  ;;  %v7095_v57 = vld [vmem:[%s9697_s1 + $0x78] sm:$0xff] }
 0x286   : > { %8949 = vmatpush3.bf16.msra.mxu0 %v8948_v38  ;;  %8956 = vmatprep.subr.bf16.mxu1 %v9544_v32  ;;  %v8978_v58 = vpack.c.bf16 %v7095_v57, %v7094_v56 }
 0x287   : > { %8950 = vmatprep.subr.bf16.mxu0 %v9544_v32 }
 0x288   : > { %8045 = vmatmul.mubr.msk.f32.gmra.mrb[10].mxu1 %vm1251_vm7, %v1049_v44  ;;  %v7069_v44 = vld [vmem:[%s9677_s19 + $0x78] sm:$0xff] }
 0x289   : > { %8053 = vmatprep.mubr.msk.f32.mxu1 %vm9545_vm4, %v9546_v45  ;;  %v8954_v46 = vpack.c.bf16 %v7069_v44, %v7068_v43 }
 0x28a   : > { %8952 = vmatpush3.bf16.msra.mxu0 %v8951_v41 }
 0x28b   : > { %8953 = vmatprep.subr.bf16.mxu0 %v9544_v32 }
 0x28e   : > { %8955 = vmatpush3.bf16.msra.mxu0 %v8954_v46 }
 0x28f   : > { %8968 = vmatprep.subr.bf16.mxu0 %v9544_v32 }
 0x291   : > { %8079 = vmatmul.mubr.msk.f32.vlgmr.msra.gmra.mrb[12].mxu0 %vm888_vm2, %v9827_v11 }
 0x292   : > { %8970 = vmatpush3.bf16.msra.mxu0 %v8969_v49  ;;  %8081 = vmatprep.mubr.msk.f32.mxu0 %vm9545_vm4, %v9546_v45 }
 0x293   : > { %8971 = vmatprep.subr.bf16.mxu0 %v9544_v32 }
 0x295   : > { %8082 = vmatmul.mubr.msk.f32.gmra.mrb[14].mxu0 %vm888_vm2, %v9842_v17 }
 0x296   : > { %8084 = vmatprep.mubr.msk.f32.mxu0 %vm9545_vm4, %v9546_v45  ;;  %8973 = vmatpush3.bf16.msra.mxu0 %v8972_v52 }
 0x297   : > { %8974 = vmatprep.subr.bf16.mxu0 %v9544_v32 }
 0x299   : > { %8085 = vmatmul.mubr.msk.f32.gmra.mrb[16].mxu0 %vm888_vm2, %v9855_v23 }
 0x29a   : > { %8128 = vmatprep.mubr.msk.f32.mxu0 %vm9545_vm4, %v9546_v45  ;;  %8976 = vmatpush3.bf16.msra.mxu0 %v8975_v55 }
 0x29b   : > { %8977 = vmatprep.subr.bf16.mxu0 %v9544_v32 }
 0x29e   : > { %8979 = vmatpush3.bf16.msra.mxu0 %v8978_v58 }
 0x2a1   : > { %8129 = vmatmul.mubr.msk.f32.vlgmr.msra.gmra.mrb[18].mxu0 %vm888_vm2, %v9827_v11 }
 0x2a2   : > { %8131 = vmatprep.mubr.msk.f32.mxu0 %vm9545_vm4, %v9546_v45 }
 0x2a5   : > { %8132 = vmatmul.mubr.msk.f32.gmra.mrb[20].mxu0 %vm888_vm2, %v9842_v17 }
 0x2a6   : > { %8134 = vmatprep.mubr.msk.f32.mxu0 %vm9545_vm4, %v9546_v45 }
 0x2a9   : > { %8135 = vmatmul.mubr.msk.f32.gmra.mrb[22].mxu0 %vm888_vm2, %v9855_v23 }
 0x353   : > { %v1336_v61 = vpop.f32.mrb[6].mxu1 }
 0x354   : > { %v1350_v62 = vmul.f32 0.25, %v1336_v61  ;;  %v8040_v63 = vpop.f32.mrb[7].mxu1 }
 0x355   : > { %v7075_v63 = vld [vmem:[%s9687_s25 + $0x40] sm:$0xff] }
 0x356   : > { %v1354_v0 = vsel %vm1353_vm9, %v1350_v62, -inf }
 0x357   : > { %1355 = vmax.xlane.f32.xlu0 %v1354_v0  ;;  %v1341_v1 = vpop.f32.mrb[8].mxu1  ;;  %v7076_v0 = vld [vmem:[%s9687_s25 + $0x48] sm:$0xff] }
 0x358   : > { %v1351_v2 = vmul.f32 0.25, %v1341_v1  ;;  %v8043_v3 = vpop.f32.mrb[9].mxu1 }
 0x35a   : > { %v1357_v4 = vsel %vm1353_vm9, %v1351_v2, -inf }
 0x35b   : > { %1358 = vmax.xlane.f32.xlu0 %v1357_v4  ;;  %v1346_v5 = vpop.f32.mrb[10].mxu1  ;;  %v7077_v4 = vld [vmem:[%s9687_s25 + $0x50] sm:$0xff] }
 0x35c   : > { %v1352_v9 = vmul.f32 0.25, %v1346_v5  ;;  %v8046_v10 = vpop.f32.mrb[11].mxu1  ;;  %v7078_v5 = vld [vmem:[%s9687_s25 + $0x58] sm:$0xff] }
 0x35d   : > { %v8960_v10 = vpack.c.bf16 %v7078_v5, %v7077_v4 }
 0x35e   : > { %v1361_v12 = vsel %vm1360_vm10, %v1352_v9, -inf }
 0x35f   : > { %1362 = vmax.xlane.f32.xlu1 %v1361_v12 }
 0x3e4   : > { %v1356_v19 = vpop.xlane.xlu0 %1355 }
 0x3e5   : > { %v1364_v20 = vsub.f32 %v1350_v62, %v1356_v19  ;;  %v8963_v19 = vpack.c.bf16 %v7080_v16, %v7079_v15 }
 0x3e7   : > { %v1367_v21 = vmul.f32 1.442695, %v1364_v20 }
 0x3e8   : > { %v1359_v22 = vpop.xlane.xlu0 %1358 }
 0x3e9   : > { %9386 = vpow2.f32 %v1367_v21  ;;  %v1365_v24 = vsub.f32 %v1351_v2, %v1359_v22  ;;  %v8957_v2 = vpack.c.bf16 %v7076_v0, %v7075_v63  ;;  %v7081_v21 = vld [vmem:[%s9687_s25 + $0x70] sm:$0xff]  ;;  %v7082_v22 = vld [vmem:[%s9687_s25 + $0x78] sm:$0xff] }
 0x3eb   : > { %v1369_v25 = vmul.f32 1.442695, %v1365_v24  ;;  %v8966_v24 = vpack.c.bf16 %v7082_v22, %v7081_v21 }
 0x3ec   : > { %v1363_v26 = vpop.xlane.xlu1 %1362 }
 0x3ed   : > { %9388 = vpow2.f32 %v1369_v25  ;;  %v1366_v27 = vsub.f32 %v1352_v9, %v1363_v26  ;;  %v7071_v25 = vld [vmem:[%s9682_s22 + $0x1] ss:$0 sm:$0xff]  ;;  %v1566_v26 = vpop.f32.mrb[12].mxu0 }
 0x3ef   : > { %v1371_v28 = vmul.f32 1.442695, %v1366_v27  ;;  %v1567_v27 = vadd.f32 %v7071_v25, %v1566_v26 }
 0x3f1   : > { %9390 = vpow2.f32 %v1371_v28  ;;  %v8080_v28 = vpop.f32.mrb[13].mxu0 }
 0x3f3   : > { %v9935_v29 = vpop.eup %9386 }
 0x3f4   : > { %v1373_v30 = vsel %vm1353_vm9, %v9935_v29, 0.0 }
 0x3f5   : > { %1374 = vadd.xlane.f32.xlu1 %v1373_v30 }
 0x3f7   : > { %v9939_v31 = vpop.eup %9388 }
 0x3f8   : > { %v1376_v33 = vsel %vm1353_vm9, %v9939_v31, 0.0 }
 0x3f9   : > { %1377 = vadd.xlane.f32.xlu0 %v1376_v33 }
 0x3fb   : > { %v9943_v34 = vpop.eup %9390 }
 0x3fc   : > { %v1379_v35 = vsel %vm1360_vm10, %v9943_v34, 0.0 }
 0x3fd   : > { %1380 = vadd.xlane.f32.xlu1 %v1379_v35 }
 0x482   : > { %v1375_v59 = vpop.xlane.xlu1 %1374 }
 0x483   : > { %9392 = vrcp.f32 %v1375_v59 }
 0x486   : > { %v1378_v61 = vpop.xlane.xlu0 %1377 }
 0x487   : > { %9394 = vrcp.f32 %v1378_v61 }
 0x48a   : > { %v1381_v62 = vpop.xlane.xlu1 %1380 }
 0x48b   : > { %9396 = vrcp.f32 %v1381_v62 }
 0x48d   : > { %v9393_v1 = vpop.eup %9392 }
 0x48e   : > { %v1383_v3 = vmul.f32 %v9393_v1, %v9935_v29  ;;  %v1571_v29 = vpop.f32.mrb[14].mxu0 }
 0x48f   : > { %v1572_v30 = vadd.f32 %v7071_v25, %v1571_v29 }
 0x490   : > { %8054 = vmatmul.mubr.msk.f32.vlgmr.msra.gmra.mrb[12].mxu1 %vm1353_vm9, %v1383_v3 }
 0x491   : > { %v9395_v9 = vpop.eup %9394  ;;  %8958 = vmatpush3.bf16.msra.mxu1 %v8957_v2  ;;  %8056 = vmatprep.mubr.msk.f32.mxu1 %vm9545_vm4, %v9546_v45 }
 0x492   : > { %8959 = vmatprep.subr.bf16.mxu1 %v9544_v32  ;;  %v1385_v12 = vmul.f32 %v9395_v9, %v9939_v31  ;;  %v8083_v31 = vpop.f32.mrb[15].mxu0 }
 0x493   : > { %v1576_v33 = vpop.f32.mrb[16].mxu0 }
 0x494   : > { %8057 = vmatmul.mubr.msk.f32.gmra.mrb[14].mxu1 %vm1353_vm9, %v1385_v12  ;;  %v8086_v35 = vpop.f32.mrb[17].mxu0 }
 0x495   : > { %v9397_v18 = vpop.eup %9396  ;;  %8961 = vmatpush3.bf16.msra.mxu1 %v8960_v10  ;;  %8059 = vmatprep.mubr.msk.f32.mxu1 %vm9545_vm4, %v9546_v45  ;;  %v1760_v37 = vpop.f32.mrb[18].mxu0 }
 0x496   : > { %8962 = vmatprep.subr.bf16.mxu1 %v9544_v32  ;;  %v1387_v20 = vmul.f32 %v9397_v18, %v9943_v34  ;;  %v1577_v34 = vadd.f32 %v7071_v25, %v1576_v33  ;;  %v10030_v38 = vadd.f32 %v7097_v36, %v1760_v37  ;;  %v8130_v39 = vpop.f32.mrb[19].mxu0 }
 0x497   : > { %v1765_v40 = vpop.f32.mrb[20].mxu0 }
 0x498   : > { %8060 = vmatmul.mubr.msk.f32.gmra.mrb[16].mxu1 %vm1353_vm9, %v1387_v20  ;;  %v10032_v41 = vadd.f32 %v7097_v36, %v1765_v40  ;;  %v8133_v42 = vpop.f32.mrb[21].mxu0 }
 0x499   : > { %8964 = vmatpush3.bf16.msra.mxu1 %v8963_v19  ;;  %8103 = vmatprep.mubr.msk.f32.mxu1 %vm9545_vm4, %v9546_v45  ;;  %v1770_v43 = vpop.f32.mrb[22].mxu0 }
 0x49a   : > { %8965 = vmatprep.subr.bf16.mxu1 %v9544_v32  ;;  %v10034_v44 = vadd.f32 %v7097_v36, %v1770_v43  ;;  %v8136_v46 = vpop.f32.mrb[23].mxu0 }
 0x49d   : > { %8967 = vmatpush3.bf16.msra.mxu1 %v8966_v24 }
 0x4a0   : > { %8104 = vmatmul.mubr.msk.f32.vlgmr.msra.gmra.mrb[18].mxu1 %vm888_vm2, %v9827_v11 }
 0x4a1   : > { %8106 = vmatprep.mubr.msk.f32.mxu1 %vm9545_vm4, %v9546_v45 }
 0x4a4   : > { %8107 = vmatmul.mubr.msk.f32.gmra.mrb[20].mxu1 %vm888_vm2, %v9842_v17 }
 0x4a5   : > { %8109 = vmatprep.mubr.msk.f32.mxu1 %vm9545_vm4, %v9546_v45 }
 0x4a8   : > { %8110 = vmatmul.mubr.msk.f32.gmra.mrb[22].mxu1 %vm888_vm2, %v9855_v23 }
 0x563   : > { %v10036_v47 = vpop.f32.mrb[12].mxu1 }
 0x564   : > { %v8055_v48 = vpop.f32.mrb[13].mxu1 }
 0x567   : > { %v10038_v49 = vpop.f32.mrb[14].mxu1 }
 0x568   : > { %v8058_v50 = vpop.f32.mrb[15].mxu1 }
 0x56b   : > { %v10040_v51 = vpop.f32.mrb[16].mxu1 }
 0x56c   : > { %v8061_v52 = vpop.f32.mrb[17].mxu1 }
 0x573   : > { %v1663_v54 = vpop.f32.mrb[18].mxu1 }
 0x574   : > { %v1664_v55 = vadd.f32 %v7084_v53, %v1663_v54  ;;  %v8105_v56 = vpop.f32.mrb[19].mxu1 }
 0x576   : > { %1776 = sbr.rel (%p7051_p5) target bundleno = 1407 (0x57f), region = 108  ;;  %7102 = vst.msk [vmem:[%s11403_s21 + $0x18] sm:$0xff] (!%p7051_p5), %vm1251_vm7, %v1664_v55 }
 0x577   : > { %v1668_v57 = vpop.f32.mrb[20].mxu1 }
 0x578   : > { %v1669_v58 = vadd.f32 %v7084_v53, %v1668_v57  ;;  %v8108_v59 = vpop.f32.mrb[21].mxu1 }
 0x57a   : > { %7103 = vst.msk [vmem:[%s11403_s21 + $0x20] sm:$0xff] (!%p7051_p5), %vm1251_vm7, %v1669_v58 }
 0x57b   : > { %v1673_v61 = vpop.f32.mrb[22].mxu1 }
 0x57c   : > { %v1674_v62 = vadd.f32 %v7084_v53, %v1673_v61  ;;  %v8111_v63 = vpop.f32.mrb[23].mxu1 }
 0x57e   : > { %7104 = vst.msk [vmem:[%s11403_s21 + $0x28] sm:$0x1] %vm1780_vm12, %v1674_v62 }
 0x57f PF: > { %8980 = vmatprep.subr.bf16.mxu0 %v9544_v32  ;;  %9365 = vmatprep.subr.bf16.mxu1 %v9544_v32  ;;  %v8981_v0 = vpack.c.bf16 %v1669_v58, %v1664_v55  ;;  %v8985_v37 = vpack.c.bf16 %v10032_v41, %v10030_v38  ;;  %v7115_v39 = vld [vmem:[%s9712_s27 + $0x10] sm:$0xff]  ;;  %v7116_v40 = vld [vmem:[%s9712_s27 + $0x18] sm:$0xff]  ;;  %v8991_v41 = vpack.c.bf16 %v9930_v14, %v9927_v13  ;;  %v7136_v14 = vld [vmem:[%s9687_s25 + $0x80] sm:$0xff]  ;;  %s11405_s3 = sld [smem:[#allocation23_spill]] (!%p7051_p5)  ;;  %vm2486_vm13 = vcmask (!%p7051_p5), 122880  }
 0x580   : > { %8143 = vmatprep.mubr.msk.f32.mxu0 %vm9545_vm4, %v9546_v45  ;;  %8149 = vmatprep.mubr.msk.f32.mxu1 %vm9545_vm4, %v9546_v45  ;;  %v8988_v42 = vpack.c.bf16 %v7116_v40, %v7115_v39  ;;  %v7138_v55 = vld [vmem:[%s9687_s25 + $0x90] sm:$0xff]  ;;  %v7139_v56 = vld [vmem:[%s9687_s25 + $0x98] sm:$0xff]  ;;  %v7141_v57 = vld [vmem:[%s9687_s25 + $0xa8] sm:$0xff] }
 0x581   : > { %8983 = vmatpush3.bf16.xpose.msk.msra.mxu0 %vm9902_vm8, %v8981_v0  ;;  %9367 = vmatpush3.bf16.xpose.msk.msra.mxu1 %vm9902_vm8, %v8981_v0  ;;  %v7142_v59 = vld [vmem:[%s9687_s25 + $0xb0] sm:$0xff]  ;;  %v7143_v61 = vld [vmem:[%s9687_s25 + $0xb8] sm:$0xff]  ;;  %v7123_v63 = vld [vmem:[%s9677_s19 + $0x80] sm:$0xff] }
 0x582   : > { %8141 = vmatprep.subr.mxu0 %v9546_v45  ;;  %9366 = vmatprep.subr.mxu1 %v9546_v45  ;;  %v7124_v0 = vld [vmem:[%s9677_s19 + $0x88] sm:$0xff] }
 0x589   : > { %8142 = vmatpush3.xpose.msk.msra.mxu0 %vm1251_vm7, %v1674_v62  ;;  %9368 = vmatpush3.xpose.msk.msra.mxu1 %vm1251_vm7, %v1674_v62  ;;  %v9015_v62 = vpack.c.bf16 %v7143_v61, %v7142_v59 }
 0x58a   : > { %8984 = vmatprep.subr.bf16.mxu0 %v9544_v32  ;;  %8987 = vmatprep.subr.bf16.mxu1 %v9544_v32 }
 0x58c   : > { %8144 = vmatmul.mubr.msk.f32.vlgmr.msra.gmra.mrb[24].mxu0 %vm1251_vm7, %v1567_v27  ;;  %8150 = vmatmul.mubr.msk.f32.vlgmr.msra.gmra.mrb[24].mxu1 %vm1251_vm7, %v1577_v34 }
 0x58d   : > { %8146 = vmatprep.mubr.msk.f32.mxu0 %vm9545_vm4, %v9546_v45  ;;  %8171 = vmatprep.mubr.msk.f32.mxu1 %vm9545_vm4, %v9546_v45 }
 0x58e   : > { %8986 = vmatpush3.bf16.msra.mxu0 %v8985_v37  ;;  %8989 = vmatpush3.bf16.msra.mxu1 %v8988_v42 }
 0x58f   : > { %8156 = vmatprep.subr.mxu0 %v9546_v45  ;;  %8993 = vmatprep.subr.bf16.mxu1 %v9544_v32 }
 0x590   : > { %8147 = vmatmul.mubr.msk.f32.gmra.mrb[26].mxu0 %vm1251_vm7, %v1572_v30 }
 0x591   : > { %8158 = vmatprep.mubr.msk.f32.mxu0 %vm9545_vm4, %v9546_v45 }
 0x592   : > { %8157 = vmatpush3.msk.msra.mxu0 %vm1397_vm11, %v10034_v44 }
 0x593   : > { %8990 = vmatprep.subr.bf16.mxu0 %v9544_v32 }
 0x65f   : > { %v1866_v1 = vpop.f32.mrb[24].mxu0  ;;  %v1876_v2 = vpop.f32.mrb[24].mxu1 }
 0x660   : > { %v1880_v3 = vmul.f32 0.25, %v1866_v1  ;;  %v1882_v4 = vmul.f32 0.25, %v1876_v2  ;;  %v8145_v5 = vpop.f32.mrb[25].mxu0  ;;  %v8151_v9 = vpop.f32.mrb[25].mxu1  ;;  %v8994_v1 = vpack.c.bf16 %v7124_v0, %v7123_v63  ;;  %v7125_v2 = vld [vmem:[%s9677_s19 + $0x90] sm:$0xff] }
 0x661   : > { %v7132_v63 = vld [vmem:[%s9682_s22 + $0x2] ss:$0 sm:$0xff] }
 0x662   : > { %v1889_v10 = vsel %vm1360_vm10, %v1882_v4, -inf  ;;  %v1883_v12 = vsel %vm1353_vm9, %v1880_v3, -inf }
 0x663   : > { %1890 = vmax.xlane.f32.xlu1 %v1889_v10  ;;  %1884 = vmax.xlane.f32.xlu0 %v1883_v12  ;;  %v1871_v15 = vpop.f32.mrb[26].mxu0  ;;  %v7127_v10 = vld [vmem:[%s9677_s19 + $0xa0] sm:$0xff]  ;;  %v7128_v12 = vld [vmem:[%s9677_s19 + $0xa8] sm:$0xff] }
 0x664   : > { %v1881_v16 = vmul.f32 0.25, %v1871_v15  ;;  %v8148_v18 = vpop.f32.mrb[27].mxu0 }
 0x665   : > { %v9000_v18 = vpack.c.bf16 %v7128_v12, %v7127_v10 }
 0x666   : > { %v1886_v19 = vsel %vm1353_vm9, %v1881_v16, -inf }
 0x667   : > { %1887 = vmax.xlane.f32.xlu0 %v1886_v19  ;;  %v7129_v19 = vld [vmem:[%s9677_s19 + $0xb0] sm:$0xff] }
 0x6f0   : > { %v1891_v20 = vpop.xlane.xlu1 %1890  ;;  %v1885_v21 = vpop.xlane.xlu0 %1884 }
 0x6f1   : > { %v1894_v22 = vsub.f32 %v1882_v4, %v1891_v20  ;;  %v1892_v24 = vsub.f32 %v1880_v3, %v1885_v21  ;;  %v7126_v3 = vld [vmem:[%s9677_s19 + $0x98] sm:$0xff] }
 0x6f2   : > { %v8997_v9 = vpack.c.bf16 %v7126_v3, %v7125_v2  ;;  %v7130_v20 = vld [vmem:[%s9677_s19 + $0xb8] sm:$0xff] }
 0x6f3   : > { %v1895_v25 = vmul.f32 1.442695, %v1892_v24  ;;  %v1899_v26 = vmul.f32 1.442695, %v1894_v22  ;;  %v9003_v24 = vpack.c.bf16 %v7130_v20, %v7129_v19 }
 0x6f4   : > { %v1888_v27 = vpop.xlane.xlu0 %1887 }
 0x6f5   : > { %v1893_v28 = vsub.f32 %v1881_v16, %v1888_v27  ;;  %9398 = vpow2.f32 %v1895_v25  ;;  %v7149_v25 = vld [vmem:[%s9697_s1 + $0x80] sm:$0xff] }
 0x6f6   : > { %9400 = vpow2.f32 %v1899_v26  ;;  %v7150_v26 = vld [vmem:[%s9697_s1 + $0x88] sm:$0xff] }
 0x6f7   : > { %v1897_v29 = vmul.f32 1.442695, %v1893_v28  ;;  %v9018_v27 = vpack.c.bf16 %v7150_v26, %v7149_v25  ;;  %v7151_v28 = vld [vmem:[%s9697_s1 + $0x90] sm:$0xff] }
 0x6f9   : > { %9402 = vpow2.f32 %v1897_v29  ;;  %v7152_v29 = vld [vmem:[%s9697_s1 + $0x98] sm:$0xff] }
 0x6ff   : > { %v9399_v30 = vpop.eup %9398 }
 0x700   : > { %v1901_v31 = vsel %vm1353_vm9, %v9399_v30, 0.0  ;;  %v9401_v33 = vpop.eup %9400 }
 0x701   : > { %1902 = vadd.xlane.f32.xlu1 %v1901_v31  ;;  %v1907_v36 = vsel %vm1360_vm10, %v9401_v33, 0.0  ;;  %v7153_v31 = vld [vmem:[%s9697_s1 + $0xa0] sm:$0xff] }
 0x703   : > { %v9403_v34 = vpop.eup %9402 }
 0x704   : > { %v1904_v35 = vsel %vm1353_vm9, %v9403_v34, 0.0 }
 0x705   : > { %1905 = vadd.xlane.f32.xlu0 %v1904_v35  ;;  %1908 = vadd.xlane.f32.xlu1 %v1907_v36  ;;  %v7155_v35 = vld [vmem:[%s9697_s1 + $0xb0] sm:$0xff]  ;;  %v7156_v36 = vld [vmem:[%s9697_s1 + $0xb8] sm:$0xff] }
 0x706   : > { %v9027_v37 = vpack.c.bf16 %v7156_v36, %v7155_v35 }
 0x78e   : > { %v1903_v43 = vpop.xlane.xlu1 %1902 }
 0x78f   : > { %9404 = vrcp.f32 %v1903_v43 }
 0x792   : > { %v1906_v46 = vpop.xlane.xlu0 %1905  ;;  %v1909_v48 = vpop.xlane.xlu1 %1908 }
 0x793   : > { %9406 = vrcp.f32 %v1906_v46 }
 0x794   : > { %9408 = vrcp.f32 %v1909_v48 }
 0x799   : > { %v9405_v38 = vpop.eup %9404 }
 0x79a   : > { %v1911_v50 = vmul.f32 %v9405_v38, %v9399_v30  ;;  %v9021_v30 = vpack.c.bf16 %v7152_v29, %v7151_v28  ;;  %v7145_v38 = vld [vmem:[%s9692_s28 + $0x2] ss:$0 sm:$0xff] }
 0x79c   : > { %8159 = vmatmul.mubr.msk.f32.vlgmr.msra.gmra.mrb[28].mxu0 %vm1353_vm9, %v1911_v50 }
 0x79d   : > { %v9407_v44 = vpop.eup %9406  ;;  %8161 = vmatprep.mubr.msk.f32.mxu0 %vm9545_vm4, %v9546_v45  ;;  %8992 = vmatpush3.bf16.msra.mxu0 %v8991_v41 }
 0x79e   : > { %v1913_v52 = vmul.f32 %v9407_v44, %v9403_v34  ;;  %9005 = vmatprep.subr.bf16.mxu0 %v9544_v32  ;;  %v9409_v53 = vpop.eup %9408 }
 0x79f   : > { %v1915_v13 = vmul.f32 %v9409_v53, %v9401_v33  ;;  %v7154_v33 = vld [vmem:[%s9697_s1 + $0xa8] sm:$0xff] }
 0x7a0   : > { %8162 = vmatmul.mubr.msk.f32.gmra.mrb[30].mxu0 %vm1353_vm9, %v1913_v52  ;;  %v9024_v34 = vpack.c.bf16 %v7154_v33, %v7153_v31 }
 0x7a1   : > { %8164 = vmatprep.mubr.msk.f32.mxu0 %vm9545_vm4, %v9546_v45 }
 0x7a4   : > { %8165 = vmatmul.mubr.msk.f32.gmra.mrb[32].mxu0 %vm1353_vm9, %v1915_v13 }
 0x7a5   : > { %8184 = vmatprep.mubr.msk.f32.mxu0 %vm9545_vm4, %v9546_v45 }
 0x7a8   : > { %8185 = vmatmul.mubr.msk.f32.vlgmr.msra.gmra.mrb[34].mxu0 %vm1251_vm7, %v10036_v47  ;;  %v7137_v47 = vld [vmem:[%s9687_s25 + $0x88] sm:$0xff] }
 0x7a9   : > { %8187 = vmatprep.mubr.msk.f32.mxu0 %vm9545_vm4, %v9546_v45  ;;  %v9006_v54 = vpack.c.bf16 %v7137_v47, %v7136_v14 }
 0x7ab   : > { %9007 = vmatpush3.bf16.msra.mxu0 %v9006_v54 }
 0x7ac   : > { %8188 = vmatmul.mubr.msk.f32.gmra.mrb[36].mxu0 %vm1251_vm7, %v10038_v49  ;;  %9008 = vmatprep.subr.bf16.mxu0 %v9544_v32  ;;  %v9009_v49 = vpack.c.bf16 %v7139_v56, %v7138_v55 }
 0x7ad   : > { %8190 = vmatprep.mubr.msk.f32.mxu0 %vm9545_vm4, %v9546_v45 }
 0x7af   : > { %9010 = vmatpush3.bf16.msra.mxu0 %v9009_v49 }
 0x7b0   : > { %8191 = vmatmul.mubr.msk.f32.gmra.mrb[38].mxu0 %vm1251_vm7, %v10040_v51  ;;  %9011 = vmatprep.subr.bf16.mxu0 %v9544_v32  ;;  %v7140_v51 = vld [vmem:[%s9687_s25 + $0xa0] sm:$0xff] }
 0x7b1   : > { %8234 = vmatprep.mubr.msk.f32.mxu0 %vm9545_vm4, %v9546_v45  ;;  %v9012_v58 = vpack.c.bf16 %v7141_v57, %v7140_v51 }
 0x7b3   : > { %9013 = vmatpush3.bf16.msra.mxu0 %v9012_v58 }
 0x7b4   : > { %9014 = vmatprep.subr.bf16.mxu0 %v9544_v32 }
 0x7b7   : > { %9016 = vmatpush3.bf16.msra.mxu0 %v9015_v62 }
 0x7ba   : > { %8235 = vmatmul.mubr.msk.f32.vlgmr.msra.gmra.mrb[40].mxu0 %vm888_vm2, %v9827_v11 }
 0x7bb   : > { %8237 = vmatprep.mubr.msk.f32.mxu0 %vm9545_vm4, %v9546_v45 }
 0x7be   : > { %8238 = vmatmul.mubr.msk.f32.gmra.mrb[42].mxu0 %vm888_vm2, %v9842_v17 }
 0x7bf   : > { %8240 = vmatprep.mubr.msk.f32.mxu0 %vm9545_vm4, %v9546_v45 }
 0x7c2   : > { %8241 = vmatmul.mubr.msk.f32.gmra.mrb[44].mxu0 %vm888_vm2, %v9855_v23 }
 0x86f   : > { %v1994_v4 = vpop.f32.mrb[28].mxu0 }
 0x870   : > { %v8160_v5 = vpop.f32.mrb[29].mxu0  ;;  %8172 = vmatmul.mubr.msk.f32.vlgmr.msra.gmra.mrb[26].mxu1 %vm1251_vm7, %v1994_v4 }
 0x871   : > { %8995 = vmatpush3.bf16.msra.mxu1 %v8994_v1  ;;  %8174 = vmatprep.mubr.msk.f32.mxu1 %vm9545_vm4, %v9546_v45 }
 0x872   : > { %8996 = vmatprep.subr.bf16.mxu1 %v9544_v32 }
 0x873   : > { %v1999_v15 = vpop.f32.mrb[30].mxu0 }
 0x874   : > { %v8163_v16 = vpop.f32.mrb[31].mxu0  ;;  %8175 = vmatmul.mubr.msk.f32.gmra.mrb[28].mxu1 %vm1251_vm7, %v1999_v15  ;;  %v7158_v15 = vld [vmem:[%s9702_s17 + $0x2] ss:$0 sm:$0xff] }
 0x875   : > { %8998 = vmatpush3.bf16.msra.mxu1 %v8997_v9  ;;  %8177 = vmatprep.mubr.msk.f32.mxu1 %vm9545_vm4, %v9546_v45 }
 0x876   : > { %8999 = vmatprep.subr.bf16.mxu1 %v9544_v32 }
 0x877   : > { %v2004_v21 = vpop.f32.mrb[32].mxu0 }
 0x878   : > { %v8166_v22 = vpop.f32.mrb[33].mxu0  ;;  %8178 = vmatmul.mubr.msk.f32.gmra.mrb[30].mxu1 %vm1251_vm7, %v2004_v21 }
 0x879   : > { %9001 = vmatpush3.bf16.msra.mxu1 %v9000_v18  ;;  %8209 = vmatprep.mubr.msk.f32.mxu1 %vm9545_vm4, %v9546_v45 }
 0x87a   : > { %9002 = vmatprep.subr.bf16.mxu1 %v9544_v32 }
 0x87b   : > { %v2175_v39 = vpop.f32.mrb[34].mxu0 }
 0x87c   : > { %v8186_v40 = vpop.f32.mrb[35].mxu0 }
 0x87d   : > { %9004 = vmatpush3.bf16.msra.mxu1 %v9003_v24 }
 0x87e   : > { %9017 = vmatprep.subr.bf16.mxu1 %v9544_v32 }
 0x87f   : > { %v2180_v42 = vpop.f32.mrb[36].mxu0 }
 0x880   : > { %8210 = vmatmul.mubr.msk.f32.vlgmr.msra.gmra.mrb[32].mxu1 %vm888_vm2, %v9827_v11  ;;  %v8189_v43 = vpop.f32.mrb[37].mxu0 }
 0x881   : > { %9019 = vmatpush3.bf16.msra.mxu1 %v9018_v27  ;;  %8212 = vmatprep.mubr.msk.f32.mxu1 %vm9545_vm4, %v9546_v45 }
 0x882   : > { %9020 = vmatprep.subr.bf16.mxu1 %v9544_v32 }
 0x883   : > { %v2185_v46 = vpop.f32.mrb[38].mxu0 }
 0x884   : > { %8213 = vmatmul.mubr.msk.f32.gmra.mrb[34].mxu1 %vm888_vm2, %v9842_v17  ;;  %v8192_v48 = vpop.f32.mrb[39].mxu0 }
 0x885   : > { %9022 = vmatpush3.bf16.msra.mxu1 %v9021_v30  ;;  %8215 = vmatprep.mubr.msk.f32.mxu1 %vm9545_vm4, %v9546_v45 }
 0x886   : > { %9023 = vmatprep.subr.bf16.mxu1 %v9544_v32 }
 0x888   : > { %8216 = vmatmul.mubr.msk.f32.gmra.mrb[36].mxu1 %vm888_vm2, %v9855_v23 }
 0x889   : > { %9025 = vmatpush3.bf16.msra.mxu1 %v9024_v34  ;;  %8259 = vmatprep.mubr.msk.f32.mxu1 %vm9545_vm4, %v9546_v45 }
 0x88a   : > { %9026 = vmatprep.subr.bf16.mxu1 %v9544_v32 }
 0x88d   : > { %9028 = vmatpush3.bf16.msra.mxu1 %v9027_v37  ;;  %v2369_v41 = vpop.f32.mrb[40].mxu0 }
 0x88e   : > { %v2370_v50 = vadd.f32 %v7145_v38, %v2369_v41  ;;  %v8236_v44 = vpop.f32.mrb[41].mxu0 }
 0x890   : > { %8260 = vmatmul.mubr.msk.f32.vlgmr.msra.gmra.mrb[38].mxu1 %vm888_vm2, %v9827_v11  ;;  %7163 = vst.msk [vmem:[%s11405_s3 + $0x30] sm:$0xff] (!%p7051_p5), %vm1251_vm7, %v2370_v50 }
 0x891   : > { %8262 = vmatprep.mubr.msk.f32.mxu1 %vm9545_vm4, %v9546_v45  ;;  %v2374_v52 = vpop.f32.mrb[42].mxu0 }
 0x892   : > { %v2375_v53 = vadd.f32 %v7145_v38, %v2374_v52  ;;  %v8239_v13 = vpop.f32.mrb[43].mxu0 }
 0x894   : > { %8263 = vmatmul.mubr.msk.f32.gmra.mrb[40].mxu1 %vm888_vm2, %v9842_v17  ;;  %7164 = vst.msk [vmem:[%s11405_s3 + $0x38] sm:$0xff] (!%p7051_p5), %vm1251_vm7, %v2375_v53 }
 0x895   : > { %8265 = vmatprep.mubr.msk.f32.mxu1 %vm9545_vm4, %v9546_v45  ;;  %v2379_v14 = vpop.f32.mrb[44].mxu0 }
 0x896   : > { %v2380_v47 = vadd.f32 %v7145_v38, %v2379_v14  ;;  %v8242_v54 = vpop.f32.mrb[45].mxu0 }
 0x898   : > { %8266 = vmatmul.mubr.msk.f32.gmra.mrb[42].mxu1 %vm888_vm2, %v9855_v23  ;;  %7165 = vst.msk [vmem:[%s11405_s3 + $0x40] sm:$0x1] (!%p7051_p5), %vm2486_vm13, %v2380_v47 }
 0x943   : > { %v2086_v55 = vpop.f32.mrb[26].mxu1 }
 0x944   : > { %v10196_v56 = vadd.f32 %v2175_v39, %v2086_v55  ;;  %v8173_v49 = vpop.f32.mrb[27].mxu1 }
 0x947   : > { %v2091_v51 = vpop.f32.mrb[28].mxu1 }
 0x948   : > { %v10198_v57 = vadd.f32 %v2180_v42, %v2091_v51  ;;  %v8176_v58 = vpop.f32.mrb[29].mxu1 }
 0x94b   : > { %v2096_v59 = vpop.f32.mrb[30].mxu1 }
 0x94c   : > { %v10200_v61 = vadd.f32 %v2185_v46, %v2096_v59  ;;  %v8179_v62 = vpop.f32.mrb[31].mxu1 }
 0x953   : > { %v2272_v0 = vpop.f32.mrb[32].mxu1 }
 0x954   : > { %v2273_v1 = vadd.f32 %v7132_v63, %v2272_v0  ;;  %v8211_v2 = vpop.f32.mrb[33].mxu1 }
 0x957   : > { %v2277_v3 = vpop.f32.mrb[34].mxu1 }
 0x958   : > { %v2278_v4 = vadd.f32 %v7132_v63, %v2277_v3  ;;  %v8214_v5 = vpop.f32.mrb[35].mxu1 }
 0x95b   : > { %v2282_v9 = vpop.f32.mrb[36].mxu1 }
 0x95c   : > { %v2283_v10 = vadd.f32 %v7132_v63, %v2282_v9  ;;  %v8217_v12 = vpop.f32.mrb[37].mxu1 }
 0x963   : > { %v2466_v16 = vpop.f32.mrb[38].mxu1 }
 0x964   : > { %v10204_v18 = vadd.f32 %v7158_v15, %v2466_v16  ;;  %v8261_v19 = vpop.f32.mrb[39].mxu1 }
 0x966   : > { %2482 = sbr.rel (%p7051_p5) target bundleno = 2413 (0x96d), region = 112 }
 0x967   : > { %v2471_v20 = vpop.f32.mrb[40].mxu1 }
 0x968   : > { %v10206_v21 = vadd.f32 %v7158_v15, %v2471_v20  ;;  %v8264_v22 = vpop.f32.mrb[41].mxu1 }
 0x96b   : > { %v2476_v24 = vpop.f32.mrb[42].mxu1 }
 0x96c   : > { %v2477_v25 = vadd.f32 %v7158_v15, %v2476_v24  ;;  %v8267_v26 = vpop.f32.mrb[43].mxu1 }
 0x96d PF: > { %9029 = vmatprep.subr.bf16.mxu0 %v9544_v32  ;;  %v9030_v27 = vpack.c.bf16 %v2375_v53, %v2370_v50  ;;  %8274 = vmatprep.mubr.msk.f32.mxu0 %vm9545_vm4, %v9546_v45  ;;  %v9034_v51 = vpack.c.bf16 %v10206_v21, %v10204_v18  ;;  %v7176_v58 = vld [vmem:[%s9712_s27 + $0x20] sm:$0xff]  ;;  %v7177_v59 = vld [vmem:[%s9712_s27 + $0x28] sm:$0xff]  ;;  %v7184_v12 = vld [vmem:[%s9677_s19 + $0xd8] sm:$0xff]  ;;  %s11407_s29 = sld [smem:[#allocation23_spill]] (!%p7051_p5)  ;;  %vm3106_vm14 = vcmask (!%p7051_p5), 122880  }
 0x96e   : > { %9033 = vmatprep.subr.bf16.mxu1 %v9544_v32  ;;  %8289 = vmatprep.mubr.msk.f32.mxu1 %vm9545_vm4, %v9546_v45  ;;  %v9037_v62 = vpack.c.bf16 %v7177_v59, %v7176_v58  ;;  %v7181_v2 = vld [vmem:[%s9677_s19 + $0xc0] sm:$0xff]  ;;  %v7182_v3 = vld [vmem:[%s9677_s19 + $0xc8] sm:$0xff]  ;;  %v7188_v26 = vld [vmem:[%s9677_s19 + $0xf8] sm:$0xff] }
 0x96f   : > { %9032 = vmatpush3.bf16.xpose.msk.msra.mxu0 %vm9902_vm8, %v9030_v27  ;;  %9035 = vmatpush3.bf16.msra.mxu1 %v9034_v51  ;;  %v9040_v5 = vpack.c.bf16 %v7182_v3, %v7181_v2  ;;  %v7185_v19 = vld [vmem:[%s9677_s19 + $0xe0] sm:$0xff]  ;;  %v7186_v20 = vld [vmem:[%s9677_s19 + $0xe8] sm:$0xff] }
 0x970   : > { %8272 = vmatprep.subr.mxu0 %v9546_v45  ;;  %8287 = vmatprep.subr.mxu1 %v9546_v45  ;;  %v9046_v22 = vpack.c.bf16 %v7186_v20, %v7185_v19 }
 0x973   : > { %8288 = vmatpush3.msk.msra.mxu1 %vm1397_vm11, %v2477_v25  ;;  %v7187_v25 = vld [vmem:[%s9677_s19 + $0xf0] sm:$0xff] }
 0x974   : > { %9039 = vmatprep.subr.bf16.mxu1 %v9544_v32  ;;  %v9049_v27 = vpack.c.bf16 %v7188_v26, %v7187_v25 }
 0x977   : > { %8273 = vmatpush3.xpose.msk.msra.mxu0 %vm1251_vm7, %v2380_v47 }
 0x978   : > { %9036 = vmatprep.subr.bf16.mxu0 %v9544_v32 }
 0x97a   : > { %8275 = vmatmul.mubr.msk.f32.vlgmr.msra.gmra.mrb[46].mxu0 %vm1251_vm7, %v2273_v1 }
 0x97b   : > { %8277 = vmatprep.mubr.msk.f32.mxu0 %vm9545_vm4, %v9546_v45  ;;  %9038 = vmatpush3.bf16.msra.mxu0 %v9037_v62  ;;  %v7190_v62 = vld [vmem:[%s9682_s22 + $0x3] ss:$0 sm:$0xff] }
 0x97c   : > { %9051 = vmatprep.subr.bf16.mxu0 %v9544_v32 }
 0x97e   : > { %8278 = vmatmul.mubr.msk.f32.gmra.mrb[48].mxu0 %vm1251_vm7, %v2278_v4 }
 0x97f   : > { %8280 = vmatprep.mubr.msk.f32.mxu0 %vm9545_vm4, %v9546_v45 }
 0x982   : > { %8281 = vmatmul.mubr.msk.f32.gmra.mrb[50].mxu0 %vm1251_vm7, %v2283_v10  ;;  %v7183_v10 = vld [vmem:[%s9677_s19 + $0xd0] sm:$0xff] }
 0x983   : > { %8302 = vmatprep.mubr.msk.f32.mxu0 %vm9545_vm4, %v9546_v45  ;;  %v9043_v16 = vpack.c.bf16 %v7184_v12, %v7183_v10  ;;  %v7216_v10 = vld [vmem:[%s9702_s17 + $0x3] ss:$0 sm:$0xff] }
 0xa4d   : > { %v2572_v28 = vpop.f32.mrb[46].mxu0 }
 0xa4e   : > { %v2586_v29 = vmul.f32 0.25, %v2572_v28  ;;  %v8276_v30 = vpop.f32.mrb[47].mxu0  ;;  %v7207_v28 = vld [vmem:[%s9697_s1 + $0xc0] sm:$0xff] }
 0xa50   : > { %v2589_v31 = vsel %vm1353_vm9, %v2586_v29, -inf }
 0xa51   : > { %2590 = vmax.xlane.f32.xlu0 %v2589_v31  ;;  %v2577_v33 = vpop.f32.mrb[48].mxu0  ;;  %v7209_v31 = vld [vmem:[%s9697_s1 + $0xd0] sm:$0xff] }
 0xa52   : > { %v2587_v34 = vmul.f32 0.25, %v2577_v33  ;;  %v8279_v35 = vpop.f32.mrb[49].mxu0  ;;  %v7210_v33 = vld [vmem:[%s9697_s1 + $0xd8] sm:$0xff] }
 0xa53   : > { %v7211_v35 = vld [vmem:[%s9697_s1 + $0xe0] sm:$0xff] }
 0xa54   : > { %v2592_v36 = vsel %vm1353_vm9, %v2587_v34, -inf }
 0xa55   : > { %2593 = vmax.xlane.f32.xlu0 %v2592_v36  ;;  %v2582_v37 = vpop.f32.mrb[50].mxu0  ;;  %v7212_v36 = vld [vmem:[%s9697_s1 + $0xe8] sm:$0xff] }
 0xa56   : > { %v2588_v39 = vmul.f32 0.25, %v2582_v37  ;;  %v8282_v40 = vpop.f32.mrb[51].mxu0  ;;  %v9070_v37 = vpack.c.bf16 %v7212_v36, %v7211_v35 }
 0xa57   : > { %v7214_v40 = vld [vmem:[%s9697_s1 + $0xf8] sm:$0xff] }
 0xa58   : > { %v2595_v42 = vsel %vm1360_vm10, %v2588_v39, -inf }
 0xa59   : > { %2596 = vmax.xlane.f32.xlu1 %v2595_v42 }
 0xade   : > { %v2591_v43 = vpop.xlane.xlu0 %2590 }
 0xadf   : > { %v2598_v46 = vsub.f32 %v2586_v29, %v2591_v43  ;;  %v7208_v29 = vld [vmem:[%s9697_s1 + $0xc8] sm:$0xff]  ;;  %v7194_v43 = vld [vmem:[%s9687_s25 + $0xc0] sm:$0xff] }
 0xae0   : > { %v9064_v30 = vpack.c.bf16 %v7208_v29, %v7207_v28 }
 0xae1   : > { %v2601_v48 = vmul.f32 1.442695, %v2598_v46  ;;  %v7195_v46 = vld [vmem:[%s9687_s25 + $0xc8] sm:$0xff] }
 0xae2   : > { %v2594_v38 = vpop.xlane.xlu0 %2593 }
 0xae3   : > { %9410 = vpow2.f32 %v2601_v48  ;;  %v2599_v41 = vsub.f32 %v2587_v34, %v2594_v38  ;;  %v9067_v34 = vpack.c.bf16 %v7210_v33, %v7209_v31  ;;  %v9052_v48 = vpack.c.bf16 %v7195_v46, %v7194_v43  ;;  %v7196_v38 = vld [vmem:[%s9687_s25 + $0xd0] sm:$0xff]  ;;  %v7203_v33 = vld [vmem:[%s9692_s28 + $0x3] ss:$0 sm:$0xff] }
 0xae5   : > { %v2603_v50 = vmul.f32 1.442695, %v2599_v41  ;;  %v7197_v41 = vld [vmem:[%s9687_s25 + $0xd8] sm:$0xff] }
 0xae6   : > { %v2597_v44 = vpop.xlane.xlu1 %2596 }
 0xae7   : > { %9412 = vpow2.f32 %v2603_v50  ;;  %v2600_v52 = vsub.f32 %v2588_v39, %v2597_v44  ;;  %v7213_v39 = vld [vmem:[%s9697_s1 + $0xf0] sm:$0xff] }
 0xae8   : > { %v9073_v42 = vpack.c.bf16 %v7214_v40, %v7213_v39 }
 0xae9   : > { %v2605_v53 = vmul.f32 1.442695, %v2600_v52  ;;  %v9055_v52 = vpack.c.bf16 %v7197_v41, %v7196_v38 }
 0xaeb   : > { %9414 = vpow2.f32 %v2605_v53  ;;  %v7198_v53 = vld [vmem:[%s9687_s25 + $0xe0] sm:$0xff] }
 0xaed   : > { %v9411_v13 = vpop.eup %9410 }
 0xaee   : > { %v2607_v14 = vsel %vm1353_vm9, %v9411_v13, 0.0 }
 0xaef   : > { %2608 = vadd.xlane.f32.xlu1 %v2607_v14 }
 0xaf1   : > { %v9413_v47 = vpop.eup %9412 }
 0xaf2   : > { %v2610_v54 = vsel %vm1353_vm9, %v9413_v47, 0.0 }
 0xaf3   : > { %2611 = vadd.xlane.f32.xlu0 %v2610_v54 }
 0xaf5   : > { %v9415_v55 = vpop.eup %9414 }
 0xaf6   : > { %v2613_v49 = vsel %vm1360_vm10, %v9415_v55, 0.0 }
 0xaf7   : > { %2614 = vadd.xlane.f32.xlu1 %v2613_v49  ;;  %v7201_v49 = vld [vmem:[%s9687_s25 + $0xf8] sm:$0xff] }
 0xb7c   : > { %v2609_v63 = vpop.xlane.xlu1 %2608 }
 0xb7d   : > { %9416 = vrcp.f32 %v2609_v63 }
 0xb80   : > { %v2612_v0 = vpop.xlane.xlu0 %2611 }
 0xb81   : > { %9418 = vrcp.f32 %v2612_v0 }
 0xb84   : > { %v2615_v1 = vpop.xlane.xlu1 %2614 }
 0xb85   : > { %9420 = vrcp.f32 %v2615_v1 }
 0xb87   : > { %v9417_v4 = vpop.eup %9416 }
 0xb88   : > { %v2617_v9 = vmul.f32 %v9417_v4, %v9411_v13  ;;  %v7199_v13 = vld [vmem:[%s9687_s25 + $0xe8] sm:$0xff] }
 0xb89   : > { %v9058_v54 = vpack.c.bf16 %v7199_v13, %v7198_v53 }
 0xb8a   : > { %8290 = vmatmul.mubr.msk.f32.vlgmr.msra.gmra.mrb[44].mxu1 %vm1353_vm9, %v2617_v9 }
 0xb8b   : > { %v9419_v15 = vpop.eup %9418  ;;  %8292 = vmatprep.mubr.msk.f32.mxu1 %vm9545_vm4, %v9546_v45  ;;  %9041 = vmatpush3.bf16.msra.mxu1 %v9040_v5 }
 0xb8c   : > { %v2619_v18 = vmul.f32 %v9419_v15, %v9413_v47  ;;  %9042 = vmatprep.subr.bf16.mxu1 %v9544_v32 }
 0xb8e   : > { %8293 = vmatmul.mubr.msk.f32.gmra.mrb[46].mxu1 %vm1353_vm9, %v2619_v18 }
 0xb8f   : > { %v9421_v21 = vpop.eup %9420  ;;  %8295 = vmatprep.mubr.msk.f32.mxu1 %vm9545_vm4, %v9546_v45  ;;  %9044 = vmatpush3.bf16.msra.mxu1 %v9043_v16 }
 0xb90   : > { %v2621_v24 = vmul.f32 %v9421_v21, %v9415_v55  ;;  %9045 = vmatprep.subr.bf16.mxu1 %v9544_v32  ;;  %v7200_v55 = vld [vmem:[%s9687_s25 + $0xf0] sm:$0xff] }
 0xb91   : > { %v9061_v59 = vpack.c.bf16 %v7201_v49, %v7200_v55 }
 0xb92   : > { %8296 = vmatmul.mubr.msk.f32.gmra.mrb[48].mxu1 %vm1353_vm9, %v2621_v24 }
 0xb93   : > { %9047 = vmatpush3.bf16.msra.mxu1 %v9046_v22  ;;  %8327 = vmatprep.mubr.msk.f32.mxu1 %vm9545_vm4, %v9546_v45 }
 0xb94   : > { %9048 = vmatprep.subr.bf16.mxu1 %v9544_v32 }
 0xb97   : > { %9050 = vmatpush3.bf16.msra.mxu1 %v9049_v27 }
 0xb98   : > { %9063 = vmatprep.subr.bf16.mxu1 %v9544_v32 }
 0xb9a   : > { %8328 = vmatmul.mubr.msk.f32.vlgmr.msra.gmra.mrb[50].mxu1 %vm888_vm2, %v9827_v11 }
 0xb9b   : > { %8330 = vmatprep.mubr.msk.f32.mxu1 %vm9545_vm4, %v9546_v45  ;;  %9065 = vmatpush3.bf16.msra.mxu1 %v9064_v30 }
 0xb9c   : > { %9066 = vmatprep.subr.bf16.mxu1 %v9544_v32 }
 0xb9e   : > { %8331 = vmatmul.mubr.msk.f32.gmra.mrb[52].mxu1 %vm888_vm2, %v9842_v17 }
 0xb9f   : > { %8333 = vmatprep.mubr.msk.f32.mxu1 %vm9545_vm4, %v9546_v45  ;;  %9068 = vmatpush3.bf16.msra.mxu1 %v9067_v34 }
 0xba0   : > { %9069 = vmatprep.subr.bf16.mxu1 %v9544_v32 }
 0xba2   : > { %8334 = vmatmul.mubr.msk.f32.gmra.mrb[54].mxu1 %vm888_vm2, %v9855_v23 }
 0xba3   : > { %8377 = vmatprep.mubr.msk.f32.mxu1 %vm9545_vm4, %v9546_v45  ;;  %9071 = vmatpush3.bf16.msra.mxu1 %v9070_v37 }
 0xba4   : > { %9072 = vmatprep.subr.bf16.mxu1 %v9544_v32 }
 0xba7   : > { %9074 = vmatpush3.bf16.msra.mxu1 %v9073_v42 }
 0xbaa   : > { %8378 = vmatmul.mubr.msk.f32.vlgmr.msra.gmra.mrb[56].mxu1 %vm888_vm2, %v9827_v11 }
 0xbab   : > { %8380 = vmatprep.mubr.msk.f32.mxu1 %vm9545_vm4, %v9546_v45 }
 0xbae   : > { %8381 = vmatmul.mubr.msk.f32.gmra.mrb[58].mxu1 %vm888_vm2, %v9842_v17 }
 0xbaf   : > { %8383 = vmatprep.mubr.msk.f32.mxu1 %vm9545_vm4, %v9546_v45 }
 0xbb2   : > { %8384 = vmatmul.mubr.msk.f32.gmra.mrb[60].mxu1 %vm888_vm2, %v9855_v23 }
 0xc5d   : > { %v2700_v50 = vpop.f32.mrb[44].mxu1 }
 0xc5e   : > { %v8291_v44 = vpop.f32.mrb[45].mxu1  ;;  %8303 = vmatmul.mubr.msk.f32.vlgmr.msra.gmra.mrb[52].mxu0 %vm1251_vm7, %v2700_v50 }
 0xc5f   : > { %9053 = vmatpush3.bf16.msra.mxu0 %v9052_v48  ;;  %8305 = vmatprep.mubr.msk.f32.mxu0 %vm9545_vm4, %v9546_v45 }
 0xc60   : > { %9054 = vmatprep.subr.bf16.mxu0 %v9544_v32 }
 0xc61   : > { %v2705_v14 = vpop.f32.mrb[46].mxu1 }
 0xc62   : > { %v8294_v47 = vpop.f32.mrb[47].mxu1  ;;  %8306 = vmatmul.mubr.msk.f32.gmra.mrb[54].mxu0 %vm1251_vm7, %v2705_v14 }
 0xc63   : > { %9056 = vmatpush3.bf16.msra.mxu0 %v9055_v52  ;;  %8308 = vmatprep.mubr.msk.f32.mxu0 %vm9545_vm4, %v9546_v45 }
 0xc64   : > { %9057 = vmatprep.subr.bf16.mxu0 %v9544_v32 }
 0xc65   : > { %v2710_v51 = vpop.f32.mrb[48].mxu1 }
 0xc66   : > { %v8297_v58 = vpop.f32.mrb[49].mxu1  ;;  %8309 = vmatmul.mubr.msk.f32.gmra.mrb[56].mxu0 %vm1251_vm7, %v2710_v51 }
 0xc67   : > { %9059 = vmatpush3.bf16.msra.mxu0 %v9058_v54  ;;  %8352 = vmatprep.mubr.msk.f32.mxu0 %vm9545_vm4, %v9546_v45 }
 0xc68   : > { %9060 = vmatprep.subr.bf16.mxu0 %v9544_v32 }
 0xc6b   : > { %9062 = vmatpush3.bf16.msra.mxu0 %v9061_v59 }
 0xc6d   : > { %v2892_v63 = vpop.f32.mrb[50].mxu1 }
 0xc6e   : > { %8353 = vmatmul.mubr.msk.f32.vlgmr.msra.gmra.mrb[58].mxu0 %vm888_vm2, %v9827_v11  ;;  %v2893_v0 = vadd.f32 %v7190_v62, %v2892_v63  ;;  %v8329_v1 = vpop.f32.mrb[51].mxu1 }
 0xc6f   : > { %8355 = vmatprep.mubr.msk.f32.mxu0 %vm9545_vm4, %v9546_v45 }
 0xc71   : > { %v2897_v2 = vpop.f32.mrb[52].mxu1 }
 0xc72   : > { %8356 = vmatmul.mubr.msk.f32.gmra.mrb[60].mxu0 %vm888_vm2, %v9842_v17  ;;  %v2898_v3 = vadd.f32 %v7190_v62, %v2897_v2  ;;  %v8332_v4 = vpop.f32.mrb[53].mxu1 }
 0xc73   : > { %8358 = vmatprep.mubr.msk.f32.mxu0 %vm9545_vm4, %v9546_v45 }
 0xc75   : > { %v2902_v5 = vpop.f32.mrb[54].mxu1 }
 0xc76   : > { %8359 = vmatmul.mubr.msk.f32.gmra.mrb[62].mxu0 %vm888_vm2, %v9855_v23  ;;  %v2903_v9 = vadd.f32 %v7190_v62, %v2902_v5  ;;  %v8335_v11 = vpop.f32.mrb[55].mxu1 }
 0xc7d   : > { %v3086_v12 = vpop.f32.mrb[56].mxu1 }
 0xc7e   : > { %v10341_v15 = vadd.f32 %v7216_v10, %v3086_v12  ;;  %v8379_v16 = vpop.f32.mrb[57].mxu1 }
 0xc81   : > { %v3091_v18 = vpop.f32.mrb[58].mxu1 }
 0xc82   : > { %v10343_v17 = vadd.f32 %v7216_v10, %v3091_v18  ;;  %v8382_v19 = vpop.f32.mrb[59].mxu1 }
 0xc85   : > { %v3096_v20 = vpop.f32.mrb[60].mxu1 }
 0xc86   : > { %v10345_v21 = vadd.f32 %v7216_v10, %v3096_v20  ;;  %v8385_v23 = vpop.f32.mrb[61].mxu1 }
 0xd31   : > { %v2792_v22 = vpop.f32.mrb[52].mxu0 }
 0xd32   : > { %v10348_v24 = vadd.f32 %v2792_v22, %v10196_v56  ;;  %v8304_v25 = vpop.f32.mrb[53].mxu0 }
 0xd35   : > { %v2797_v26 = vpop.f32.mrb[54].mxu0 }
 0xd36   : > { %v10351_v27 = vadd.f32 %v2797_v26, %v10198_v57  ;;  %v8307_v28 = vpop.f32.mrb[55].mxu0 }
 0xd39   : > { %v2802_v29 = vpop.f32.mrb[56].mxu0 }
 0xd3a   : > { %v10354_v30 = vadd.f32 %v2802_v29, %v10200_v61  ;;  %v8310_v31 = vpop.f32.mrb[57].mxu0 }
 0xd41   : > { %v2989_v34 = vpop.f32.mrb[58].mxu0 }
 0xd42   : > { %v2990_v35 = vadd.f32 %v7203_v33, %v2989_v34  ;;  %v8354_v36 = vpop.f32.mrb[59].mxu0 }
 0xd44   : > { %3102 = sbr.rel (%p7051_p5) target bundleno = 3405 (0xd4d), region = 116  ;;  %7221 = vst.msk [vmem:[%s11407_s29 + $0x48] sm:$0xff] (!%p7051_p5), %vm1251_vm7, %v2990_v35 }
 0xd45   : > { %v2994_v37 = vpop.f32.mrb[60].mxu0 }
 0xd46   : > { %v2995_v39 = vadd.f32 %v7203_v33, %v2994_v37  ;;  %v8357_v40 = vpop.f32.mrb[61].mxu0 }
 0xd48   : > { %7222 = vst.msk [vmem:[%s11407_s29 + $0x50] sm:$0xff] (!%p7051_p5), %vm1251_vm7, %v2995_v39 }
 0xd49   : > { %v2999_v56 = vpop.f32.mrb[62].mxu0 }
 0xd4a   : > { %v3000_v42 = vadd.f32 %v7203_v33, %v2999_v56  ;;  %v8360_v43 = vpop.f32.mrb[63].mxu0 }
 0xd4c   : > { %7223 = vst.msk [vmem:[%s11407_s29 + $0x58] sm:$0x1] %vm3106_vm14, %v3000_v42 }
 0xd4d PF: > { %9075 = vmatprep.subr.bf16.mxu0 %v9544_v32  ;;  %v9076_v57 = vpack.c.bf16 %v2995_v39, %v2990_v35  ;;  %8392 = vmatprep.mubr.msk.f32.mxu0 %vm9545_vm4, %v9546_v45  ;;  %v9080_v11 = vpack.c.bf16 %v10343_v17, %v10341_v15  ;;  %v7234_v10 = vld [vmem:[%s9712_s27 + $0x30] sm:$0xff]  ;;  %v7235_v12 = vld [vmem:[%s9712_s27 + $0x38] sm:$0xff]  ;;  %v7239_v39 = vld [vmem:[%s9707_s2] ss:$0 sm:$0xff]  ;;  %s11409_s21 = sld [smem:[#allocation20_spill]] (!%p7051_p5)  ;;  %s11410_s18 = sld [smem:[#allocation21_spill]] (!%p7051_p5) }
 0xd4e   : > { %9082 = vmatprep.subr.bf16.mxu1 %v9544_v32  ;;  %8420 = vmatprep.mubr.msk.f32.mxu1 %vm9545_vm4, %v9546_v45  ;;  %v9083_v16 = vpack.c.bf16 %v7235_v12, %v7234_v10  ;;  %v3505_v10 = vld [vmem:[%s9727_s24 + $0x20] sm:$0xff]  ;;  %v3507_v12 = vld [vmem:[%s9727_s24 + $0x30] sm:$0xff]  ;;  %s11411_s12 = sld [smem:[#allocation22_spill]] (!%p7051_p5) }
 0xd4f   : > { %9078 = vmatpush3.bf16.xpose.msk.msra.mxu0 %vm9902_vm8, %v9076_v57 }
 0xd50   : > { %8390 = vmatprep.subr.mxu0 %v9546_v45  ;;  %9084 = vmatpush3.bf16.msra.mxu1 %v9083_v16  ;;  %v9091_v16 = vpack.c.bf16 %v3507_v12, %v3505_v10  ;;  %v3681_v12 = vld [vmem:[%s9737_s9 + $0x30] sm:$0xff] }
 0xd57   : > { %8391 = vmatpush3.xpose.msk.msra.mxu0 %vm1251_vm7, %v3000_v42 }
 0xd58   : > { %9079 = vmatprep.subr.bf16.mxu0 %v9544_v32 }
 0xd5a   : > { %8393 = vmatmul.mubr.msk.f32.vlgmr.msra.gmra.mrb[64].mxu0 %vm1251_vm7, %v2893_v0 }
 0xd5b   : > { %8395 = vmatprep.mubr.msk.f32.mxu0 %vm9545_vm4, %v9546_v45  ;;  %9081 = vmatpush3.bf16.msra.mxu0 %v9080_v11 }
 0xd5c   : > { %8405 = vmatprep.subr.mxu0 %v9546_v45 }
 0xd5e   : > { %8396 = vmatmul.mubr.msk.f32.gmra.mrb[66].mxu0 %vm1251_vm7, %v2898_v3 }
 0xd5f   : > { %8398 = vmatprep.mubr.msk.f32.mxu0 %vm9545_vm4, %v9546_v45  ;;  %8406 = vmatpush3.msk.msra.mxu0 %vm1397_vm11, %v10345_v21 }
 0xd62   : > { %8399 = vmatmul.mubr.msk.f32.gmra.mrb[68].mxu0 %vm1251_vm7, %v2903_v9 }
 0xd63   : > { %8407 = vmatprep.mubr.msk.f32.mxu0 %vm9545_vm4, %v9546_v45 }
 0xe2d   : > { %v3192_v61 = vpop.f32.mrb[64].mxu0 }
 0xe2e   : > { %v3206_v46 = vmul.f32 0.25, %v3192_v61  ;;  %v8394_v48 = vpop.f32.mrb[65].mxu0 }
 0xe30   : > { %v3209_v38 = vsel %vm1353_vm9, %v3206_v46, -inf }
 0xe31   : > { %3210 = vmax.xlane.f32.xlu0 %v3209_v38  ;;  %v3197_v41 = vpop.f32.mrb[66].mxu0 }
 0xe32   : > { %v3207_v50 = vmul.f32 0.25, %v3197_v41  ;;  %v8397_v44 = vpop.f32.mrb[67].mxu0 }
 0xe34   : > { %v3212_v52 = vsel %vm1353_vm9, %v3207_v50, -inf }
 0xe35   : > { %3213 = vmax.xlane.f32.xlu0 %v3212_v52  ;;  %v3202_v53 = vpop.f32.mrb[68].mxu0 }
 0xe36   : > { %v3208_v13 = vmul.f32 0.25, %v3202_v53  ;;  %v8400_v14 = vpop.f32.mrb[69].mxu0 }
 0xe38   : > { %v3215_v47 = vsel %vm1360_vm10, %v3208_v13, -inf }
 0xe39   : > { %3216 = vmax.xlane.f32.xlu1 %v3215_v47 }
 0xebe   : > { %v3211_v54 = vpop.xlane.xlu0 %3210 }
 0xebf   : > { %v3218_v55 = vsub.f32 %v3206_v46, %v3211_v54 }
 0xec1   : > { %v3221_v49 = vmul.f32 1.442695, %v3218_v55 }
 0xec2   : > { %v3214_v51 = vpop.xlane.xlu0 %3213 }
 0xec3   : > { %9422 = vpow2.f32 %v3221_v49  ;;  %v3219_v58 = vsub.f32 %v3207_v50, %v3214_v51 }
 0xec5   : > { %v3223_v59 = vmul.f32 1.442695, %v3219_v58 }
 0xec6   : > { %v3217_v62 = vpop.xlane.xlu1 %3216 }
 0xec7   : > { %9424 = vpow2.f32 %v3223_v59  ;;  %v3220_v63 = vsub.f32 %v3208_v13, %v3217_v62 }
 0xec9   : > { %v3225_v0 = vmul.f32 1.442695, %v3220_v63  ;;  %v3502_v63 = vld [vmem:[%s9727_s24 + $0x8] sm:$0xff] }
 0xecb   : > { %9426 = vpow2.f32 %v3225_v0  ;;  %v3504_v0 = vld [vmem:[%s9727_s24 + $0x18] sm:$0xff] }
 0xecd   : > { %v9423_v1 = vpop.eup %9422 }
 0xece   : > { %v3227_v2 = vsel %vm1353_vm9, %v9423_v1, 0.0 }
 0xecf   : > { %3228 = vadd.xlane.f32.xlu1 %v3227_v2  ;;  %v3501_v2 = vld [vmem:[%s9727_s24] sm:$0xff] }
 0xed1   : > { %v9425_v3 = vpop.eup %9424 }
 0xed2   : > { %v3230_v4 = vsel %vm1353_vm9, %v9425_v3, 0.0 }
 0xed3   : > { %3231 = vadd.xlane.f32.xlu0 %v3230_v4 }
 0xed5   : > { %v9427_v5 = vpop.eup %9426 }
 0xed6   : > { %v3233_v9 = vsel %vm1360_vm10, %v9427_v5, 0.0 }
 0xed7   : > { %3234 = vadd.xlane.f32.xlu1 %v3233_v9  ;;  %v3508_v9 = vld [vmem:[%s9727_s24 + $0x38] sm:$0xff] }
 0xf5c   : > { %v3229_v18 = vpop.xlane.xlu1 %3228 }
 0xf5d   : > { %9428 = vrcp.f32 %v3229_v18  ;;  %v3510_v18 = vld [vmem:[%s9727_s24 + $0x48] sm:$0xff] }
 0xf60   : > { %v3232_v19 = vpop.xlane.xlu0 %3231 }
 0xf61   : > { %9430 = vrcp.f32 %v3232_v19  ;;  %v3512_v19 = vld [vmem:[%s9727_s24 + $0x58] sm:$0xff] }
 0xf64   : > { %v3235_v20 = vpop.xlane.xlu1 %3234 }
 0xf65   : > { %9432 = vrcp.f32 %v3235_v20  ;;  %v9093_v20 = vpack.c.bf16 %v3512_v19, %v3510_v18  ;;  %v3699_v19 = vld [vmem:[%s9737_s9 + $0xc0] sm:$0xff] }
 0xf67   : > { %v9429_v23 = vpop.eup %9428 }
 0xf68   : > { %v3237_v22 = vmul.f32 %v9429_v23, %v9423_v1  ;;  %v9085_v1 = vpack.c.bf16 %v3504_v0, %v3502_v63  ;;  %v3509_v23 = vld [vmem:[%s9727_s24 + $0x40] sm:$0xff] }
 0xf69   : > { %v3695_v0 = vld [vmem:[%s9737_s9 + $0xa0] sm:$0xff] }
 0xf6a   : > { %8408 = vmatmul.mubr.msk.f32.vlgmr.msra.gmra.mrb[70].mxu0 %vm1353_vm9, %v3237_v22  ;;  %9086 = vmatprep.subr.bf16.mxu0 %v9085_v1  ;;  %v3511_v22 = vld [vmem:[%s9727_s24 + $0x50] sm:$0xff]  ;;  %v3696_v1 = vld [vmem:[%s9737_s9 + $0xa8] sm:$0xff] }
 0xf6b   : > { %v9431_v15 = vpop.eup %9430  ;;  %8410 = vmatprep.mubr.msk.f32.mxu0 %vm9545_vm4, %v9546_v45 }
 0xf6c   : > { %v3239_v17 = vmul.f32 %v9431_v15, %v9425_v3  ;;  %v3503_v3 = vld [vmem:[%s9727_s24 + $0x10] sm:$0xff]  ;;  %v9095_v15 = vpack.c.bf16 %v3511_v22, %v3509_v23  ;;  %v3683_v22 = vld [vmem:[%s9737_s9 + $0x40] sm:$0xff] }
 0xf6d   : > { %v9087_v4 = vpack.c.bf16 %v3503_v3, %v3501_v2  ;;  %v9109_v2 = vpack.c.bf16 %v3696_v1, %v3695_v0  ;;  %v3679_v3 = vld [vmem:[%s9737_s9 + $0x20] sm:$0xff] }
 0xf6e   : > { %8411 = vmatmul.mubr.msk.f32.gmra.mrb[72].mxu0 %vm1353_vm9, %v3239_v17  ;;  %v3514_v17 = vld [vmem:[%s9727_s24 + $0x68] sm:$0xff] }
 0xf6f   : > { %v9433_v21 = vpop.eup %9432  ;;  %8413 = vmatprep.mubr.msk.f32.mxu0 %vm9545_vm4, %v9546_v45  ;;  %9088 = vmatpush1.bf16.msra.mxu0 %v9087_v4  ;;  %v3680_v4 = vld [vmem:[%s9737_s9 + $0x28] sm:$0xff] }
 0xf70   : > { %v3241_v25 = vmul.f32 %v9433_v21, %v9427_v5  ;;  %v3506_v5 = vld [vmem:[%s9727_s24 + $0x28] sm:$0xff]  ;;  %v3516_v21 = vld [vmem:[%s9727_s24 + $0x78] sm:$0xff] }
 0xf71   : > { %v9089_v11 = vpack.c.bf16 %v3508_v9, %v3506_v5  ;;  %v9111_v5 = vpack.c.bf16 %v3680_v4, %v3679_v3  ;;  %v3697_v9 = vld [vmem:[%s9737_s9 + $0xb0] sm:$0xff] }
 0xf72   : > { %8414 = vmatmul.mubr.msk.f32.gmra.mrb[74].mxu0 %vm1353_vm9, %v3241_v25  ;;  %v9097_v25 = vpack.c.bf16 %v3516_v21, %v3514_v17  ;;  %v3701_v21 = vld [vmem:[%s9737_s9 + $0xd0] sm:$0xff] }
 0xf73   : > { %3602 = vmatprep.mubr.f32.mxu0 %v9546_v45  ;;  %9090 = vmatprep.subr.bf16.mxu0 %v9089_v11  ;;  %v3698_v11 = vld [vmem:[%s9737_s9 + $0xb8] sm:$0xff] }
 0xf74   : > { %9092 = vmatpush1.bf16.msra.mxu0 %v9091_v16  ;;  %v9113_v10 = vpack.c.bf16 %v3698_v11, %v3697_v9  ;;  %v3682_v16 = vld [vmem:[%s9737_s9 + $0x38] sm:$0xff] }
 0xf75   : > { %9094 = vmatprep.subr.bf16.mxu0 %v9093_v20  ;;  %v9115_v18 = vpack.c.bf16 %v3682_v16, %v3681_v12  ;;  %v3700_v20 = vld [vmem:[%s9737_s9 + $0xc8] sm:$0xff] }
 0xf76   : > { %v9117_v23 = vpack.c.bf16 %v3700_v20, %v3699_v19 }
 0xf78   : > { %9096 = vmatpush1.bf16.msra.mxu0 %v9095_v15  ;;  %v3684_v15 = vld [vmem:[%s9737_s9 + $0x48] sm:$0xff] }
 0xf79   : > { %9098 = vmatprep.subr.bf16.mxu0 %v9097_v25  ;;  %v9119_v17 = vpack.c.bf16 %v3684_v15, %v3683_v22  ;;  %v3702_v25 = vld [vmem:[%s9737_s9 + $0xd8] sm:$0xff] }
0x103d   : > { %v3320_v26 = vpop.f32.mrb[70].mxu0 }
0x103e   : > { %v8409_v28 = vpop.f32.mrb[71].mxu0  ;;  %8421 = vmatmul.mubr.msk.f32.vlgmr.msra.gmra.mrb[62].mxu1 %vm1251_vm7, %v3320_v26  ;;  %v3513_v26 = vld [vmem:[%s9727_s24 + $0x60] sm:$0xff] }
0x103f   : > { %8423 = vmatprep.mubr.msk.f32.mxu1 %vm9545_vm4, %v9546_v45  ;;  %v3515_v28 = vld [vmem:[%s9727_s24 + $0x70] sm:$0xff] }
0x1041   : > { %v3325_v29 = vpop.f32.mrb[72].mxu0 }
0x1042   : > { %v8412_v31 = vpop.f32.mrb[73].mxu0  ;;  %8424 = vmatmul.mubr.msk.f32.gmra.mrb[64].mxu1 %vm1251_vm7, %v3325_v29  ;;  %v9099_v29 = vpack.c.bf16 %v3515_v28, %v3513_v26  ;;  %v9121_v26 = vpack.c.bf16 %v3702_v25, %v3701_v21  ;;  %v3685_v28 = vld [vmem:[%s9737_s9 + $0x50] sm:$0xff] }
0x1043   : > { %8426 = vmatprep.mubr.msk.f32.mxu1 %vm9545_vm4, %v9546_v45 }
0x1044   : > { %9100 = vmatpush1.bf16.msra.mxu0 %v9099_v29  ;;  %v3686_v29 = vld [vmem:[%s9737_s9 + $0x58] sm:$0xff] }
0x1045   : > { %v3330_v33 = vpop.f32.mrb[74].mxu0 }
0x1046   : > { %v8415_v34 = vpop.f32.mrb[75].mxu0  ;;  %8427 = vmatmul.mubr.msk.f32.gmra.mrb[66].mxu1 %vm1251_vm7, %v3330_v33 }
0x1111   : > { %v3412_v35 = vpop.f32.mrb[62].mxu1 }
0x1112   : > { %v3426_v36 = vadd.f32 %v3412_v35, %v10348_v24  ;;  %v8422_v37 = vpop.f32.mrb[63].mxu1 }
0x1114   : > { %v3429_v40 = vadd.f32 %v3426_v36, %v9763_v6 }
0x1115   : > { %v3417_v56 = vpop.f32.mrb[64].mxu1 }
0x1116   : > { %v10421_v42 = vadd.f32 %v7239_v39, %v3429_v40  ;;  %v3427_v43 = vadd.f32 %v3417_v56, %v10351_v27  ;;  %v8425_v57 = vpop.f32.mrb[65].mxu1 }
0x1117   : > { %v7240_v57 = vld [vmem:[%s9717_s4] ss:$0 sm:$0xff] }
0x1118   : > { %v3430_v61 = vadd.f32 %v3427_v43, %v9767_v8  ;;  %v3444_v46 = vsel %vm888_vm2, %v10421_v42, 0.0 }
0x1119   : > { %3445 = vadd.xlane.f32.xlu0 %v3444_v46  ;;  %v3422_v48 = vpop.f32.mrb[66].mxu1  ;;  %v7241_v46 = vld [vmem:[%s9722_s30] ss:$0 sm:$0xff] }
0x111a   : > { %v10427_v38 = vadd.f32 %v7239_v39, %v3430_v61  ;;  %v3428_v24 = vadd.f32 %v3422_v48, %v10354_v30  ;;  %v8428_v41 = vpop.f32.mrb[67].mxu1 }
0x111c   : > { %v3431_v6 = vadd.f32 %v3428_v24, %v9765_v7  ;;  %v3447_v50 = vsel %vm888_vm2, %v10427_v38, 0.0 }
0x111d   : > { %3448 = vadd.xlane.f32.xlu1 %v3447_v50 }
0x111e   : > { %v10433_v27 = vadd.f32 %v7239_v39, %v3431_v6 }
0x1120   : > { %v3450_v8 = vsel %vm895_vm3, %v10433_v27, 0.0 }
0x1121   : > { %3451 = vadd.xlane.f32.xlu0 %v3450_v8 }
0x11a6   : > { %v3446_v44 = vpop.xlane.xlu0 %3445 }
0x11a7   : > { %v3453_v52 = vmul.f32 0.015625, %v3446_v44 }
0x11a9   : > { %v3456_v53 = vsub.f32 %v10421_v42, %v3453_v52 }
0x11aa   : > { %v3449_v13 = vpop.xlane.xlu1 %3448 }
0x11ab   : > { %v3454_v30 = vmul.f32 0.015625, %v3449_v13  ;;  %v3459_v14 = vmul.f32 %v3456_v53, %v3456_v53 }
0x11ad   : > { %v10439_v7 = vsub.f32 %v10427_v38, %v3454_v30  ;;  %v3462_v47 = vsel %vm888_vm2, %v3459_v14, 0.0  ;;  %v3691_v30 = vld [vmem:[%s9737_s9 + $0x80] sm:$0xff]  ;;  %v3692_v14 = vld [vmem:[%s9737_s9 + $0x88] sm:$0xff] }
0x11ae   : > { %3463 = vadd.xlane.f32.xlu1 %v3462_v47  ;;  %v3452_v54 = vpop.xlane.xlu0 %3451  ;;  %v3675_v47 = vld [vmem:[%s9737_s9] sm:$0xff] }
0x11af   : > { %v3455_v55 = vmul.f32 0.015625, %v3452_v54  ;;  %v3460_v49 = vmul.f32 %v10439_v7, %v10439_v7  ;;  %v3676_v54 = vld [vmem:[%s9737_s9 + $0x8] sm:$0xff] }
0x11b1   : > { %v10445_v51 = vsub.f32 %v10433_v27, %v3455_v55  ;;  %v3465_v58 = vsel %vm888_vm2, %v3460_v49, 0.0  ;;  %v9103_v55 = vpack.c.bf16 %v3676_v54, %v3675_v47  ;;  %v3693_v49 = vld [vmem:[%s9737_s9 + $0x90] sm:$0xff] }
0x11b2   : > { %3466 = vadd.xlane.f32.xlu0 %v3465_v58 }
0x11b3   : > { %v3461_v59 = vmul.f32 %v10445_v51, %v10445_v51 }
0x11b5   : > { %v3468_v62 = vsel %vm895_vm3, %v3461_v59, 0.0  ;;  %v3677_v59 = vld [vmem:[%s9737_s9 + $0x10] sm:$0xff] }
0x11b6   : > { %3469 = vadd.xlane.f32.xlu1 %v3468_v62  ;;  %v3678_v62 = vld [vmem:[%s9737_s9 + $0x18] sm:$0xff] }
0x11b7   : > { %v9107_v63 = vpack.c.bf16 %v3678_v62, %v3677_v59 }
0x123b   : > { %v3464_v31 = vpop.xlane.xlu1 %3463 }
0x123c   : > { %v3471_v33 = vmul.f32 0.015625, %v3464_v31  ;;  %v9123_v31 = vpack.c.bf16 %v3686_v29, %v3685_v28 }
0x123e   : > { %v3474_v34 = vadd.f32 1e-06, %v3471_v33  ;;  %v3703_v33 = vld [vmem:[%s9737_s9 + $0xe0] sm:$0xff] }
0x123f   : > { %v3467_v35 = vpop.xlane.xlu0 %3466 }
0x1240   : > { %9434 = vrsqrt.f32 %v3474_v34  ;;  %v3472_v36 = vmul.f32 0.015625, %v3467_v35  ;;  %v3704_v34 = vld [vmem:[%s9737_s9 + $0xe8] sm:$0xff] }
0x1241   : > { %v9125_v35 = vpack.c.bf16 %v3704_v34, %v3703_v33 }
0x1242   : > { %v3475_v37 = vadd.f32 1e-06, %v3472_v36  ;;  %v3687_v36 = vld [vmem:[%s9737_s9 + $0x60] sm:$0xff] }
0x1243   : > { %v3470_v39 = vpop.xlane.xlu1 %3469 }
0x1244   : > { %9436 = vrsqrt.f32 %v3475_v37  ;;  %v3473_v40 = vmul.f32 0.015625, %v3470_v39  ;;  %v3688_v37 = vld [vmem:[%s9737_s9 + $0x68] sm:$0xff] }
0x1245   : > { %v9127_v39 = vpack.c.bf16 %v3688_v37, %v3687_v36 }
0x1246   : > { %v3476_v56 = vadd.f32 1e-06, %v3473_v40  ;;  %v3705_v40 = vld [vmem:[%s9737_s9 + $0xf0] sm:$0xff] }
0x1248   : > { %9438 = vrsqrt.f32 %v3476_v56  ;;  %v3706_v56 = vld [vmem:[%s9737_s9 + $0xf8] sm:$0xff] }
0x124a   : > { %v9435_v43 = vpop.eup %9434 }
0x124b   : > { %v3480_v61 = vmul.f32 %v9435_v43, %v3456_v53  ;;  %v9129_v43 = vpack.c.bf16 %v3706_v56, %v3705_v40 }
0x124d   : > { %v3489_v48 = vmul.f32 %v7240_v57, %v3480_v61  ;;  %v3690_v61 = vld [vmem:[%s9737_s9 + $0x78] sm:$0xff] }
0x124e   : > { %v9437_v24 = vpop.eup %9436 }
0x124f   : > { %v3498_v41 = vadd.f32 %v7241_v46, %v3489_v48  ;;  %v3481_v6 = vmul.f32 %v9437_v24, %v10439_v7  ;;  %v9101_v7 = vpack.c.bf16 %v3692_v14, %v3691_v30  ;;  %v3519_v48 = vlaneseq }
0x1251   : > { %7242 = vmatmul.mubr.msk.f32.vlgmr.msra.gmra.mrb[76].mxu0 %vm888_vm2, %v3498_v41  ;;  %v3490_v50 = vmul.f32 %v7240_v57, %v3481_v6  ;;  %9102 = vmatprep.subr.bf16.mxu1 %v9101_v7  ;;  %v10508_v24 = vshrl.u32 %v3519_v48, 7  ;;  %v3517_v6 = vld [vmem:[%s9732_s26] sm:$0x3] }
0x1252   : > { %v9439_v8 = vpop.eup %9438  ;;  %3608 = vmatprep.mubr.f32.mxu0 %v9546_v45  ;;  %9104 = vmatpush3.bf16.msra.mxu1 %v9103_v55 }
0x1253   : > { %v3499_v44 = vadd.f32 %v7241_v46, %v3490_v50  ;;  %v3482_v52 = vmul.f32 %v9439_v8, %v10445_v51  ;;  %v3694_v51 = vld [vmem:[%s9737_s9 + $0x98] sm:$0xff]  ;;  %v3521_v41 = vsub.s32 0, %v10508_v24  ;;  %v3525_v50 = vsub.s32 1, %v10508_v24 }
0x1254   : > { %v9105_v58 = vpack.c.bf16 %v3694_v51, %v3693_v49 }
0x1255   : > { %7243 = vmatmul.mubr.msk.f32.gmra.mrb[78].mxu0 %vm888_vm2, %v3499_v44  ;;  %v3491_v53 = vmul.f32 %v7240_v57, %v3482_v52  ;;  %v3689_v57 = vld [vmem:[%s9737_s9 + $0x70] sm:$0xff]  ;;  %v3522_v8 = vrot.slane %v3517_v6, %v3521_v41  ;;  %v3526_v44 = vrot.slane %v3517_v6, %v3525_v50 }
0x1256   : > { %3614 = vmatprep.mubr.f32.mxu0 %v9546_v45  ;;  %9106 = vmatprep.subr.bf16.mxu1 %v9105_v58 }
0x1257   : > { %v3500_v13 = vadd.f32 %v7241_v46, %v3491_v53  ;;  %9108 = vmatpush3.bf16.msra.mxu1 %v9107_v63  ;;  %v9131_v46 = vpack.c.bf16 %v3690_v61, %v3689_v57 }
0x1258   : > { %9110 = vmatprep.subr.bf16.mxu1 %v9109_v2 }
0x1259   : > { %7244 = vmatmul.mubr.msk.f32.gmra.mrb[80].mxu0 %vm888_vm2, %v3500_v13 }
0x125b   : > { %9112 = vmatpush3.bf16.msra.mxu1 %v9111_v5 }
0x125c   : > { %9114 = vmatprep.subr.bf16.mxu1 %v9113_v10 }
0x125f   : > { %9116 = vmatpush3.bf16.msra.mxu1 %v9115_v18 }
0x1260   : > { %9118 = vmatprep.subr.bf16.mxu1 %v9117_v23 }
0x1263   : > { %9120 = vmatpush3.bf16.msra.mxu1 %v9119_v17 }
0x1264   : > { %9122 = vmatprep.subr.bf16.mxu1 %v9121_v26 }
0x1267   : > { %9124 = vmatpush3.bf16.msra.mxu1 %v9123_v31 }
0x1268   : > { %9126 = vmatprep.subr.bf16.mxu1 %v9125_v35 }
0x126b   : > { %9128 = vmatpush3.bf16.msra.mxu1 %v9127_v39 }
0x126c   : > { %9130 = vmatprep.subr.bf16.mxu1 %v9129_v43 }
0x126f   : > { %9132 = vmatpush3.bf16.msra.mxu1 %v9131_v46 }
0x1324   : > { %v3604_v52 = vpop.f32.mrb[76].mxu0 }
0x1325   : > { %v3605_v53 = vadd.f32 %v3604_v52, %v3522_v8  ;;  %v3606_v13 = vpop.f32.mrb[77].mxu0 }
0x1326   : > { %v3607_v30 = vadd.f32 %v3606_v13, %v3526_v44 }
0x1327   : > { %v3621_v14 = vmul.f32 %v3605_v53, %v3605_v53 }
0x1328   : > { %v3622_v7 = vmul.f32 %v3607_v30, %v3607_v30  ;;  %v3610_v47 = vpop.f32.mrb[78].mxu0 }
0x1329   : > { %v3627_v54 = vmul.f32 %v3621_v14, %v3605_v53  ;;  %v3611_v55 = vadd.f32 %v3610_v47, %v3522_v8  ;;  %v3612_v49 = vpop.f32.mrb[79].mxu0 }
0x132a   : > { %v3628_v51 = vmul.f32 %v3622_v7, %v3607_v30  ;;  %v3613_v58 = vadd.f32 %v3612_v49, %v3526_v44 }
0x132b   : > { %v3633_v59 = vmul.f32 0.044715, %v3627_v54  ;;  %v3623_v62 = vmul.f32 %v3611_v55, %v3611_v55 }
0x132c   : > { %v3634_v63 = vmul.f32 0.044715, %v3628_v51  ;;  %v3624_v0 = vmul.f32 %v3613_v58, %v3613_v58  ;;  %v3616_v1 = vpop.f32.mrb[80].mxu0 }
0x132d   : > { %v3639_v2 = vadd.f32 %v3633_v59, %v3605_v53  ;;  %v3629_v3 = vmul.f32 %v3623_v62, %v3611_v55  ;;  %v3617_v4 = vadd.f32 %v3616_v1, %v3522_v8  ;;  %v3618_v5 = vpop.f32.mrb[81].mxu0 }
0x132e   : > { %v3640_v9 = vadd.f32 %v3634_v63, %v3607_v30  ;;  %v3630_v11 = vmul.f32 %v3624_v0, %v3613_v58  ;;  %v3619_v10 = vadd.f32 %v3618_v5, %v3526_v44 }
0x132f   : > { %v3645_v12 = vmul.f32 0.7978846, %v3639_v2  ;;  %v3635_v16 = vmul.f32 0.044715, %v3629_v3  ;;  %v3625_v18 = vmul.f32 %v3617_v4, %v3617_v4 }
0x1330   : > { %v3646_v19 = vmul.f32 0.7978846, %v3640_v9  ;;  %v3636_v20 = vmul.f32 0.044715, %v3630_v11  ;;  %v3626_v23 = vmul.f32 %v3619_v10, %v3619_v10 }
0x1331   : > { %9440 = vtanh.f32 %v3645_v12  ;;  %v3641_v22 = vadd.f32 %v3635_v16, %v3611_v55  ;;  %v3631_v15 = vmul.f32 %v3625_v18, %v3617_v4 }
0x1332   : > { %v3642_v17 = vadd.f32 %v3636_v20, %v3613_v58  ;;  %v3632_v21 = vmul.f32 %v3626_v23, %v3619_v10  ;;  %9442 = vtanh.f32 %v3646_v19 }
0x1333   : > { %v3647_v25 = vmul.f32 0.7978846, %v3641_v22  ;;  %v3637_v26 = vmul.f32 0.044715, %v3631_v15 }
0x1334   : > { %v3648_v28 = vmul.f32 0.7978846, %v3642_v17  ;;  %v3638_v29 = vmul.f32 0.044715, %v3632_v21 }
0x1335   : > { %v3643_v31 = vadd.f32 %v3637_v26, %v3617_v4  ;;  %9444 = vtanh.f32 %v3647_v25 }
0x1336   : > { %v3644_v33 = vadd.f32 %v3638_v29, %v3619_v10  ;;  %9446 = vtanh.f32 %v3648_v28 }
0x1337   : > { %v3649_v34 = vmul.f32 0.7978846, %v3643_v31 }
0x1338   : > { %v3650_v35 = vmul.f32 0.7978846, %v3644_v33 }
0x1339   : > { %9448 = vtanh.f32 %v3649_v34 }
0x133a   : > { %9450 = vtanh.f32 %v3650_v35 }
0x133b   : > { %v9441_v36 = vpop.eup %9440 }
0x133c   : > { %v9443_v37 = vpop.eup %9442  ;;  %v3657_v39 = vadd.f32 1.0, %v9441_v36 }
0x133d   : > { %v3658_v40 = vadd.f32 1.0, %v9443_v37 }
0x133e   : > { %v3663_v56 = vmul.f32 0.5, %v3657_v39 }
0x133f   : > { %v9445_v43 = vpop.eup %9444  ;;  %v3664_v57 = vmul.f32 0.5, %v3658_v40 }
0x1340   : > { %v9447_v61 = vpop.eup %9446  ;;  %v3659_v46 = vadd.f32 1.0, %v9445_v43  ;;  %v3669_v8 = vmul.f32 %v3663_v56, %v3605_v53 }
0x1341   : > { %v3670_v48 = vmul.f32 %v3664_v57, %v3607_v30  ;;  %v3660_v6 = vadd.f32 1.0, %v9447_v61  ;;  %v7245_v30 = vld [vmem:[%s9742_s11] ss:$0 sm:$0xff] }
0x1342   : > { %v3665_v44 = vmul.f32 0.5, %v3659_v46 }
0x1343   : > { %v9449_v52 = vpop.eup %9448  ;;  %3778 = vmatprep.mubr.f32.mxu1 %v3670_v48  ;;  %v3666_v13 = vmul.f32 0.5, %v3660_v6  ;;  %v7247_v6 = vld [vmem:[%s11409_s21] ss:$0 sm:$0xff] (!%p7051_p5) }
0x1344   : > { %v9451_v14 = vpop.eup %9450  ;;  %3779 = vmatmul.mubr.f32.vlgmr.msra.gmra.mrb[68].mxu1 %v3669_v8  ;;  %v3661_v7 = vadd.f32 1.0, %v9449_v52  ;;  %v3671_v49 = vmul.f32 %v3665_v44, %v3611_v55  ;;  %v7248_v44 = vld [vmem:[%s11410_s18] ss:$0 sm:$0xff] (!%p7051_p5) }
0x1345   : > { %v3672_v47 = vmul.f32 %v3666_v13, %v3613_v58  ;;  %v3662_v54 = vadd.f32 1.0, %v9451_v14 }
0x1346   : > { %v3667_v51 = vmul.f32 0.5, %v3661_v7 }
0x1347   : > { %3783 = vmatprep.mubr.f32.mxu1 %v3672_v47  ;;  %v3668_v59 = vmul.f32 0.5, %v3662_v54 }
0x1348   : > { %3784 = vmatmul.mubr.f32.gmra.mrb[70].mxu1 %v3671_v49  ;;  %v3673_v63 = vmul.f32 %v3667_v51, %v3617_v4 }
0x1349   : > { %v3674_v62 = vmul.f32 %v3668_v59, %v3619_v10 }
0x134b   : > { %3788 = vmatprep.mubr.f32.mxu1 %v3674_v62 }
0x134c   : > { %3789 = vmatmul.mubr.f32.gmra.mrb[72].mxu1 %v3673_v63 }
0x1417   : > { %v7707_v53 = vpop.f32.mrb[68].mxu1 }
0x1418   : > { %v7708_v0 = vpop.f32.mrb[69].mxu1 }
0x1419   : > { %v7709_v1 = vadd.f32 %v7708_v0, %v7707_v53 }
0x141b   : > { %v3781_v2 = vadd.f32 %v7709_v1, %v7245_v30  ;;  %v7710_v3 = vpop.f32.mrb[70].mxu1 }
0x141c   : > { %v7711_v5 = vpop.f32.mrb[71].mxu1 }
0x141d   : > { %v3794_v9 = vadd.f32 %v3781_v2, %v10421_v42  ;;  %v7712_v58 = vadd.f32 %v7711_v5, %v7710_v3 }
0x141f   : > { %3797 = vst.msk [vmem:[#allocation2] sm:$0xff] %vm888_vm2, %v3794_v9  ;;  %v3786_v55 = vadd.f32 %v7712_v58, %v7245_v30  ;;  %v7713_v11 = vpop.f32.mrb[72].mxu1  ;;  %v3805_v42 = vsel (!%p7051_p5), %vm888_vm2, %v3794_v9, 0.0 }
0x1420   : > { %v7714_v12 = vpop.f32.mrb[73].mxu1  ;;  %3806 = vadd.xlane.f32.xlu0 (!%p7051_p5), %v3805_v42 }
0x1421   : > { %v3795_v10 = vadd.f32 %v3786_v55, %v10427_v38  ;;  %v7715_v4 = vadd.f32 %v7714_v12, %v7713_v11  ;;  %3802 = sbr.rel (%p7051_p5) target bundleno = 5474 (0x1562), region = 120 }
0x1423   : > { %3798 = vst.msk [vmem:[#allocation2 + $0x8] sm:$0xff] %vm888_vm2, %v3795_v10  ;;  %v3791_v16 = vadd.f32 %v7715_v4, %v7245_v30  ;;  %v3808_v20 = vsel (!%p7051_p5), %vm888_vm2, %v3795_v10, 0.0 }
0x1424   : > { %3809 = vadd.xlane.f32.xlu0 (!%p7051_p5), %v3808_v20 }
0x1425   : > { %v3796_v18 = vadd.f32 %v3791_v16, %v10433_v27 }
0x1427   : > { %3799 = vst.msk [vmem:[#allocation2 + $0x10] sm:$0x1] %vm895_vm3, %v3796_v18  ;;  %v3811_v19 = vsel (!%p7051_p5), %vm895_vm3, %v3796_v18, 0.0 }
0x1428   : > { %3812 = vadd.xlane.f32.xlu1 %v3811_v19 }
0x14ad   : > { %v3807_v38 = vpop.xlane.xlu0 %3806 }
0x14ae   : > { %v3814_v22 = vmul.f32 0.015625, %v3807_v38 }
0x14b0   : > { %v3817_v17 = vsub.f32 %v3794_v9, %v3814_v22 }
0x14b1   : > { %v3810_v21 = vpop.xlane.xlu0 %3809 }
0x14b2   : > { %v3815_v25 = vmul.f32 0.015625, %v3810_v21  ;;  %v3820_v26 = vmul.f32 %v3817_v17, %v3817_v17 }
0x14b4   : > { %v3818_v29 = vsub.f32 %v3795_v10, %v3815_v25  ;;  %v3823_v31 = vsel %vm888_vm2, %v3820_v26, 0.0 }
0x14b5   : > { %v3813_v23 = vpop.xlane.xlu1 %3812  ;;  %3824 = vadd.xlane.f32.xlu1 %v3823_v31 }
0x14b6   : > { %v3816_v15 = vmul.f32 0.015625, %v3813_v23  ;;  %v3821_v34 = vmul.f32 %v3818_v29, %v3818_v29 }
0x14b8   : > { %v3819_v27 = vsub.f32 %v3796_v18, %v3816_v15  ;;  %v3826_v35 = vsel %vm888_vm2, %v3821_v34, 0.0 }
0x14b9   : > { %3827 = vadd.xlane.f32.xlu0 %v3826_v35 }
0x14ba   : > { %v3822_v28 = vmul.f32 %v3819_v27, %v3819_v27 }
0x14bc   : > { %v3829_v33 = vsel %vm895_vm3, %v3822_v28, 0.0 }
0x14bd   : > { %3830 = vadd.xlane.f32.xlu1 %v3829_v33 }
0x1542   : > { %v3825_v36 = vpop.xlane.xlu1 %3824 }
0x1543   : > { %v3832_v37 = vmul.f32 0.015625, %v3825_v36 }
0x1545   : > { %v3835_v39 = vadd.f32 1e-06, %v3832_v37 }
0x1546   : > { %v3828_v56 = vpop.xlane.xlu0 %3827 }
0x1547   : > { %9452 = vrsqrt.f32 %v3835_v39  ;;  %v3833_v57 = vmul.f32 0.015625, %v3828_v56 }
0x1549   : > { %v3836_v46 = vadd.f32 1e-06, %v3833_v57 }
0x154a   : > { %v3831_v40 = vpop.xlane.xlu1 %3830 }
0x154b   : > { %v3834_v43 = vmul.f32 0.015625, %v3831_v40 }
0x154d   : > { %v3837_v61 = vadd.f32 1e-06, %v3834_v43 }
0x154f   : > { %9454 = vrsqrt.f32 %v3837_v61 }
0x1550   : > { %9456 = vrsqrt.f32 %v3836_v46 }
0x1551   : > { %v9453_v48 = vpop.eup %9452 }
0x1552   : > { %v3841_v8 = vmul.f32 %v9453_v48, %v3817_v17 }
0x1554   : > { %v3850_v52 = vmul.f32 %v7247_v6, %v3841_v8 }
0x1556   : > { %v3859_v7 = vadd.f32 %v7248_v44, %v3850_v52 }
0x1558   : > { %3862 = vst.msk [vmem:[%s11411_s12] sm:$0xff] %vm888_vm2, %v3859_v7 }
0x1559   : > { %v9455_v13 = vpop.eup %9454 }
0x155a   : > { %v9457_v14 = vpop.eup %9456  ;;  %v3843_v47 = vmul.f32 %v9455_v13, %v3819_v27 }
0x155b   : > { %v3842_v54 = vmul.f32 %v9457_v14, %v3818_v29 }
0x155c   : > { %v3852_v49 = vmul.f32 %v7247_v6, %v3843_v47 }
0x155d   : > { %v3851_v51 = vmul.f32 %v7247_v6, %v3842_v54 }
0x155e   : > { %v3861_v59 = vadd.f32 %v7248_v44, %v3852_v49 }
0x155f   : > { %v3860_v62 = vadd.f32 %v7248_v44, %v3851_v51 }
0x1560   : > { %3864 = vst.msk [vmem:[%s11411_s12 + $0x10] sm:$0x1] %vm895_vm3, %v3861_v59 }
0x1561   : > { %3863 = vst.msk [vmem:[%s11411_s12 + $0x8] sm:$0xff] %vm888_vm2, %v3860_v62 }
0x1562 PF: > { %v10550_v63 = vld [vmem:[#allocation2 + $0x18] sm:$0xff]  ;;  %v10552_v53 = vld [vmem:[#allocation2 + $0x28] sm:$0x1]  ;;  %v10554_v30 = vld [vmem:[#allocation2 + $0x20] sm:$0xff]  ;;  %9133 = vmatprep.subr.bf16.mxu0 %v9544_v32  ;;  %9157 = vmatprep.subr.bf16.mxu1 %v9544_v32  ;;  %s11412_s8 = sld [smem:[#allocation5_spill]]  ;;  %s11413_s21 = sld [smem:[#allocation6_spill]] }
0x1563   : > { %v3871_v0 = vsel %vm888_vm2, %v10550_v63, 0.0  ;;  %v3877_v1 = vsel %vm895_vm3, %v10552_v53, 0.0  ;;  %8445 = vmatprep.mubr.msk.f32.mxu0 %vm9545_vm4, %v9546_v45  ;;  %8495 = vmatprep.mubr.msk.f32.mxu1 %vm9545_vm4, %v9546_v45  ;;  %v3874_v2 = vsel %vm888_vm2, %v10554_v30, 0.0  ;;  %v3928_v23 = vld [vmem:[%s9677_s19] sm:$0xff]  ;;  %v3929_v22 = vld [vmem:[%s9677_s19 + $0x8] sm:$0xff]  ;;  %v3930_v25 = vld [vmem:[%s9677_s19 + $0x10] sm:$0xff] }
0x1564   : > { %3872 = vadd.xlane.f32.xlu0 %v3871_v0  ;;  %3878 = vadd.xlane.f32.xlu1 %v3877_v1  ;;  %v9134_v15 = vpack.c.bf16 %v3929_v22, %v3928_v23  ;;  %v4127_v17 = vld [vmem:[%s9697_s1] sm:$0xff]  ;;  %v4128_v27 = vld [vmem:[%s9697_s1 + $0x8] sm:$0xff]  ;;  %v3931_v26 = vld [vmem:[%s9677_s19 + $0x18] sm:$0xff]  ;;  %s11415_s29 = sld [smem:[#allocation23_spill]] (!%p7051_p5)  ;;  %vm4228_vm15 = vcmask (!%p7051_p5), 122880  }
0x1565   : > { %v9158_v21 = vpack.c.bf16 %v4128_v27, %v4127_v17  ;;  %v9137_v28 = vpack.c.bf16 %v3931_v26, %v3930_v25  ;;  %v4129_v29 = vld [vmem:[%s9697_s1 + $0x10] sm:$0xff]  ;;  %v4130_v31 = vld [vmem:[%s9697_s1 + $0x18] sm:$0xff]  ;;  %v3932_v34 = vld [vmem:[%s9677_s19 + $0x20] sm:$0xff] }
0x1566   : > { %9135 = vmatpush3.bf16.msra.mxu0 %v9134_v15  ;;  %v9161_v33 = vpack.c.bf16 %v4130_v31, %v4129_v29  ;;  %v3933_v35 = vld [vmem:[%s9677_s19 + $0x28] sm:$0xff]  ;;  %v4131_v36 = vld [vmem:[%s9697_s1 + $0x20] sm:$0xff]  ;;  %v3934_v56 = vld [vmem:[%s9677_s19 + $0x30] sm:$0xff] }
0x1567   : > { %9159 = vmatpush3.bf16.msra.mxu1 %v9158_v21  ;;  %9136 = vmatprep.subr.bf16.mxu0 %v9544_v32  ;;  %v9140_v37 = vpack.c.bf16 %v3933_v35, %v3932_v34  ;;  %v4132_v39 = vld [vmem:[%s9697_s1 + $0x28] sm:$0xff]  ;;  %v3935_v43 = vld [vmem:[%s9677_s19 + $0x38] sm:$0xff]  ;;  %v4133_v57 = vld [vmem:[%s9697_s1 + $0x30] sm:$0xff] }
0x1568   : > { %3875 = vadd.xlane.f32.xlu0 %v3874_v2  ;;  %9160 = vmatprep.subr.bf16.mxu1 %v9544_v32  ;;  %v9164_v40 = vpack.c.bf16 %v4132_v39, %v4131_v36  ;;  %v4134_v61 = vld [vmem:[%s9697_s1 + $0x38] sm:$0xff]  ;;  %v9143_v46 = vpack.c.bf16 %v3935_v43, %v3934_v56  ;;  %v7249_v51 = vld [vmem:[%s11412_s8] ss:$0 sm:$0xff]  ;;  %v4033_v0 = vld [vmem:[%s9687_s25 + $0x8] sm:$0xff] }
0x1569   : > { %v9167_v48 = vpack.c.bf16 %v4134_v61, %v4133_v57  ;;  %v4032_v62 = vld [vmem:[%s9687_s25] sm:$0xff]  ;;  %v4038_v22 = vld [vmem:[%s9687_s25 + $0x30] sm:$0xff]  ;;  %v4039_v15 = vld [vmem:[%s9687_s25 + $0x38] sm:$0xff] }
0x156a   : > { %9138 = vmatpush3.bf16.msra.mxu0 %v9137_v28  ;;  %v7250_v1 = vld [vmem:[%s11413_s21] ss:$0 sm:$0xff]  ;;  %v9155_v17 = vpack.c.bf16 %v4039_v15, %v4038_v22 }
0x156b   : > { %9162 = vmatpush3.bf16.msra.mxu1 %v9161_v33  ;;  %9139 = vmatprep.subr.bf16.mxu0 %v9544_v32  ;;  %v7251_v27 = vld [vmem:[%s9682_s22] ss:$0 sm:$0xff] }
0x156c   : > { %9163 = vmatprep.subr.bf16.mxu1 %v9544_v32  ;;  %v7259_v21 = vld [vmem:[%s9702_s17] ss:$0 sm:$0xff] }
0x156e   : > { %9141 = vmatpush3.bf16.msra.mxu0 %v9140_v37 }
0x156f   : > { %9165 = vmatpush3.bf16.msra.mxu1 %v9164_v40  ;;  %9142 = vmatprep.subr.bf16.mxu0 %v9544_v32 }
0x1570   : > { %9166 = vmatprep.subr.bf16.mxu1 %v9544_v32 }
0x1572   : > { %9144 = vmatpush3.bf16.msra.mxu0 %v9143_v46 }
0x1573   : > { %9168 = vmatpush3.bf16.msra.mxu1 %v9167_v48  ;;  %9145 = vmatprep.subr.bf16.mxu0 %v9544_v32 }
0x15f1   : > { %v3873_v3 = vpop.xlane.xlu0 %3872  ;;  %v3879_v5 = vpop.xlane.xlu1 %3878 }
0x15f2   : > { %v3880_v9 = vmul.f32 0.015625, %v3873_v3  ;;  %v3882_v58 = vmul.f32 0.015625, %v3879_v5  ;;  %v9146_v5 = vpack.c.bf16 %v4033_v0, %v4032_v62 }
0x15f4   : > { %v10569_v55 = vsub.f32 %v10550_v63, %v3880_v9  ;;  %v10572_v11 = vsub.f32 %v10552_v53, %v3882_v58 }
0x15f5   : > { %v3876_v12 = vpop.xlane.xlu0 %3875 }
0x15f6   : > { %v3881_v10 = vmul.f32 0.015625, %v3876_v12  ;;  %v3886_v4 = vmul.f32 %v10569_v55, %v10569_v55  ;;  %v3888_v16 = vmul.f32 %v10572_v11, %v10572_v11 }
0x15f8   : > { %v10579_v18 = vsub.f32 %v10554_v30, %v3881_v10  ;;  %v3889_v42 = vsel %vm888_vm2, %v3886_v4, 0.0  ;;  %v3895_v19 = vsel %vm895_vm3, %v3888_v16, 0.0  ;;  %v4034_v10 = vld [vmem:[%s9687_s25 + $0x10] sm:$0xff]  ;;  %v4035_v4 = vld [vmem:[%s9687_s25 + $0x18] sm:$0xff] }
0x15f9   : > { %3890 = vadd.xlane.f32.xlu1 %v3889_v42 }
0x15fa   : > { %v3887_v20 = vmul.f32 %v10579_v18, %v10579_v18 }
0x15fc   : > { %v3892_v38 = vsel %vm888_vm2, %v3887_v20, 0.0  ;;  %v4037_v20 = vld [vmem:[%s9687_s25 + $0x28] sm:$0xff] }
0x15fd   : > { %3896 = vadd.xlane.f32.xlu1 %v3895_v19  ;;  %3893 = vadd.xlane.f32.xlu0 %v3892_v38  ;;  %v4036_v19 = vld [vmem:[%s9687_s25 + $0x20] sm:$0xff] }
0x15fe   : > { %v9152_v38 = vpack.c.bf16 %v4037_v20, %v4036_v19 }
0x1686   : > { %v3891_v6 = vpop.xlane.xlu1 %3890 }
0x1687   : > { %v3898_v8 = vmul.f32 0.015625, %v3891_v6  ;;  %v7255_v6 = vld [vmem:[%s9692_s28] ss:$0 sm:$0xff] }
0x1689   : > { %v3901_v44 = vadd.f32 1e-06, %v3898_v8 }
0x168a   : > { %v3897_v52 = vpop.xlane.xlu1 %3896  ;;  %v3894_v13 = vpop.xlane.xlu0 %3893 }
0x168b   : > { %9458 = vrsqrt.f32 %v3901_v44  ;;  %v3900_v14 = vmul.f32 0.015625, %v3897_v52  ;;  %v3899_v7 = vmul.f32 0.015625, %v3894_v13 }
0x168d   : > { %v3903_v47 = vadd.f32 1e-06, %v3900_v14  ;;  %v3902_v54 = vadd.f32 1e-06, %v3899_v7 }
0x168f   : > { %9460 = vrsqrt.f32 %v3903_v47 }
0x1690   : > { %9462 = vrsqrt.f32 %v3902_v54 }
0x1695   : > { %v9459_v49 = vpop.eup %9458 }
0x1696   : > { %v3907_v59 = vmul.f32 %v9459_v49, %v10569_v55 }
0x1698   : > { %v3916_v2 = vmul.f32 %v7249_v51, %v3907_v59 }
0x1699   : > { %v9461_v3 = vpop.eup %9460 }
0x169a   : > { %v9463_v9 = vpop.eup %9462  ;;  %v10614_v58 = vadd.f32 %v7250_v1, %v3916_v2  ;;  %v3909_v16 = vmul.f32 %v9461_v3, %v10572_v11 }
0x169b   : > { %v3908_v12 = vmul.f32 %v9463_v9, %v10579_v18  ;;  %v9149_v18 = vpack.c.bf16 %v4035_v4, %v4034_v10 }
0x169c   : > { %8446 = vmatmul.mubr.msk.f32.vlgmr.msra.gmra.mrb[82].mxu0 %vm888_vm2, %v10614_v58  ;;  %8496 = vmatmul.mubr.msk.f32.vlgmr.msra.gmra.mrb[74].mxu1 %vm888_vm2, %v10614_v58  ;;  %v3918_v42 = vmul.f32 %v7249_v51, %v3909_v16 }
0x169d   : > { %9147 = vmatpush3.bf16.msra.mxu0 %v9146_v5  ;;  %8448 = vmatprep.mubr.msk.f32.mxu0 %vm9545_vm4, %v9546_v45  ;;  %v3917_v55 = vmul.f32 %v7249_v51, %v3908_v12 }
0x169e   : > { %9148 = vmatprep.subr.bf16.mxu0 %v9544_v32  ;;  %8498 = vmatprep.mubr.msk.f32.mxu1 %vm9545_vm4, %v9546_v45  ;;  %v10642_v23 = vadd.f32 %v7250_v1, %v3918_v42 }
0x169f   : > { %v10629_v11 = vadd.f32 %v7250_v1, %v3917_v55 }
0x16a1   : > { %8449 = vmatmul.mubr.msk.f32.gmra.mrb[84].mxu0 %vm888_vm2, %v10629_v11  ;;  %8499 = vmatmul.mubr.msk.f32.gmra.mrb[76].mxu1 %vm888_vm2, %v10629_v11 }
0x16a2   : > { %9150 = vmatpush3.bf16.msra.mxu0 %v9149_v18  ;;  %8451 = vmatprep.mubr.msk.f32.mxu0 %vm9545_vm4, %v9546_v45 }
0x16a3   : > { %9151 = vmatprep.subr.bf16.mxu0 %v9544_v32  ;;  %8501 = vmatprep.mubr.msk.f32.mxu1 %vm9545_vm4, %v9546_v45 }
0x16a5   : > { %8452 = vmatmul.mubr.msk.f32.gmra.mrb[86].mxu0 %vm888_vm2, %v10642_v23  ;;  %8502 = vmatmul.mubr.msk.f32.gmra.mrb[78].mxu1 %vm888_vm2, %v10642_v23 }
0x16a6   : > { %9153 = vmatpush3.bf16.msra.mxu0 %v9152_v38  ;;  %8470 = vmatprep.mubr.msk.f32.mxu0 %vm9545_vm4, %v9546_v45 }
0x16a7   : > { %9154 = vmatprep.subr.bf16.mxu0 %v9544_v32 }
0x16aa   : > { %9156 = vmatpush3.bf16.msra.mxu0 %v9155_v17 }
0x16ad   : > { %8471 = vmatmul.mubr.msk.f32.vlgmr.msra.gmra.mrb[88].mxu0 %vm888_vm2, %v10614_v58 }
0x16ae   : > { %8473 = vmatprep.mubr.msk.f32.mxu0 %vm9545_vm4, %v9546_v45 }
0x16b1   : > { %8474 = vmatmul.mubr.msk.f32.gmra.mrb[90].mxu0 %vm888_vm2, %v10629_v11 }
0x16b2   : > { %8476 = vmatprep.mubr.msk.f32.mxu0 %vm9545_vm4, %v9546_v45 }
0x16b5   : > { %8477 = vmatmul.mubr.msk.f32.gmra.mrb[92].mxu0 %vm888_vm2, %v10642_v23 }
0x176f   : > { %v4018_v25 = vpop.f32.mrb[82].mxu0  ;;  %v4208_v26 = vpop.f32.mrb[74].mxu1 }
0x1770   : > { %v4019_v28 = vadd.f32 %v7251_v27, %v4018_v25  ;;  %v10665_v29 = vadd.f32 %v7259_v21, %v4208_v26  ;;  %v8447_v31 = vpop.f32.mrb[83].mxu0  ;;  %v8497_v33 = vpop.f32.mrb[75].mxu1 }
0x1774   : > { %v4023_v34 = vpop.f32.mrb[84].mxu0  ;;  %v4213_v35 = vpop.f32.mrb[76].mxu1 }
0x1775   : > { %v4024_v36 = vadd.f32 %v7251_v27, %v4023_v34  ;;  %v10667_v37 = vadd.f32 %v7259_v21, %v4213_v35  ;;  %v8450_v39 = vpop.f32.mrb[85].mxu0  ;;  %v8500_v40 = vpop.f32.mrb[77].mxu1 }
0x1778   : > { %v4028_v56 = vpop.f32.mrb[86].mxu0  ;;  %v4218_v43 = vpop.f32.mrb[78].mxu1 }
0x1779   : > { %v4029_v57 = vadd.f32 %v7251_v27, %v4028_v56  ;;  %v10669_v61 = vadd.f32 %v7259_v21, %v4218_v43  ;;  %v8453_v46 = vpop.f32.mrb[87].mxu0  ;;  %v8503_v48 = vpop.f32.mrb[79].mxu1 }
0x1780   : > { %v4113_v8 = vpop.f32.mrb[88].mxu0 }
0x1781   : > { %v4114_v44 = vadd.f32 %v7255_v6, %v4113_v8  ;;  %v8472_v52 = vpop.f32.mrb[89].mxu0 }
0x1783   : > { %4224 = sbr.rel (%p7051_p5) target bundleno = 6028 (0x178c), region = 124  ;;  %7264 = vst.msk [vmem:[%s11415_s29 + $0x60] sm:$0xff] (!%p7051_p5), %vm1251_vm7, %v4114_v44 }
0x1784   : > { %v4118_v13 = vpop.f32.mrb[90].mxu0 }
0x1785   : > { %v4119_v14 = vadd.f32 %v7255_v6, %v4118_v13  ;;  %v8475_v7 = vpop.f32.mrb[91].mxu0 }
0x1787   : > { %7265 = vst.msk [vmem:[%s11415_s29 + $0x68] sm:$0xff] (!%p7051_p5), %vm1251_vm7, %v4119_v14 }
0x1788   : > { %v4123_v47 = vpop.f32.mrb[92].mxu0 }
0x1789   : > { %v4124_v54 = vadd.f32 %v7255_v6, %v4123_v47  ;;  %v8478_v49 = vpop.f32.mrb[93].mxu0 }
0x178b   : > { %7266 = vst.msk [vmem:[%s11415_s29 + $0x70] sm:$0x1] %vm4228_vm15, %v4124_v54 }
0x178c PF: > { %9169 = vmatprep.subr.bf16.mxu0 %v9544_v32  ;;  %v9170_v51 = vpack.c.bf16 %v4119_v14, %v4114_v44  ;;  %8510 = vmatprep.mubr.msk.f32.mxu0 %vm9545_vm4, %v9546_v45  ;;  %v10709_v55 = vld [vmem:[%s9712_s27] sm:$0xff]  ;;  %v10712_v18 = vld [vmem:[%s9712_s27 + $0x8] sm:$0xff]  ;;  %v7279_v40 = vld [vmem:[%s9677_s19 + $0x50] sm:$0xff]  ;;  %v9174_v6 = vpack.c.bf16 %v10667_v37, %v10665_v29  ;;  %s11417_s21 = sld [smem:[#allocation23_spill]] (!%p7051_p5)  ;;  %vm4749_vm0 = vcmask (!%p7051_p5), 122880  }
0x178d   : > { %9173 = vmatprep.subr.bf16.mxu1 %v9544_v32  ;;  %8525 = vmatprep.mubr.msk.f32.mxu1 %vm9545_vm4, %v9546_v45  ;;  %v7277_v42 = vld [vmem:[%s9677_s19 + $0x40] sm:$0xff]  ;;  %v7278_v19 = vld [vmem:[%s9677_s19 + $0x48] sm:$0xff]  ;;  %v7280_v56 = vld [vmem:[%s9677_s19 + $0x58] sm:$0xff] }
0x178e   : > { %9172 = vmatpush3.bf16.xpose.msk.msra.mxu0 %vm9902_vm8, %v9170_v51  ;;  %v9177_v20 = vpack.c.bf16 %v7278_v19, %v7277_v42  ;;  %v9180_v43 = vpack.c.bf16 %v7280_v56, %v7279_v40  ;;  %v7282_v46 = vld [vmem:[%s9677_s19 + $0x68] sm:$0xff]  ;;  %v7283_v8 = vld [vmem:[%s9677_s19 + $0x70] sm:$0xff]  ;;  %v7284_v44 = vld [vmem:[%s9677_s19 + $0x78] sm:$0xff]  ;;  %9175 = vmatpush3.bf16.msra.mxu1 %v9174_v6 }
0x178f   : > { %8508 = vmatprep.subr.mxu0 %v9546_v45  ;;  %v9186_v52 = vpack.c.bf16 %v7284_v44, %v7283_v8  ;;  %8523 = vmatprep.subr.mxu1 %v9546_v45  ;;  %v7303_v13 = vld [vmem:[%s9697_s1 + $0x40] sm:$0xff]  ;;  %v7304_v14 = vld [vmem:[%s9697_s1 + $0x48] sm:$0xff]  ;;  %v7305_v29 = vld [vmem:[%s9697_s1 + $0x50] sm:$0xff] }
0x1790   : > { %v9201_v7 = vpack.c.bf16 %v7304_v14, %v7303_v13  ;;  %v7306_v37 = vld [vmem:[%s9697_s1 + $0x58] sm:$0xff]  ;;  %v7309_v51 = vld [vmem:[%s9697_s1 + $0x70] sm:$0xff] }
0x1791   : > { %v9204_v47 = vpack.c.bf16 %v7306_v37, %v7305_v29 }
0x1792   : > { %8524 = vmatpush3.msk.msra.mxu1 %vm1397_vm11, %v10669_v61  ;;  %v7307_v61 = vld [vmem:[%s9697_s1 + $0x60] sm:$0xff] }
0x1793   : > { %9188 = vmatprep.subr.bf16.mxu1 %v9544_v32 }
0x1796   : > { %8509 = vmatpush3.xpose.msk.msra.mxu0 %vm1251_vm7, %v4124_v54  ;;  %v7308_v54 = vld [vmem:[%s9697_s1 + $0x68] sm:$0xff] }
0x1797   : > { %9176 = vmatprep.subr.bf16.mxu0 %v9544_v32  ;;  %v9207_v49 = vpack.c.bf16 %v7308_v54, %v7307_v61 }
0x1799   : > { %8511 = vmatmul.mubr.msk.f32.vlgmr.msra.gmra.mrb[94].mxu0 %vm1251_vm7, %v4019_v28 }
0x179a   : > { %8513 = vmatprep.mubr.msk.f32.mxu0 %vm9545_vm4, %v9546_v45  ;;  %9178 = vmatpush3.bf16.msra.mxu0 %v9177_v20 }
0x179b   : > { %9179 = vmatprep.subr.bf16.mxu0 %v9544_v32 }
0x179d   : > { %8514 = vmatmul.mubr.msk.f32.gmra.mrb[96].mxu0 %vm1251_vm7, %v4024_v36 }
0x179e   : > { %8516 = vmatprep.mubr.msk.f32.mxu0 %vm9545_vm4, %v9546_v45  ;;  %9181 = vmatpush3.bf16.msra.mxu0 %v9180_v43 }
0x179f   : > { %9182 = vmatprep.subr.bf16.mxu0 %v9544_v32 }
0x17a1   : > { %8517 = vmatmul.mubr.msk.f32.gmra.mrb[98].mxu0 %vm1251_vm7, %v4029_v57  ;;  %v7281_v57 = vld [vmem:[%s9677_s19 + $0x60] sm:$0xff] }
0x17a2   : > { %8550 = vmatprep.mubr.msk.f32.mxu0 %vm9545_vm4, %v9546_v45  ;;  %v9183_v48 = vpack.c.bf16 %v7282_v46, %v7281_v57  ;;  %v7312_v57 = vld [vmem:[%s9702_s17 + $0x1] ss:$0 sm:$0xff] }
0x17a4   : > { %9184 = vmatpush3.bf16.msra.mxu0 %v9183_v48 }
0x17a5   : > { %9185 = vmatprep.subr.bf16.mxu0 %v9544_v32 }
0x17a8   : > { %9187 = vmatpush3.bf16.msra.mxu0 %v9186_v52 }
0x17a9   : > { %9200 = vmatprep.subr.bf16.mxu0 %v9544_v32 }
0x17ab   : > { %8551 = vmatmul.mubr.msk.f32.vlgmr.msra.gmra.mrb[100].mxu0 %vm888_vm2, %v10614_v58 }
0x17ac   : > { %9202 = vmatpush3.bf16.msra.mxu0 %v9201_v7  ;;  %8553 = vmatprep.mubr.msk.f32.mxu0 %vm9545_vm4, %v9546_v45 }
0x17ad   : > { %9203 = vmatprep.subr.bf16.mxu0 %v9544_v32 }
0x17af   : > { %8554 = vmatmul.mubr.msk.f32.gmra.mrb[102].mxu0 %vm888_vm2, %v10629_v11 }
0x17b0   : > { %8556 = vmatprep.mubr.msk.f32.mxu0 %vm9545_vm4, %v9546_v45  ;;  %9205 = vmatpush3.bf16.msra.mxu0 %v9204_v47 }
0x17b1   : > { %9206 = vmatprep.subr.bf16.mxu0 %v9544_v32 }
0x17b3   : > { %8557 = vmatmul.mubr.msk.f32.gmra.mrb[104].mxu0 %vm888_vm2, %v10642_v23 }
0x17b4   : > { %8600 = vmatprep.mubr.msk.f32.mxu0 %vm9545_vm4, %v9546_v45  ;;  %9208 = vmatpush3.bf16.msra.mxu0 %v9207_v49 }
0x17b5   : > { %9209 = vmatprep.subr.bf16.mxu0 %v9544_v32 }
0x186c   : > { %v4314_v59 = vpop.f32.mrb[94].mxu0 }
0x186d   : > { %v4328_v62 = vmul.f32 0.25, %v4314_v59  ;;  %v8512_v0 = vpop.f32.mrb[95].mxu0  ;;  %v7310_v59 = vld [vmem:[%s9697_s1 + $0x78] sm:$0xff] }
0x186f   : > { %v4331_v1 = vsel %vm1353_vm9, %v4328_v62, -inf }
0x1870   : > { %4332 = vmax.xlane.f32.xlu0 %v4331_v1  ;;  %v4319_v2 = vpop.f32.mrb[96].mxu0 }
0x1871   : > { %v4329_v3 = vmul.f32 0.25, %v4319_v2  ;;  %v8515_v5 = vpop.f32.mrb[97].mxu0 }
0x1872   : > { %v7291_v5 = vld [vmem:[%s9687_s25 + $0x48] sm:$0xff] }
0x1873   : > { %v4334_v9 = vsel %vm1353_vm9, %v4329_v3, -inf }
0x1874   : > { %4335 = vmax.xlane.f32.xlu0 %v4334_v9  ;;  %v4324_v12 = vpop.f32.mrb[98].mxu0 }
0x1875   : > { %v4330_v10 = vmul.f32 0.25, %v4324_v12  ;;  %v8518_v4 = vpop.f32.mrb[99].mxu0 }
0x1876   : > { %v7292_v4 = vld [vmem:[%s9687_s25 + $0x50] sm:$0xff] }
0x1877   : > { %v4337_v16 = vsel %vm1360_vm10, %v4330_v10, -inf }
0x1878   : > { %4338 = vmax.xlane.f32.xlu1 %v4337_v16  ;;  %v7293_v16 = vld [vmem:[%s9687_s25 + $0x58] sm:$0xff] }
0x1879   : > { %v9192_v19 = vpack.c.bf16 %v7293_v16, %v7292_v4 }
0x18fd   : > { %v4333_v38 = vpop.xlane.xlu0 %4332 }
0x18fe   : > { %v4340_v22 = vsub.f32 %v4328_v62, %v4333_v38  ;;  %v9210_v62 = vpack.c.bf16 %v7310_v59, %v7309_v51  ;;  %v7294_v38 = vld [vmem:[%s9687_s25 + $0x60] sm:$0xff] }
0x18ff   : > { %v7299_v51 = vld [vmem:[%s9692_s28 + $0x1] ss:$0 sm:$0xff] }
0x1900   : > { %v4343_v15 = vmul.f32 1.442695, %v4340_v22  ;;  %9211 = vmatpush3.bf16.msra.mxu0 %v9210_v62  ;;  %v7295_v22 = vld [vmem:[%s9687_s25 + $0x68] sm:$0xff] }
0x1901   : > { %v4336_v17 = vpop.xlane.xlu0 %4335 }
0x1902   : > { %9464 = vpow2.f32 %v4343_v15  ;;  %v4341_v27 = vsub.f32 %v4329_v3, %v4336_v17  ;;  %v7290_v3 = vld [vmem:[%s9687_s25 + $0x40] sm:$0xff]  ;;  %v9195_v17 = vpack.c.bf16 %v7295_v22, %v7294_v38 }
0x1903   : > { %8601 = vmatmul.mubr.msk.f32.vlgmr.msra.gmra.mrb[106].mxu0 %vm888_vm2, %v10614_v58  ;;  %v9189_v12 = vpack.c.bf16 %v7291_v5, %v7290_v3 }
0x1904   : > { %v4345_v21 = vmul.f32 1.442695, %v4341_v27  ;;  %8603 = vmatprep.mubr.msk.f32.mxu0 %vm9545_vm4, %v9546_v45 }
0x1905   : > { %v4339_v25 = vpop.xlane.xlu1 %4338 }
0x1906   : > { %9466 = vpow2.f32 %v4345_v21  ;;  %v4342_v26 = vsub.f32 %v4330_v10, %v4339_v25  ;;  %v7296_v21 = vld [vmem:[%s9687_s25 + $0x70] sm:$0xff]  ;;  %v7297_v25 = vld [vmem:[%s9687_s25 + $0x78] sm:$0xff] }
0x1907   : > { %8604 = vmatmul.mubr.msk.f32.gmra.mrb[108].mxu0 %vm888_vm2, %v10629_v11 }
0x1908   : > { %v4347_v28 = vmul.f32 1.442695, %v4342_v26  ;;  %8606 = vmatprep.mubr.msk.f32.mxu0 %vm9545_vm4, %v9546_v45  ;;  %v9198_v26 = vpack.c.bf16 %v7297_v25, %v7296_v21 }
0x190a   : > { %9468 = vpow2.f32 %v4347_v28  ;;  %v7286_v28 = vld [vmem:[%s9682_s22 + $0x1] ss:$0 sm:$0xff] }
0x190b   : > { %8607 = vmatmul.mubr.msk.f32.gmra.mrb[110].mxu0 %vm888_vm2, %v10642_v23 }
0x190c   : > { %v10717_v31 = vpop.eup %9464 }
0x190d   : > { %v4349_v33 = vsel %vm1353_vm9, %v10717_v31, 0.0 }
0x190e   : > { %4350 = vadd.xlane.f32.xlu1 %v4349_v33 }
0x1910   : > { %v10721_v34 = vpop.eup %9466 }
0x1911   : > { %v4352_v35 = vsel %vm1353_vm9, %v10721_v34, 0.0 }
0x1912   : > { %4353 = vadd.xlane.f32.xlu0 %v4352_v35 }
0x1914   : > { %v10725_v36 = vpop.eup %9468 }
0x1915   : > { %v4355_v39 = vsel %vm1360_vm10, %v10725_v36, 0.0 }
0x1916   : > { %4356 = vadd.xlane.f32.xlu1 %v4355_v39 }
0x199b   : > { %v4351_v0 = vpop.xlane.xlu1 %4350 }
0x199c   : > { %9470 = vrcp.f32 %v4351_v0 }
0x199f   : > { %v4354_v1 = vpop.xlane.xlu0 %4353 }
0x19a0   : > { %9472 = vrcp.f32 %v4354_v1 }
0x19a3   : > { %v4357_v2 = vpop.xlane.xlu1 %4356 }
0x19a4   : > { %9474 = vrcp.f32 %v4357_v2 }
0x19a6   : > { %v9471_v9 = vpop.eup %9470 }
0x19a7   : > { %v4359_v10 = vmul.f32 %v9471_v9, %v10717_v31  ;;  %v4539_v31 = vpop.f32.mrb[100].mxu0 }
0x19a8   : > { %v4540_v33 = vadd.f32 %v7286_v28, %v4539_v31 }
0x19a9   : > { %8526 = vmatmul.mubr.msk.f32.vlgmr.msra.gmra.mrb[80].mxu1 %vm1353_vm9, %v4359_v10 }
0x19aa   : > { %v9473_v42 = vpop.eup %9472  ;;  %9190 = vmatpush3.bf16.msra.mxu1 %v9189_v12  ;;  %8528 = vmatprep.mubr.msk.f32.mxu1 %vm9545_vm4, %v9546_v45 }
0x19ab   : > { %9191 = vmatprep.subr.bf16.mxu1 %v9544_v32  ;;  %v4361_v20 = vmul.f32 %v9473_v42, %v10721_v34  ;;  %v8552_v34 = vpop.f32.mrb[101].mxu0 }
0x19ac   : > { %v4544_v35 = vpop.f32.mrb[102].mxu0 }
0x19ad   : > { %8529 = vmatmul.mubr.msk.f32.gmra.mrb[82].mxu1 %vm1353_vm9, %v4361_v20  ;;  %v8555_v39 = vpop.f32.mrb[103].mxu0 }
0x19ae   : > { %v9475_v15 = vpop.eup %9474  ;;  %9193 = vmatpush3.bf16.msra.mxu1 %v9192_v19  ;;  %8531 = vmatprep.mubr.msk.f32.mxu1 %vm9545_vm4, %v9546_v45  ;;  %v4549_v40 = vpop.f32.mrb[104].mxu0 }
0x19af   : > { %9194 = vmatprep.subr.bf16.mxu1 %v9544_v32  ;;  %v4363_v27 = vmul.f32 %v9475_v15, %v10725_v36  ;;  %v4545_v36 = vadd.f32 %v7286_v28, %v4544_v35  ;;  %v4550_v56 = vadd.f32 %v7286_v28, %v4549_v40  ;;  %v8558_v43 = vpop.f32.mrb[105].mxu0 }
0x19b1   : > { %8532 = vmatmul.mubr.msk.f32.gmra.mrb[84].mxu1 %vm1353_vm9, %v4363_v27 }
0x19b2   : > { %9196 = vmatpush3.bf16.msra.mxu1 %v9195_v17  ;;  %8575 = vmatprep.mubr.msk.f32.mxu1 %vm9545_vm4, %v9546_v45 }
0x19b3   : > { %9197 = vmatprep.subr.bf16.mxu1 %v9544_v32 }
0x19b6   : > { %9199 = vmatpush3.bf16.msra.mxu1 %v9198_v26 }
0x19b9   : > { %8576 = vmatmul.mubr.msk.f32.vlgmr.msra.gmra.mrb[86].mxu1 %vm888_vm2, %v10614_v58 }
0x19ba   : > { %8578 = vmatprep.mubr.msk.f32.mxu1 %vm9545_vm4, %v9546_v45 }
0x19bd   : > { %8579 = vmatmul.mubr.msk.f32.gmra.mrb[88].mxu1 %vm888_vm2, %v10629_v11 }
0x19be   : > { %8581 = vmatprep.mubr.msk.f32.mxu1 %vm9545_vm4, %v9546_v45 }
0x19c1   : > { %8582 = vmatmul.mubr.msk.f32.gmra.mrb[90].mxu1 %vm888_vm2, %v10642_v23 }
0x19d6   : > { %v4729_v46 = vpop.f32.mrb[106].mxu0 }
0x19d7   : > { %v10812_v48 = vadd.f32 %v7312_v57, %v4729_v46  ;;  %v8602_v6 = vpop.f32.mrb[107].mxu0 }
0x19da   : > { %v4734_v8 = vpop.f32.mrb[108].mxu0 }
0x19db   : > { %v10814_v44 = vadd.f32 %v7312_v57, %v4734_v8  ;;  %v8605_v52 = vpop.f32.mrb[109].mxu0 }
0x19de   : > { %v4739_v13 = vpop.f32.mrb[110].mxu0 }
0x19df   : > { %v10816_v14 = vadd.f32 %v7312_v57, %v4739_v13  ;;  %v8608_v7 = vpop.f32.mrb[111].mxu0 }
0x1a7c   : > { %v10818_v29 = vpop.f32.mrb[80].mxu1 }
0x1a7d   : > { %v8527_v37 = vpop.f32.mrb[81].mxu1 }
0x1a80   : > { %v10820_v47 = vpop.f32.mrb[82].mxu1 }
0x1a81   : > { %v8530_v61 = vpop.f32.mrb[83].mxu1 }
0x1a84   : > { %v10822_v54 = vpop.f32.mrb[84].mxu1 }
0x1a85   : > { %v8533_v49 = vpop.f32.mrb[85].mxu1 }
0x1a8c   : > { %v4634_v59 = vpop.f32.mrb[86].mxu1 }
0x1a8d   : > { %v4635_v62 = vadd.f32 %v7299_v51, %v4634_v59  ;;  %v8577_v0 = vpop.f32.mrb[87].mxu1 }
0x1a8f   : > { %4745 = sbr.rel (%p7051_p5) target bundleno = 6808 (0x1a98), region = 128  ;;  %7317 = vst.msk [vmem:[%s11417_s21 + $0x78] sm:$0xff] (!%p7051_p5), %vm1251_vm7, %v4635_v62 }
0x1a90   : > { %v4639_v1 = vpop.f32.mrb[88].mxu1 }
0x1a91   : > { %v4640_v2 = vadd.f32 %v7299_v51, %v4639_v1  ;;  %v8580_v3 = vpop.f32.mrb[89].mxu1 }
0x1a93   : > { %7318 = vst.msk [vmem:[%s11417_s21 + $0x80] sm:$0xff] (!%p7051_p5), %vm1251_vm7, %v4640_v2 }
0x1a94   : > { %v4644_v5 = vpop.f32.mrb[90].mxu1 }
0x1a95   : > { %v4645_v9 = vadd.f32 %v7299_v51, %v4644_v5  ;;  %v8583_v12 = vpop.f32.mrb[91].mxu1 }
0x1a97   : > { %7319 = vst.msk [vmem:[%s11417_s21 + $0x88] sm:$0x1] %vm4749_vm0, %v4645_v9 }
0x1a98 PF: > { %9212 = vmatprep.subr.bf16.mxu1 %v9544_v32  ;;  %v9213_v10 = vpack.c.bf16 %v4640_v2, %v4635_v62  ;;  %8615 = vmatprep.mubr.msk.f32.mxu1 %vm9545_vm4, %v9546_v45  ;;  %v9217_v52 = vpack.c.bf16 %v10814_v44, %v10812_v48  ;;  %v7330_v13 = vld [vmem:[%s9712_s27 + $0x10] sm:$0xff]  ;;  %v7331_v7 = vld [vmem:[%s9712_s27 + $0x18] sm:$0xff]  ;;  %v9223_v44 = vpack.c.bf16 %v10712_v18, %v10709_v55  ;;  %v7351_v18 = vld [vmem:[%s9687_s25 + $0x80] sm:$0xff]  ;;  %s11419_s3 = sld [smem:[#allocation23_spill]] (!%p7051_p5)  ;;  %vm5448_vm1 = vcmask (!%p7051_p5), 122880  }
0x1a99   : > { %9219 = vmatprep.subr.bf16.mxu0 %v9544_v32  ;;  %8643 = vmatprep.mubr.msk.f32.mxu0 %vm9545_vm4, %v9546_v45  ;;  %v9220_v37 = vpack.c.bf16 %v7331_v7, %v7330_v13  ;;  %v7353_v2 = vld [vmem:[%s9687_s25 + $0x90] sm:$0xff]  ;;  %v7354_v3 = vld [vmem:[%s9687_s25 + $0x98] sm:$0xff]  ;;  %v7356_v5 = vld [vmem:[%s9687_s25 + $0xa8] sm:$0xff] }
0x1a9a   : > { %9215 = vmatpush3.bf16.xpose.msk.msra.mxu1 %vm9902_vm8, %v9213_v10  ;;  %v7357_v12 = vld [vmem:[%s9687_s25 + $0xb0] sm:$0xff]  ;;  %v7358_v10 = vld [vmem:[%s9687_s25 + $0xb8] sm:$0xff] }
0x1a9b   : > { %8613 = vmatprep.subr.mxu1 %v9546_v45  ;;  %9221 = vmatpush3.bf16.msra.mxu0 %v9220_v37  ;;  %v7370_v13 = vld [vmem:[%s9697_s1 + $0xb0] sm:$0xff]  ;;  %v7371_v7 = vld [vmem:[%s9697_s1 + $0xb8] sm:$0xff] }
0x1a9c   : > { %9225 = vmatprep.subr.bf16.mxu0 %v9544_v32  ;;  %v9259_v37 = vpack.c.bf16 %v7371_v7, %v7370_v13 }
0x1aa2   : > { %8614 = vmatpush3.xpose.msk.msra.mxu1 %vm1251_vm7, %v4645_v9 }
0x1aa3   : > { %9216 = vmatprep.subr.bf16.mxu1 %v9544_v32 }
0x1aa5   : > { %8616 = vmatmul.mubr.msk.f32.vlgmr.msra.gmra.mrb[92].mxu1 %vm1251_vm7, %v4540_v33 }
0x1aa6   : > { %8618 = vmatprep.mubr.msk.f32.mxu1 %vm9545_vm4, %v9546_v45  ;;  %9218 = vmatpush3.bf16.msra.mxu1 %v9217_v52 }
0x1aa7   : > { %8628 = vmatprep.subr.mxu1 %v9546_v45 }
0x1aa9   : > { %8619 = vmatmul.mubr.msk.f32.gmra.mrb[94].mxu1 %vm1251_vm7, %v4545_v36 }
0x1aaa   : > { %8621 = vmatprep.mubr.msk.f32.mxu1 %vm9545_vm4, %v9546_v45  ;;  %8629 = vmatpush3.msk.msra.mxu1 %vm1397_vm11, %v10816_v14 }
0x1aab   : > { %9222 = vmatprep.subr.bf16.mxu1 %v9544_v32 }
0x1aad   : > { %8622 = vmatmul.mubr.msk.f32.gmra.mrb[96].mxu1 %vm1251_vm7, %v4550_v56 }
0x1aae   : > { %8630 = vmatprep.mubr.msk.f32.mxu1 %vm9545_vm4, %v9546_v45 }
0x1b78   : > { %v4835_v4 = vpop.f32.mrb[92].mxu1 }
0x1b79   : > { %v4849_v16 = vmul.f32 0.25, %v4835_v4  ;;  %v8617_v42 = vpop.f32.mrb[93].mxu1  ;;  %v9247_v4 = vpack.c.bf16 %v7358_v10, %v7357_v12 }
0x1b7a   : > { %v7339_v42 = vld [vmem:[%s9677_s19 + $0x88] sm:$0xff] }
0x1b7b   : > { %v4852_v19 = vsel %vm1353_vm9, %v4849_v16, -inf }
0x1b7c   : > { %4853 = vmax.xlane.f32.xlu0 %v4852_v19  ;;  %v4840_v20 = vpop.f32.mrb[94].mxu1 }
0x1b7d   : > { %v4850_v38 = vmul.f32 0.25, %v4840_v20  ;;  %v8620_v22 = vpop.f32.mrb[95].mxu1  ;;  %v7340_v20 = vld [vmem:[%s9677_s19 + $0x90] sm:$0xff] }
0x1b7f   : > { %v4855_v15 = vsel %vm1353_vm9, %v4850_v38, -inf }
0x1b80   : > { %4856 = vmax.xlane.f32.xlu0 %v4855_v15  ;;  %v4845_v17 = vpop.f32.mrb[96].mxu1 }
0x1b81   : > { %v4851_v27 = vmul.f32 0.25, %v4845_v17  ;;  %v8623_v21 = vpop.f32.mrb[97].mxu1 }
0x1b82   : > { %v7343_v21 = vld [vmem:[%s9677_s19 + $0xa8] sm:$0xff] }
0x1b83   : > { %v4858_v25 = vsel %vm1360_vm10, %v4851_v27, -inf }
0x1b84   : > { %4859 = vmax.xlane.f32.xlu1 %v4858_v25 }
0x1c09   : > { %v4854_v26 = vpop.xlane.xlu0 %4853 }
0x1c0a   : > { %v4861_v28 = vsub.f32 %v4849_v16, %v4854_v26  ;;  %v7338_v16 = vld [vmem:[%s9677_s19 + $0x80] sm:$0xff] }
0x1c0b   : > { %v9226_v19 = vpack.c.bf16 %v7339_v42, %v7338_v16 }
0x1c0c   : > { %v4864_v31 = vmul.f32 1.442695, %v4861_v28 }
0x1c0d   : > { %v4857_v33 = vpop.xlane.xlu0 %4856 }
0x1c0e   : > { %9476 = vpow2.f32 %v4864_v31  ;;  %v4862_v34 = vsub.f32 %v4850_v38, %v4857_v33  ;;  %v7341_v38 = vld [vmem:[%s9677_s19 + $0x98] sm:$0xff]  ;;  %v7344_v31 = vld [vmem:[%s9677_s19 + $0xb0] sm:$0xff] }
0x1c0f   : > { %v9229_v17 = vpack.c.bf16 %v7341_v38, %v7340_v20  ;;  %v7345_v33 = vld [vmem:[%s9677_s19 + $0xb8] sm:$0xff]  ;;  %v7347_v20 = vld [vmem:[%s9682_s22 + $0x2] ss:$0 sm:$0xff] }
0x1c10   : > { %v4866_v35 = vmul.f32 1.442695, %v4862_v34 }
0x1c11   : > { %v4860_v36 = vpop.xlane.xlu1 %4859 }
0x1c12   : > { %9478 = vpow2.f32 %v4866_v35  ;;  %v4863_v39 = vsub.f32 %v4851_v27, %v4860_v36  ;;  %v7342_v27 = vld [vmem:[%s9677_s19 + $0xa0] sm:$0xff]  ;;  %v9235_v36 = vpack.c.bf16 %v7345_v33, %v7344_v31 }
0x1c13   : > { %v9232_v28 = vpack.c.bf16 %v7343_v21, %v7342_v27  ;;  %v7373_v31 = vld [vmem:[%s9702_s17 + $0x2] ss:$0 sm:$0xff] }
0x1c14   : > { %v4868_v40 = vmul.f32 1.442695, %v4863_v39  ;;  %v7364_v39 = vld [vmem:[%s9697_s1 + $0x80] sm:$0xff] }
0x1c16   : > { %9480 = vpow2.f32 %v4868_v40  ;;  %v7365_v40 = vld [vmem:[%s9697_s1 + $0x88] sm:$0xff] }
0x1c18   : > { %v9477_v56 = vpop.eup %9476 }
0x1c19   : > { %v4870_v43 = vsel %vm1353_vm9, %v9477_v56, 0.0 }
0x1c1a   : > { %4871 = vadd.xlane.f32.xlu1 %v4870_v43  ;;  %v7366_v43 = vld [vmem:[%s9697_s1 + $0x90] sm:$0xff] }
0x1c1c   : > { %v9479_v57 = vpop.eup %9478 }
0x1c1d   : > { %v4873_v46 = vsel %vm1353_vm9, %v9479_v57, 0.0 }
0x1c1e   : > { %4874 = vadd.xlane.f32.xlu0 %v4873_v46 }
0x1c20   : > { %v9481_v6 = vpop.eup %9480 }
0x1c21   : > { %v4876_v8 = vsel %vm1360_vm10, %v9481_v6, 0.0 }
0x1c22   : > { %4877 = vadd.xlane.f32.xlu1 %v4876_v8  ;;  %v7369_v8 = vld [vmem:[%s9697_s1 + $0xa8] sm:$0xff] }
0x1ca7   : > { %v4872_v61 = vpop.xlane.xlu1 %4871 }
0x1ca8   : > { %9482 = vrcp.f32 %v4872_v61 }
0x1cab   : > { %v4875_v49 = vpop.xlane.xlu0 %4874 }
0x1cac   : > { %9484 = vrcp.f32 %v4875_v49 }
0x1caf   : > { %v4878_v51 = vpop.xlane.xlu1 %4877 }
0x1cb0   : > { %9486 = vrcp.f32 %v4878_v51 }
0x1cb2   : > { %v9483_v48 = vpop.eup %9482 }
0x1cb3   : > { %v4880_v59 = vmul.f32 %v9483_v48, %v9477_v56  ;;  %v9250_v56 = vpack.c.bf16 %v7365_v40, %v7364_v39 }
0x1cb5   : > { %8631 = vmatmul.mubr.msk.f32.vlgmr.msra.gmra.mrb[98].mxu1 %vm1353_vm9, %v4880_v59 }
0x1cb6   : > { %v9485_v14 = vpop.eup %9484  ;;  %8633 = vmatprep.mubr.msk.f32.mxu1 %vm9545_vm4, %v9546_v45  ;;  %9224 = vmatpush3.bf16.msra.mxu1 %v9223_v44 }
0x1cb7   : > { %v4882_v62 = vmul.f32 %v9485_v14, %v9479_v57  ;;  %9237 = vmatprep.subr.bf16.mxu1 %v9544_v32  ;;  %v7367_v57 = vld [vmem:[%s9697_s1 + $0x98] sm:$0xff]  ;;  %v7360_v14 = vld [vmem:[%s9692_s28 + $0x2] ss:$0 sm:$0xff] }
0x1cb8   : > { %v9253_v46 = vpack.c.bf16 %v7367_v57, %v7366_v43 }
0x1cb9   : > { %8634 = vmatmul.mubr.msk.f32.gmra.mrb[100].mxu1 %vm1353_vm9, %v4882_v62 }
0x1cba   : > { %v9487_v0 = vpop.eup %9486  ;;  %8636 = vmatprep.mubr.msk.f32.mxu1 %vm9545_vm4, %v9546_v45 }
0x1cbb   : > { %v4884_v55 = vmul.f32 %v9487_v0, %v9481_v6  ;;  %v7368_v6 = vld [vmem:[%s9697_s1 + $0xa0] sm:$0xff] }
0x1cbc   : > { %v9256_v52 = vpack.c.bf16 %v7369_v8, %v7368_v6 }
0x1cbd   : > { %8637 = vmatmul.mubr.msk.f32.gmra.mrb[102].mxu1 %vm1353_vm9, %v4884_v55 }
0x1cbe   : > { %8656 = vmatprep.mubr.msk.f32.mxu1 %vm9545_vm4, %v9546_v45 }
0x1cc1   : > { %8657 = vmatmul.mubr.msk.f32.vlgmr.msra.gmra.mrb[104].mxu1 %vm1251_vm7, %v10818_v29  ;;  %v7352_v29 = vld [vmem:[%s9687_s25 + $0x88] sm:$0xff] }
0x1cc2   : > { %8659 = vmatprep.mubr.msk.f32.mxu1 %vm9545_vm4, %v9546_v45  ;;  %v9238_v1 = vpack.c.bf16 %v7352_v29, %v7351_v18 }
0x1cc4   : > { %9239 = vmatpush3.bf16.msra.mxu1 %v9238_v1 }
0x1cc5   : > { %8660 = vmatmul.mubr.msk.f32.gmra.mrb[106].mxu1 %vm1251_vm7, %v10820_v47  ;;  %9240 = vmatprep.subr.bf16.mxu1 %v9544_v32  ;;  %v9241_v47 = vpack.c.bf16 %v7354_v3, %v7353_v2 }
0x1cc6   : > { %8662 = vmatprep.mubr.msk.f32.mxu1 %vm9545_vm4, %v9546_v45 }
0x1cc8   : > { %9242 = vmatpush3.bf16.msra.mxu1 %v9241_v47 }
0x1cc9   : > { %8663 = vmatmul.mubr.msk.f32.gmra.mrb[108].mxu1 %vm1251_vm7, %v10822_v54  ;;  %9243 = vmatprep.subr.bf16.mxu1 %v9544_v32  ;;  %v7355_v54 = vld [vmem:[%s9687_s25 + $0xa0] sm:$0xff] }
0x1cca   : > { %8706 = vmatprep.mubr.msk.f32.mxu1 %vm9545_vm4, %v9546_v45  ;;  %v9244_v9 = vpack.c.bf16 %v7356_v5, %v7355_v54 }
0x1ccc   : > { %9245 = vmatpush3.bf16.msra.mxu1 %v9244_v9 }
0x1ccd   : > { %9246 = vmatprep.subr.bf16.mxu1 %v9544_v32 }
0x1cd0   : > { %9248 = vmatpush3.bf16.msra.mxu1 %v9247_v4 }
0x1cd3   : > { %8707 = vmatmul.mubr.msk.f32.vlgmr.msra.gmra.mrb[110].mxu1 %vm888_vm2, %v10614_v58 }
0x1cd4   : > { %8709 = vmatprep.mubr.msk.f32.mxu1 %vm9545_vm4, %v9546_v45 }
0x1cd7   : > { %8710 = vmatmul.mubr.msk.f32.gmra.mrb[112].mxu1 %vm888_vm2, %v10629_v11 }
0x1cd8   : > { %8712 = vmatprep.mubr.msk.f32.mxu1 %vm9545_vm4, %v9546_v45 }
0x1cdb   : > { %8713 = vmatmul.mubr.msk.f32.gmra.mrb[114].mxu1 %vm888_vm2, %v10642_v23 }
0x1d88   : > { %v4963_v22 = vpop.f32.mrb[98].mxu1 }
0x1d89   : > { %v8632_v15 = vpop.f32.mrb[99].mxu1  ;;  %8644 = vmatmul.mubr.msk.f32.vlgmr.msra.gmra.mrb[112].mxu0 %vm1251_vm7, %v4963_v22 }
0x1d8a   : > { %9227 = vmatpush3.bf16.msra.mxu0 %v9226_v19  ;;  %8646 = vmatprep.mubr.msk.f32.mxu0 %vm9545_vm4, %v9546_v45 }
0x1d8b   : > { %9228 = vmatprep.subr.bf16.mxu0 %v9544_v32 }
0x1d8c   : > { %v4968_v25 = vpop.f32.mrb[100].mxu1 }
0x1d8d   : > { %v8635_v26 = vpop.f32.mrb[101].mxu1  ;;  %8647 = vmatmul.mubr.msk.f32.gmra.mrb[114].mxu0 %vm1251_vm7, %v4968_v25 }
0x1d8e   : > { %9230 = vmatpush3.bf16.msra.mxu0 %v9229_v17  ;;  %8649 = vmatprep.mubr.msk.f32.mxu0 %vm9545_vm4, %v9546_v45 }
0x1d8f   : > { %9231 = vmatprep.subr.bf16.mxu0 %v9544_v32 }
0x1d90   : > { %v4973_v34 = vpop.f32.mrb[102].mxu1 }
0x1d91   : > { %v8638_v35 = vpop.f32.mrb[103].mxu1  ;;  %8650 = vmatmul.mubr.msk.f32.gmra.mrb[116].mxu0 %vm1251_vm7, %v4973_v34 }
0x1d92   : > { %9233 = vmatpush3.bf16.msra.mxu0 %v9232_v28  ;;  %8681 = vmatprep.mubr.msk.f32.mxu0 %vm9545_vm4, %v9546_v45 }
0x1d93   : > { %9234 = vmatprep.subr.bf16.mxu0 %v9544_v32 }
0x1d94   : > { %v5143_v61 = vpop.f32.mrb[104].mxu1 }
0x1d95   : > { %v8658_v49 = vpop.f32.mrb[105].mxu1 }
0x1d96   : > { %9236 = vmatpush3.bf16.msra.mxu0 %v9235_v36 }
0x1d97   : > { %9249 = vmatprep.subr.bf16.mxu0 %v9544_v32 }
0x1d98   : > { %v5148_v51 = vpop.f32.mrb[106].mxu1 }
0x1d99   : > { %8682 = vmatmul.mubr.msk.f32.vlgmr.msra.gmra.mrb[118].mxu0 %vm888_vm2, %v10614_v58  ;;  %v8661_v48 = vpop.f32.mrb[107].mxu1 }
0x1d9a   : > { %9251 = vmatpush3.bf16.msra.mxu0 %v9250_v56  ;;  %8684 = vmatprep.mubr.msk.f32.mxu0 %vm9545_vm4, %v9546_v45 }
0x1d9b   : > { %9252 = vmatprep.subr.bf16.mxu0 %v9544_v32 }
0x1d9c   : > { %v5153_v44 = vpop.f32.mrb[108].mxu1 }
0x1d9d   : > { %8685 = vmatmul.mubr.msk.f32.gmra.mrb[120].mxu0 %vm888_vm2, %v10629_v11  ;;  %v8664_v59 = vpop.f32.mrb[109].mxu1 }
0x1d9e   : > { %9254 = vmatpush3.bf16.msra.mxu0 %v9253_v46  ;;  %8687 = vmatprep.mubr.msk.f32.mxu0 %vm9545_vm4, %v9546_v45 }
0x1d9f   : > { %9255 = vmatprep.subr.bf16.mxu0 %v9544_v32 }
0x1da1   : > { %8688 = vmatmul.mubr.msk.f32.gmra.mrb[122].mxu0 %vm888_vm2, %v10642_v23 }
0x1da2   : > { %9257 = vmatpush3.bf16.msra.mxu0 %v9256_v52  ;;  %8731 = vmatprep.mubr.msk.f32.mxu0 %vm9545_vm4, %v9546_v45 }
0x1da3   : > { %9258 = vmatprep.subr.bf16.mxu0 %v9544_v32 }
0x1da6   : > { %9260 = vmatpush3.bf16.msra.mxu0 %v9259_v37  ;;  %v5333_v62 = vpop.f32.mrb[110].mxu1 }
0x1da7   : > { %v5334_v0 = vadd.f32 %v7360_v14, %v5333_v62  ;;  %v8708_v55 = vpop.f32.mrb[111].mxu1 }
0x1da9   : > { %8732 = vmatmul.mubr.msk.f32.vlgmr.msra.gmra.mrb[124].mxu0 %vm888_vm2, %v10614_v58  ;;  %7378 = vst.msk [vmem:[%s11419_s3 + $0x90] sm:$0xff] (!%p7051_p5), %vm1251_vm7, %v5334_v0 }
0x1daa   : > { %8734 = vmatprep.mubr.msk.f32.mxu0 %vm9545_vm4, %v9546_v45  ;;  %v5338_v18 = vpop.f32.mrb[112].mxu1 }
0x1dab   : > { %v5339_v29 = vadd.f32 %v7360_v14, %v5338_v18  ;;  %v8711_v1 = vpop.f32.mrb[113].mxu1 }
0x1dad   : > { %8735 = vmatmul.mubr.msk.f32.gmra.mrb[126].mxu0 %vm888_vm2, %v10629_v11  ;;  %7379 = vst.msk [vmem:[%s11419_s3 + $0x98] sm:$0xff] (!%p7051_p5), %vm1251_vm7, %v5339_v29 }
0x1dae   : > { %8737 = vmatprep.mubr.msk.f32.mxu0 %vm9545_vm4, %v9546_v45  ;;  %v5343_v2 = vpop.f32.mrb[114].mxu1 }
0x1daf   : > { %v5344_v3 = vadd.f32 %v7360_v14, %v5343_v2  ;;  %v8714_v47 = vpop.f32.mrb[115].mxu1 }
0x1db1   : > { %8738 = vmatmul.mubr.msk.f32.gmra.mrb[128].mxu0 %vm888_vm2, %v10642_v23  ;;  %7380 = vst.msk [vmem:[%s11419_s3 + $0xa0] sm:$0x1] (!%p7051_p5), %vm5448_vm1, %v5344_v3 }
0x1e5c   : > { %v5054_v54 = vpop.f32.mrb[112].mxu0 }
0x1e5d   : > { %v10973_v5 = vadd.f32 %v5143_v61, %v5054_v54  ;;  %v8645_v9 = vpop.f32.mrb[113].mxu0 }
0x1e60   : > { %v5059_v12 = vpop.f32.mrb[114].mxu0 }
0x1e61   : > { %v10975_v10 = vadd.f32 %v5148_v51, %v5059_v12  ;;  %v8648_v4 = vpop.f32.mrb[115].mxu0 }
0x1e64   : > { %v5064_v16 = vpop.f32.mrb[116].mxu0 }
0x1e65   : > { %v10977_v42 = vadd.f32 %v5153_v44, %v5064_v16  ;;  %v8651_v19 = vpop.f32.mrb[117].mxu0 }
0x1e6c   : > { %v5238_v38 = vpop.f32.mrb[118].mxu0 }
0x1e6d   : > { %v5239_v22 = vadd.f32 %v7347_v20, %v5238_v38  ;;  %v8683_v15 = vpop.f32.mrb[119].mxu0 }
0x1e70   : > { %v5243_v17 = vpop.f32.mrb[120].mxu0 }
0x1e71   : > { %v5244_v27 = vadd.f32 %v7347_v20, %v5243_v17  ;;  %v8686_v21 = vpop.f32.mrb[121].mxu0 }
0x1e74   : > { %v5248_v25 = vpop.f32.mrb[122].mxu0 }
0x1e75   : > { %v5249_v26 = vadd.f32 %v7347_v20, %v5248_v25  ;;  %v8689_v28 = vpop.f32.mrb[123].mxu0 }
0x1e7c   : > { %v5428_v33 = vpop.f32.mrb[124].mxu0 }
0x1e7d   : > { %v10981_v34 = vadd.f32 %v7373_v31, %v5428_v33  ;;  %v8733_v35 = vpop.f32.mrb[125].mxu0 }
0x1e7f   : > { %5444 = sbr.rel (%p7051_p5) target bundleno = 7814 (0x1e86), region = 132 }
0x1e80   : > { %v5433_v36 = vpop.f32.mrb[126].mxu0 }
0x1e81   : > { %v10983_v39 = vadd.f32 %v7373_v31, %v5433_v36  ;;  %v8736_v40 = vpop.f32.mrb[127].mxu0 }
0x1e84   : > { %v5438_v56 = vpop.f32.mrb[128].mxu0 }
0x1e85   : > { %v5439_v43 = vadd.f32 %v7373_v31, %v5438_v56  ;;  %v8739_v57 = vpop.f32.mrb[129].mxu0 }
0x1e86 PF: > { %9261 = vmatprep.subr.bf16.mxu1 %v9544_v32  ;;  %v9262_v46 = vpack.c.bf16 %v5339_v29, %v5334_v0  ;;  %8746 = vmatprep.mubr.msk.f32.mxu1 %vm9545_vm4, %v9546_v45  ;;  %v9266_v19 = vpack.c.bf16 %v10983_v39, %v10981_v34  ;;  %v7391_v20 = vld [vmem:[%s9712_s27 + $0x20] sm:$0xff]  ;;  %v7392_v38 = vld [vmem:[%s9712_s27 + $0x28] sm:$0xff]  ;;  %v7398_v33 = vld [vmem:[%s9677_s19 + $0xd0] sm:$0xff]  ;;  %vm6061_vm5 = vcmask (!%p7051_p5), 122880  }
0x1e87   : > { %9265 = vmatprep.subr.bf16.mxu0 %v9544_v32  ;;  %8761 = vmatprep.mubr.msk.f32.mxu0 %vm9545_vm4, %v9546_v45  ;;  %v7396_v21 = vld [vmem:[%s9677_s19 + $0xc0] sm:$0xff]  ;;  %v7397_v25 = vld [vmem:[%s9677_s19 + $0xc8] sm:$0xff]  ;;  %v7399_v34 = vld [vmem:[%s9677_s19 + $0xd8] sm:$0xff] }
0x1e88   : > { %9264 = vmatpush3.bf16.xpose.msk.msra.mxu1 %vm9902_vm8, %v9262_v46  ;;  %9267 = vmatpush3.bf16.msra.mxu0 %v9266_v19  ;;  %v9272_v28 = vpack.c.bf16 %v7397_v25, %v7396_v21  ;;  %v9275_v36 = vpack.c.bf16 %v7399_v34, %v7398_v33  ;;  %v7400_v40 = vld [vmem:[%s9677_s19 + $0xe0] sm:$0xff]  ;;  %v7401_v56 = vld [vmem:[%s9677_s19 + $0xe8] sm:$0xff] }
0x1e89   : > { %8744 = vmatprep.subr.mxu1 %v9546_v45  ;;  %8759 = vmatprep.subr.mxu0 %v9546_v45  ;;  %v9278_v57 = vpack.c.bf16 %v7401_v56, %v7400_v40 }
0x1e8c   : > { %8760 = vmatpush3.msk.msra.mxu0 %vm1397_vm11, %v5439_v43 }
0x1e8d   : > { %9271 = vmatprep.subr.bf16.mxu0 %v9544_v32 }
0x1e90   : > { %8745 = vmatpush3.xpose.msk.msra.mxu1 %vm1251_vm7, %v5344_v3 }
0x1e91   : > { %9268 = vmatprep.subr.bf16.mxu1 %v9544_v32 }
0x1e93   : > { %8747 = vmatmul.mubr.msk.f32.vlgmr.msra.gmra.mrb[116].mxu1 %vm1251_vm7, %v5239_v22  ;;  %v9269_v22 = vpack.c.bf16 %v7392_v38, %v7391_v20  ;;  %v7415_v20 = vld [vmem:[%s9687_s25 + $0xf0] sm:$0xff]  ;;  %v7416_v38 = vld [vmem:[%s9687_s25 + $0xf8] sm:$0xff] }
0x1e94   : > { %8749 = vmatprep.mubr.msk.f32.mxu1 %vm9545_vm4, %v9546_v45 }
0x1e95   : > { %9270 = vmatpush3.bf16.msra.mxu1 %v9269_v22 }
0x1e96   : > { %9283 = vmatprep.subr.bf16.mxu1 %v9544_v32 }
0x1e97   : > { %8750 = vmatmul.mubr.msk.f32.gmra.mrb[118].mxu1 %vm1251_vm7, %v5244_v27 }
0x1e98   : > { %8752 = vmatprep.mubr.msk.f32.mxu1 %vm9545_vm4, %v9546_v45 }
0x1e9b   : > { %8753 = vmatmul.mubr.msk.f32.gmra.mrb[120].mxu1 %vm1251_vm7, %v5249_v26 }
0x1e9c   : > { %8774 = vmatprep.mubr.msk.f32.mxu1 %vm9545_vm4, %v9546_v45 }
0x1f66   : > { %v5534_v6 = vpop.f32.mrb[116].mxu1 }
0x1f67   : > { %v5548_v8 = vmul.f32 0.25, %v5534_v6  ;;  %v8748_v52 = vpop.f32.mrb[117].mxu1  ;;  %v7402_v6 = vld [vmem:[%s9677_s19 + $0xf0] sm:$0xff] }
0x1f69   : > { %v5551_v13 = vsel %vm1353_vm9, %v5548_v8, -inf }
0x1f6a   : > { %5552 = vmax.xlane.f32.xlu0 %v5551_v13  ;;  %v5539_v7 = vpop.f32.mrb[118].mxu1  ;;  %v7422_v13 = vld [vmem:[%s9697_s1 + $0xc0] sm:$0xff] }
0x1f6b   : > { %v5549_v37 = vmul.f32 0.25, %v5539_v7  ;;  %v8751_v61 = vpop.f32.mrb[119].mxu1  ;;  %v7423_v7 = vld [vmem:[%s9697_s1 + $0xc8] sm:$0xff] }
0x1f6c   : > { %v7424_v61 = vld [vmem:[%s9697_s1 + $0xd0] sm:$0xff] }
0x1f6d   : > { %v5554_v49 = vsel %vm1353_vm9, %v5549_v37, -inf }
0x1f6e   : > { %5555 = vmax.xlane.f32.xlu0 %v5554_v49  ;;  %v5544_v51 = vpop.f32.mrb[120].mxu1  ;;  %v7425_v49 = vld [vmem:[%s9697_s1 + $0xd8] sm:$0xff] }
0x1f6f   : > { %v5550_v48 = vmul.f32 0.25, %v5544_v51  ;;  %v8754_v44 = vpop.f32.mrb[121].mxu1  ;;  %v9299_v51 = vpack.c.bf16 %v7425_v49, %v7424_v61 }
0x1f70   : > { %v7427_v44 = vld [vmem:[%s9697_s1 + $0xe8] sm:$0xff] }
0x1f71   : > { %v5557_v59 = vsel %vm1360_vm10, %v5550_v48, -inf }
0x1f72   : > { %5558 = vmax.xlane.f32.xlu1 %v5557_v59 }
0x1ff7   : > { %v5553_v14 = vpop.xlane.xlu0 %5552 }
0x1ff8   : > { %v5560_v62 = vsub.f32 %v5548_v8, %v5553_v14  ;;  %v7403_v8 = vld [vmem:[%s9677_s19 + $0xf8] sm:$0xff]  ;;  %v7428_v14 = vld [vmem:[%s9697_s1 + $0xf0] sm:$0xff] }
0x1ff9   : > { %v9281_v52 = vpack.c.bf16 %v7403_v8, %v7402_v6 }
0x1ffa   : > { %v5563_v0 = vmul.f32 1.442695, %v5560_v62  ;;  %v7429_v62 = vld [vmem:[%s9697_s1 + $0xf8] sm:$0xff] }
0x1ffb   : > { %v5556_v55 = vpop.xlane.xlu0 %5555 }
0x1ffc   : > { %9488 = vpow2.f32 %v5563_v0  ;;  %v5561_v18 = vsub.f32 %v5549_v37, %v5556_v55  ;;  %v9296_v37 = vpack.c.bf16 %v7423_v7, %v7422_v13  ;;  %v9305_v0 = vpack.c.bf16 %v7429_v62, %v7428_v14  ;;  %v7409_v55 = vld [vmem:[%s9687_s25 + $0xc0] sm:$0xff] }
0x1ffe   : > { %v5565_v29 = vmul.f32 1.442695, %v5561_v18  ;;  %v7410_v18 = vld [vmem:[%s9687_s25 + $0xc8] sm:$0xff] }
0x1fff   : > { %v5559_v1 = vpop.xlane.xlu1 %5558 }
0x2000   : > { %9490 = vpow2.f32 %v5565_v29  ;;  %v5562_v2 = vsub.f32 %v5550_v48, %v5559_v1  ;;  %v7426_v48 = vld [vmem:[%s9697_s1 + $0xe0] sm:$0xff]  ;;  %v9284_v29 = vpack.c.bf16 %v7410_v18, %v7409_v55  ;;  %v7411_v1 = vld [vmem:[%s9687_s25 + $0xd0] sm:$0xff]  ;;  %s11421_s1 = sld [smem:[#allocation23_spill]] (!%p7051_p5) }
0x2001   : > { %v9302_v59 = vpack.c.bf16 %v7427_v44, %v7426_v48  ;;  %v7418_v44 = vld [vmem:[%s9692_s28 + $0x3] ss:$0 sm:$0xff] }
0x2002   : > { %v5567_v3 = vmul.f32 1.442695, %v5562_v2  ;;  %v7412_v2 = vld [vmem:[%s9687_s25 + $0xd8] sm:$0xff] }
0x2004   : > { %9492 = vpow2.f32 %v5567_v3 }
0x2006   : > { %v9489_v47 = vpop.eup %9488 }
0x2007   : > { %v5569_v54 = vsel %vm1353_vm9, %v9489_v47, 0.0 }
0x2008   : > { %5570 = vadd.xlane.f32.xlu1 %v5569_v54  ;;  %v9287_v54 = vpack.c.bf16 %v7412_v2, %v7411_v1 }
0x200a   : > { %v9491_v9 = vpop.eup %9490 }
0x200b   : > { %v5572_v12 = vsel %vm1353_vm9, %v9491_v9, 0.0 }
0x200c   : > { %5573 = vadd.xlane.f32.xlu0 %v5572_v12  ;;  %v7414_v12 = vld [vmem:[%s9687_s25 + $0xe8] sm:$0xff] }
0x200e   : > { %v9493_v4 = vpop.eup %9492 }
0x200f   : > { %v5575_v16 = vsel %vm1360_vm10, %v9493_v4, 0.0 }
0x2010   : > { %5576 = vadd.xlane.f32.xlu1 %v5575_v16 }
0x2095   : > { %v5571_v15 = vpop.xlane.xlu1 %5570 }
0x2096   : > { %9494 = vrcp.f32 %v5571_v15 }
0x2099   : > { %v5574_v17 = vpop.xlane.xlu0 %5573 }
0x209a   : > { %9496 = vrcp.f32 %v5574_v17  ;;  %v9293_v17 = vpack.c.bf16 %v7416_v38, %v7415_v20 }
0x209d   : > { %v5577_v27 = vpop.xlane.xlu1 %5576 }
0x209e   : > { %9498 = vrcp.f32 %v5577_v27  ;;  %v7405_v27 = vld [vmem:[%s9682_s22 + $0x3] ss:$0 sm:$0xff] }
0x20a0   : > { %v9495_v26 = vpop.eup %9494 }
0x20a1   : > { %v5579_v31 = vmul.f32 %v9495_v26, %v9489_v47 }
0x20a3   : > { %8762 = vmatmul.mubr.msk.f32.vlgmr.msra.gmra.mrb[130].mxu0 %vm1353_vm9, %v5579_v31 }
0x20a4   : > { %v9497_v35 = vpop.eup %9496  ;;  %8764 = vmatprep.mubr.msk.f32.mxu0 %vm9545_vm4, %v9546_v45  ;;  %9273 = vmatpush3.bf16.msra.mxu0 %v9272_v28 }
0x20a5   : > { %v5581_v39 = vmul.f32 %v9497_v35, %v9491_v9  ;;  %9274 = vmatprep.subr.bf16.mxu0 %v9544_v32  ;;  %v7413_v9 = vld [vmem:[%s9687_s25 + $0xe0] sm:$0xff] }
0x20a6   : > { %v9290_v19 = vpack.c.bf16 %v7414_v12, %v7413_v9 }
0x20a7   : > { %8765 = vmatmul.mubr.msk.f32.gmra.mrb[132].mxu0 %vm1353_vm9, %v5581_v39 }
0x20a8   : > { %v9499_v43 = vpop.eup %9498  ;;  %8767 = vmatprep.mubr.msk.f32.mxu0 %vm9545_vm4, %v9546_v45  ;;  %9276 = vmatpush3.bf16.msra.mxu0 %v9275_v36  ;;  %v7431_v36 = vld [vmem:[%s9702_s17 + $0x3] ss:$0 sm:$0xff] }
0x20a9   : > { %v5583_v46 = vmul.f32 %v9499_v43, %v9493_v4  ;;  %9277 = vmatprep.subr.bf16.mxu0 %v9544_v32 }
0x20ab   : > { %8768 = vmatmul.mubr.msk.f32.gmra.mrb[134].mxu0 %vm1353_vm9, %v5583_v46 }
0x20ac   : > { %9279 = vmatpush3.bf16.msra.mxu0 %v9278_v57  ;;  %8799 = vmatprep.mubr.msk.f32.mxu0 %vm9545_vm4, %v9546_v45 }
0x20ad   : > { %9280 = vmatprep.subr.bf16.mxu0 %v9544_v32 }
0x20b0   : > { %9282 = vmatpush3.bf16.msra.mxu0 %v9281_v52 }
0x20b1   : > { %9295 = vmatprep.subr.bf16.mxu0 %v9544_v32 }
0x20b3   : > { %8800 = vmatmul.mubr.msk.f32.vlgmr.msra.gmra.mrb[136].mxu0 %vm888_vm2, %v10614_v58 }
0x20b4   : > { %8802 = vmatprep.mubr.msk.f32.mxu0 %vm9545_vm4, %v9546_v45  ;;  %9297 = vmatpush3.bf16.msra.mxu0 %v9296_v37 }
0x20b5   : > { %9298 = vmatprep.subr.bf16.mxu0 %v9544_v32 }
0x20b7   : > { %8803 = vmatmul.mubr.msk.f32.gmra.mrb[138].mxu0 %vm888_vm2, %v10629_v11 }
0x20b8   : > { %8805 = vmatprep.mubr.msk.f32.mxu0 %vm9545_vm4, %v9546_v45  ;;  %9300 = vmatpush3.bf16.msra.mxu0 %v9299_v51 }
0x20b9   : > { %9301 = vmatprep.subr.bf16.mxu0 %v9544_v32 }
0x20bb   : > { %8806 = vmatmul.mubr.msk.f32.gmra.mrb[140].mxu0 %vm888_vm2, %v10642_v23 }
0x20bc   : > { %8849 = vmatprep.mubr.msk.f32.mxu0 %vm9545_vm4, %v9546_v45  ;;  %9303 = vmatpush3.bf16.msra.mxu0 %v9302_v59 }
0x20bd   : > { %9304 = vmatprep.subr.bf16.mxu0 %v9544_v32 }
0x20c0   : > { %9306 = vmatpush3.bf16.msra.mxu0 %v9305_v0 }
0x20c3   : > { %8850 = vmatmul.mubr.msk.f32.vlgmr.msra.gmra.mrb[142].mxu0 %vm888_vm2, %v10614_v58 }
0x20c4   : > { %8852 = vmatprep.mubr.msk.f32.mxu0 %vm9545_vm4, %v9546_v45 }
0x20c7   : > { %8853 = vmatmul.mubr.msk.f32.gmra.mrb[144].mxu0 %vm888_vm2, %v10629_v11 }
0x20c8   : > { %8855 = vmatprep.mubr.msk.f32.mxu0 %vm9545_vm4, %v9546_v45 }
0x20cb   : > { %8856 = vmatmul.mubr.msk.f32.gmra.mrb[146].mxu0 %vm888_vm2, %v10642_v23 }
0x2176   : > { %v5662_v3 = vpop.f32.mrb[130].mxu0 }
0x2177   : > { %v8763_v47 = vpop.f32.mrb[131].mxu0  ;;  %8775 = vmatmul.mubr.msk.f32.vlgmr.msra.gmra.mrb[122].mxu1 %vm1251_vm7, %v5662_v3 }
0x2178   : > { %9285 = vmatpush3.bf16.msra.mxu1 %v9284_v29  ;;  %8777 = vmatprep.mubr.msk.f32.mxu1 %vm9545_vm4, %v9546_v45 }
0x2179   : > { %9286 = vmatprep.subr.bf16.mxu1 %v9544_v32 }
0x217a   : > { %v5667_v4 = vpop.f32.mrb[132].mxu0 }
0x217b   : > { %v8766_v16 = vpop.f32.mrb[133].mxu0  ;;  %8778 = vmatmul.mubr.msk.f32.gmra.mrb[124].mxu1 %vm1251_vm7, %v5667_v4 }
0x217c   : > { %9288 = vmatpush3.bf16.msra.mxu1 %v9287_v54  ;;  %8780 = vmatprep.mubr.msk.f32.mxu1 %vm9545_vm4, %v9546_v45 }
0x217d   : > { %9289 = vmatprep.subr.bf16.mxu1 %v9544_v32 }
0x217e   : > { %v5672_v22 = vpop.f32.mrb[134].mxu0 }
0x217f   : > { %v8769_v15 = vpop.f32.mrb[135].mxu0  ;;  %8781 = vmatmul.mubr.msk.f32.gmra.mrb[126].mxu1 %vm1251_vm7, %v5672_v22 }
0x2180   : > { %9291 = vmatpush3.bf16.msra.mxu1 %v9290_v19  ;;  %8824 = vmatprep.mubr.msk.f32.mxu1 %vm9545_vm4, %v9546_v45 }
0x2181   : > { %9292 = vmatprep.subr.bf16.mxu1 %v9544_v32 }
0x2184   : > { %9294 = vmatpush3.bf16.msra.mxu1 %v9293_v17 }
0x2186   : > { %v5851_v21 = vpop.f32.mrb[136].mxu0 }
0x2187   : > { %8825 = vmatmul.mubr.msk.f32.vlgmr.msra.gmra.mrb[128].mxu1 %vm888_vm2, %v10614_v58  ;;  %v5852_v25 = vadd.f32 %v7405_v27, %v5851_v21  ;;  %v8801_v26 = vpop.f32.mrb[137].mxu0 }
0x2188   : > { %8827 = vmatprep.mubr.msk.f32.mxu1 %vm9545_vm4, %v9546_v45 }
0x218a   : > { %v5856_v28 = vpop.f32.mrb[138].mxu0 }
0x218b   : > { %8828 = vmatmul.mubr.msk.f32.gmra.mrb[130].mxu1 %vm888_vm2, %v10629_v11  ;;  %v5857_v31 = vadd.f32 %v7405_v27, %v5856_v28  ;;  %v8804_v33 = vpop.f32.mrb[139].mxu0 }
0x218c   : > { %8830 = vmatprep.mubr.msk.f32.mxu1 %vm9545_vm4, %v9546_v45 }
0x218e   : > { %v5861_v34 = vpop.f32.mrb[140].mxu0 }
0x218f   : > { %8831 = vmatmul.mubr.msk.f32.gmra.mrb[132].mxu1 %vm888_vm2, %v10642_v23  ;;  %v5862_v35 = vadd.f32 %v7405_v27, %v5861_v34  ;;  %v8807_v58 = vpop.f32.mrb[141].mxu0 }
0x2196   : > { %v6041_v39 = vpop.f32.mrb[142].mxu0 }
0x2197   : > { %v11118_v40 = vadd.f32 %v7431_v36, %v6041_v39  ;;  %v8851_v56 = vpop.f32.mrb[143].mxu0 }
0x219a   : > { %v6046_v43 = vpop.f32.mrb[144].mxu0 }
0x219b   : > { %v11120_v11 = vadd.f32 %v7431_v36, %v6046_v43  ;;  %v8854_v57 = vpop.f32.mrb[145].mxu0 }
0x219e   : > { %v6051_v46 = vpop.f32.mrb[146].mxu0 }
0x219f   : > { %v11122_v6 = vadd.f32 %v7431_v36, %v6051_v46  ;;  %v8857_v23 = vpop.f32.mrb[147].mxu0 }
0x224a   : > { %v5753_v8 = vpop.f32.mrb[122].mxu1 }
0x224b   : > { %v11125_v52 = vadd.f32 %v5753_v8, %v10973_v5  ;;  %v8776_v13 = vpop.f32.mrb[123].mxu1 }
0x224e   : > { %v5758_v7 = vpop.f32.mrb[124].mxu1 }
0x224f   : > { %v11128_v37 = vadd.f32 %v5758_v7, %v10975_v10  ;;  %v8779_v61 = vpop.f32.mrb[125].mxu1 }
0x2252   : > { %v5763_v49 = vpop.f32.mrb[126].mxu1 }
0x2253   : > { %v11131_v51 = vadd.f32 %v5763_v49, %v10977_v42  ;;  %v8782_v48 = vpop.f32.mrb[127].mxu1 }
0x225a   : > { %v5946_v59 = vpop.f32.mrb[128].mxu1 }
0x225b   : > { %v5947_v14 = vadd.f32 %v7418_v44, %v5946_v59  ;;  %v8826_v62 = vpop.f32.mrb[129].mxu1 }
0x225d   : > { %6057 = sbr.rel (%p7051_p5) target bundleno = 8806 (0x2266), region = 136  ;;  %7436 = vst.msk [vmem:[%s11421_s1 + $0xa8] sm:$0xff] (!%p7051_p5), %vm1251_vm7, %v5947_v14 }
0x225e   : > { %v5951_v0 = vpop.f32.mrb[130].mxu1 }
0x225f   : > { %v5952_v55 = vadd.f32 %v7418_v44, %v5951_v0  ;;  %v8829_v18 = vpop.f32.mrb[131].mxu1 }
0x2261   : > { %7437 = vst.msk [vmem:[%s11421_s1 + $0xb0] sm:$0xff] (!%p7051_p5), %vm1251_vm7, %v5952_v55 }
0x2262   : > { %v5956_v5 = vpop.f32.mrb[132].mxu1 }
0x2263   : > { %v5957_v29 = vadd.f32 %v7418_v44, %v5956_v5  ;;  %v8832_v1 = vpop.f32.mrb[133].mxu1 }
0x2265   : > { %7438 = vst.msk [vmem:[%s11421_s1 + $0xb8] sm:$0x1] %vm6061_vm5, %v5957_v29 }
0x2266 PF: > { %9307 = vmatprep.subr.bf16.mxu1 %v9544_v32  ;;  %v9308_v10 = vpack.c.bf16 %v5952_v55, %v5947_v14  ;;  %8864 = vmatprep.mubr.msk.f32.mxu1 %vm9545_vm4, %v9546_v45  ;;  %v9312_v36 = vpack.c.bf16 %v11120_v11, %v11118_v40  ;;  %v7449_v39 = vld [vmem:[%s9712_s27 + $0x30] sm:$0xff]  ;;  %v7450_v56 = vld [vmem:[%s9712_s27 + $0x38] sm:$0xff]  ;;  %v7454_v18 = vld [vmem:[%s9707_s2] ss:$0 sm:$0xff]  ;;  %s11423_s27 = sld [smem:[#allocation20_spill]] (!%p7051_p5)  ;;  %s11425_s29 = sld [smem:[#allocation22_spill]] (!%p7051_p5) }
0x2267   : > { %9311 = vmatprep.subr.bf16.mxu0 %v9544_v32  ;;  %8879 = vmatprep.mubr.msk.f32.mxu0 %vm9545_vm4, %v9546_v45  ;;  %v9315_v43 = vpack.c.bf16 %v7450_v56, %v7449_v39  ;;  %v6459_v56 = vld [vmem:[%s9727_s24 + $0x20] sm:$0xff] }
0x2268   : > { %9310 = vmatpush3.bf16.xpose.msk.msra.mxu1 %vm9902_vm8, %v9308_v10  ;;  %9313 = vmatpush3.bf16.msra.mxu0 %v9312_v36  ;;  %v6462_v36 = vld [vmem:[%s9727_s24 + $0x38] sm:$0xff] }
0x2269   : > { %8862 = vmatprep.subr.mxu1 %v9546_v45  ;;  %8877 = vmatprep.subr.mxu0 %v9546_v45 }
0x226c   : > { %8878 = vmatpush3.msk.msra.mxu0 %vm1397_vm11, %v11122_v6 }
0x2270   : > { %8863 = vmatpush3.xpose.msk.msra.mxu1 %vm1251_vm7, %v5957_v29 }
0x2271   : > { %9314 = vmatprep.subr.bf16.mxu1 %v9544_v32 }
0x2273   : > { %8865 = vmatmul.mubr.msk.f32.vlgmr.msra.gmra.mrb[134].mxu1 %vm1251_vm7, %v5852_v25 }
0x2274   : > { %8867 = vmatprep.mubr.msk.f32.mxu1 %vm9545_vm4, %v9546_v45  ;;  %9316 = vmatpush3.bf16.msra.mxu1 %v9315_v43  ;;  %v6461_v43 = vld [vmem:[%s9727_s24 + $0x30] sm:$0xff] }
0x2277   : > { %8868 = vmatmul.mubr.msk.f32.gmra.mrb[136].mxu1 %vm1251_vm7, %v5857_v31 }
0x2278   : > { %8870 = vmatprep.mubr.msk.f32.mxu1 %vm9545_vm4, %v9546_v45 }
0x227b   : > { %8871 = vmatmul.mubr.msk.f32.gmra.mrb[138].mxu1 %vm1251_vm7, %v5862_v35 }
0x227c   : > { %8892 = vmatprep.mubr.msk.f32.mxu1 %vm9545_vm4, %v9546_v45 }
0x2346   : > { %v6147_v60 = vpop.f32.mrb[134].mxu1 }
0x2347   : > { %v6161_v42 = vmul.f32 0.25, %v6147_v60  ;;  %v8866_v2 = vpop.f32.mrb[135].mxu1 }
0x2349   : > { %v6164_v32 = vsel %vm1353_vm9, %v6161_v42, -inf }
0x234a   : > { %6165 = vmax.xlane.f32.xlu0 %v6164_v32  ;;  %v6152_v3 = vpop.f32.mrb[136].mxu1 }
0x234b   : > { %v6162_v47 = vmul.f32 0.25, %v6152_v3  ;;  %v8869_v54 = vpop.f32.mrb[137].mxu1 }
0x234d   : > { %v6167_v9 = vsel %vm1353_vm9, %v6162_v47, -inf }
0x234e   : > { %6168 = vmax.xlane.f32.xlu0 %v6167_v9  ;;  %v6157_v12 = vpop.f32.mrb[138].mxu1 }
0x234f   : > { %v6163_v4 = vmul.f32 0.25, %v6157_v12  ;;  %v8872_v16 = vpop.f32.mrb[139].mxu1 }
0x2351   : > { %v6170_v19 = vsel %vm1360_vm10, %v6163_v4, -inf }
0x2352   : > { %6171 = vmax.xlane.f32.xlu1 %v6170_v19 }
0x23d7   : > { %v6166_v20 = vpop.xlane.xlu0 %6165 }
0x23d8   : > { %v6173_v38 = vsub.f32 %v6161_v42, %v6166_v20 }
0x23da   : > { %v6176_v22 = vmul.f32 1.442695, %v6173_v38 }
0x23db   : > { %v6169_v15 = vpop.xlane.xlu0 %6168 }
0x23dc   : > { %9500 = vpow2.f32 %v6176_v22  ;;  %v6174_v17 = vsub.f32 %v6162_v47, %v6169_v15 }
0x23de   : > { %v6178_v27 = vmul.f32 1.442695, %v6174_v17 }
0x23df   : > { %v6172_v21 = vpop.xlane.xlu1 %6171 }
0x23e0   : > { %9502 = vpow2.f32 %v6178_v27  ;;  %v6175_v25 = vsub.f32 %v6163_v4, %v6172_v21 }
0x23e2   : > { %v6180_v26 = vmul.f32 1.442695, %v6175_v25 }
0x23e4   : > { %9504 = vpow2.f32 %v6180_v26  ;;  %v6456_v26 = vld [vmem:[%s9727_s24 + $0x8] sm:$0xff] }
0x23e6   : > { %v9501_v28 = vpop.eup %9500 }
0x23e7   : > { %v6182_v31 = vsel %vm1353_vm9, %v9501_v28, 0.0 }
0x23e8   : > { %6183 = vadd.xlane.f32.xlu1 %v6182_v31 }
0x23ea   : > { %v9503_v33 = vpop.eup %9502 }
0x23eb   : > { %v6185_v34 = vsel %vm1353_vm9, %v9503_v33, 0.0 }
0x23ec   : > { %6186 = vadd.xlane.f32.xlu0 %v6185_v34  ;;  %v6457_v34 = vld [vmem:[%s9727_s24 + $0x10] sm:$0xff] }
0x23ee   : > { %v9505_v35 = vpop.eup %9504 }
0x23ef   : > { %v6188_v58 = vsel %vm1360_vm10, %v9505_v35, 0.0 }
0x23f0   : > { %6189 = vadd.xlane.f32.xlu1 %v6188_v58  ;;  %v6460_v58 = vld [vmem:[%s9727_s24 + $0x28] sm:$0xff] }
0x23f1   : > { %v9321_v39 = vpack.c.bf16 %v6462_v36, %v6460_v58  ;;  %v6651_v36 = vld [vmem:[%s9737_s9 + $0xb0] sm:$0xff] }
0x2475   : > { %v6184_v57 = vpop.xlane.xlu1 %6183 }
0x2476   : > { %9506 = vrcp.f32 %v6184_v57  ;;  %v9323_v57 = vpack.c.bf16 %v6461_v43, %v6459_v56  ;;  %v6635_v43 = vld [vmem:[%s9737_s9 + $0x30] sm:$0xff] }
0x2479   : > { %v6187_v46 = vpop.xlane.xlu0 %6186 }
0x247a   : > { %9508 = vrcp.f32 %v6187_v46  ;;  %v6464_v46 = vld [vmem:[%s9727_s24 + $0x48] sm:$0xff] }
0x247d   : > { %v6190_v23 = vpop.xlane.xlu1 %6189 }
0x247e   : > { %9510 = vrcp.f32 %v6190_v23  ;;  %v6466_v23 = vld [vmem:[%s9727_s24 + $0x58] sm:$0xff] }
0x2480   : > { %v9507_v8 = vpop.eup %9506 }
0x2481   : > { %v6192_v13 = vmul.f32 %v9507_v8, %v9501_v28  ;;  %v6458_v28 = vld [vmem:[%s9727_s24 + $0x18] sm:$0xff]  ;;  %v9325_v8 = vpack.c.bf16 %v6466_v23, %v6464_v46  ;;  %v6653_v23 = vld [vmem:[%s9737_s9 + $0xc0] sm:$0xff] }
0x2482   : > { %v9317_v31 = vpack.c.bf16 %v6458_v28, %v6456_v26  ;;  %v6649_v28 = vld [vmem:[%s9737_s9 + $0xa0] sm:$0xff] }
0x2483   : > { %8880 = vmatmul.mubr.msk.f32.vlgmr.msra.gmra.mrb[148].mxu0 %vm1353_vm9, %v6192_v13  ;;  %v6463_v13 = vld [vmem:[%s9727_s24 + $0x40] sm:$0xff] }
0x2484   : > { %v9509_v40 = vpop.eup %9508  ;;  %8882 = vmatprep.mubr.msk.f32.mxu0 %vm9545_vm4, %v9546_v45  ;;  %9318 = vmatprep.subr.bf16.mxu0 %v9317_v31  ;;  %v6650_v31 = vld [vmem:[%s9737_s9 + $0xa8] sm:$0xff] }
0x2485   : > { %v6194_v11 = vmul.f32 %v9509_v40, %v9503_v33  ;;  %v6455_v33 = vld [vmem:[%s9727_s24] sm:$0xff]  ;;  %v6465_v40 = vld [vmem:[%s9727_s24 + $0x50] sm:$0xff] }
0x2487   : > { %8883 = vmatmul.mubr.msk.f32.gmra.mrb[150].mxu0 %vm1353_vm9, %v6194_v11  ;;  %v9327_v11 = vpack.c.bf16 %v6465_v40, %v6463_v13  ;;  %v6637_v40 = vld [vmem:[%s9737_s9 + $0x40] sm:$0xff] }
0x2488   : > { %v9511_v6 = vpop.eup %9510  ;;  %8885 = vmatprep.mubr.msk.f32.mxu0 %vm9545_vm4, %v9546_v45 }
0x2489   : > { %v6196_v7 = vmul.f32 %v9511_v6, %v9505_v35  ;;  %v9319_v35 = vpack.c.bf16 %v6457_v34, %v6455_v33  ;;  %v6468_v6 = vld [vmem:[%s9727_s24 + $0x68] sm:$0xff]  ;;  %v9341_v33 = vpack.c.bf16 %v6650_v31, %v6649_v28  ;;  %v6633_v34 = vld [vmem:[%s9737_s9 + $0x20] sm:$0xff] }
0x248b   : > { %8886 = vmatmul.mubr.msk.f32.gmra.mrb[152].mxu0 %vm1353_vm9, %v6196_v7  ;;  %v6470_v7 = vld [vmem:[%s9727_s24 + $0x78] sm:$0xff] }
0x248c   : > { %6556 = vmatprep.mubr.f32.mxu0 %v9546_v45  ;;  %9320 = vmatpush1.bf16.msra.mxu0 %v9319_v35  ;;  %v6634_v35 = vld [vmem:[%s9737_s9 + $0x28] sm:$0xff] }
0x248d   : > { %9322 = vmatprep.subr.bf16.mxu0 %v9321_v39  ;;  %v9343_v58 = vpack.c.bf16 %v6634_v35, %v6633_v34  ;;  %v6652_v39 = vld [vmem:[%s9737_s9 + $0xb8] sm:$0xff] }
0x248e   : > { %v9345_v56 = vpack.c.bf16 %v6652_v39, %v6651_v36 }
0x2490   : > { %9324 = vmatpush1.bf16.msra.mxu0 %v9323_v57  ;;  %v6636_v57 = vld [vmem:[%s9737_s9 + $0x38] sm:$0xff] }
0x2491   : > { %9326 = vmatprep.subr.bf16.mxu0 %v9325_v8  ;;  %v9347_v46 = vpack.c.bf16 %v6636_v57, %v6635_v43  ;;  %v6654_v8 = vld [vmem:[%s9737_s9 + $0xc8] sm:$0xff] }
0x2492   : > { %v9349_v13 = vpack.c.bf16 %v6654_v8, %v6653_v23 }
0x2494   : > { %9328 = vmatpush1.bf16.msra.mxu0 %v9327_v11  ;;  %v6638_v11 = vld [vmem:[%s9737_s9 + $0x48] sm:$0xff] }
0x2556   : > { %v6275_v61 = vpop.f32.mrb[148].mxu0 }
0x2557   : > { %v8881_v49 = vpop.f32.mrb[149].mxu0  ;;  %8893 = vmatmul.mubr.msk.f32.vlgmr.msra.gmra.mrb[140].mxu1 %vm1251_vm7, %v6275_v61  ;;  %v9329_v61 = vpack.c.bf16 %v6470_v7, %v6468_v6  ;;  %v9351_v6 = vpack.c.bf16 %v6638_v11, %v6637_v40  ;;  %v6655_v7 = vld [vmem:[%s9737_s9 + $0xd0] sm:$0xff] }
0x2558   : > { %8895 = vmatprep.mubr.msk.f32.mxu1 %vm9545_vm4, %v9546_v45  ;;  %v6467_v49 = vld [vmem:[%s9727_s24 + $0x60] sm:$0xff] }
0x2559   : > { %9330 = vmatprep.subr.bf16.mxu0 %v9329_v61  ;;  %v6656_v61 = vld [vmem:[%s9737_s9 + $0xd8] sm:$0xff] }
0x255a   : > { %v6280_v48 = vpop.f32.mrb[150].mxu0 }
0x255b   : > { %v8884_v44 = vpop.f32.mrb[151].mxu0  ;;  %8896 = vmatmul.mubr.msk.f32.gmra.mrb[142].mxu1 %vm1251_vm7, %v6280_v48  ;;  %v6469_v48 = vld [vmem:[%s9727_s24 + $0x70] sm:$0xff]  ;;  %s11424_s24 = sld [smem:[#allocation21_spill]] (!%p7051_p5) }
0x255c   : > { %8898 = vmatprep.mubr.msk.f32.mxu1 %vm9545_vm4, %v9546_v45  ;;  %v9331_v44 = vpack.c.bf16 %v6469_v48, %v6467_v49  ;;  %v9353_v49 = vpack.c.bf16 %v6656_v61, %v6655_v7  ;;  %v6639_v48 = vld [vmem:[%s9737_s9 + $0x50] sm:$0xff] }
0x255e   : > { %v6285_v59 = vpop.f32.mrb[152].mxu0  ;;  %9332 = vmatpush1.bf16.msra.mxu0 %v9331_v44  ;;  %v6640_v44 = vld [vmem:[%s9737_s9 + $0x58] sm:$0xff] }
0x255f   : > { %v8887_v14 = vpop.f32.mrb[153].mxu0  ;;  %8899 = vmatmul.mubr.msk.f32.gmra.mrb[144].mxu1 %vm1251_vm7, %v6285_v59 }
0x262a   : > { %v6366_v62 = vpop.f32.mrb[140].mxu1 }
0x262b   : > { %v6380_v0 = vadd.f32 %v6366_v62, %v11125_v52  ;;  %v8894_v55 = vpop.f32.mrb[141].mxu1 }
0x262d   : > { %v6383_v5 = vadd.f32 %v6380_v0, %v10550_v63 }
0x262e   : > { %v6371_v29 = vpop.f32.mrb[142].mxu1 }
0x262f   : > { %v11198_v1 = vadd.f32 %v7454_v18, %v6383_v5  ;;  %v6381_v10 = vadd.f32 %v6371_v29, %v11128_v37  ;;  %v8897_v60 = vpop.f32.mrb[143].mxu1 }
0x2631   : > { %v6384_v42 = vadd.f32 %v6381_v10, %v10554_v30  ;;  %v6398_v2 = vsel %vm888_vm2, %v11198_v1, 0.0 }
0x2632   : > { %6399 = vadd.xlane.f32.xlu0 %v6398_v2  ;;  %v6376_v32 = vpop.f32.mrb[144].mxu1 }
0x2633   : > { %v11204_v3 = vadd.f32 %v7454_v18, %v6384_v42  ;;  %v6382_v52 = vadd.f32 %v6376_v32, %v11131_v51  ;;  %v8900_v47 = vpop.f32.mrb[145].mxu1  ;;  %v7455_v42 = vld [vmem:[%s9717_s4] ss:$0 sm:$0xff] }
0x2634   : > { %v7456_v32 = vld [vmem:[%s9722_s30] ss:$0 sm:$0xff] }
0x2635   : > { %v6385_v63 = vadd.f32 %v6382_v52, %v10552_v53  ;;  %v6401_v54 = vsel %vm888_vm2, %v11204_v3, 0.0 }
0x2636   : > { %6402 = vadd.xlane.f32.xlu1 %v6401_v54 }
0x2637   : > { %v11210_v37 = vadd.f32 %v7454_v18, %v6385_v63 }
0x2639   : > { %v6404_v30 = vsel %vm895_vm3, %v11210_v37, 0.0 }
0x263a   : > { %6405 = vadd.xlane.f32.xlu0 %v6404_v30 }
0x26bf   : > { %v6400_v9 = vpop.xlane.xlu0 %6399 }
0x26c0   : > { %v6407_v12 = vmul.f32 0.015625, %v6400_v9 }
0x26c2   : > { %v6410_v4 = vsub.f32 %v11198_v1, %v6407_v12 }
0x26c3   : > { %v6403_v16 = vpop.xlane.xlu1 %6402 }
0x26c4   : > { %v6408_v51 = vmul.f32 0.015625, %v6403_v16  ;;  %v6413_v19 = vmul.f32 %v6410_v4, %v6410_v4 }
0x26c6   : > { %v11216_v53 = vsub.f32 %v11204_v3, %v6408_v51  ;;  %v6416_v20 = vsel %vm888_vm2, %v6413_v19, 0.0  ;;  %v6645_v19 = vld [vmem:[%s9737_s9 + $0x80] sm:$0xff] }
0x26c7   : > { %6417 = vadd.xlane.f32.xlu1 %v6416_v20  ;;  %v6406_v38 = vpop.xlane.xlu0 %6405 }
0x26c8   : > { %v6409_v22 = vmul.f32 0.015625, %v6406_v38  ;;  %v6414_v15 = vmul.f32 %v11216_v53, %v11216_v53  ;;  %v6629_v38 = vld [vmem:[%s9737_s9] sm:$0xff] }
0x26ca   : > { %v11222_v17 = vsub.f32 %v11210_v37, %v6409_v22  ;;  %v6419_v27 = vsel %vm888_vm2, %v6414_v15, 0.0  ;;  %v6630_v22 = vld [vmem:[%s9737_s9 + $0x8] sm:$0xff] }
0x26cb   : > { %6420 = vadd.xlane.f32.xlu0 %v6419_v27  ;;  %v9335_v15 = vpack.c.bf16 %v6630_v22, %v6629_v38  ;;  %v6648_v27 = vld [vmem:[%s9737_s9 + $0x98] sm:$0xff] }
0x26cc   : > { %v6415_v21 = vmul.f32 %v11222_v17, %v11222_v17 }
0x26ce   : > { %v6422_v25 = vsel %vm895_vm3, %v6415_v21, 0.0  ;;  %v6631_v21 = vld [vmem:[%s9737_s9 + $0x10] sm:$0xff] }
0x26cf   : > { %6423 = vadd.xlane.f32.xlu1 %v6422_v25  ;;  %v6632_v25 = vld [vmem:[%s9737_s9 + $0x18] sm:$0xff] }
0x26d0   : > { %v9339_v26 = vpack.c.bf16 %v6632_v25, %v6631_v21 }
0x2754   : > { %v6418_v59 = vpop.xlane.xlu1 %6417 }
0x2755   : > { %v6425_v14 = vmul.f32 0.015625, %v6418_v59  ;;  %v9355_v59 = vpack.c.bf16 %v6640_v44, %v6639_v48 }
0x2757   : > { %v6428_v62 = vadd.f32 1e-06, %v6425_v14  ;;  %v6657_v14 = vld [vmem:[%s9737_s9 + $0xe0] sm:$0xff] }
0x2758   : > { %v6421_v0 = vpop.xlane.xlu0 %6420 }
0x2759   : > { %9512 = vrsqrt.f32 %v6428_v62  ;;  %v6426_v55 = vmul.f32 0.015625, %v6421_v0  ;;  %v6658_v62 = vld [vmem:[%s9737_s9 + $0xe8] sm:$0xff] }
0x275a   : > { %v9357_v0 = vpack.c.bf16 %v6658_v62, %v6657_v14 }
0x275b   : > { %v6429_v18 = vadd.f32 1e-06, %v6426_v55  ;;  %v6641_v55 = vld [vmem:[%s9737_s9 + $0x60] sm:$0xff] }
0x275c   : > { %v6424_v5 = vpop.xlane.xlu1 %6423 }
0x275d   : > { %9514 = vrsqrt.f32 %v6429_v18  ;;  %v6427_v29 = vmul.f32 0.015625, %v6424_v5  ;;  %v6642_v18 = vld [vmem:[%s9737_s9 + $0x68] sm:$0xff] }
0x275e   : > { %v9359_v5 = vpack.c.bf16 %v6642_v18, %v6641_v55 }
0x275f   : > { %v6430_v10 = vadd.f32 1e-06, %v6427_v29  ;;  %v6659_v29 = vld [vmem:[%s9737_s9 + $0xf0] sm:$0xff] }
0x2761   : > { %9516 = vrsqrt.f32 %v6430_v10  ;;  %v6660_v10 = vld [vmem:[%s9737_s9 + $0xf8] sm:$0xff] }
0x2763   : > { %v9513_v60 = vpop.eup %9512 }
0x2764   : > { %v6434_v2 = vmul.f32 %v9513_v60, %v6410_v4  ;;  %v9361_v60 = vpack.c.bf16 %v6660_v10, %v6659_v29 }
0x2766   : > { %v6443_v52 = vmul.f32 %v7455_v42, %v6434_v2  ;;  %v6644_v2 = vld [vmem:[%s9737_s9 + $0x78] sm:$0xff] }
0x2767   : > { %v9515_v47 = vpop.eup %9514 }
0x2768   : > { %v6452_v63 = vadd.f32 %v7456_v32, %v6443_v52  ;;  %v6435_v54 = vmul.f32 %v9515_v47, %v11216_v53  ;;  %v6646_v53 = vld [vmem:[%s9737_s9 + $0x88] sm:$0xff]  ;;  %v6471_v52 = vld [vmem:[%s9732_s26] sm:$0x3] }
0x2769   : > { %v9333_v20 = vpack.c.bf16 %v6646_v53, %v6645_v19  ;;  %v6476_v47 = vrot.slane %v6471_v52, %v3521_v41 }
0x276a   : > { %7457 = vmatmul.mubr.msk.f32.vlgmr.msra.gmra.mrb[154].mxu0 %vm888_vm2, %v6452_v63  ;;  %v6444_v30 = vmul.f32 %v7455_v42, %v6435_v54  ;;  %v6480_v63 = vrot.slane %v6471_v52, %v3525_v50 }
0x276b   : > { %v9517_v9 = vpop.eup %9516  ;;  %6562 = vmatprep.mubr.f32.mxu0 %v9546_v45  ;;  %9334 = vmatprep.subr.bf16.mxu1 %v9333_v20 }
0x276c   : > { %v6453_v12 = vadd.f32 %v7456_v32, %v6444_v30  ;;  %v6436_v4 = vmul.f32 %v9517_v9, %v11222_v17  ;;  %9336 = vmatpush3.bf16.msra.mxu1 %v9335_v15  ;;  %v6647_v17 = vld [vmem:[%s9737_s9 + $0x90] sm:$0xff] }
0x276e   : > { %7458 = vmatmul.mubr.msk.f32.gmra.mrb[156].mxu0 %vm888_vm2, %v6453_v12  ;;  %v6445_v16 = vmul.f32 %v7455_v42, %v6436_v4  ;;  %v6643_v42 = vld [vmem:[%s9737_s9 + $0x70] sm:$0xff] }
0x276f   : > { %6568 = vmatprep.mubr.f32.mxu0 %v9546_v45  ;;  %v9337_v45 = vpack.c.bf16 %v6648_v27, %v6647_v17 }
0x2770   : > { %v6454_v51 = vadd.f32 %v7456_v32, %v6445_v16  ;;  %v9363_v32 = vpack.c.bf16 %v6644_v2, %v6643_v42 }
0x2771   : > { %9338 = vmatprep.subr.bf16.mxu1 %v9337_v45 }
0x2772   : > { %7459 = vmatmul.mubr.msk.f32.gmra.mrb[158].mxu0 %vm888_vm2, %v6454_v51  ;;  %9340 = vmatpush3.bf16.msra.mxu1 %v9339_v26 }
0x2773   : > { %9342 = vmatprep.subr.bf16.mxu1 %v9341_v33 }
0x2776   : > { %9344 = vmatpush3.bf16.msra.mxu1 %v9343_v58 }
0x2777   : > { %9346 = vmatprep.subr.bf16.mxu1 %v9345_v56 }
0x277a   : > { %9348 = vmatpush3.bf16.msra.mxu1 %v9347_v46 }
0x277b   : > { %9350 = vmatprep.subr.bf16.mxu1 %v9349_v13 }
0x277e   : > { %9352 = vmatpush3.bf16.msra.mxu1 %v9351_v6 }
0x277f   : > { %9354 = vmatprep.subr.bf16.mxu1 %v9353_v49 }
0x2782   : > { %9356 = vmatpush3.bf16.msra.mxu1 %v9355_v59 }
0x2783   : > { %9358 = vmatprep.subr.bf16.mxu1 %v9357_v0 }
0x2786   : > { %9360 = vmatpush3.bf16.msra.mxu1 %v9359_v5 }
0x2787   : > { %9362 = vmatprep.subr.bf16.mxu1 %v9361_v60 }
0x278a   : > { %9364 = vmatpush3.bf16.msra.mxu1 %v9363_v32 }
0x283d   : > { %v6558_v54 = vpop.f32.mrb[154].mxu0 }
0x283e   : > { %v6559_v30 = vadd.f32 %v6558_v54, %v6476_v47  ;;  %v6560_v9 = vpop.f32.mrb[155].mxu0 }
0x283f   : > { %v6561_v12 = vadd.f32 %v6560_v9, %v6480_v63 }
0x2840   : > { %v6575_v4 = vmul.f32 %v6559_v30, %v6559_v30 }
0x2841   : > { %v6576_v16 = vmul.f32 %v6561_v12, %v6561_v12  ;;  %v6564_v51 = vpop.f32.mrb[156].mxu0 }
0x2842   : > { %v6581_v19 = vmul.f32 %v6575_v4, %v6559_v30  ;;  %v6565_v53 = vadd.f32 %v6564_v51, %v6476_v47  ;;  %v6566_v20 = vpop.f32.mrb[157].mxu0 }
0x2843   : > { %v6582_v38 = vmul.f32 %v6576_v16, %v6561_v12  ;;  %v6567_v22 = vadd.f32 %v6566_v20, %v6480_v63 }
0x2844   : > { %v6587_v15 = vmul.f32 0.044715, %v6581_v19  ;;  %v6577_v17 = vmul.f32 %v6565_v53, %v6565_v53 }
0x2845   : > { %v6588_v27 = vmul.f32 0.044715, %v6582_v38  ;;  %v6578_v45 = vmul.f32 %v6567_v22, %v6567_v22  ;;  %v6570_v41 = vpop.f32.mrb[158].mxu0 }
0x2846   : > { %v6593_v21 = vadd.f32 %v6587_v15, %v6559_v30  ;;  %v6583_v24 = vmul.f32 %v6577_v17, %v6565_v53  ;;  %v6571_v50 = vadd.f32 %v6570_v41, %v6476_v47  ;;  %v6572_v25 = vpop.f32.mrb[159].mxu0 }
0x2847   : > { %v6594_v26 = vadd.f32 %v6588_v27, %v6561_v12  ;;  %v6584_v28 = vmul.f32 %v6578_v45, %v6567_v22  ;;  %v6573_v31 = vadd.f32 %v6572_v25, %v6480_v63 }
0x2848   : > { %v6599_v33 = vmul.f32 0.7978846, %v6593_v21  ;;  %v6589_v34 = vmul.f32 0.044715, %v6583_v24  ;;  %v6579_v35 = vmul.f32 %v6571_v50, %v6571_v50 }
0x2849   : > { %v6600_v58 = vmul.f32 0.7978846, %v6594_v26  ;;  %v6590_v36 = vmul.f32 0.044715, %v6584_v28  ;;  %v6580_v39 = vmul.f32 %v6573_v31, %v6573_v31 }
0x284a   : > { %9518 = vtanh.f32 %v6599_v33  ;;  %v6595_v56 = vadd.f32 %v6589_v34, %v6565_v53  ;;  %v6585_v43 = vmul.f32 %v6579_v35, %v6571_v50 }
0x284b   : > { %v6596_v57 = vadd.f32 %v6590_v36, %v6567_v22  ;;  %v6586_v46 = vmul.f32 %v6580_v39, %v6573_v31  ;;  %9520 = vtanh.f32 %v6600_v58 }
0x284c   : > { %v6601_v23 = vmul.f32 0.7978846, %v6595_v56  ;;  %v6591_v8 = vmul.f32 0.044715, %v6585_v43 }
0x284d   : > { %v6602_v13 = vmul.f32 0.7978846, %v6596_v57  ;;  %v6592_v40 = vmul.f32 0.044715, %v6586_v46 }
0x284e   : > { %v6597_v11 = vadd.f32 %v6591_v8, %v6571_v50  ;;  %9522 = vtanh.f32 %v6601_v23 }
0x284f   : > { %v6598_v6 = vadd.f32 %v6592_v40, %v6573_v31  ;;  %9524 = vtanh.f32 %v6602_v13 }
0x2850   : > { %v6603_v7 = vmul.f32 0.7978846, %v6597_v11 }
0x2851   : > { %v6604_v61 = vmul.f32 0.7978846, %v6598_v6 }
0x2852   : > { %9526 = vtanh.f32 %v6603_v7 }
0x2853   : > { %9528 = vtanh.f32 %v6604_v61 }
0x2854   : > { %v9519_v49 = vpop.eup %9518 }
0x2855   : > { %v9521_v48 = vpop.eup %9520  ;;  %v6611_v44 = vadd.f32 1.0, %v9519_v49 }
0x2856   : > { %v6612_v59 = vadd.f32 1.0, %v9521_v48 }
0x2857   : > { %v6617_v14 = vmul.f32 0.5, %v6611_v44 }
0x2858   : > { %v9523_v62 = vpop.eup %9522  ;;  %v6618_v0 = vmul.f32 0.5, %v6612_v59 }
0x2859   : > { %v9525_v55 = vpop.eup %9524  ;;  %v6613_v18 = vadd.f32 1.0, %v9523_v62  ;;  %v6623_v10 = vmul.f32 %v6617_v14, %v6559_v30  ;;  %v7462_v14 = vld [vmem:[%s11423_s27] ss:$0 sm:$0xff] (!%p7051_p5) }
0x285a   : > { %v6624_v5 = vmul.f32 %v6618_v0, %v6561_v12  ;;  %v6614_v29 = vadd.f32 1.0, %v9525_v55  ;;  %v7460_v12 = vld [vmem:[%s9742_s11] ss:$0 sm:$0xff] }
0x285b   : > { %v6619_v60 = vmul.f32 0.5, %v6613_v18  ;;  %v7463_v0 = vld [vmem:[%s11424_s24] ss:$0 sm:$0xff] (!%p7051_p5) }
0x285c   : > { %v9527_v42 = vpop.eup %9526  ;;  %6732 = vmatprep.mubr.f32.mxu1 %v6624_v5  ;;  %v6620_v2 = vmul.f32 0.5, %v6614_v29 }
0x285d   : > { %v9529_v32 = vpop.eup %9528  ;;  %6733 = vmatmul.mubr.f32.vlgmr.msra.gmra.mrb[146].mxu1 %v6623_v10  ;;  %v6615_v52 = vadd.f32 1.0, %v9527_v42  ;;  %v6625_v54 = vmul.f32 %v6619_v60, %v6565_v53 }
0x285e   : > { %v6626_v47 = vmul.f32 %v6620_v2, %v6567_v22  ;;  %v6616_v63 = vadd.f32 1.0, %v9529_v32 }
0x285f   : > { %v6621_v9 = vmul.f32 0.5, %v6615_v52 }
0x2860   : > { %6737 = vmatprep.mubr.f32.mxu1 %v6626_v47  ;;  %v6622_v4 = vmul.f32 0.5, %v6616_v63 }
0x2861   : > { %6738 = vmatmul.mubr.f32.gmra.mrb[148].mxu1 %v6625_v54  ;;  %v6627_v51 = vmul.f32 %v6621_v9, %v6571_v50 }
0x2862   : > { %v6628_v16 = vmul.f32 %v6622_v4, %v6573_v31 }
0x2864   : > { %6742 = vmatprep.mubr.f32.mxu1 %v6628_v16 }
0x2865   : > { %6743 = vmatmul.mubr.f32.gmra.mrb[150].mxu1 %v6627_v51 }
0x2930   : > { %v7948_v30 = vpop.f32.mrb[146].mxu1 }
0x2931   : > { %v7949_v19 = vpop.f32.mrb[147].mxu1 }
0x2932   : > { %v7950_v20 = vadd.f32 %v7949_v19, %v7948_v30 }
0x2934   : > { %v6735_v38 = vadd.f32 %v7950_v20, %v7460_v12  ;;  %v7951_v15 = vpop.f32.mrb[148].mxu1 }
0x2935   : > { %v7952_v17 = vpop.f32.mrb[149].mxu1 }
0x2936   : > { %v6748_v27 = vadd.f32 %v6735_v38, %v11198_v1  ;;  %v7953_v22 = vadd.f32 %v7952_v17, %v7951_v15 }
0x2938   : > { %6751 = vst.msk [vmem:[#allocation2 + $0x18] sm:$0xff] %vm888_vm2, %v6748_v27  ;;  %v6740_v53 = vadd.f32 %v7953_v22, %v7460_v12  ;;  %v7954_v45 = vpop.f32.mrb[150].mxu1  ;;  %v6759_v1 = vsel (!%p7051_p5), %vm888_vm2, %v6748_v27, 0.0 }
0x2939   : > { %v7955_v41 = vpop.f32.mrb[151].mxu1  ;;  %6760 = vadd.xlane.f32.xlu0 (!%p7051_p5), %v6759_v1 }
0x293a   : > { %v6749_v21 = vadd.f32 %v6740_v53, %v11204_v3  ;;  %v7956_v24 = vadd.f32 %v7955_v41, %v7954_v45  ;;  %6756 = sbr.rel (%p7051_p5) target bundleno = 10875 (0x2a7b), region = 140 }
0x293c   : > { %6752 = vst.msk [vmem:[#allocation2 + $0x20] sm:$0xff] %vm888_vm2, %v6749_v21  ;;  %v6745_v50 = vadd.f32 %v7956_v24, %v7460_v12  ;;  %v6762_v28 = vsel (!%p7051_p5), %vm888_vm2, %v6749_v21, 0.0 }
0x293d   : > { %6763 = vadd.xlane.f32.xlu0 (!%p7051_p5), %v6762_v28 }
0x293e   : > { %v6750_v25 = vadd.f32 %v6745_v50, %v11210_v37 }
0x2940   : > { %6753 = vst.msk [vmem:[#allocation2 + $0x28] sm:$0x1] %vm895_vm3, %v6750_v25  ;;  %v6765_v26 = vsel (!%p7051_p5), %vm895_vm3, %v6750_v25, 0.0 }
0x2941   : > { %6766 = vadd.xlane.f32.xlu1 %v6765_v26 }
0x29c6   : > { %v6761_v3 = vpop.xlane.xlu0 %6760 }
0x29c7   : > { %v6768_v33 = vmul.f32 0.015625, %v6761_v3 }
0x29c9   : > { %v6771_v35 = vsub.f32 %v6748_v27, %v6768_v33 }
0x29ca   : > { %v6764_v58 = vpop.xlane.xlu0 %6763 }
0x29cb   : > { %v6769_v36 = vmul.f32 0.015625, %v6764_v58  ;;  %v6774_v39 = vmul.f32 %v6771_v35, %v6771_v35 }
0x29cd   : > { %v6772_v43 = vsub.f32 %v6749_v21, %v6769_v36  ;;  %v6777_v57 = vsel %vm888_vm2, %v6774_v39, 0.0 }
0x29ce   : > { %v6767_v31 = vpop.xlane.xlu1 %6766  ;;  %6778 = vadd.xlane.f32.xlu1 %v6777_v57 }
0x29cf   : > { %v6770_v34 = vmul.f32 0.015625, %v6767_v31  ;;  %v6775_v23 = vmul.f32 %v6772_v43, %v6772_v43 }
0x29d1   : > { %v6773_v37 = vsub.f32 %v6750_v25, %v6770_v34  ;;  %v6780_v8 = vsel %vm888_vm2, %v6775_v23, 0.0 }
0x29d2   : > { %6781 = vadd.xlane.f32.xlu0 %v6780_v8 }
0x29d3   : > { %v6776_v56 = vmul.f32 %v6773_v37, %v6773_v37 }
0x29d5   : > { %v6783_v46 = vsel %vm895_vm3, %v6776_v56, 0.0 }
0x29d6   : > { %6784 = vadd.xlane.f32.xlu1 %v6783_v46 }
0x2a5b   : > { %v6779_v13 = vpop.xlane.xlu1 %6778 }
0x2a5c   : > { %v6786_v40 = vmul.f32 0.015625, %v6779_v13 }
0x2a5e   : > { %v6789_v11 = vadd.f32 1e-06, %v6786_v40 }
0x2a5f   : > { %v6782_v7 = vpop.xlane.xlu0 %6781 }
0x2a60   : > { %9530 = vrsqrt.f32 %v6789_v11  ;;  %v6787_v49 = vmul.f32 0.015625, %v6782_v7 }
0x2a62   : > { %v6790_v44 = vadd.f32 1e-06, %v6787_v49 }
0x2a63   : > { %v6785_v6 = vpop.xlane.xlu1 %6784 }
0x2a64   : > { %v6788_v61 = vmul.f32 0.015625, %v6785_v6 }
0x2a66   : > { %v6791_v48 = vadd.f32 1e-06, %v6788_v61 }
0x2a68   : > { %9532 = vrsqrt.f32 %v6791_v48 }
0x2a69   : > { %9534 = vrsqrt.f32 %v6790_v44 }
0x2a6a   : > { %v9531_v59 = vpop.eup %9530 }
0x2a6b   : > { %v6795_v62 = vmul.f32 %v9531_v59, %v6771_v35 }
0x2a6d   : > { %v6804_v55 = vmul.f32 %v7462_v14, %v6795_v62 }
0x2a6f   : > { %v6813_v29 = vadd.f32 %v7463_v0, %v6804_v55 }
0x2a71   : > { %7464 = vst.msk [vmem:[%s11425_s29 + $0x18] sm:$0xff] %vm888_vm2, %v6813_v29 }
0x2a72   : > { %v9533_v18 = vpop.eup %9532 }
0x2a73   : > { %v9535_v5 = vpop.eup %9534  ;;  %v6797_v10 = vmul.f32 %v9533_v18, %v6773_v37 }
0x2a74   : > { %v6796_v60 = vmul.f32 %v9535_v5, %v6772_v43 }
0x2a75   : > { %v6806_v42 = vmul.f32 %v7462_v14, %v6797_v10 }
0x2a76   : > { %v6805_v2 = vmul.f32 %v7462_v14, %v6796_v60 }
0x2a77   : > { %v6815_v32 = vadd.f32 %v7463_v0, %v6806_v42 }
0x2a78   : > { %v6814_v52 = vadd.f32 %v7463_v0, %v6805_v2 }
0x2a79   : > { %7466 = vst.msk [vmem:[%s11425_s29 + $0x28] sm:$0x1] %vm895_vm3, %v6815_v32 }
0x2a7a   : > { %7465 = vst.msk [vmem:[%s11425_s29 + $0x20] sm:$0xff] %vm888_vm2, %v6814_v52 }
0x2a7b PF: > { %s11426_s7 = sld [smem:[#allocation3_spill]] }
0x2a81   : > { %s31_s1 = sadd.s32 1, %s11426_s7  }
0x2a82   : > { %p28_p6 = scmp.ge.s32.totalorder %s31_s1, 14  }
0x2a84   :  { %30 = sbr.rel (!%p28_p6) target bundleno = 18 (0x12), region = 249 }

</bundles_post_ra>
